<compile_context>
chip_gen: v5e
topology: v5e:2x2
jax: 0.10.0
libtpu: 0.0.40
codegen_flags: <defaults>
</compile_context>

<pallas_src>
from functools import partial

import jax
import jax.numpy as jnp
from jax.experimental import pallas as pl
from jax.experimental.pallas import tpu as pltpu


# ----------------------------------------------------------------------------
# Fused Pallas kernel: whole PlainNet forward, one batch element per grid step
# ----------------------------------------------------------------------------
def _plainnet_fused_kernel(
    x_ref,                       # (1, H, W, Cin)             f32
    w1_ref, s1_ref, b1_ref,      # (9*Cin, C0) bf16, (1, C0) f32, (1, C0) f32
    w2a_ref, s2a_ref, b2a_ref,   # (9*C0, C0)  bf16, (1, C0) f32, (1, C0) f32
    w2b_ref, s2b_ref, b2b_ref,   # (9*C0, C0)  bf16, (1, C0) f32, (1, C0) f32
    w3_ref, s3_ref, b3_ref,      # (C0, C1)    bf16, (1, C1) f32, (1, C1) f32
    wl_ref, bl_ref,              # (C1, NC) f32, (1, NC) f32
    o_ref,                       # (1, 1, NC) f32
    pad1_ref,                    # VMEM scratch (1, H+2, W+2, Cin) f32
    pad2_ref,                    # VMEM scratch (1, H+2, W+2, C0)  f32
    *, H, W, Cin, C0, C1,
):
    M = H * W

    def im2col(padded, c):
        # padded: (1, H+2, W+2, c) zero-padded activation (f32 value)
        taps = [padded[:, kh:kh + H, kw:kw + W, :]
                for kh in range(3) for kw in range(3)]
        pm = jnp.concatenate(taps, axis=-1)                 # (1, H, W, 9*c)
        return pm.reshape(M, 9 * c).astype(jnp.bfloat16)    # bf16 MXU input

    def mm(a_bf16, w_ref):
        return jax.lax.dot_general(
            a_bf16, w_ref[...],
            dimension_numbers=(((1,), (0,)), ((), ())),
            preferred_element_type=jnp.float32)             # f32 accumulate

    # ---- Block 1: ConvK3BNRELU(Cin -> C0) -----------------------------------
    pad1_ref[...] = jnp.zeros_like(pad1_ref)
    pad1_ref[:, 1:H + 1, 1:W + 1, :] = x_ref[...]
    y1 = mm(im2col(pad1_ref[...], Cin), w1_ref)             # (M, C0) f32
    y1 = jnp.maximum(y1 * s1_ref[...] + b1_ref[...], 0.0)

    # ---- Block 2: ResK3K3(C0 -> C0) -----------------------------------------
    # Zero pad2 once: the border stays zero across both interior overwrites.
    pad2_ref[...] = jnp.zeros_like(pad2_ref)
    pad2_ref[:, 1:H + 1, 1:W + 1, :] = y1.reshape(1, H, W, C0)
    y2a = mm(im2col(pad2_ref[...], C0), w2a_ref)
    y2a = jnp.maximum(y2a * s2a_ref[...] + b2a_ref[...], 0.0)

    pad2_ref[:, 1:H + 1, 1:W + 1, :] = y2a.reshape(1, H, W, C0)
    y2b = mm(im2col(pad2_ref[...], C0), w2b_ref)
    y2 = jnp.maximum(y2b * s2b_ref[...] + b2b_ref[...] + y1, 0.0)   # skip + ReLU

    # ---- Block 3: ConvK1BNRELU(C0 -> C1) ------------------------------------
    y3 = mm(y2.astype(jnp.bfloat16), w3_ref)                # (M, C1) f32
    y3 = jnp.maximum(y3 * s3_ref[...] + b3_ref[...], 0.0)

    # ---- Block 4+5: AdaptiveAvgPool(1) + Linear(num_classes) ----------------
    pooled = jnp.mean(y3, axis=0, keepdims=True)            # (1, C1)
    logits = jnp.dot(pooled, wl_ref[...],
                     preferred_element_type=jnp.float32) + bl_ref[...]
    o_ref[0] = logits.astype(o_ref.dtype)


# ----------------------------------------------------------------------------
# Wrapper: weight prep + single pallas_call
# ----------------------------------------------------------------------------
def plainnet_forward_impl(x_nchw, params):
    # layout: PyTorch NCHW -> NHWC for the kernel
    x = jnp.transpose(x_nchw, (0, 2, 3, 1)).astype(jnp.float32)
    B, H, W, Cin = x.shape
    C0 = params["w1"].shape[-1]
    C1 = params["w3"].shape[-1]
    NC = params["wl"].shape[-1]

    # im2col weight matrices (bf16 MXU inputs); folded BN scale/bias stay f32.
    w1 = params["w1"].reshape(9 * Cin, C0).astype(jnp.bfloat16)
    w2a = params["w2a"].reshape(9 * C0, C0).astype(jnp.bfloat16)
    w2b = params["w2b"].reshape(9 * C0, C0).astype(jnp.bfloat16)
    w3 = params["w3"].astype(jnp.bfloat16)
    wl = params["wl"].astype(jnp.float32)
    row = lambda v: v.reshape(1, -1).astype(jnp.float32)

    kernel = partial(_plainnet_fused_kernel, H=H, W=W, Cin=Cin, C0=C0, C1=C1)
    full2d = lambda b: (0, 0)

    out = pl.pallas_call(
        kernel,
        out_shape=jax.ShapeDtypeStruct((B, 1, NC), jnp.float32),
        grid=(B,),
        in_specs=[
            pl.BlockSpec((1, H, W, Cin), lambda b: (b, 0, 0, 0)),
            pl.BlockSpec((9 * Cin, C0), full2d),
            pl.BlockSpec((1, C0), full2d),
            pl.BlockSpec((1, C0), full2d),
            pl.BlockSpec((9 * C0, C0), full2d),
            pl.BlockSpec((1, C0), full2d),
            pl.BlockSpec((1, C0), full2d),
            pl.BlockSpec((9 * C0, C0), full2d),
            pl.BlockSpec((1, C0), full2d),
            pl.BlockSpec((1, C0), full2d),
            pl.BlockSpec((C0, C1), full2d),
            pl.BlockSpec((1, C1), full2d),
            pl.BlockSpec((1, C1), full2d),
            pl.BlockSpec((C1, NC), full2d),
            pl.BlockSpec((1, NC), full2d),
        ],
        out_specs=pl.BlockSpec((1, 1, NC), lambda b: (b, 0, 0)),
        scratch_shapes=[
            pltpu.VMEM((1, H + 2, W + 2, Cin), jnp.float32),
            pltpu.VMEM((1, H + 2, W + 2, C0), jnp.float32),
        ],
        compiler_params=pltpu.CompilerParams(
            dimension_semantics=("parallel",)),   # v7x: 2 TCs split the batch
    )(x,
      w1, row(params["s1"]), row(params["b1"]),
      w2a, row(params["s2a"]), row(params["b2a"]),
      w2b, row(params["s2b"]), row(params["b2b"]),
      w3, row(params["s3"]), row(params["b3"]),
      wl, row(params["bl"]))
    return out.reshape(B, NC)


plainnet_forward = jax.jit(plainnet_forward_impl)


# ----------------------------------------------------------------------------
# Pure-JAX reference (f32) for correctness checking
# ----------------------------------------------------------------------------
def reference_forward(x_nchw, p):
    x = jnp.transpose(x_nchw, (0, 2, 3, 1))
    conv3 = lambda a, w: jax.lax.conv_general_dilated(
        a, w, window_strides=(1, 1), padding="SAME",
        dimension_numbers=("NHWC", "HWIO", "NHWC"))
    y = jnp.maximum(conv3(x, p["w1"]) * p["s1"] + p["b1"], 0.0)
    z = jnp.maximum(conv3(y, p["w2a"]) * p["s2a"] + p["b2a"], 0.0)
    z = jnp.maximum(conv3(z, p["w2b"]) * p["s2b"] + p["b2b"] + y, 0.0)
    z = jnp.maximum(jnp.einsum("bhwc,cd->bhwd", z, p["w3"]) * p["s3"] + p["b3"], 0.0)
    pooled = z.mean(axis=(1, 2))
    return pooled @ p["wl"] + p["bl"]


# ----------------------------------------------------------------------------
# Parameter construction (deterministic, synthetic)
# ----------------------------------------------------------------------------
def _fold_bn(key, c, eps=1e-5):
    k1, k2, k3, k4 = jax.random.split(key, 4)
    gamma = jax.random.uniform(k1, (c,), jnp.float32, 0.5, 1.5)
    beta = 0.1 * jax.random.normal(k2, (c,), jnp.float32)
    mean = 0.1 * jax.random.normal(k3, (c,), jnp.float32)
    var = jax.random.uniform(k4, (c,), jnp.float32, 0.5, 1.5)
    scale = gamma / jnp.sqrt(var + eps)
    bias = beta - mean * scale
    return scale, bias


def make_params(key, c_in=4, c0=8, c1=16, num_classes=10):
    keys = jax.random.split(key, 10)
    p = {}
    p["w1"] = 0.1 * jax.random.normal(keys[0], (3, 3, c_in, c0), jnp.float32)
    p["s1"], p["b1"] = _fold_bn(keys[1], c0)
    p["w2a"] = 0.1 * jax.random.normal(keys[2], (3, 3, c0, c0), jnp.float32)
    p["s2a"], p["b2a"] = _fold_bn(keys[3], c0)
    p["w2b"] = 0.1 * jax.random.normal(keys[4], (3, 3, c0, c0), jnp.float32)
    p["s2b"], p["b2b"] = _fold_bn(keys[5], c0)
    p["w3"] = 0.1 * jax.random.normal(keys[6], (c0, c1), jnp.float32)
    p["s3"], p["b3"] = _fold_bn(keys[7], c1)
    p["wl"] = 0.1 * jax.random.normal(keys[8], (c1, num_classes), jnp.float32)
    p["bl"] = 0.1 * jax.random.normal(keys[9], (num_classes,), jnp.float32)
    return p


if __name__ == "__main__":
    key = jax.random.PRNGKey(0)
    kx, kp = jax.random.split(key)
    # PyTorch-convention input: NCHW, batch=2, channels=4, spatial=16
    x = jax.random.normal(kx, (2, 4, 16, 16), jnp.float32)
    params = make_params(kp, c_in=4, c0=8, c1=16, num_classes=10)

    out = plainnet_forward(x, params)
    jax.block_until_ready(out)
    assert out.shape == (2, 10)

    ref = reference_forward(x, params)
    err = float(jnp.max(jnp.abs(out - ref)))
    assert err < 5e-2, f"max abs err vs f32 reference: {err}"
    print("KERNEL_OK")
</pallas_src>

<mosaic_0001>
module attributes {stable_mosaic.version = 11 : i64} {
  func.func @_plainnet_fused_kernel(%arg0: i32, %arg1: memref<1x16x16x4xf32, #tpu.memory_space<vmem>>, %arg2: memref<36x8xbf16, #tpu.memory_space<vmem>>, %arg3: memref<1x8xf32, #tpu.memory_space<vmem>>, %arg4: memref<1x8xf32, #tpu.memory_space<vmem>>, %arg5: memref<72x8xbf16, #tpu.memory_space<vmem>>, %arg6: memref<1x8xf32, #tpu.memory_space<vmem>>, %arg7: memref<1x8xf32, #tpu.memory_space<vmem>>, %arg8: memref<72x8xbf16, #tpu.memory_space<vmem>>, %arg9: memref<1x8xf32, #tpu.memory_space<vmem>>, %arg10: memref<1x8xf32, #tpu.memory_space<vmem>>, %arg11: memref<8x16xbf16, #tpu.memory_space<vmem>>, %arg12: memref<1x16xf32, #tpu.memory_space<vmem>>, %arg13: memref<1x16xf32, #tpu.memory_space<vmem>>, %arg14: memref<16x10xf32, #tpu.memory_space<vmem>>, %arg15: memref<1x10xf32, #tpu.memory_space<vmem>>, %arg16: memref<1x1x10xf32, #tpu.memory_space<vmem>>, %arg17: memref<1x18x18x4xf32, #tpu.memory_space<vmem>>, %arg18: memref<1x18x18x8xf32, #tpu.memory_space<vmem>>) attributes {dimension_semantics = [#tpu.dimension_semantics<parallel>], iteration_bounds = array<i64: 2>, scalar_prefetch = 0 : i64, scratch_operands = 2 : i64, tpu.core_type = #tpu.core_type<tc>, window_params = [{transform_indices = @transform_0, window_bounds = array<i64: 1, 16, 16, 4>}, {pipeline_mode = #tpu.pipeline_mode<synchronous>, transform_indices = @transform_1, window_bounds = array<i64: 36, 8>}, {pipeline_mode = #tpu.pipeline_mode<synchronous>, transform_indices = @transform_2, window_bounds = array<i64: 1, 8>}, {pipeline_mode = #tpu.pipeline_mode<synchronous>, transform_indices = @transform_3, window_bounds = array<i64: 1, 8>}, {pipeline_mode = #tpu.pipeline_mode<synchronous>, transform_indices = @transform_4, window_bounds = array<i64: 72, 8>}, {pipeline_mode = #tpu.pipeline_mode<synchronous>, transform_indices = @transform_5, window_bounds = array<i64: 1, 8>}, {pipeline_mode = #tpu.pipeline_mode<synchronous>, transform_indices = @transform_6, window_bounds = array<i64: 1, 8>}, {pipeline_mode = #tpu.pipeline_mode<synchronous>, transform_indices = @transform_7, window_bounds = array<i64: 72, 8>}, {pipeline_mode = #tpu.pipeline_mode<synchronous>, transform_indices = @transform_8, window_bounds = array<i64: 1, 8>}, {pipeline_mode = #tpu.pipeline_mode<synchronous>, transform_indices = @transform_9, window_bounds = array<i64: 1, 8>}, {pipeline_mode = #tpu.pipeline_mode<synchronous>, transform_indices = @transform_10, window_bounds = array<i64: 8, 16>}, {pipeline_mode = #tpu.pipeline_mode<synchronous>, transform_indices = @transform_11, window_bounds = array<i64: 1, 16>}, {pipeline_mode = #tpu.pipeline_mode<synchronous>, transform_indices = @transform_12, window_bounds = array<i64: 1, 16>}, {pipeline_mode = #tpu.pipeline_mode<synchronous>, transform_indices = @transform_13, window_bounds = array<i64: 16, 10>}, {pipeline_mode = #tpu.pipeline_mode<synchronous>, transform_indices = @transform_14, window_bounds = array<i64: 1, 10>}, {transform_indices = @transform_15, window_bounds = array<i64: 1, 1, 10>}]} {
    %cst = arith.constant 0.000000e+00 : f32
    %0 = vector.broadcast %cst : f32 to vector<1x18x18x4xf32>
    %c0 = arith.constant 0 : index
    %c0_0 = arith.constant 0 : index
    %c0_1 = arith.constant 0 : index
    %c0_2 = arith.constant 0 : index
    %1 = vector.load %arg17[%c0, %c0_0, %c0_1, %c0_2] : memref<1x18x18x4xf32, #tpu.memory_space<vmem>>, vector<1x18x18x4xf32>
    tpu.vector_store %arg17[%c0, %c0_0, %c0_1, %c0_2], %0 {strides = array<i32>} : memref<1x18x18x4xf32, #tpu.memory_space<vmem>>, vector<1x18x18x4xf32>,
    %c0_3 = arith.constant 0 : index
    %c0_4 = arith.constant 0 : index
    %c0_5 = arith.constant 0 : index
    %c0_6 = arith.constant 0 : index
    %2 = vector.load %arg1[%c0_3, %c0_4, %c0_5, %c0_6] : memref<1x16x16x4xf32, #tpu.memory_space<vmem>>, vector<1x16x16x4xf32>
    %c0_7 = arith.constant 0 : index
    %c1 = arith.constant 1 : index
    %c1_8 = arith.constant 1 : index
    %c0_9 = arith.constant 0 : index
    %3 = vector.load %arg17[%c0_7, %c1, %c1_8, %c0_9] : memref<1x18x18x4xf32, #tpu.memory_space<vmem>>, vector<1x16x16x4xf32>
    tpu.vector_store %arg17[%c0_7, %c1, %c1_8, %c0_9], %2 {strides = array<i32>} : memref<1x18x18x4xf32, #tpu.memory_space<vmem>>, vector<1x16x16x4xf32>,
    %c0_10 = arith.constant 0 : index
    %c0_11 = arith.constant 0 : index
    %c0_12 = arith.constant 0 : index
    %c0_13 = arith.constant 0 : index
    %4 = vector.load %arg17[%c0_10, %c0_11, %c0_12, %c0_13] : memref<1x18x18x4xf32, #tpu.memory_space<vmem>>, vector<1x18x18x4xf32>
    %5 = vector.extract_strided_slice %4 {offsets = [0, 0, 0, 0], sizes = [1, 16, 16, 4], strides = [1, 1, 1, 1]} : vector<1x18x18x4xf32> to vector<1x16x16x4xf32>
    %6 = vector.extract_strided_slice %4 {offsets = [0, 0, 1, 0], sizes = [1, 16, 16, 4], strides = [1, 1, 1, 1]} : vector<1x18x18x4xf32> to vector<1x16x16x4xf32>
    %7 = vector.extract_strided_slice %4 {offsets = [0, 0, 2, 0], sizes = [1, 16, 16, 4], strides = [1, 1, 1, 1]} : vector<1x18x18x4xf32> to vector<1x16x16x4xf32>
    %8 = vector.extract_strided_slice %4 {offsets = [0, 1, 0, 0], sizes = [1, 16, 16, 4], strides = [1, 1, 1, 1]} : vector<1x18x18x4xf32> to vector<1x16x16x4xf32>
    %9 = vector.extract_strided_slice %4 {offsets = [0, 1, 1, 0], sizes = [1, 16, 16, 4], strides = [1, 1, 1, 1]} : vector<1x18x18x4xf32> to vector<1x16x16x4xf32>
    %10 = vector.extract_strided_slice %4 {offsets = [0, 1, 2, 0], sizes = [1, 16, 16, 4], strides = [1, 1, 1, 1]} : vector<1x18x18x4xf32> to vector<1x16x16x4xf32>
    %11 = vector.extract_strided_slice %4 {offsets = [0, 2, 0, 0], sizes = [1, 16, 16, 4], strides = [1, 1, 1, 1]} : vector<1x18x18x4xf32> to vector<1x16x16x4xf32>
    %12 = vector.extract_strided_slice %4 {offsets = [0, 2, 1, 0], sizes = [1, 16, 16, 4], strides = [1, 1, 1, 1]} : vector<1x18x18x4xf32> to vector<1x16x16x4xf32>
    %13 = vector.extract_strided_slice %4 {offsets = [0, 2, 2, 0], sizes = [1, 16, 16, 4], strides = [1, 1, 1, 1]} : vector<1x18x18x4xf32> to vector<1x16x16x4xf32>
    %14 = tpu.concatenate %5, %6, %7, %8, %9, %10, %11, %12, %13 in 3 : vector<1x16x16x4xf32>, vector<1x16x16x4xf32>, vector<1x16x16x4xf32>, vector<1x16x16x4xf32>, vector<1x16x16x4xf32>, vector<1x16x16x4xf32>, vector<1x16x16x4xf32>, vector<1x16x16x4xf32>, vector<1x16x16x4xf32> -> vector<1x16x16x36xf32>
    %15 = vector.shape_cast %14 : vector<1x16x16x36xf32> to vector<256x36xf32>
    %16 = arith.truncf %15 : vector<256x36xf32> to vector<256x36xbf16>
    %c0_14 = arith.constant 0 : index
    %c0_15 = arith.constant 0 : index
    %17 = vector.load %arg2[%c0_14, %c0_15] : memref<36x8xbf16, #tpu.memory_space<vmem>>, vector<36x8xbf16>
    %cst_16 = arith.constant dense<0.000000e+00> : vector<256x8xf32>
    %18 = tpu.matmul %16, %17, %cst_16 {dimension_numbers = #tpu.dot_dimension_numbers<[1], [0], [0], [1], [0, 0, 1, 1], [], []>} : vector<256x36xbf16>, vector<36x8xbf16>, vector<256x8xf32> -> vector<256x8xf32>
    %c0_17 = arith.constant 0 : index
    %c0_18 = arith.constant 0 : index
    %19 = vector.load %arg3[%c0_17, %c0_18] : memref<1x8xf32, #tpu.memory_space<vmem>>, vector<1x8xf32>
    %20 = vector.broadcast %19 : vector<1x8xf32> to vector<256x8xf32>
    %21 = arith.mulf %18, %20 : vector<256x8xf32>
    %c0_19 = arith.constant 0 : index
    %c0_20 = arith.constant 0 : index
    %22 = vector.load %arg4[%c0_19, %c0_20] : memref<1x8xf32, #tpu.memory_space<vmem>>, vector<1x8xf32>
    %23 = vector.broadcast %22 : vector<1x8xf32> to vector<256x8xf32>
    %24 = arith.addf %21, %23 : vector<256x8xf32>
    %cst_21 = arith.constant 0.000000e+00 : f32
    %25 = vector.broadcast %cst_21 : f32 to vector<256x8xf32>
    %26 = arith.maximumf %24, %25 : vector<256x8xf32>
    %cst_22 = arith.constant 0.000000e+00 : f32
    %27 = vector.broadcast %cst_22 : f32 to vector<1x18x18x8xf32>
    %c0_23 = arith.constant 0 : index
    %c0_24 = arith.constant 0 : index
    %c0_25 = arith.constant 0 : index
    %c0_26 = arith.constant 0 : index
    %28 = vector.load %arg18[%c0_23, %c0_24, %c0_25, %c0_26] : memref<1x18x18x8xf32, #tpu.memory_space<vmem>>, vector<1x18x18x8xf32>
    tpu.vector_store %arg18[%c0_23, %c0_24, %c0_25, %c0_26], %27 {strides = array<i32>} : memref<1x18x18x8xf32, #tpu.memory_space<vmem>>, vector<1x18x18x8xf32>,
    %29 = vector.shape_cast %26 : vector<256x8xf32> to vector<1x16x16x8xf32>
    %c0_27 = arith.constant 0 : index
    %c1_28 = arith.constant 1 : index
    %c1_29 = arith.constant 1 : index
    %c0_30 = arith.constant 0 : index
    %30 = vector.load %arg18[%c0_27, %c1_28, %c1_29, %c0_30] : memref<1x18x18x8xf32, #tpu.memory_space<vmem>>, vector<1x16x16x8xf32>
    tpu.vector_store %arg18[%c0_27, %c1_28, %c1_29, %c0_30], %29 {strides = array<i32>} : memref<1x18x18x8xf32, #tpu.memory_space<vmem>>, vector<1x16x16x8xf32>,
    %c0_31 = arith.constant 0 : index
    %c0_32 = arith.constant 0 : index
    %c0_33 = arith.constant 0 : index
    %c0_34 = arith.constant 0 : index
    %31 = vector.load %arg18[%c0_31, %c0_32, %c0_33, %c0_34] : memref<1x18x18x8xf32, #tpu.memory_space<vmem>>, vector<1x18x18x8xf32>
    %32 = vector.extract_strided_slice %31 {offsets = [0, 0, 0, 0], sizes = [1, 16, 16, 8], strides = [1, 1, 1, 1]} : vector<1x18x18x8xf32> to vector<1x16x16x8xf32>
    %33 = vector.extract_strided_slice %31 {offsets = [0, 0, 1, 0], sizes = [1, 16, 16, 8], strides = [1, 1, 1, 1]} : vector<1x18x18x8xf32> to vector<1x16x16x8xf32>
    %34 = vector.extract_strided_slice %31 {offsets = [0, 0, 2, 0], sizes = [1, 16, 16, 8], strides = [1, 1, 1, 1]} : vector<1x18x18x8xf32> to vector<1x16x16x8xf32>
    %35 = vector.extract_strided_slice %31 {offsets = [0, 1, 0, 0], sizes = [1, 16, 16, 8], strides = [1, 1, 1, 1]} : vector<1x18x18x8xf32> to vector<1x16x16x8xf32>
    %36 = vector.extract_strided_slice %31 {offsets = [0, 1, 1, 0], sizes = [1, 16, 16, 8], strides = [1, 1, 1, 1]} : vector<1x18x18x8xf32> to vector<1x16x16x8xf32>
    %37 = vector.extract_strided_slice %31 {offsets = [0, 1, 2, 0], sizes = [1, 16, 16, 8], strides = [1, 1, 1, 1]} : vector<1x18x18x8xf32> to vector<1x16x16x8xf32>
    %38 = vector.extract_strided_slice %31 {offsets = [0, 2, 0, 0], sizes = [1, 16, 16, 8], strides = [1, 1, 1, 1]} : vector<1x18x18x8xf32> to vector<1x16x16x8xf32>
    %39 = vector.extract_strided_slice %31 {offsets = [0, 2, 1, 0], sizes = [1, 16, 16, 8], strides = [1, 1, 1, 1]} : vector<1x18x18x8xf32> to vector<1x16x16x8xf32>
    %40 = vector.extract_strided_slice %31 {offsets = [0, 2, 2, 0], sizes = [1, 16, 16, 8], strides = [1, 1, 1, 1]} : vector<1x18x18x8xf32> to vector<1x16x16x8xf32>
    %41 = tpu.concatenate %32, %33, %34, %35, %36, %37, %38, %39, %40 in 3 : vector<1x16x16x8xf32>, vector<1x16x16x8xf32>, vector<1x16x16x8xf32>, vector<1x16x16x8xf32>, vector<1x16x16x8xf32>, vector<1x16x16x8xf32>, vector<1x16x16x8xf32>, vector<1x16x16x8xf32>, vector<1x16x16x8xf32> -> vector<1x16x16x72xf32>
    %42 = vector.shape_cast %41 : vector<1x16x16x72xf32> to vector<256x72xf32>
    %43 = arith.truncf %42 : vector<256x72xf32> to vector<256x72xbf16>
    %c0_35 = arith.constant 0 : index
    %c0_36 = arith.constant 0 : index
    %44 = vector.load %arg5[%c0_35, %c0_36] : memref<72x8xbf16, #tpu.memory_space<vmem>>, vector<72x8xbf16>
    %cst_37 = arith.constant dense<0.000000e+00> : vector<256x8xf32>
    %45 = tpu.matmul %43, %44, %cst_37 {dimension_numbers = #tpu.dot_dimension_numbers<[1], [0], [0], [1], [0, 0, 1, 1], [], []>} : vector<256x72xbf16>, vector<72x8xbf16>, vector<256x8xf32> -> vector<256x8xf32>
    %c0_38 = arith.constant 0 : index
    %c0_39 = arith.constant 0 : index
    %46 = vector.load %arg6[%c0_38, %c0_39] : memref<1x8xf32, #tpu.memory_space<vmem>>, vector<1x8xf32>
    %47 = vector.broadcast %46 : vector<1x8xf32> to vector<256x8xf32>
    %48 = arith.mulf %45, %47 : vector<256x8xf32>
    %c0_40 = arith.constant 0 : index
    %c0_41 = arith.constant 0 : index
    %49 = vector.load %arg7[%c0_40, %c0_41] : memref<1x8xf32, #tpu.memory_space<vmem>>, vector<1x8xf32>
    %50 = vector.broadcast %49 : vector<1x8xf32> to vector<256x8xf32>
    %51 = arith.addf %48, %50 : vector<256x8xf32>
    %cst_42 = arith.constant 0.000000e+00 : f32
    %52 = vector.broadcast %cst_42 : f32 to vector<256x8xf32>
    %53 = arith.maximumf %51, %52 : vector<256x8xf32>
    %54 = vector.shape_cast %53 : vector<256x8xf32> to vector<1x16x16x8xf32>
    %c0_43 = arith.constant 0 : index
    %c1_44 = arith.constant 1 : index
    %c1_45 = arith.constant 1 : index
    %c0_46 = arith.constant 0 : index
    %55 = vector.load %arg18[%c0_43, %c1_44, %c1_45, %c0_46] : memref<1x18x18x8xf32, #tpu.memory_space<vmem>>, vector<1x16x16x8xf32>
    tpu.vector_store %arg18[%c0_43, %c1_44, %c1_45, %c0_46], %54 {strides = array<i32>} : memref<1x18x18x8xf32, #tpu.memory_space<vmem>>, vector<1x16x16x8xf32>,
    %c0_47 = arith.constant 0 : index
    %c0_48 = arith.constant 0 : index
    %c0_49 = arith.constant 0 : index
    %c0_50 = arith.constant 0 : index
    %56 = vector.load %arg18[%c0_47, %c0_48, %c0_49, %c0_50] : memref<1x18x18x8xf32, #tpu.memory_space<vmem>>, vector<1x18x18x8xf32>
    %57 = vector.extract_strided_slice %56 {offsets = [0, 0, 0, 0], sizes = [1, 16, 16, 8], strides = [1, 1, 1, 1]} : vector<1x18x18x8xf32> to vector<1x16x16x8xf32>
    %58 = vector.extract_strided_slice %56 {offsets = [0, 0, 1, 0], sizes = [1, 16, 16, 8], strides = [1, 1, 1, 1]} : vector<1x18x18x8xf32> to vector<1x16x16x8xf32>
    %59 = vector.extract_strided_slice %56 {offsets = [0, 0, 2, 0], sizes = [1, 16, 16, 8], strides = [1, 1, 1, 1]} : vector<1x18x18x8xf32> to vector<1x16x16x8xf32>
    %60 = vector.extract_strided_slice %56 {offsets = [0, 1, 0, 0], sizes = [1, 16, 16, 8], strides = [1, 1, 1, 1]} : vector<1x18x18x8xf32> to vector<1x16x16x8xf32>
    %61 = vector.extract_strided_slice %56 {offsets = [0, 1, 1, 0], sizes = [1, 16, 16, 8], strides = [1, 1, 1, 1]} : vector<1x18x18x8xf32> to vector<1x16x16x8xf32>
    %62 = vector.extract_strided_slice %56 {offsets = [0, 1, 2, 0], sizes = [1, 16, 16, 8], strides = [1, 1, 1, 1]} : vector<1x18x18x8xf32> to vector<1x16x16x8xf32>
    %63 = vector.extract_strided_slice %56 {offsets = [0, 2, 0, 0], sizes = [1, 16, 16, 8], strides = [1, 1, 1, 1]} : vector<1x18x18x8xf32> to vector<1x16x16x8xf32>
    %64 = vector.extract_strided_slice %56 {offsets = [0, 2, 1, 0], sizes = [1, 16, 16, 8], strides = [1, 1, 1, 1]} : vector<1x18x18x8xf32> to vector<1x16x16x8xf32>
    %65 = vector.extract_strided_slice %56 {offsets = [0, 2, 2, 0], sizes = [1, 16, 16, 8], strides = [1, 1, 1, 1]} : vector<1x18x18x8xf32> to vector<1x16x16x8xf32>
    %66 = tpu.concatenate %57, %58, %59, %60, %61, %62, %63, %64, %65 in 3 : vector<1x16x16x8xf32>, vector<1x16x16x8xf32>, vector<1x16x16x8xf32>, vector<1x16x16x8xf32>, vector<1x16x16x8xf32>, vector<1x16x16x8xf32>, vector<1x16x16x8xf32>, vector<1x16x16x8xf32>, vector<1x16x16x8xf32> -> vector<1x16x16x72xf32>
    %67 = vector.shape_cast %66 : vector<1x16x16x72xf32> to vector<256x72xf32>
    %68 = arith.truncf %67 : vector<256x72xf32> to vector<256x72xbf16>
    %c0_51 = arith.constant 0 : index
    %c0_52 = arith.constant 0 : index
    %69 = vector.load %arg8[%c0_51, %c0_52] : memref<72x8xbf16, #tpu.memory_space<vmem>>, vector<72x8xbf16>
    %cst_53 = arith.constant dense<0.000000e+00> : vector<256x8xf32>
    %70 = tpu.matmul %68, %69, %cst_53 {dimension_numbers = #tpu.dot_dimension_numbers<[1], [0], [0], [1], [0, 0, 1, 1], [], []>} : vector<256x72xbf16>, vector<72x8xbf16>, vector<256x8xf32> -> vector<256x8xf32>
    %c0_54 = arith.constant 0 : index
    %c0_55 = arith.constant 0 : index
    %71 = vector.load %arg9[%c0_54, %c0_55] : memref<1x8xf32, #tpu.memory_space<vmem>>, vector<1x8xf32>
    %72 = vector.broadcast %71 : vector<1x8xf32> to vector<256x8xf32>
    %73 = arith.mulf %70, %72 : vector<256x8xf32>
    %c0_56 = arith.constant 0 : index
    %c0_57 = arith.constant 0 : index
    %74 = vector.load %arg10[%c0_56, %c0_57] : memref<1x8xf32, #tpu.memory_space<vmem>>, vector<1x8xf32>
    %75 = vector.broadcast %74 : vector<1x8xf32> to vector<256x8xf32>
    %76 = arith.addf %73, %75 : vector<256x8xf32>
    %77 = arith.addf %76, %26 : vector<256x8xf32>
    %cst_58 = arith.constant 0.000000e+00 : f32
    %78 = vector.broadcast %cst_58 : f32 to vector<256x8xf32>
    %79 = arith.maximumf %77, %78 : vector<256x8xf32>
    %80 = arith.truncf %79 : vector<256x8xf32> to vector<256x8xbf16>
    %c0_59 = arith.constant 0 : index
    %c0_60 = arith.constant 0 : index
    %81 = vector.load %arg11[%c0_59, %c0_60] : memref<8x16xbf16, #tpu.memory_space<vmem>>, vector<8x16xbf16>
    %cst_61 = arith.constant dense<0.000000e+00> : vector<256x16xf32>
    %82 = tpu.matmul %80, %81, %cst_61 {dimension_numbers = #tpu.dot_dimension_numbers<[1], [0], [0], [1], [0, 0, 1, 1], [], []>} : vector<256x8xbf16>, vector<8x16xbf16>, vector<256x16xf32> -> vector<256x16xf32>
    %c0_62 = arith.constant 0 : index
    %c0_63 = arith.constant 0 : index
    %83 = vector.load %arg12[%c0_62, %c0_63] : memref<1x16xf32, #tpu.memory_space<vmem>>, vector<1x16xf32>
    %84 = vector.broadcast %83 : vector<1x16xf32> to vector<256x16xf32>
    %85 = arith.mulf %82, %84 : vector<256x16xf32>
    %c0_64 = arith.constant 0 : index
    %c0_65 = arith.constant 0 : index
    %86 = vector.load %arg13[%c0_64, %c0_65] : memref<1x16xf32, #tpu.memory_space<vmem>>, vector<1x16xf32>
    %87 = vector.broadcast %86 : vector<1x16xf32> to vector<256x16xf32>
    %88 = arith.addf %85, %87 : vector<256x16xf32>
    %cst_66 = arith.constant 0.000000e+00 : f32
    %89 = vector.broadcast %cst_66 : f32 to vector<256x16xf32>
    %90 = arith.maximumf %88, %89 : vector<256x16xf32>
    %cst_67 = arith.constant dense<0.000000e+00> : vector<16xf32>
    %91 = vector.multi_reduction <add>, %90, %cst_67 [0] : vector<256x16xf32> to vector<16xf32>
    %92 = vector.shape_cast %91 : vector<16xf32> to vector<1x16xf32>
    %cst_68 = arith.constant 2.560000e+02 : f32
    %93 = vector.broadcast %cst_68 : f32 to vector<1x16xf32>
    %94 = arith.divf %92, %93 : vector<1x16xf32>
    %c0_69 = arith.constant 0 : index
    %c0_70 = arith.constant 0 : index
    %95 = vector.load %arg14[%c0_69, %c0_70] : memref<16x10xf32, #tpu.memory_space<vmem>>, vector<16x10xf32>
    %cst_71 = arith.constant dense<0.000000e+00> : vector<1x10xf32>
    %96 = tpu.matmul %94, %95, %cst_71 {dimension_numbers = #tpu.dot_dimension_numbers<[1], [0], [0], [1], [0, 0, 1, 1], [], []>} : vector<1x16xf32>, vector<16x10xf32>, vector<1x10xf32> -> vector<1x10xf32>
    %c0_72 = arith.constant 0 : index
    %c0_73 = arith.constant 0 : index
    %97 = vector.load %arg15[%c0_72, %c0_73] : memref<1x10xf32, #tpu.memory_space<vmem>>, vector<1x10xf32>
    %98 = arith.addf %96, %97 : vector<1x10xf32>
    %c0_74 = arith.constant 0 : index
    %c0_75 = arith.constant 0 : index
    %c0_76 = arith.constant 0 : index
    %99 = vector.load %arg16[%c0_74, %c0_75, %c0_76] : memref<1x1x10xf32, #tpu.memory_space<vmem>>, vector<1x1x10xf32>
    %100 = vector.shape_cast %99 : vector<1x1x10xf32> to vector<1x10xf32>
    %101 = vector.shape_cast %98 : vector<1x10xf32> to vector<1x1x10xf32>
    tpu.vector_store %arg16[%c0_74, %c0_75, %c0_76], %101 {strides = array<i32>} : memref<1x1x10xf32, #tpu.memory_space<vmem>>, vector<1x1x10xf32>,
    return
  }
  func.func @transform_0(%arg0: i32) -> (i32, i32, i32, i32) {
    %c0_i32 = arith.constant 0 : i32
    %c0_i32_0 = arith.constant 0 : i32
    %c0_i32_1 = arith.constant 0 : i32
    %c0_i32_2 = arith.constant 0 : i32
    return %arg0, %c0_i32, %c0_i32_0, %c0_i32_1 : i32, i32, i32, i32
  }
  func.func @transform_1(%arg0: i32) -> (i32, i32) {
    %c0_i32 = arith.constant 0 : i32
    %c0_i32_0 = arith.constant 0 : i32
    %c0_i32_1 = arith.constant 0 : i32
    return %c0_i32, %c0_i32_0 : i32, i32
  }
  func.func @transform_2(%arg0: i32) -> (i32, i32) {
    %c0_i32 = arith.constant 0 : i32
    %c0_i32_0 = arith.constant 0 : i32
    %c0_i32_1 = arith.constant 0 : i32
    return %c0_i32, %c0_i32_0 : i32, i32
  }
  func.func @transform_3(%arg0: i32) -> (i32, i32) {
    %c0_i32 = arith.constant 0 : i32
    %c0_i32_0 = arith.constant 0 : i32
    %c0_i32_1 = arith.constant 0 : i32
    return %c0_i32, %c0_i32_0 : i32, i32
  }
  func.func @transform_4(%arg0: i32) -> (i32, i32) {
    %c0_i32 = arith.constant 0 : i32
    %c0_i32_0 = arith.constant 0 : i32
    %c0_i32_1 = arith.constant 0 : i32
    return %c0_i32, %c0_i32_0 : i32, i32
  }
  func.func @transform_5(%arg0: i32) -> (i32, i32) {
    %c0_i32 = arith.constant 0 : i32
    %c0_i32_0 = arith.constant 0 : i32
    %c0_i32_1 = arith.constant 0 : i32
    return %c0_i32, %c0_i32_0 : i32, i32
  }
  func.func @transform_6(%arg0: i32) -> (i32, i32) {
    %c0_i32 = arith.constant 0 : i32
    %c0_i32_0 = arith.constant 0 : i32
    %c0_i32_1 = arith.constant 0 : i32
    return %c0_i32, %c0_i32_0 : i32, i32
  }
  func.func @transform_7(%arg0: i32) -> (i32, i32) {
    %c0_i32 = arith.constant 0 : i32
    %c0_i32_0 = arith.constant 0 : i32
    %c0_i32_1 = arith.constant 0 : i32
    return %c0_i32, %c0_i32_0 : i32, i32
  }
  func.func @transform_8(%arg0: i32) -> (i32, i32) {
    %c0_i32 = arith.constant 0 : i32
    %c0_i32_0 = arith.constant 0 : i32
    %c0_i32_1 = arith.constant 0 : i32
    return %c0_i32, %c0_i32_0 : i32, i32
  }
  func.func @transform_9(%arg0: i32) -> (i32, i32) {
    %c0_i32 = arith.constant 0 : i32
    %c0_i32_0 = arith.constant 0 : i32
    %c0_i32_1 = arith.constant 0 : i32
    return %c0_i32, %c0_i32_0 : i32, i32
  }
  func.func @transform_10(%arg0: i32) -> (i32, i32) {
    %c0_i32 = arith.constant 0 : i32
    %c0_i32_0 = arith.constant 0 : i32
    %c0_i32_1 = arith.constant 0 : i32
    return %c0_i32, %c0_i32_0 : i32, i32
  }
  func.func @transform_11(%arg0: i32) -> (i32, i32) {
    %c0_i32 = arith.constant 0 : i32
    %c0_i32_0 = arith.constant 0 : i32
    %c0_i32_1 = arith.constant 0 : i32
    return %c0_i32, %c0_i32_0 : i32, i32
  }
  func.func @transform_12(%arg0: i32) -> (i32, i32) {
    %c0_i32 = arith.constant 0 : i32
    %c0_i32_0 = arith.constant 0 : i32
    %c0_i32_1 = arith.constant 0 : i32
    return %c0_i32, %c0_i32_0 : i32, i32
  }
  func.func @transform_13(%arg0: i32) -> (i32, i32) {
    %c0_i32 = arith.constant 0 : i32
    %c0_i32_0 = arith.constant 0 : i32
    %c0_i32_1 = arith.constant 0 : i32
    return %c0_i32, %c0_i32_0 : i32, i32
  }
  func.func @transform_14(%arg0: i32) -> (i32, i32) {
    %c0_i32 = arith.constant 0 : i32
    %c0_i32_0 = arith.constant 0 : i32
    %c0_i32_1 = arith.constant 0 : i32
    return %c0_i32, %c0_i32_0 : i32, i32
  }
  func.func @transform_15(%arg0: i32) -> (i32, i32, i32) {
    %c0_i32 = arith.constant 0 : i32
    %c0_i32_0 = arith.constant 0 : i32
    %c0_i32_1 = arith.constant 0 : i32
    return %arg0, %c0_i32, %c0_i32_0 : i32, i32, i32
  }
}

</mosaic_0001>

<bundles_post_ra>
// kernel: plainnet_forward_impl.1
= control target key start
LH: loop header
LB: loop body
LE: loop exit
PB: predicated region body
PF: predicated region fallthrough
CT: control target
= control target key end

     0   :  { %s13195_s0 = inlined_call_operand.vmem [shape: f32[2,16,16,4], index: 0, kind: input, shape index: {}]   ;;  %s13196_s1 = inlined_call_operand.vmem [shape: bf16[36,8], index: 1, kind: input, shape index: {}]   ;;  %s13197_s2 = inlined_call_operand.vmem [shape: f32[1,8], index: 2, kind: input, shape index: {}]   ;;  %s13198_s3 = inlined_call_operand.vmem [shape: f32[1,8], index: 3, kind: input, shape index: {}]   ;;  %s13199_s4 = inlined_call_operand.vmem [shape: bf16[72,8], index: 4, kind: input, shape index: {}]   ;;  %s13200_s5 = inlined_call_operand.vmem [shape: f32[1,8], index: 5, kind: input, shape index: {}]   ;;  %s13201_s6 = inlined_call_operand.vmem [shape: f32[1,8], index: 6, kind: input, shape index: {}]   ;;  %s13202_s7 = inlined_call_operand.vmem [shape: bf16[72,8], index: 7, kind: input, shape index: {}]   ;;  %s13203_s8 = inlined_call_operand.vmem [shape: f32[1,8], index: 8, kind: input, shape index: {}]   ;;  %s13204_s9 = inlined_call_operand.vmem [shape: f32[1,8], index: 9, kind: input, shape index: {}]   ;;  %s13205_s10 = inlined_call_operand.vmem [shape: bf16[8,16], index: 10, kind: input, shape index: {}]   ;;  %s13206_s11 = inlined_call_operand.vmem [shape: f32[1,16], index: 11, kind: input, shape index: {}]   ;;  %s13207_s12 = inlined_call_operand.vmem [shape: f32[1,16], index: 12, kind: input, shape index: {}]   ;;  %s13208_s13 = inlined_call_operand.vmem [shape: f32[16,10], index: 13, kind: input, shape index: {}]   ;;  %s13209_s14 = inlined_call_operand.vmem [shape: f32[1,10], index: 14, kind: input, shape index: {}]   ;;  %s13210_s15 = inlined_call_operand.hbm [shape: f32[2,1,10], index: 15, kind: output, shape index: {}]  }
   0x1   :  { %13435 = sst [smem:[#allocation98_spill]] %s13195_s0 }
   0x2   :  { %13436 = sst [smem:[#allocation99_spill]] %s13196_s1 }
   0x3   :  { %13437 = sst [smem:[#allocation100_spill]] %s13197_s2 }
   0x4   :  { %13438 = sst [smem:[#allocation101_spill]] %s13198_s3 }
   0x5   :  { %13439 = sst [smem:[#allocation102_spill]] %s13199_s4 }
   0x6   :  { %20 = vsyncpa [#allocation5], 0 }
   0x7   :  { %22 = vsyncpa [#allocation5 + $0x1], 0  ;;  %s8392_s18 = smov 0   ;;  %s8394_s19 = smov 0  }
   0x8   :  { %s8396_s20 = smov 0   ;;  %s8398_s21 = smov 0  }
   0x9 LB: > { %s8413_s22 = sadd.s32 4294967295, %s8296_s21   ;;  %s6025_s23 = sadd.s32 4294967294, %s8296_s21   ;;  %s8296_s21 = sphi %s8398_s21, %s13818_s21   ;;  %s8292_s20 = sphi %s8396_s20, %s13817_s20   ;;  %s8288_s19 = sphi %s8394_s19, %s13816_s19   ;;  %s8284_s18 = sphi %s8392_s18, %s13815_s18  }
   0xa   : > { %s8417_s24 = sadd.s32 1, %s8296_s21   ;;  %s355_s25 = sadd.s32 1, %s8292_s20 }
   0xb   : > { %s352_s26 = ssub.s32 %s8296_s21, %s8417_s24  ;;  %p365_p0 = scmp.ne.s32.totalorder %s8292_s20, %s8288_s19 }
   0xc   : > { %p353_p1 = scmp.eq.s32.totalorder %s352_s26, 0  ;;  %p366_p2 = scmp.eq.s32.totalorder %s8413_s22, 1 }
   0xd   : > { %p371_p3 = scmp.ne.s32.totalorder %s8288_s19, %s8284_s18  ;;  %p372_p4 = scmp.eq.s32.totalorder %s6025_s23, 1 }
   0xe   : > { %s8428_s27 = scalar_select %p353_p1, %s8292_s20, %s355_s25  }
   0xf   : > { %p8430_p5 = por %p366_p2, %p365_p0  ;;  %p8434_p6 = por %p372_p4, %p371_p3 }
  0x10   : > { %13440 = sst [smem:[#allocation7_spill]] %s8428_s27  ;;  %p6028_p7 = scmp.ge.s32.totalorder %s8296_s21, 1 }
  0x11   : > { %p440_p8 = scmp.lt.s32.totalorder %s8296_s21, 3 }
  0x13   : > { %p441_p9 = pnand %p6028_p7, %p440_p8 }
  0x15   : > { %444 = sbr.rel (%p441_p9) target bundleno = 2221 (0x8ad), region = 80 }
  0x1a   : > { %vm493_vm0 = vcmask 31744   ;;  %vm496_vm1 = vcmask 25600   ;;  %v13211_v0 = vmov 0.0   ;;  %vm716_vm2 = vcmask 1046528   ;;  %s8299_s30 = smov 4   ;;  %p487_p10 = scmp.lt.s32.totalorder %s8413_s22, 1 }
  0x1b   : > { %494 = vst.msk [vmem:[#allocation2] sm:$0xff] %vm493_vm0, %v13211_v0  ;;  %s13443_s0 = sld [smem:[#allocation98_spill]]  ;;  %vm893_vm3 = vcmask 1045504   ;;  %vm1704_vm4 = vcmask 64512   ;;  %s8303_s23 = smov 20   ;;  %vm2020_vm5 = vcmask 1041408  }
  0x1c   : > { %495 = vst.msk [vmem:[#allocation2 + $0x8] sm:$0xff] %vm493_vm0, %v13211_v0  ;;  %s488_s16 = scalar_select %p487_p10, %s8413_s22, 1  ;;  %vm1737_vm6 = vcmask 97280   ;;  %vm1770_vm7 = vcmask 130048   ;;  %vm1836_vm8 = vcmask 195584   ;;  %vm1803_vm9 = vcmask 162816  }
  0x1d   : > { %497 = vst.msk [vmem:[#allocation2 + $0x10] sm:$0x3] %vm496_vm1, %v13211_v0  ;;  %s13278_s25 = smov 24   ;;  %s13526_s1 = sld [smem:[#allocation99_spill]]  ;;  %vm1869_vm10 = vcmask 228352   ;;  %vm1902_vm11 = vcmask 261120  }
  0x1e   : > { %498 = vst.msk [vmem:[#allocation2 + $0x18] sm:$0xff] %vm493_vm0, %v13211_v0  ;;  %s6138_s17 = sshll.u32 %s488_s16, 8  ;;  %s13314_s16 = smov 8   ;;  %vm1971_vm12 = vcmask 293888   ;;  %vm2219_vm13 = vcmask 58368   ;;  %vm3722_vm14 = vcmask 1043456  }
  0x1f   : > { %499 = vst.msk [vmem:[#allocation2 + $0x20] sm:$0xff] %vm493_vm0, %v13211_v0  ;;  %s13546_s2 = sld [smem:[#allocation100_spill]]  ;;  %vm3489_vm15 = vcmask 326656  }
  0x20   : > { %500 = vst.msk [vmem:[#allocation2 + $0x28] sm:$0x3] %vm496_vm1, %v13211_v0  ;;  %s13547_s3 = sld [smem:[#allocation101_spill]] }
  0x21   : > { %501 = vst.msk [vmem:[#allocation2 + $0x30] sm:$0xff] %vm493_vm0, %v13211_v0  ;;  %s8555_s26 = scalar_lea.vmem %s13443_s0, %s6138_s17  ;;  %s13283_s17 = smov 16  }
  0x22   : > { %v8454_v1 = vld [vmem:[#allocation2] sm:$0xff]  ;;  %502 = vst.msk [vmem:[#allocation2 + $0x38] sm:$0xff] %vm493_vm0, %v13211_v0  ;;  %v555_v10 = vld [vmem:[%s8555_s26 + $0x30] sm:$0xff]  ;;  %v556_v11 = vld [vmem:[%s8555_s26 + $0x38] sm:$0xff]  ;;  %s13684_s4 = sld [smem:[#allocation102_spill]] }
  0x23   : > { %v8458_v2 = vld [vmem:[#allocation2 + $0x8] sm:$0xff]  ;;  %v717_v3 = vrot.slane %v8454_v1, 1  ;;  %503 = vst.msk [vmem:[#allocation2 + $0x40] sm:$0x3] %vm496_vm1, %v13211_v0  ;;  %v551_v12 = vld [vmem:[%s8555_s26 + $0x10] sm:$0xff]  ;;  %v552_v13 = vld [vmem:[%s8555_s26 + $0x18] sm:$0xff] }
  0x24   : > { %v8463_v4 = vld [vmem:[#allocation2 + $0x10] sm:$0x3]  ;;  %v718_v5 = vrot.slane %v8458_v2, 1  ;;  %504 = vst.msk [vmem:[#allocation2 + $0x48] sm:$0xff] %vm493_vm0, %v13211_v0  ;;  %v549_v14 = vld [vmem:[%s8555_s26] sm:$0xff]  ;;  %v550_v15 = vld [vmem:[%s8555_s26 + $0x8] sm:$0xff] }
  0x25   : > { %v720_v6 = vrot.slane %v8463_v4, 1  ;;  %505 = vst.msk [vmem:[#allocation2 + $0x50] sm:$0xff] %vm493_vm0, %v13211_v0  ;;  %v557_v16 = vld [vmem:[%s8555_s26 + $0x40] sm:$0xff]  ;;  %v558_v17 = vld [vmem:[%s8555_s26 + $0x48] sm:$0xff]  ;;  %v559_v21 = vld [vmem:[%s8555_s26 + $0x50] sm:$0xff] }
  0x26   : > { %v719_v7 = vsel %vm716_vm2, %v717_v3, %v718_v5  ;;  %506 = vst.msk [vmem:[#allocation2 + $0x58] sm:$0x3] %vm496_vm1, %v13211_v0  ;;  %v553_v18 = vld [vmem:[%s8555_s26 + $0x20] sm:$0xff]  ;;  %v554_v19 = vld [vmem:[%s8555_s26 + $0x28] sm:$0xff]  ;;  %v560_v25 = vld [vmem:[%s8555_s26 + $0x58] sm:$0xff] }
  0x27   : > { %v721_v8 = vsel %vm716_vm2, %v718_v5, %v720_v6  ;;  %507 = vst.msk [vmem:[#allocation2 + $0x60] sm:$0xff] %vm493_vm0, %v13211_v0  ;;  %v563_v29 = vld [vmem:[%s8555_s26 + $0x70] sm:$0xff]  ;;  %v564_v33 = vld [vmem:[%s8555_s26 + $0x78] sm:$0xff]  ;;  %v561_v39 = vld [vmem:[%s8555_s26 + $0x60] sm:$0xff] }
  0x28   : > { %v6202_v9 = vpack.i.bf16 %v721_v8, %v719_v7  ;;  %508 = vst.msk [vmem:[#allocation2 + $0x68] sm:$0xff] %vm493_vm0, %v13211_v0  ;;  %v562_v44 = vld [vmem:[%s8555_s26 + $0x68] sm:$0xff]  ;;  %v565_v50 = vld [vmem:[%s8555_s26 + $0x80] sm:$0xff] }
  0x29   : > { %509 = vst.msk [vmem:[#allocation2 + $0x70] sm:$0x3] %vm496_vm1, %v13211_v0  ;;  %v566_v55 = vld [vmem:[%s8555_s26 + $0x88] sm:$0xff]  ;;  %v569_v61 = vld [vmem:[%s8555_s26 + $0xa0] sm:$0xff] }
  0x2a   : > { %6203 = vrot.lane.b32.xlu0 %v6202_v9, %s8299_s30  ;;  %510 = vst.msk [vmem:[#allocation2 + $0x78] sm:$0xff] %vm493_vm0, %v13211_v0  ;;  %v570_v6 = vld [vmem:[%s8555_s26 + $0xa8] sm:$0xff] }
  0x2b   : > { %511 = vst.msk [vmem:[#allocation2 + $0x80] sm:$0xff] %vm493_vm0, %v13211_v0 }
  0x2c   : > { %512 = vst.msk [vmem:[#allocation2 + $0x88] sm:$0x3] %vm496_vm1, %v13211_v0 }
  0x2d   : > { %513 = vst.msk [vmem:[#allocation2 + $0x90] sm:$0xff] %vm493_vm0, %v13211_v0 }
  0x2e   : > { %514 = vst.msk [vmem:[#allocation2 + $0x98] sm:$0xff] %vm493_vm0, %v13211_v0 }
  0x2f   : > { %515 = vst.msk [vmem:[#allocation2 + $0xa0] sm:$0x3] %vm496_vm1, %v13211_v0 }
  0x30   : > { %516 = vst.msk [vmem:[#allocation2 + $0xa8] sm:$0xff] %vm493_vm0, %v13211_v0 }
  0x31   : > { %517 = vst.msk [vmem:[#allocation2 + $0xb0] sm:$0xff] %vm493_vm0, %v13211_v0 }
  0x32   : > { %518 = vst.msk [vmem:[#allocation2 + $0xb8] sm:$0x3] %vm496_vm1, %v13211_v0 }
  0x33   : > { %519 = vst.msk [vmem:[#allocation2 + $0xc0] sm:$0xff] %vm493_vm0, %v13211_v0 }
  0x34   : > { %520 = vst.msk [vmem:[#allocation2 + $0xc8] sm:$0xff] %vm493_vm0, %v13211_v0 }
  0x35   : > { %521 = vst.msk [vmem:[#allocation2 + $0xd0] sm:$0x3] %vm496_vm1, %v13211_v0 }
  0x36   : > { %522 = vst.msk [vmem:[#allocation2 + $0xd8] sm:$0xff] %vm493_vm0, %v13211_v0 }
  0x37   : > { %523 = vst.msk [vmem:[#allocation2 + $0xe0] sm:$0xff] %vm493_vm0, %v13211_v0 }
  0x38   : > { %524 = vst.msk [vmem:[#allocation2 + $0xe8] sm:$0x3] %vm496_vm1, %v13211_v0 }
  0x39   : > { %525 = vst.msk [vmem:[#allocation2 + $0xf0] sm:$0xff] %vm493_vm0, %v13211_v0 }
  0x3a   : > { %526 = vst.msk [vmem:[#allocation2 + $0xf8] sm:$0xff] %vm493_vm0, %v13211_v0 }
  0x3b   : > { %527 = vst.msk [vmem:[#allocation2 + $0x100] sm:$0x3] %vm496_vm1, %v13211_v0 }
  0x3c   : > { %528 = vst.msk [vmem:[#allocation2 + $0x108] sm:$0xff] %vm493_vm0, %v13211_v0 }
  0x3d   : > { %529 = vst.msk [vmem:[#allocation2 + $0x110] sm:$0xff] %vm493_vm0, %v13211_v0 }
  0x3e   : > { %530 = vst.msk [vmem:[#allocation2 + $0x118] sm:$0x3] %vm496_vm1, %v13211_v0 }
  0x3f   : > { %531 = vst.msk [vmem:[#allocation2 + $0x120] sm:$0xff] %vm493_vm0, %v13211_v0 }
  0x40   : > { %532 = vst.msk [vmem:[#allocation2 + $0x128] sm:$0xff] %vm493_vm0, %v13211_v0 }
  0x41   : > { %533 = vst.msk [vmem:[#allocation2 + $0x130] sm:$0x3] %vm496_vm1, %v13211_v0 }
  0x42   : > { %534 = vst.msk [vmem:[#allocation2 + $0x138] sm:$0xff] %vm493_vm0, %v13211_v0 }
  0x43   : > { %535 = vst.msk [vmem:[#allocation2 + $0x140] sm:$0xff] %vm493_vm0, %v13211_v0 }
  0x44   : > { %536 = vst.msk [vmem:[#allocation2 + $0x148] sm:$0x3] %vm496_vm1, %v13211_v0 }
  0x45   : > { %537 = vst.msk [vmem:[#allocation2 + $0x150] sm:$0xff] %vm493_vm0, %v13211_v0 }
  0x46   : > { %538 = vst.msk [vmem:[#allocation2 + $0x158] sm:$0xff] %vm493_vm0, %v13211_v0 }
  0x47   : > { %539 = vst.msk [vmem:[#allocation2 + $0x160] sm:$0x3] %vm496_vm1, %v13211_v0 }
  0x48   : > { %540 = vst.msk [vmem:[#allocation2 + $0x168] sm:$0xff] %vm493_vm0, %v13211_v0 }
  0x49   : > { %541 = vst.msk [vmem:[#allocation2 + $0x170] sm:$0xff] %vm493_vm0, %v13211_v0 }
  0x4a   : > { %542 = vst.msk [vmem:[#allocation2 + $0x178] sm:$0x3] %vm496_vm1, %v13211_v0 }
  0x4b   : > { %543 = vst.msk [vmem:[#allocation2 + $0x180] sm:$0xff] %vm493_vm0, %v13211_v0 }
  0x4c   : > { %544 = vst.msk [vmem:[#allocation2 + $0x188] sm:$0xff] %vm493_vm0, %v13211_v0 }
  0x4d   : > { %545 = vst.msk [vmem:[#allocation2 + $0x190] sm:$0x3] %vm496_vm1, %v13211_v0 }
  0x4e   : > { %546 = vst.msk [vmem:[#allocation2 + $0x198] sm:$0xff] %vm493_vm0, %v13211_v0 }
  0x4f   : > { %547 = vst.msk [vmem:[#allocation2 + $0x1a0] sm:$0xff] %vm493_vm0, %v13211_v0 }
  0x50   : > { %548 = vst.msk [vmem:[#allocation2 + $0x1a8] sm:$0x3] %vm496_vm1, %v13211_v0  ;;  %vm3522_vm1 = vcmask 392192  }
  0x51   : > { %588 = vst.msk [vmem:[#allocation2 + $0x61] sm:$0xff] %vm493_vm0, %v555_v10 }
  0x52   : > { %589 = vst.msk [vmem:[#allocation2 + $0x69] sm:$0xff] %vm493_vm0, %v556_v11 }
  0x53   : > { %584 = vst.msk [vmem:[#allocation2 + $0x31] sm:$0xff] %vm493_vm0, %v551_v12  ;;  %v567_v12 = vld [vmem:[%s8555_s26 + $0x90] sm:$0xff] }
  0x54   : > { %585 = vst.msk [vmem:[#allocation2 + $0x39] sm:$0xff] %vm493_vm0, %v552_v13 }
  0x55   : > { %582 = vst.msk [vmem:[#allocation2 + $0x19] sm:$0xff] %vm493_vm0, %v549_v14 }
  0x56   : > { %583 = vst.msk [vmem:[#allocation2 + $0x21] sm:$0xff] %vm493_vm0, %v550_v15 }
  0x57   : > { %590 = vst.msk [vmem:[#allocation2 + $0x79] sm:$0xff] %vm493_vm0, %v557_v16 }
  0x58   : > { %v8584_v20 = vld [vmem:[#allocation2 + $0x60] sm:$0xff]  ;;  %591 = vst.msk [vmem:[#allocation2 + $0x81] sm:$0xff] %vm493_vm0, %v558_v17  ;;  %v568_v17 = vld [vmem:[%s8555_s26 + $0x98] sm:$0xff] }
  0x59   : > { %v8588_v22 = vld [vmem:[#allocation2 + $0x68] sm:$0xff]  ;;  %v8590_v23 = vld [vmem:[#allocation2 + $0x70] sm:$0x3]  ;;  %v737_v24 = vrot.slane %v8584_v20, 1  ;;  %586 = vst.msk [vmem:[#allocation2 + $0x49] sm:$0xff] %vm493_vm0, %v553_v18 }
  0x5a   : > { %v738_v26 = vrot.slane %v8588_v22, 1  ;;  %v740_v27 = vrot.slane %v8590_v23, 1  ;;  %v8597_v28 = vld [vmem:[#allocation2 + $0x30] sm:$0xff]  ;;  %587 = vst.msk [vmem:[#allocation2 + $0x51] sm:$0xff] %vm493_vm0, %v554_v19 }
  0x5b   : > { %v8601_v30 = vld [vmem:[#allocation2 + $0x38] sm:$0xff]  ;;  %v8603_v31 = vld [vmem:[#allocation2 + $0x40] sm:$0x3]  ;;  %v727_v32 = vrot.slane %v8597_v28, 1  ;;  %592 = vst.msk [vmem:[#allocation2 + $0x91] sm:$0xff] %vm493_vm0, %v559_v21 }
  0x5c   : > { %v739_v34 = vsel %vm716_vm2, %v737_v24, %v738_v26  ;;  %v741_v35 = vsel %vm716_vm2, %v738_v26, %v740_v27  ;;  %v728_v36 = vrot.slane %v8601_v30, 1  ;;  %v730_v37 = vrot.slane %v8603_v31, 1  ;;  %v8612_v38 = vld [vmem:[#allocation2 + $0x18] sm:$0xff]  ;;  %593 = vst.msk [vmem:[#allocation2 + $0x99] sm:$0xff] %vm493_vm0, %v560_v25  ;;  %v571_v26 = vld [vmem:[%s8555_s26 + $0xb0] sm:$0xff] }
  0x5d   : > { %v8616_v40 = vpack.i.bf16 %v741_v35, %v739_v34  ;;  %v8618_v41 = vld [vmem:[#allocation2 + $0x20] sm:$0xff]  ;;  %v8620_v42 = vld [vmem:[#allocation2 + $0x28] sm:$0x3]  ;;  %v722_v43 = vrot.slane %v8612_v38, 1  ;;  %596 = vst.msk [vmem:[#allocation2 + $0xc1] sm:$0xff] %vm493_vm0, %v563_v29  ;;  %v572_v34 = vld [vmem:[%s8555_s26 + $0xb8] sm:$0xff] }
  0x5e   : > { %v729_v45 = vsel %vm716_vm2, %v727_v32, %v728_v36  ;;  %v731_v46 = vsel %vm716_vm2, %v728_v36, %v730_v37  ;;  %v723_v47 = vrot.slane %v8618_v41, 1  ;;  %v725_v48 = vrot.slane %v8620_v42, 1  ;;  %v8629_v49 = vld [vmem:[#allocation2 + $0x78] sm:$0xff]  ;;  %597 = vst.msk [vmem:[#allocation2 + $0xc9] sm:$0xff] %vm493_vm0, %v564_v33 }
  0x5f   : > { %13444 = vst [vmem:[#allocation8_spill] sm:$0xff] %v8616_v40  ;;  %6223 = vrot.lane.b32.xlu2 %v8616_v40, %s8299_s30  ;;  %v8635_v51 = vpack.i.bf16 %v731_v46, %v729_v45  ;;  %v8637_v52 = vld [vmem:[#allocation2 + $0x80] sm:$0xff]  ;;  %v8639_v53 = vld [vmem:[#allocation2 + $0x88] sm:$0x3]  ;;  %v742_v54 = vrot.slane %v8629_v49, 1 }
  0x60   : > { %594 = vst.msk [vmem:[#allocation2 + $0xa9] sm:$0xff] %vm493_vm0, %v561_v39  ;;  %v724_v56 = vsel %vm716_vm2, %v722_v43, %v723_v47  ;;  %v726_v57 = vsel %vm716_vm2, %v723_v47, %v725_v48  ;;  %v743_v58 = vrot.slane %v8637_v52, 1  ;;  %v745_v59 = vrot.slane %v8639_v53, 1  ;;  %v8648_v60 = vld [vmem:[#allocation2 + $0x48] sm:$0xff] }
  0x61   : > { %13445 = vst [vmem:[#allocation9_spill] sm:$0xff] %v8635_v51  ;;  %6213 = vrot.lane.b32.xlu1 %v8635_v51, %s8299_s30  ;;  %v8654_v62 = vpack.i.bf16 %v726_v57, %v724_v56  ;;  %v8656_v63 = vld [vmem:[#allocation2 + $0x50] sm:$0xff]  ;;  %v8658_v3 = vld [vmem:[#allocation2 + $0x58] sm:$0x3]  ;;  %v732_v5 = vrot.slane %v8648_v60, 1 }
  0x62   : > { %595 = vst.msk [vmem:[#allocation2 + $0xb1] sm:$0xff] %vm493_vm0, %v562_v44  ;;  %v744_v7 = vsel %vm716_vm2, %v742_v54, %v743_v58  ;;  %v746_v8 = vsel %vm716_vm2, %v743_v58, %v745_v59  ;;  %v733_v9 = vrot.slane %v8656_v63, 1  ;;  %v735_v10 = vrot.slane %v8658_v3, 1  ;;  %v8667_v11 = vld [vmem:[#allocation2 + $0x90] sm:$0xff]  ;;  %v573_v59 = vld [vmem:[%s8555_s26 + $0xc0] sm:$0xff] }
  0x63   : > { %13446 = vst [vmem:[#allocation10_spill] sm:$0xff] %v8654_v62  ;;  %6208 = vrot.lane.b32.xlu0 %v8654_v62, %s8299_s30  ;;  %v8673_v13 = vpack.i.bf16 %v746_v8, %v744_v7  ;;  %v8675_v14 = vld [vmem:[#allocation2 + $0x98] sm:$0xff]  ;;  %v8677_v15 = vld [vmem:[#allocation2 + $0xa0] sm:$0x3]  ;;  %v747_v16 = vrot.slane %v8667_v11, 1  ;;  %v575_v44 = vld [vmem:[%s8555_s26 + $0xd0] sm:$0xff] }
  0x64   : > { %598 = vst.msk [vmem:[#allocation2 + $0xd9] sm:$0xff] %vm493_vm0, %v565_v50  ;;  %v734_v18 = vsel %vm716_vm2, %v732_v5, %v733_v9  ;;  %v736_v19 = vsel %vm716_vm2, %v733_v9, %v735_v10  ;;  %v748_v21 = vrot.slane %v8675_v14, 1  ;;  %v750_v24 = vrot.slane %v8677_v15, 1  ;;  %v8686_v25 = vld [vmem:[#allocation2 + $0xc0] sm:$0xff]  ;;  %v576_v50 = vld [vmem:[%s8555_s26 + $0xd8] sm:$0xff]  ;;  %v574_v7 = vld [vmem:[%s8555_s26 + $0xc8] sm:$0xff] }
  0x65   : > { %599 = vst.msk [vmem:[#allocation2 + $0xe1] sm:$0xff] %vm493_vm0, %v566_v55  ;;  %v8690_v27 = vpack.i.bf16 %v736_v19, %v734_v18  ;;  %v8692_v29 = vld [vmem:[#allocation2 + $0xc8] sm:$0xff]  ;;  %v8694_v32 = vld [vmem:[#allocation2 + $0xd0] sm:$0x3]  ;;  %v757_v33 = vrot.slane %v8686_v25, 1 }
  0x66   : > { %13447 = vst [vmem:[#allocation11_spill] sm:$0xff] %v8673_v13  ;;  %v749_v35 = vsel %vm716_vm2, %v747_v16, %v748_v21  ;;  %v751_v36 = vsel %vm716_vm2, %v748_v21, %v750_v24  ;;  %v758_v37 = vrot.slane %v8692_v29, 1  ;;  %v760_v39 = vrot.slane %v8694_v32, 1 }
  0x67   : > { %602 = vst.msk [vmem:[#allocation2 + $0x109] sm:$0xff] %vm493_vm0, %v569_v61  ;;  %v8703_v43 = vld [vmem:[#allocation2 + $0xa8] sm:$0xff]  ;;  %6228 = vrot.lane.b32.xlu2 %v8673_v13, %s8299_s30  ;;  %v8709_v45 = vpack.i.bf16 %v751_v36, %v749_v35 }
  0x68   : > { %603 = vst.msk [vmem:[#allocation2 + $0x111] sm:$0xff] %vm493_vm0, %v570_v6  ;;  %v752_v48 = vrot.slane %v8703_v43, 1  ;;  %v759_v54 = vsel %vm716_vm2, %v757_v33, %v758_v37  ;;  %v761_v55 = vsel %vm716_vm2, %v758_v37, %v760_v39 }
  0x69   : > { %13448 = vst [vmem:[#allocation12_spill] sm:$0xff] %v8690_v27  ;;  %v8711_v46 = vld [vmem:[#allocation2 + $0xb0] sm:$0xff]  ;;  %v8713_v47 = vld [vmem:[#allocation2 + $0xb8] sm:$0x3]  ;;  %6218 = vrot.lane.b32.xlu1 %v8690_v27, %s8299_s30  ;;  %v8745_v18 = vpack.i.bf16 %v761_v55, %v759_v54 }
  0x6a   : > { %600 = vst.msk [vmem:[#allocation2 + $0xf1] sm:$0xff] %vm493_vm0, %v567_v12  ;;  %v753_v56 = vrot.slane %v8711_v46, 1  ;;  %v755_v57 = vrot.slane %v8713_v47, 1 }
  0x6b   : > { %601 = vst.msk [vmem:[#allocation2 + $0xf9] sm:$0xff] %vm493_vm0, %v568_v17  ;;  %v8722_v58 = vld [vmem:[#allocation2 + $0xd8] sm:$0xff]  ;;  %v577_v17 = vld [vmem:[%s8555_s26 + $0xe0] sm:$0xff]  ;;  %6233 = vrot.lane.b32.xlu0 %v8709_v45, %s8299_s30 }
  0x6c   : > { %13449 = vst [vmem:[#allocation13_spill] sm:$0xff] %v8709_v45  ;;  %v8728_v61 = vld [vmem:[#allocation2 + $0xe0] sm:$0xff]  ;;  %v8730_v5 = vld [vmem:[#allocation2 + $0xe8] sm:$0x3]  ;;  %v762_v6 = vrot.slane %v8722_v58, 1  ;;  %v754_v8 = vsel %vm716_vm2, %v752_v48, %v753_v56  ;;  %v756_v9 = vsel %vm716_vm2, %v753_v56, %v755_v57 }
  0x6d   : > { %604 = vst.msk [vmem:[#allocation2 + $0x121] sm:$0xff] %vm493_vm0, %v571_v26  ;;  %v763_v10 = vrot.slane %v8728_v61, 1  ;;  %v765_v12 = vrot.slane %v8730_v5, 1  ;;  %v578_v26 = vld [vmem:[%s8555_s26 + $0xe8] sm:$0xff]  ;;  %v8761_v39 = vpack.i.bf16 %v756_v9, %v754_v8 }
  0x6e   : > { %605 = vst.msk [vmem:[#allocation2 + $0x129] sm:$0xff] %vm493_vm0, %v572_v34  ;;  %v8739_v16 = vld [vmem:[#allocation2 + $0x108] sm:$0xff] }
  0x6f   : > { %608 = vst.msk [vmem:[#allocation2 + $0x151] sm:$0xff] %vm493_vm0, %v575_v44  ;;  %v8747_v19 = vld [vmem:[#allocation2 + $0x110] sm:$0xff]  ;;  %v8749_v21 = vld [vmem:[#allocation2 + $0x118] sm:$0x3]  ;;  %v772_v24 = vrot.slane %v8739_v16, 1  ;;  %v764_v33 = vsel %vm716_vm2, %v762_v6, %v763_v10  ;;  %v766_v34 = vsel %vm716_vm2, %v763_v10, %v765_v12  ;;  %6243 = vrot.lane.b32.xlu2 %v8745_v18, %s8299_s30 }
  0x70   : > { %609 = vst.msk [vmem:[#allocation2 + $0x159] sm:$0xff] %vm493_vm0, %v576_v50  ;;  %v773_v35 = vrot.slane %v8747_v19, 1  ;;  %v775_v36 = vrot.slane %v8749_v21, 1  ;;  %v8776_v57 = vpack.i.bf16 %v766_v34, %v764_v33 }
  0x71   : > { %13450 = vst [vmem:[#allocation14_spill] sm:$0xff] %v8745_v18  ;;  %v8758_v37 = vld [vmem:[#allocation2 + $0xf0] sm:$0xff]  ;;  %6238 = vrot.lane.b32.xlu1 %v8761_v39, %s8299_s30 }
  0x72   : > { %606 = vst.msk [vmem:[#allocation2 + $0x139] sm:$0xff] %vm493_vm0, %v573_v59  ;;  %v8763_v44 = vld [vmem:[#allocation2 + $0xf8] sm:$0xff]  ;;  %v8765_v48 = vld [vmem:[#allocation2 + $0x100] sm:$0x3]  ;;  %v767_v50 = vrot.slane %v8758_v37, 1  ;;  %v774_v59 = vsel %vm716_vm2, %v772_v24, %v773_v35  ;;  %v776_v8 = vsel %vm716_vm2, %v773_v35, %v775_v36 }
  0x73   : > { %607 = vst.msk [vmem:[#allocation2 + $0x141] sm:$0xff] %vm493_vm0, %v574_v7  ;;  %v768_v54 = vrot.slane %v8763_v44, 1  ;;  %v770_v55 = vrot.slane %v8765_v48, 1  ;;  %6248 = vrot.lane.b32.xlu0 %v8776_v57, %s8299_s30  ;;  %v8799_v35 = vpack.i.bf16 %v776_v8, %v774_v59 }
  0x74   : > { %13451 = vst [vmem:[#allocation15_spill] sm:$0xff] %v8761_v39  ;;  %v8771_v56 = vld [vmem:[#allocation2 + $0x120] sm:$0xff] }
  0x75   : > { %610 = vst.msk [vmem:[#allocation2 + $0x169] sm:$0xff] %vm493_vm0, %v577_v17  ;;  %v8779_v6 = vld [vmem:[#allocation2 + $0x128] sm:$0xff]  ;;  %v8781_v7 = vld [vmem:[#allocation2 + $0x130] sm:$0x3]  ;;  %v777_v9 = vrot.slane %v8771_v56, 1  ;;  %v769_v33 = vsel %vm716_vm2, %v767_v50, %v768_v54  ;;  %v771_v34 = vsel %vm716_vm2, %v768_v54, %v770_v55 }
  0x76   : > { %611 = vst.msk [vmem:[#allocation2 + $0x171] sm:$0xff] %vm493_vm0, %v578_v26  ;;  %v778_v10 = vrot.slane %v8779_v6, 1  ;;  %v780_v12 = vrot.slane %v8781_v7, 1  ;;  %v8787_v17 = vld [vmem:[#allocation2 + $0x150] sm:$0xff]  ;;  %v8812_v55 = vpack.i.bf16 %v771_v34, %v769_v33 }
  0x77   : > { %13452 = vst [vmem:[#allocation16_spill] sm:$0xff] %v8776_v57  ;;  %v8791_v26 = vld [vmem:[#allocation2 + $0x158] sm:$0xff]  ;;  %v8793_v24 = vld [vmem:[#allocation2 + $0x160] sm:$0x3]  ;;  %v787_v36 = vrot.slane %v8787_v17, 1  ;;  %6258 = vrot.lane.b32.xlu2 %v8799_v35, %s8299_s30 }
  0x78   : > { %13453 = vst [vmem:[#allocation17_spill] sm:$0xff] %v8791_v26  ;;  %v788_v0 = vrot.slane %v8791_v26, 1  ;;  %v779_v45 = vsel %vm716_vm2, %v777_v9, %v778_v10  ;;  %v781_v50 = vsel %vm716_vm2, %v778_v10, %v780_v12  ;;  %v790_v54 = vrot.slane %v8793_v24, 1 }
  0x79   : > { %13454 = vst [vmem:[#allocation18_spill] sm:$0xff] %v8793_v24  ;;  %v8803_v18 = vld [vmem:[#allocation2 + $0x138] sm:$0xff]  ;;  %v8825_v9 = vpack.i.bf16 %v781_v50, %v779_v45  ;;  %6253 = vrot.lane.b32.xlu1 %v8812_v55, %s8299_s30 }
  0x7a   : > { %13455 = vst [vmem:[#allocation19_spill] sm:$0xff] %v8799_v35  ;;  %v8805_v39 = vld [vmem:[#allocation2 + $0x140] sm:$0xff]  ;;  %v8807_v13 = vld [vmem:[#allocation2 + $0x148] sm:$0x3]  ;;  %v782_v40 = vrot.slane %v8803_v18, 1  ;;  %v789_v10 = vsel %vm716_vm2, %v787_v36, %v788_v0  ;;  %v791_v12 = vsel %vm716_vm2, %v788_v0, %v790_v54  ;;  %v899_v0 = vrot.slane %v8612_v38, 2 }
  0x7b   : > { %13456 = vst [vmem:[#allocation20_spill] sm:$0xff] %v8812_v55  ;;  %v783_v51 = vrot.slane %v8805_v39, 1  ;;  %v785_v27 = vrot.slane %v8807_v13, 1  ;;  %6263 = vrot.lane.b32.xlu0 %v8825_v9, %s8299_s30  ;;  %v8838_v45 = vpack.i.bf16 %v791_v12, %v789_v10  ;;  %v900_v54 = vrot.slane %v8618_v41, 2 }
  0x7c   : > { %v8814_v59 = vld [vmem:[#allocation2 + $0x168] sm:$0xff]  ;;  %v902_v35 = vrot.slane %v8620_v42, 2  ;;  %v907_v10 = vrot.slane %v8603_v31, 2 }
  0x7d   : > { %v8816_v8 = vld [vmem:[#allocation2 + $0x170] sm:$0xff]  ;;  %v8818_v57 = vld [vmem:[#allocation2 + $0x178] sm:$0x3]  ;;  %v792_v33 = vrot.slane %v8814_v59, 1  ;;  %v784_v24 = vsel %vm716_vm2, %v782_v40, %v783_v51  ;;  %v786_v26 = vsel %vm716_vm2, %v783_v51, %v785_v27  ;;  %v897_v40 = vrot.slane %v8463_v4, 2 }
  0x7e   : > { %v793_v34 = vrot.slane %v8816_v8, 1  ;;  %v795_v62 = vrot.slane %v8818_v57, 1  ;;  %v8845_v55 = vpack.i.bf16 %v786_v26, %v784_v24  ;;  %v894_v51 = vrot.slane %v8454_v1, 2 }
  0x7f   : > { %v895_v27 = vrot.slane %v8458_v2, 2  ;;  %6273 = vrot.lane.b32.xlu2 %v8838_v45, %s8299_s30  ;;  %v903_v42 = vsel %vm893_vm3, %v900_v54, %v902_v35  ;;  %v904_v26 = vrot.slane %v8597_v28, 2  ;;  %v905_v24 = vrot.slane %v8601_v30, 2 }
  0x80   : > { %v794_v36 = vsel %vm716_vm2, %v792_v33, %v793_v34  ;;  %v796_v50 = vsel %vm716_vm2, %v793_v34, %v795_v62  ;;  %v901_v62 = vsel %vm893_vm3, %v899_v0, %v900_v54  ;;  %v917_v4 = vrot.slane %v8590_v23, 2 }
  0x81   : > { %v8853_v12 = vpack.i.bf16 %v796_v50, %v794_v36  ;;  %6268 = vrot.lane.b32.xlu1 %v8845_v55, %s8299_s30  ;;  %v896_v1 = vsel %vm893_vm3, %v894_v51, %v895_v27  ;;  %v898_v2 = vsel %vm893_vm3, %v895_v27, %v897_v40  ;;  %v8866_v31 = vpack.i.bf16 %v903_v42, %v901_v62 }
  0x82   : > { %v906_v35 = vsel %vm893_vm3, %v904_v26, %v905_v24  ;;  %v908_v33 = vsel %vm893_vm3, %v905_v24, %v907_v10  ;;  %v914_v34 = vrot.slane %v8584_v20, 2  ;;  %v915_v0 = vrot.slane %v8588_v22, 2 }
  0x83   : > { %6278 = vrot.lane.b32.xlu0 %v8853_v12, %s8299_s30  ;;  %v6282_v36 = vpack.i.bf16 %v898_v2, %v896_v1  ;;  %v909_v50 = vrot.slane %v8648_v60, 2  ;;  %v910_v54 = vrot.slane %v8656_v63, 2  ;;  %v912_v23 = vrot.slane %v8658_v3, 2  ;;  %s8301_s30 = smov 12  }
  0x84   : > { %v8877_v40 = vpack.i.bf16 %v908_v33, %v906_v35  ;;  %v919_v51 = vrot.slane %v8629_v49, 2  ;;  %v920_v27 = vrot.slane %v8637_v52, 2  ;;  %v916_v10 = vsel %vm893_vm3, %v914_v34, %v915_v0 }
  0x85   : > { %v918_v62 = vsel %vm893_vm3, %v915_v0, %v917_v4  ;;  %v922_v42 = vrot.slane %v8639_v53, 2  ;;  %v911_v3 = vsel %vm893_vm3, %v909_v50, %v910_v54  ;;  %v913_v26 = vsel %vm893_vm3, %v910_v54, %v912_v23 }
  0x86   : > { %v8889_v24 = vpack.i.bf16 %v918_v62, %v916_v10  ;;  %v921_v1 = vsel %vm893_vm3, %v919_v51, %v920_v27  ;;  %v929_v35 = vrot.slane %v8703_v43, 2  ;;  %v930_v4 = vrot.slane %v8711_v46, 2 }
  0x87   : > { %6288 = vrot.lane.b32.xlu2 %v8866_v31, %s13314_s16  ;;  %v923_v2 = vsel %vm893_vm3, %v920_v27, %v922_v42  ;;  %v932_v53 = vrot.slane %v8713_v47, 2  ;;  %v8896_v33 = vpack.i.bf16 %v913_v26, %v911_v3  ;;  %v924_v34 = vrot.slane %v8667_v11, 2 }
  0x88   : > { %v925_v0 = vrot.slane %v8675_v14, 2  ;;  %v8903_v50 = vpack.i.bf16 %v923_v2, %v921_v1  ;;  %v934_v54 = vrot.slane %v8686_v25, 2  ;;  %v935_v23 = vrot.slane %v8692_v29, 2 }
  0x89   : > { %6283 = vrot.lane.b32.xlu1 %v6282_v36, %s13314_s16  ;;  %v927_v36 = vrot.slane %v8677_v15, 2  ;;  %v931_v51 = vsel %vm893_vm3, %v929_v35, %v930_v4  ;;  %v933_v47 = vsel %vm893_vm3, %v930_v4, %v932_v53  ;;  %v937_v27 = vrot.slane %v8694_v32, 2 }
  0x8a   : > { %v926_v15 = vsel %vm893_vm3, %v924_v34, %v925_v0  ;;  %v8916_v62 = vpack.i.bf16 %v933_v47, %v931_v51  ;;  %v936_v42 = vsel %vm893_vm3, %v934_v54, %v935_v23  ;;  %v944_v26 = vrot.slane %v8758_v37, 2 }
  0x8b   : > { %6293 = vrot.lane.b32.xlu0 %v8877_v40, %s13314_s16  ;;  %v928_v10 = vsel %vm893_vm3, %v925_v0, %v927_v36  ;;  %v938_v3 = vsel %vm893_vm3, %v935_v23, %v937_v27  ;;  %v945_v32 = vrot.slane %v8763_v44, 2  ;;  %v947_v1 = vrot.slane %v8765_v48, 2 }
  0x8c   : > { %v8923_v2 = vpack.i.bf16 %v928_v10, %v926_v15  ;;  %v939_v35 = vrot.slane %v8722_v58, 2  ;;  %v940_v4 = vrot.slane %v8728_v61, 2  ;;  %v942_v53 = vrot.slane %v8730_v5, 2 }
  0x8d   : > { %v8930_v34 = vpack.i.bf16 %v938_v3, %v936_v42  ;;  %v949_v0 = vrot.slane %v8739_v16, 2  ;;  %v950_v36 = vrot.slane %v8747_v19, 2  ;;  %v946_v54 = vsel %vm893_vm3, %v944_v26, %v945_v32 }
  0x8e   : > { %v948_v48 = vsel %vm893_vm3, %v945_v32, %v947_v1  ;;  %v952_v23 = vrot.slane %v8749_v21, 2  ;;  %v941_v5 = vsel %vm893_vm3, %v939_v35, %v940_v4  ;;  %v943_v51 = vsel %vm893_vm3, %v940_v4, %v942_v53 }
  0x8f   : > { %6303 = vrot.lane.b32.xlu2 %v8889_v24, %s13314_s16  ;;  %v8943_v47 = vpack.i.bf16 %v948_v48, %v946_v54  ;;  %v951_v27 = vsel %vm893_vm3, %v949_v0, %v950_v36  ;;  %v959_v10 = vrot.slane %v8803_v18, 2  ;;  %v960_v21 = vrot.slane %v8805_v39, 2  ;;  %v13458_v54 = vld [vmem:[#allocation18_spill] sm:$0xff] }
  0x90   : > { %v953_v15 = vsel %vm893_vm3, %v950_v36, %v952_v23  ;;  %v962_v42 = vrot.slane %v8807_v13, 2  ;;  %v8950_v3 = vpack.i.bf16 %v943_v51, %v941_v5  ;;  %v954_v26 = vrot.slane %v8771_v56, 2  ;;  %v13457_v13 = vld [vmem:[#allocation17_spill] sm:$0xff] }
  0x91   : > { %6298 = vrot.lane.b32.xlu1 %v8896_v33, %s13314_s16  ;;  %v955_v32 = vrot.slane %v8779_v6, 2  ;;  %v957_v1 = vrot.slane %v8781_v7, 2  ;;  %v8957_v35 = vpack.i.bf16 %v953_v15, %v951_v27  ;;  %v964_v4 = vrot.slane %v8787_v17, 2 }
  0x92   : > { %v961_v53 = vsel %vm893_vm3, %v959_v10, %v960_v21  ;;  %v963_v0 = vsel %vm893_vm3, %v960_v21, %v962_v42  ;;  %v965_v36 = vrot.slane %v13457_v13, 2  ;;  %v967_v48 = vrot.slane %v13458_v54, 2 }
  0x93   : > { %6308 = vrot.lane.b32.xlu0 %v8903_v50, %s13314_s16  ;;  %v956_v7 = vsel %vm893_vm3, %v954_v26, %v955_v32  ;;  %v958_v23 = vsel %vm893_vm3, %v955_v32, %v957_v1  ;;  %v8970_v5 = vpack.i.bf16 %v963_v0, %v961_v53  ;;  %v969_v10 = vrot.slane %v8814_v59, 2  ;;  %v580_v0 = vld [vmem:[%s8555_s26 + $0xf8] sm:$0xff] }
  0x94   : > { %v966_v51 = vsel %vm893_vm3, %v964_v4, %v965_v36  ;;  %v968_v27 = vsel %vm893_vm3, %v965_v36, %v967_v48  ;;  %v8974_v15 = vpack.i.bf16 %v958_v23, %v956_v7  ;;  %v970_v21 = vrot.slane %v8816_v8, 2  ;;  %613 = vst.msk [vmem:[#allocation2 + $0x189] sm:$0xff] %vm493_vm0, %v580_v0  ;;  %v13470_v7 = vld [vmem:[#allocation8_spill] sm:$0xff] }
  0x95   : > { %v972_v42 = vrot.slane %v8818_v57, 2  ;;  %v8981_v26 = vpack.i.bf16 %v968_v27, %v966_v51  ;;  %v6362_v4 = vpack.i.bf16 %v8618_v41, %v8612_v38  ;;  %v579_v57 = vld [vmem:[%s8555_s26 + $0xf0] sm:$0xff]  ;;  %v8998_v36 = vpack.i.bf16 %v8601_v30, %v8597_v28  ;;  %v13473_v27 = vld [vmem:[#allocation11_spill] sm:$0xff]  ;;  %s8305_s26 = smov 28  }
  0x96   : > { %v971_v32 = vsel %vm893_vm3, %v969_v10, %v970_v21  ;;  %612 = vst.msk [vmem:[#allocation2 + $0x181] sm:$0xff] %vm493_vm0, %v579_v57  ;;  %v9008_v38 = vpack.i.bf16 %v8588_v22, %v8584_v20  ;;  %v9012_v41 = vpack.i.bf16 %v8656_v63, %v8648_v60  ;;  %v9018_v28 = vpack.i.bf16 %v8637_v52, %v8629_v49  ;;  %v13472_v51 = vld [vmem:[#allocation13_spill] sm:$0xff] }
  0x97   : > { %6318 = vrot.lane.b32.xlu2 %v8916_v62, %s13314_s16  ;;  %v973_v1 = vsel %vm893_vm3, %v970_v21, %v972_v42  ;;  %v9028_v20 = vpack.i.bf16 %v8711_v46, %v8703_v43  ;;  %v9032_v22 = vpack.i.bf16 %v8675_v14, %v8667_v11  ;;  %v9038_v49 = vpack.i.bf16 %v8692_v29, %v8686_v25  ;;  %v13476_v42 = vld [vmem:[#allocation15_spill] sm:$0xff] }
  0x98   : > { %v8991_v53 = vpack.i.bf16 %v973_v1, %v971_v32  ;;  %v9048_v60 = vpack.i.bf16 %v8763_v44, %v8758_v37  ;;  %v9052_v63 = vpack.i.bf16 %v8728_v61, %v8722_v58  ;;  %v9058_v11 = vpack.i.bf16 %v8747_v19, %v8739_v16  ;;  %v13478_v1 = vld [vmem:[#allocation16_spill] sm:$0xff] }
  0x99   : > { %6313 = vrot.lane.b32.xlu1 %v8923_v2, %s13314_s16  ;;  %v13461_v14 = vmov 0.0   ;;  %v9078_v43 = vpack.i.bf16 %v8805_v39, %v8803_v18  ;;  %v9086_v46 = vpack.i.bf16 %v8779_v6, %v8771_v56  ;;  %v9096_v58 = vpack.i.bf16 %v13457_v13, %v8787_v17  ;;  %v13465_v17 = vld [vmem:[#allocation10_spill] sm:$0xff]  ;;  %v13468_v13 = vld [vmem:[#allocation9_spill] sm:$0xff] }
  0x9a   : > { %2217 = vst.msk [vmem:[#allocation3] sm:$0xff] %vm1704_vm4, %v13461_v14  ;;  %v9130_v44 = vpack.i.bf16 %v8816_v8, %v8814_v59  ;;  %v13467_v8 = vld [vmem:[#allocation12_spill] sm:$0xff] }
  0x9b   : > { %6323 = vrot.lane.b32.xlu0 %v8930_v34, %s13314_s16  ;;  %2218 = vst.msk [vmem:[#allocation3 + $0x8] sm:$0xff] %vm1704_vm4, %v13461_v14 }
  0x9c   : > { %2221 = vst.msk [vmem:[#allocation3 + $0x18] sm:$0xff] %vm1704_vm4, %v13461_v14  ;;  %v9074_v29 = vpop.permute.xlu0 %6203 }
  0x9d   : > { %2222 = vst.msk [vmem:[#allocation3 + $0x20] sm:$0xff] %vm1704_vm4, %v13461_v14  ;;  %v9100_v61 = vld [vmem:[#allocation2 + $0x180] sm:$0xff]  ;;  %v9102_v16 = vld [vmem:[#allocation2 + $0x188] sm:$0xff] }
  0x9e   : > { %2224 = vst.msk [vmem:[#allocation3 + $0x30] sm:$0xff] %vm1704_vm4, %v13461_v14  ;;  %v9120_v37 = vpack.i.bf16 %v9102_v16, %v9100_v61 }
  0x9f   : > { %6333 = vrot.lane.b32.xlu2 %v8943_v47, %s13314_s16  ;;  %2225 = vst.msk [vmem:[#allocation3 + $0x38] sm:$0xff] %vm1704_vm4, %v13461_v14 }
  0xa0   : > { %2227 = vst.msk [vmem:[#allocation3 + $0x48] sm:$0xff] %vm1704_vm4, %v13461_v14 }
  0xa1   : > { %6328 = vrot.lane.b32.xlu1 %v8950_v3, %s13314_s16  ;;  %2228 = vst.msk [vmem:[#allocation3 + $0x50] sm:$0xff] %vm1704_vm4, %v13461_v14 }
  0xa2   : > { %2230 = vst.msk [vmem:[#allocation3 + $0x60] sm:$0xff] %vm1704_vm4, %v13461_v14 }
  0xa3   : > { %6338 = vrot.lane.b32.xlu0 %v8957_v35, %s13314_s16  ;;  %2231 = vst.msk [vmem:[#allocation3 + $0x68] sm:$0xff] %vm1704_vm4, %v13461_v14 }
  0xa4   : > { %2233 = vst.msk [vmem:[#allocation3 + $0x78] sm:$0xff] %vm1704_vm4, %v13461_v14 }
  0xa5   : > { %2234 = vst.msk [vmem:[#allocation3 + $0x80] sm:$0xff] %vm1704_vm4, %v13461_v14 }
  0xa6   : > { %2236 = vst.msk [vmem:[#allocation3 + $0x90] sm:$0xff] %vm1704_vm4, %v13461_v14 }
  0xa7   : > { %6348 = vrot.lane.b32.xlu2 %v8970_v5, %s13314_s16  ;;  %2237 = vst.msk [vmem:[#allocation3 + $0x98] sm:$0xff] %vm1704_vm4, %v13461_v14 }
  0xa8   : > { %2239 = vst.msk [vmem:[#allocation3 + $0xa8] sm:$0xff] %vm1704_vm4, %v13461_v14 }
  0xa9   : > { %6343 = vrot.lane.b32.xlu1 %v8974_v15, %s13314_s16  ;;  %2240 = vst.msk [vmem:[#allocation3 + $0xb0] sm:$0xff] %vm1704_vm4, %v13461_v14 }
  0xaa   : > { %2242 = vst.msk [vmem:[#allocation3 + $0xc0] sm:$0xff] %vm1704_vm4, %v13461_v14 }
  0xab   : > { %6353 = vrot.lane.b32.xlu0 %v8981_v26, %s13314_s16  ;;  %2243 = vst.msk [vmem:[#allocation3 + $0xc8] sm:$0xff] %vm1704_vm4, %v13461_v14 }
  0xac   : > { %2245 = vst.msk [vmem:[#allocation3 + $0xd8] sm:$0xff] %vm1704_vm4, %v13461_v14 }
  0xad   : > { %2246 = vst.msk [vmem:[#allocation3 + $0xe0] sm:$0xff] %vm1704_vm4, %v13461_v14 }
  0xae   : > { %2248 = vst.msk [vmem:[#allocation3 + $0xf0] sm:$0xff] %vm1704_vm4, %v13461_v14 }
  0xaf   : > { %6363 = vrot.lane.b32.xlu2 %v6362_v4, %s8301_s30  ;;  %2249 = vst.msk [vmem:[#allocation3 + $0xf8] sm:$0xff] %vm1704_vm4, %v13461_v14  ;;  %v13479_v4 = vld [vmem:[#allocation14_spill] sm:$0xff] }
  0xb0   : > { %2251 = vst.msk [vmem:[#allocation3 + $0x108] sm:$0xff] %vm1704_vm4, %v13461_v14 }
  0xb1   : > { %6358 = vrot.lane.b32.xlu1 %v8991_v53, %s13314_s16  ;;  %2252 = vst.msk [vmem:[#allocation3 + $0x110] sm:$0xff] %vm1704_vm4, %v13461_v14 }
  0xb2   : > { %2254 = vst.msk [vmem:[#allocation3 + $0x120] sm:$0xff] %vm1704_vm4, %v13461_v14 }
  0xb3   : > { %6368 = vrot.lane.b32.xlu0 %v8998_v36, %s8301_s30  ;;  %2255 = vst.msk [vmem:[#allocation3 + $0x128] sm:$0xff] %vm1704_vm4, %v13461_v14 }
  0xb4   : > { %2257 = vst.msk [vmem:[#allocation3 + $0x138] sm:$0xff] %vm1704_vm4, %v13461_v14 }
  0xb5   : > { %2258 = vst.msk [vmem:[#allocation3 + $0x140] sm:$0xff] %vm1704_vm4, %v13461_v14 }
  0xb6   : > { %2260 = vst.msk [vmem:[#allocation3 + $0x150] sm:$0xff] %vm1704_vm4, %v13461_v14 }
  0xb7   : > { %6378 = vrot.lane.b32.xlu2 %v9008_v38, %s8301_s30  ;;  %2261 = vst.msk [vmem:[#allocation3 + $0x158] sm:$0xff] %vm1704_vm4, %v13461_v14 }
  0xb8   : > { %2263 = vst.msk [vmem:[#allocation3 + $0x168] sm:$0xff] %vm1704_vm4, %v13461_v14 }
  0xb9   : > { %6373 = vrot.lane.b32.xlu1 %v9012_v41, %s8301_s30  ;;  %v9022_v30 = vpop.permute.xlu2 %6223  ;;  %2264 = vst.msk [vmem:[#allocation3 + $0x170] sm:$0xff] %vm1704_vm4, %v13461_v14 }
  0xba   : > { %13459 = vst [vmem:[#allocation17_spill] sm:$0xff] %v9022_v30 }
  0xbb   : > { %6383 = vrot.lane.b32.xlu0 %v9018_v28, %s8301_s30  ;;  %2266 = vst.msk [vmem:[#allocation3 + $0x180] sm:$0xff] %vm1704_vm4, %v13461_v14 }
  0xbc   : > { %2267 = vst.msk [vmem:[#allocation3 + $0x188] sm:$0xff] %vm1704_vm4, %v13461_v14 }
  0xbd   : > { %2269 = vst.msk [vmem:[#allocation3 + $0x198] sm:$0xff] %vm1704_vm4, %v13461_v14 }
  0xbe   : > { %2270 = vst.msk [vmem:[#allocation3 + $0x1a0] sm:$0xff] %vm1704_vm4, %v13461_v14 }
  0xbf   : > { %6393 = vrot.lane.b32.xlu2 %v9028_v20, %s8301_s30 }
  0xc1   : > { %6388 = vrot.lane.b32.xlu1 %v9032_v22, %s8301_s30  ;;  %v9042_v52 = vpop.permute.xlu2 %6228 }
  0xc2   : > { %13460 = vst [vmem:[#allocation18_spill] sm:$0xff] %v9042_v52 }
  0xc3   : > { %6398 = vrot.lane.b32.xlu0 %v9038_v49, %s8301_s30 }
  0xc7   : > { %6408 = vrot.lane.b32.xlu2 %v9048_v60, %s8301_s30 }
  0xc9   : > { %6403 = vrot.lane.b32.xlu1 %v9052_v63, %s8301_s30  ;;  %v9066_v25 = vpop.permute.xlu2 %6243 }
  0xca   : > { %13462 = vst [vmem:[#allocation21_spill] sm:$0xff] %v9066_v25  ;;  %v13484_v25 = vld [vmem:[#allocation19_spill] sm:$0xff] }
  0xcb   : > { %6413 = vrot.lane.b32.xlu0 %v9058_v11, %s8301_s30 }
  0xcf   : > { %6423 = vrot.lane.b32.xlu2 %v9078_v43, %s8301_s30 }
  0xd1   : > { %6418 = vrot.lane.b32.xlu1 %v9086_v46, %s8301_s30  ;;  %v9108_v18 = vpop.permute.xlu2 %6258 }
  0xd2   : > { %13463 = vst [vmem:[#allocation22_spill] sm:$0xff] %v9108_v18  ;;  %v664_v18 = vld [vmem:[#allocation2 + $0x190] sm:$0x3] }
  0xd3   : > { %v9114_v19 = vpop.permute.xlu1 %6213  ;;  %6428 = vrot.lane.b32.xlu0 %v9096_v58, %s8301_s30 }
  0xd5   : > { %v9126_v39 = vpop.permute.xlu0 %6208 }
  0xd7   : > { %6438 = vrot.lane.b32.xlu2 %v9120_v37, %s8301_s30 }
  0xd9   : > { %6433 = vrot.lane.b32.xlu1 %v9130_v44, %s8301_s30  ;;  %v9144_v56 = vpop.permute.xlu2 %6273  ;;  %s13276_s30 = smov 32  }
  0xda   : > { %13464 = vst [vmem:[#allocation23_spill] sm:$0xff] %v9144_v56 }
  0xdb   : > { %v9150_v6 = vpop.permute.xlu1 %6218  ;;  %6443 = vrot.lane.b32.xlu0 %v13465_v17, %s13283_s17  ;;  %v13482_v17 = vld [vmem:[#allocation20_spill] sm:$0xff] }
  0xdd   : > { %v9158_v59 = vpop.permute.xlu0 %6233 }
  0xde   : > { %13466 = vst [vmem:[#allocation10_spill] sm:$0xff] %v9158_v59 }
  0xdf   : > { %6453 = vrot.lane.b32.xlu2 %v13467_v8, %s13283_s17 }
  0xe1   : > { %6448 = vrot.lane.b32.xlu1 %v13468_v13, %s13283_s17  ;;  %v9172_v54 = vpop.permute.xlu2 %6288 }
  0xe3   : > { %v9178_v48 = vpop.permute.xlu1 %6238  ;;  %6458 = vrot.lane.b32.xlu0 %v13470_v7, %s13283_s17 }
  0xe4   : > { %13469 = vst [vmem:[#allocation12_spill] sm:$0xff] %v9178_v48 }
  0xe5   : > { %v9188_v23 = vpop.permute.xlu0 %6248 }
  0xe6   : > { %13471 = vst [vmem:[#allocation9_spill] sm:$0xff] %v9188_v23  ;;  %v1172_v23 = vrot.slane %v664_v18, 1 }
  0xe7   : > { %6468 = vrot.lane.b32.xlu2 %v13472_v51, %s13283_s17 }
  0xe9   : > { %6463 = vrot.lane.b32.xlu1 %v13473_v27, %s13283_s17  ;;  %v9202_v10 = vpop.permute.xlu2 %6303 }
  0xea   : > { %13474 = vst [vmem:[#allocation8_spill] sm:$0xff] %v9202_v10  ;;  %v1271_v10 = vrot.slane %v9102_v16, 2 }
  0xeb   : > { %v9206_v21 = vpop.permute.xlu1 %6253  ;;  %6473 = vrot.lane.b32.xlu0 %v13476_v42, %s13283_s17 }
  0xec   : > { %13475 = vst [vmem:[#allocation13_spill] sm:$0xff] %v9206_v21  ;;  %v1170_v21 = vrot.slane %v9102_v16, 1 }
  0xed   : > { %v9210_v32 = vpop.permute.xlu0 %6263 }
  0xee   : > { %13477 = vst [vmem:[#allocation11_spill] sm:$0xff] %v9210_v32  ;;  %v1169_v32 = vrot.slane %v9100_v61, 1 }
  0xef   : > { %6483 = vrot.lane.b32.xlu2 %v13478_v1, %s13283_s17 }
  0xf1   : > { %6478 = vrot.lane.b32.xlu1 %v13479_v4, %s13283_s17  ;;  %v9216_v57 = vpop.permute.xlu2 %6318 }
  0xf2   : > { %13480 = vst [vmem:[#allocation15_spill] sm:$0xff] %v9216_v57  ;;  %v1173_v57 = vsel %vm716_vm2, %v1170_v21, %v1172_v23 }
  0xf3   : > { %v9218_v0 = vpop.permute.xlu1 %6268  ;;  %6488 = vrot.lane.b32.xlu0 %v13482_v17, %s13283_s17 }
  0xf4   : > { %13481 = vst [vmem:[#allocation16_spill] sm:$0xff] %v9218_v0 }
  0xf5   : > { %v9222_v56 = vpop.permute.xlu0 %6278 }
  0xf6   : > { %13483 = vst [vmem:[#allocation14_spill] sm:$0xff] %v9222_v56  ;;  %v1171_v56 = vsel %vm716_vm2, %v1169_v32, %v1170_v21 }
  0xf7   : > { %6498 = vrot.lane.b32.xlu2 %v8825_v9, %s13283_s17  ;;  %v9242_v59 = vpack.i.bf16 %v1173_v57, %v1171_v56 }
  0xf9   : > { %6493 = vrot.lane.b32.xlu1 %v13484_v25, %s13283_s17  ;;  %v9230_v14 = vpop.permute.xlu2 %6333 }
  0xfa   : > { %13485 = vst [vmem:[#allocation20_spill] sm:$0xff] %v9230_v14 }
  0xfb   : > { %v9232_v0 = vpop.permute.xlu1 %6283  ;;  %6503 = vrot.lane.b32.xlu0 %v8845_v55, %s13283_s17 }
  0xfd   : > { %v9238_v48 = vpop.permute.xlu0 %6293 }
  0xff   : > { %6513 = vrot.lane.b32.xlu2 %v8853_v12, %s13283_s17 }
 0x101   : > { %6508 = vrot.lane.b32.xlu1 %v8838_v45, %s13283_s17  ;;  %v9246_v14 = vpop.permute.xlu2 %6348 }
 0x102   : > { %13486 = vst [vmem:[#allocation19_spill] sm:$0xff] %v9246_v14 }
 0x103   : > { %v9248_v52 = vpop.permute.xlu1 %6298  ;;  %6518 = vrot.lane.b32.xlu0 %v9242_v59, %s13283_s17  ;;  %s13609_s17 = smov 24  }
 0x105   : > { %v9252_v32 = vpop.permute.xlu0 %6308 }
 0x106   : > { %13487 = vst [vmem:[#allocation24_spill] sm:$0xff] %v9252_v32 }
 0x107   : > { %6528 = vrot.lane.b32.xlu2 %v8877_v40, %s8303_s23 }
 0x109   : > { %6523 = vrot.lane.b32.xlu1 %v8866_v31, %s8303_s23  ;;  %v9258_v56 = vpop.permute.xlu2 %6363 }
 0x10b   : > { %v9260_v23 = vpop.permute.xlu1 %6313  ;;  %6533 = vrot.lane.b32.xlu0 %v8896_v33, %s8303_s23 }
 0x10c   : > { %13488 = vst [vmem:[#allocation25_spill] sm:$0xff] %v9260_v23 }
 0x10d   : > { %v9264_v21 = vpop.permute.xlu0 %6323 }
 0x10e   : > { %13489 = vst [vmem:[#allocation26_spill] sm:$0xff] %v9264_v21 }
 0x10f   : > { %6543 = vrot.lane.b32.xlu2 %v8903_v50, %s8303_s23 }
 0x111   : > { %6538 = vrot.lane.b32.xlu1 %v8889_v24, %s8303_s23  ;;  %v9270_v57 = vpop.permute.xlu2 %6378 }
 0x112   : > { %13490 = vst [vmem:[#allocation27_spill] sm:$0xff] %v9270_v57 }
 0x113   : > { %v9272_v14 = vpop.permute.xlu1 %6328  ;;  %6548 = vrot.lane.b32.xlu0 %v8923_v2, %s8303_s23 }
 0x114   : > { %13491 = vst [vmem:[#allocation28_spill] sm:$0xff] %v9272_v14 }
 0x115   : > { %v9276_v31 = vpop.permute.xlu0 %6338 }
 0x116   : > { %13492 = vst [vmem:[#allocation29_spill] sm:$0xff] %v9276_v31 }
 0x117   : > { %6558 = vrot.lane.b32.xlu2 %v8930_v34, %s8303_s23 }
 0x119   : > { %6553 = vrot.lane.b32.xlu1 %v8916_v62, %s8303_s23  ;;  %v9282_v21 = vpop.permute.xlu2 %6393 }
 0x11a   : > { %13493 = vst [vmem:[#allocation30_spill] sm:$0xff] %v9282_v21 }
 0x11b   : > { %v9284_v23 = vpop.permute.xlu1 %6343  ;;  %6563 = vrot.lane.b32.xlu0 %v8950_v3, %s8303_s23 }
 0x11c   : > { %13494 = vst [vmem:[#allocation31_spill] sm:$0xff] %v9284_v23  ;;  %v1270_v23 = vrot.slane %v9100_v61, 2 }
 0x11d   : > { %v9288_v32 = vpop.permute.xlu0 %6353 }
 0x11e   : > { %13495 = vst [vmem:[#allocation32_spill] sm:$0xff] %v9288_v32  ;;  %v1273_v32 = vrot.slane %v664_v18, 2 }
 0x11f   : > { %6573 = vrot.lane.b32.xlu2 %v8957_v35, %s8303_s23 }
 0x121   : > { %6568 = vrot.lane.b32.xlu1 %v8943_v47, %s8303_s23  ;;  %v9294_v31 = vpop.permute.xlu2 %6408 }
 0x122   : > { %13496 = vst [vmem:[#allocation33_spill] sm:$0xff] %v9294_v31  ;;  %v1274_v31 = vsel %vm893_vm3, %v1271_v10, %v1273_v32 }
 0x123   : > { %v9296_v14 = vpop.permute.xlu1 %6358  ;;  %6578 = vrot.lane.b32.xlu0 %v8974_v15, %s8303_s23 }
 0x124   : > { %13497 = vst [vmem:[#allocation34_spill] sm:$0xff] %v9296_v14  ;;  %v1272_v14 = vsel %vm893_vm3, %v1270_v23, %v1271_v10 }
 0x125   : > { %v9300_v21 = vpop.permute.xlu0 %6368  ;;  %v9318_v16 = vpack.i.bf16 %v1274_v31, %v1272_v14  ;;  %v9372_v31 = vld [vmem:[#allocation2 + $0x1a0] sm:$0xff] }
 0x127   : > { %6588 = vrot.lane.b32.xlu2 %v8981_v26, %s8303_s23 }
 0x129   : > { %6583 = vrot.lane.b32.xlu1 %v8970_v5, %s8303_s23  ;;  %v9308_v30 = vpop.permute.xlu2 %6423 }
 0x12a   : > { %13498 = vst [vmem:[#allocation35_spill] sm:$0xff] %v9308_v30 }
 0x12b   : > { %v9312_v57 = vpop.permute.xlu1 %6373  ;;  %6593 = vrot.lane.b32.xlu0 %v8991_v53, %s8303_s23 }
 0x12d   : > { %v9316_v61 = vpop.permute.xlu0 %6383 }
 0x12f   : > { %6603 = vrot.lane.b32.xlu2 %v8998_v36, %s13278_s25 }
 0x131   : > { %6598 = vrot.lane.b32.xlu1 %v9318_v16, %s8303_s23  ;;  %v9324_v18 = vpop.permute.xlu2 %6438  ;;  %s13589_s23 = smov 16  }
 0x132   : > { %13499 = vst [vmem:[#allocation36_spill] sm:$0xff] %v9324_v18 }
 0x133   : > { %v9326_v23 = vpop.permute.xlu1 %6388  ;;  %6608 = vrot.lane.b32.xlu0 %v9012_v41, %s13278_s25 }
 0x135   : > { %v9330_v10 = vpop.permute.xlu0 %6398 }
 0x137   : > { %6618 = vrot.lane.b32.xlu2 %v9018_v28, %s13278_s25 }
 0x139   : > { %6613 = vrot.lane.b32.xlu1 %v9008_v38, %s13278_s25  ;;  %v9336_v14 = vpop.permute.xlu2 %6453 }
 0x13b   : > { %v9338_v36 = vpop.permute.xlu1 %6403  ;;  %6623 = vrot.lane.b32.xlu0 %v9032_v22, %s13278_s25 }
 0x13d   : > { %v9342_v32 = vpop.permute.xlu0 %6413 }
 0x13e   : > { %13500 = vst [vmem:[#allocation37_spill] sm:$0xff] %v9342_v32 }
 0x13f   : > { %6633 = vrot.lane.b32.xlu2 %v9038_v49, %s13278_s25 }
 0x141   : > { %6628 = vrot.lane.b32.xlu1 %v9028_v20, %s13278_s25  ;;  %v9348_v41 = vpop.permute.xlu2 %6468 }
 0x143   : > { %v9350_v28 = vpop.permute.xlu1 %6418  ;;  %6638 = vrot.lane.b32.xlu0 %v9052_v63, %s13278_s25  ;;  %v9370_v63 = vld [vmem:[#allocation2 + $0x198] sm:$0xff] }
 0x144   : > { %13501 = vst [vmem:[#allocation38_spill] sm:$0xff] %v9350_v28  ;;  %v6286_v28 = vunpack.i.h.bf16 %v9232_v0 }
 0x145   : > { %v9354_v38 = vpop.permute.xlu0 %6428 }
 0x146   : > { %13502 = vst [vmem:[#allocation39_spill] sm:$0xff] %v9354_v38 }
 0x147   : > { %6648 = vrot.lane.b32.xlu2 %v9058_v11, %s13278_s25 }
 0x149   : > { %6643 = vrot.lane.b32.xlu1 %v9048_v60, %s13278_s25  ;;  %v9360_v22 = vpop.permute.xlu2 %6483 }
 0x14b   : > { %v9362_v49 = vpop.permute.xlu1 %6433  ;;  %6653 = vrot.lane.b32.xlu0 %v9086_v46, %s13278_s25  ;;  %v6677_v46 = vpack.i.bf16 %v9372_v31, %v9370_v63 }
 0x14c   : > { %13503 = vst [vmem:[#allocation40_spill] sm:$0xff] %v9362_v49 }
 0x14d   : > { %v9366_v20 = vpop.permute.xlu0 %6443 }
 0x14f   : > { %6663 = vrot.lane.b32.xlu2 %v9096_v58, %s13278_s25 }
 0x151   : > { %6658 = vrot.lane.b32.xlu1 %v9078_v43, %s13278_s25  ;;  %v9376_v60 = vpop.permute.xlu2 %6498 }
 0x152   : > { %13504 = vst [vmem:[#allocation41_spill] sm:$0xff] %v9376_v60  ;;  %v6205_v60 = vunpack.i.l.bf16 %v9074_v29 }
 0x153   : > { %v9378_v11 = vpop.permute.xlu1 %6448  ;;  %6668 = vrot.lane.b32.xlu0 %v9130_v44, %s13278_s25 }
 0x155   : > { %v9384_v18 = vpop.permute.xlu0 %6458 }
 0x157   : > { %6678 = vrot.lane.b32.xlu2 %v6677_v46, %s13278_s25 }
 0x159   : > { %6673 = vrot.lane.b32.xlu1 %v9120_v37, %s13278_s25  ;;  %v9391_v43 = vpop.permute.xlu2 %6513  ;;  %s13613_s25 = smov 8  }
 0x15a   : > { %13505 = vst [vmem:[#allocation42_spill] sm:$0xff] %v9391_v43  ;;  %v1470_v43 = vrot.slane %v9370_v63, 1 }
 0x15b   : > { %v9389_v58 = vpop.permute.xlu1 %6463  ;;  %6683 = vrot.lane.b32.xlu0 %v13468_v13, %s8305_s26 }
 0x15d   : > { %v9395_v49 = vpop.permute.xlu0 %6473 }
 0x15f   : > { %6693 = vrot.lane.b32.xlu2 %v13470_v7, %s8305_s26 }
 0x161   : > { %6688 = vrot.lane.b32.xlu1 %v13467_v8, %s8305_s26  ;;  %v9405_v37 = vpop.permute.xlu2 %6528 }
 0x163   : > { %v9401_v44 = vpop.permute.xlu1 %6478  ;;  %6698 = vrot.lane.b32.xlu0 %v13473_v27, %s8305_s26 }
 0x165   : > { %v9407_v46 = vpop.permute.xlu0 %6488 }
 0x166   : > { %13506 = vst [vmem:[#allocation43_spill] sm:$0xff] %v9407_v46  ;;  %v6446_v46 = vunpack.i.h.bf16 %v9366_v20 }
 0x167   : > { %6708 = vrot.lane.b32.xlu2 %v13476_v42, %s8305_s26  ;;  %v667_v42 = vld [vmem:[#allocation2 + $0x1a8] sm:$0x3] }
 0x168   : > { %v1473_v38 = vrot.slane %v667_v42, 1 }
 0x169   : > { %6703 = vrot.lane.b32.xlu1 %v13472_v51, %s8305_s26  ;;  %v9419_v7 = vpop.permute.xlu2 %6543 }
 0x16b   : > { %v9413_v13 = vpop.permute.xlu1 %6493  ;;  %6713 = vrot.lane.b32.xlu0 %v13479_v4, %s8305_s26  ;;  %v1471_v4 = vrot.slane %v9372_v31, 1 }
 0x16c   : > { %13507 = vst [vmem:[#allocation44_spill] sm:$0xff] %v9413_v13  ;;  %v6365_v13 = vunpack.i.l.bf16 %v9258_v56 }
 0x16d   : > { %v9417_v8 = vpop.permute.xlu0 %6503 }
 0x16e   : > { %13508 = vst [vmem:[#allocation45_spill] sm:$0xff] %v9417_v8 }
 0x16f   : > { %6723 = vrot.lane.b32.xlu2 %v13482_v17, %s8305_s26 }
 0x171   : > { %6718 = vrot.lane.b32.xlu1 %v13478_v1, %s8305_s26  ;;  %v9435_v17 = vpop.permute.xlu2 %6558 }
 0x173   : > { %v9425_v27 = vpop.permute.xlu1 %6508  ;;  %6728 = vrot.lane.b32.xlu0 %v13484_v25, %s8305_s26  ;;  %v1472_v25 = vsel %vm716_vm2, %v1470_v43, %v1471_v4 }
 0x174   : > { %13509 = vst [vmem:[#allocation46_spill] sm:$0xff] %v9425_v27 }
 0x175   : > { %v9429_v51 = vpop.permute.xlu0 %6518 }
 0x176   : > { %13510 = vst [vmem:[#allocation47_spill] sm:$0xff] %v9429_v51  ;;  %v1474_v51 = vsel %vm716_vm2, %v1471_v4, %v1473_v38  ;;  %v1571_v38 = vrot.slane %v9370_v63, 2 }
 0x177   : > { %6738 = vrot.lane.b32.xlu2 %v8845_v55, %s8305_s26  ;;  %v6757_v27 = vpack.i.bf16 %v1474_v51, %v1472_v25  ;;  %v1574_v51 = vrot.slane %v667_v42, 2 }
 0x179   : > { %6733 = vrot.lane.b32.xlu1 %v8825_v9, %s8305_s26  ;;  %v9451_v8 = vpop.permute.xlu2 %6573 }
 0x17a   : > { %13511 = vst [vmem:[#allocation48_spill] sm:$0xff] %v9451_v8 }
 0x17b   : > { %v9439_v1 = vpop.permute.xlu1 %6523  ;;  %6743 = vrot.lane.b32.xlu0 %v8838_v45, %s8305_s26 }
 0x17d   : > { %v9445_v55 = vpop.permute.xlu0 %6533 }
 0x17f   : > { %6753 = vrot.lane.b32.xlu2 %v9242_v59, %s8305_s26  ;;  %v1572_v59 = vrot.slane %v9372_v31, 2 }
 0x181   : > { %6748 = vrot.lane.b32.xlu1 %v8853_v12, %s8305_s26  ;;  %v9468_v43 = vpop.permute.xlu2 %6588 }
 0x182   : > { %13512 = vst [vmem:[#allocation49_spill] sm:$0xff] %v9468_v43 }
 0x183   : > { %v9453_v9 = vpop.permute.xlu1 %6538  ;;  %6758 = vrot.lane.b32.xlu0 %v6757_v27, %s8305_s26  ;;  %s13407_s26 = smov 48  }
 0x185   : > { %v9456_v45 = vpop.permute.xlu0 %6548 }
 0x187   : > { %6768 = vrot.lane.b32.xlu2 %v8896_v33, %s13276_s30  ;;  %v1573_v33 = vsel %vm893_vm3, %v1571_v38, %v1572_v59 }
 0x189   : > { %6763 = vrot.lane.b32.xlu1 %v8877_v40, %s13276_s30  ;;  %v1575_v40 = vsel %vm893_vm3, %v1572_v59, %v1574_v51  ;;  %v9484_v4 = vpop.permute.xlu2 %6603 }
 0x18a   : > { %v6837_v31 = vpack.i.bf16 %v1575_v40, %v1573_v33  ;;  %v1955_v40 = vld [vmem:[%s13526_s1 + $0x10] sm:$0x3] }
 0x18b   : > { %v9464_v12 = vpop.permute.xlu1 %6553  ;;  %6773 = vrot.lane.b32.xlu0 %v8889_v24, %s13276_s30 }
 0x18d   : > { %v9470_v27 = vpop.permute.xlu0 %6563 }
 0x18f   : > { %6783 = vrot.lane.b32.xlu2 %v8923_v2, %s13276_s30 }
 0x191   : > { %6778 = vrot.lane.b32.xlu1 %v8903_v50, %s13276_s30 }
 0x193   : > { %v9478_v63 = vpop.permute.xlu1 %6568  ;;  %6788 = vrot.lane.b32.xlu0 %v8916_v62, %s13276_s30  ;;  %v9498_v62 = vpop.permute.xlu2 %6618 }
 0x194   : > { %13513 = vst [vmem:[#allocation50_spill] sm:$0xff] %v9478_v63  ;;  %v8133_v63 = vld [vmem:[#allocation2] sm:$0xff] }
 0x195   : > { %v9482_v24 = vpop.permute.xlu0 %6578 }
 0x196   : > { %13514 = vst [vmem:[#allocation51_spill] sm:$0xff] %v9482_v24 }
 0x197   : > { %6798 = vrot.lane.b32.xlu2 %v8950_v3, %s13276_s30 }
 0x199   : > { %6793 = vrot.lane.b32.xlu1 %v8930_v34, %s13276_s30 }
 0x19b   : > { %v9490_v2 = vpop.permute.xlu1 %6583  ;;  %6803 = vrot.lane.b32.xlu0 %v8943_v47, %s13276_s30  ;;  %v9512_v47 = vpop.permute.xlu2 %6633 }
 0x19c   : > { %13515 = vst [vmem:[#allocation52_spill] sm:$0xff] %v9490_v2 }
 0x19d   : > { %v9494_v50 = vpop.permute.xlu0 %6593 }
 0x19e   : > { %13516 = vst [vmem:[#allocation53_spill] sm:$0xff] %v9494_v50 }
 0x19f   : > { %6813 = vrot.lane.b32.xlu2 %v8974_v15, %s13276_s30 }
 0x1a1   : > { %6808 = vrot.lane.b32.xlu1 %v8957_v35, %s13276_s30 }
 0x1a3   : > { %v9502_v42 = vpop.permute.xlu1 %6598  ;;  %6818 = vrot.lane.b32.xlu0 %v8970_v5, %s13276_s30  ;;  %v9523_v15 = vpop.permute.xlu2 %6648 }
 0x1a4   : > { %13517 = vst [vmem:[#allocation54_spill] sm:$0xff] %v9502_v42 }
 0x1a5   : > { %v9506_v34 = vpop.permute.xlu0 %6608  ;;  %13518 = vst [vmem:[#allocation55_spill] sm:$0xff] %v9523_v15  ;;  %v6445_v15 = vunpack.i.l.bf16 %v9366_v20 }
 0x1a7   : > { %6828 = vrot.lane.b32.xlu2 %v8991_v53, %s13276_s30 }
 0x1a9   : > { %6823 = vrot.lane.b32.xlu1 %v8981_v26, %s13276_s30 }
 0x1ab   : > { %v9514_v3 = vpop.permute.xlu1 %6613  ;;  %6833 = vrot.lane.b32.xlu0 %v9318_v16, %s13276_s30  ;;  %v9529_v26 = vpop.permute.xlu2 %6663 }
 0x1ac   : > { %13520 = vst [vmem:[#allocation57_spill] sm:$0xff] %v9529_v26 }
 0x1ad   : > { %v9518_v35 = vpop.permute.xlu0 %6623 }
 0x1b1   : > { %6838 = vrot.lane.b32.xlu1 %v6837_v31, %s13276_s30  ;;  %v1965_v31 = vunpack.c.l.b16 %v1955_v40  ;;  %v6139_v40 = vld [vmem:[%s13526_s1] sm:$0xff]  ;;  %s13405_s30 = smov 40  }
 0x1b3   : > { %v9521_v5 = vpop.permute.xlu1 %6628  ;;  %v9535_v51 = vpop.permute.xlu2 %6678  ;;  %v1968_v43 = vpack.c.b16 %v1965_v31, %v1965_v31 }
 0x1b4   : > { %13523 = vst [vmem:[#allocation60_spill] sm:$0xff] %v9535_v51  ;;  %v6140_v51 = vld [vmem:[%s13526_s1 + $0x8] sm:$0xff]  ;;  %s13736_s1 = smov 40  }
 0x1b5   : > { %v9525_v25 = vpop.permute.xlu0 %6638  ;;  %v2022_v26 = vsel %vm2020_vm5, %v1968_v43, 0  ;;  %vm3588_vm5 = vcmask 523264  }
 0x1b6   : > { %2029 = vmatpush.bf16.msra.mxu0 %v2022_v26 }
 0x1ba   : > { %2030 = vmatpush.bf16.msra.mxu0 %v6140_v51  ;;  %v6206_v51 = vunpack.i.h.bf16 %v9074_v29 }
 0x1bb   : > { %v9527_v53 = vpop.permute.xlu1 %6643  ;;  %v9544_v42 = vpop.permute.xlu2 %6693 }
 0x1bc   : > { %13519 = vst [vmem:[#allocation56_spill] sm:$0xff] %v9527_v53  ;;  %v6605_v53 = vunpack.i.l.bf16 %v9484_v4 }
 0x1bd   : > { %v9533_v38 = vpop.permute.xlu0 %6653 }
 0x1be   : > { %13522 = vst [vmem:[#allocation59_spill] sm:$0xff] %v9533_v38  ;;  %2031 = vmatpush.bf16.msra.mxu0 %v6139_v40  ;;  %v6285_v40 = vunpack.i.l.bf16 %v9232_v0  ;;  %v6366_v38 = vunpack.i.h.bf16 %v9258_v56  ;;  %v6525_v0 = vunpack.i.l.bf16 %v9439_v1  ;;  %v6526_v56 = vunpack.i.h.bf16 %v9439_v1 }
 0x1c3   : > { %v9531_v59 = vpop.permute.xlu1 %6658  ;;  %v9556_v2 = vpop.permute.xlu2 %6708 }
 0x1c4   : > { %13521 = vst [vmem:[#allocation58_spill] sm:$0xff] %v9531_v59 }
 0x1c5   : > { %v9539_v33 = vpop.permute.xlu0 %6668 }
 0x1c6   : > { %13525 = vst [vmem:[#allocation62_spill] sm:$0xff] %v9539_v33 }
 0x1cb   : > { %v9537_v16 = vpop.permute.xlu1 %6673  ;;  %v9562_v43 = vpop.permute.xlu2 %6723 }
 0x1cc   : > { %13524 = vst [vmem:[#allocation61_spill] sm:$0xff] %v9537_v16 }
 0x1cd   : > { %v6684_v16 = vpop.permute.xlu0 %6683  ;;  %13527 = vst [vmem:[#allocation63_spill] sm:$0xff] %v9562_v43 }
 0x1ce   : > { %v6686_v20 = vunpack.i.h.bf16 %v6684_v16 }
 0x1d3   : > { %v9546_v50 = vpop.permute.xlu1 %6688  ;;  %v9569_v24 = vpop.permute.xlu2 %6738 }
 0x1d4   : > { %13529 = vst [vmem:[#allocation65_spill] sm:$0xff] %v9569_v24  ;;  %v1672_v24 = vsel %vm493_vm0, %v8133_v63, %v6205_v60  ;;  %v6685_v60 = vunpack.i.l.bf16 %v6684_v16 }
 0x1d5   : > { %v9558_v30 = vpop.permute.xlu0 %6698  ;;  %v1705_v43 = vsel %vm1704_vm4, %v1672_v24, %v6285_v40 }
 0x1db   : > { %v9551_v33 = vpop.permute.xlu1 %6703  ;;  %v9597_v40 = vpop.permute.xlu2 %6753 }
 0x1dd   : > { %v9566_v59 = vpop.permute.xlu0 %6713 }
 0x1e3   : > { %v9560_v31 = vpop.permute.xlu1 %6718 }
 0x1eb   : > { %v9564_v26 = vpop.permute.xlu1 %6733 }
 0x1ec   : > { %13528 = vst [vmem:[#allocation64_spill] sm:$0xff] %v9564_v26  ;;  %v8132_v26 = vld [vmem:[#allocation2 + $0x8] sm:$0xff] }
 0x1ed   : > { %v1673_v32 = vsel %vm493_vm0, %v8132_v26, %v6206_v51  ;;  %v9588_v26 = vpop.permute.xlu0 %6728  ;;  %v1738_v51 = vsel %vm1737_vm6, %v1705_v43, %v6365_v13 }
 0x1ee   : > { %v1706_v29 = vsel %vm1704_vm4, %v1673_v32, %v6286_v28  ;;  %v6606_v32 = vunpack.i.h.bf16 %v9484_v4  ;;  %v1771_v28 = vsel %vm1770_vm7, %v1738_v51, %v6445_v15 }
 0x1ef   : > { %v1804_v24 = vsel %vm1803_vm9, %v1771_v28, %v6525_v0  ;;  %v6210_v0 = vunpack.i.l.bf16 %v9126_v39  ;;  %v6290_v28 = vunpack.i.l.bf16 %v9172_v54 }
 0x1f3   : > { %v9575_v8 = vpop.permute.xlu1 %6748 }
 0x1f4   : > { %13530 = vst [vmem:[#allocation66_spill] sm:$0xff] %v9575_v8  ;;  %v1739_v8 = vsel %vm1737_vm6, %v1706_v29, %v6366_v38  ;;  %v1837_v38 = vsel %vm1836_vm8, %v1804_v24, %v6605_v53  ;;  %v6211_v53 = vunpack.i.h.bf16 %v9126_v39  ;;  %v6451_v39 = vunpack.i.h.bf16 %v9378_v11 }
 0x1f5   : > { %v1772_v63 = vsel %vm1770_vm7, %v1739_v8, %v6446_v46  ;;  %v1870_v15 = vsel %vm1869_vm10, %v1837_v38, %v6685_v60  ;;  %v9606_v51 = vpop.permute.xlu0 %6743  ;;  %v6370_v38 = vunpack.i.l.bf16 %v9300_v21 }
 0x1f6   : > { %v1805_v1 = vsel %vm1803_vm9, %v1772_v63, %v6526_v56  ;;  %v8135_v63 = vld [vmem:[#allocation2 + $0x18] sm:$0xff] }
 0x1f7   : > { %v1838_v43 = vsel %vm1836_vm8, %v1805_v1, %v6606_v32  ;;  %v6291_v32 = vunpack.i.h.bf16 %v9172_v54  ;;  %v1674_v24 = vsel %vm493_vm0, %v8135_v63, %v6210_v0  ;;  %v6371_v1 = vunpack.i.h.bf16 %v9300_v21 }
 0x1f8   : > { %v1871_v16 = vsel %vm1869_vm10, %v1838_v43, %v6686_v20  ;;  %v8134_v20 = vld [vmem:[#allocation2 + $0x20] sm:$0xff]  ;;  %v6531_v43 = vunpack.i.h.bf16 %v9405_v37  ;;  %v1707_v54 = vsel %vm1704_vm4, %v1674_v24, %v6290_v28 }
 0x1f9   : > { %v1675_v60 = vsel %vm493_vm0, %v8134_v20, %v6211_v53  ;;  %v6691_v53 = vunpack.i.h.bf16 %v9546_v50 }
 0x1fb   : > { %v6764_v13 = vpop.permute.xlu1 %6763 }
 0x1fc   : > { %v6766_v4 = vunpack.i.h.bf16 %v6764_v13  ;;  %v6765_v29 = vunpack.i.l.bf16 %v6764_v13  ;;  %v6450_v13 = vunpack.i.l.bf16 %v9378_v11  ;;  %v6690_v11 = vunpack.i.l.bf16 %v9546_v50 }
 0x1fd   : > { %v9633_v63 = vpop.permute.xlu0 %6758 }
 0x1fe   : > { %v1903_v46 = vsel %vm1902_vm11, %v1870_v15, %v6765_v29  ;;  %v1904_v8 = vsel %vm1902_vm11, %v1871_v16, %v6766_v4  ;;  %v6530_v4 = vunpack.i.l.bf16 %v9405_v37  ;;  %v6769_v29 = vpop.permute.xlu2 %6768  ;;  %v1708_v15 = vsel %vm1704_vm4, %v1675_v60, %v6291_v32 }
 0x1ff   : > { %v1935_v56 = vpack.c.bf16 %v1904_v8, %v1903_v46  ;;  %v6611_v16 = vunpack.i.h.bf16 %v9506_v34  ;;  %v6610_v46 = vunpack.i.l.bf16 %v9506_v34  ;;  %v1740_v8 = vsel %vm1737_vm6, %v1707_v54, %v6370_v38 }
 0x200   : > { %v1741_v21 = vsel %vm1737_vm6, %v1708_v15, %v6371_v1  ;;  %v1773_v0 = vsel %vm1770_vm7, %v1740_v8, %v6450_v13  ;;  %v6770_v28 = vunpack.i.l.bf16 %v6769_v29  ;;  %v6216_v13 = vunpack.i.h.bf16 %v9114_v19  ;;  %v8136_v8 = vld [vmem:[#allocation2 + $0x38] sm:$0xff] }
 0x201   : > { %6039 = vmatmul.msk.bf16.vlgmr.msra.gmra.mxu0 %vm1971_vm12, %v1935_v56  ;;  %v1774_v37 = vsel %vm1770_vm7, %v1741_v21, %v6451_v39  ;;  %v6771_v56 = vunpack.i.h.bf16 %v6769_v29  ;;  %v1806_v32 = vsel %vm1803_vm9, %v1773_v0, %v6530_v4  ;;  %v6215_v4 = vunpack.i.l.bf16 %v9114_v19 }
 0x202   : > { %v1807_v20 = vsel %vm1803_vm9, %v1774_v37, %v6531_v43  ;;  %v1839_v34 = vsel %vm1836_vm8, %v1806_v32, %v6610_v46  ;;  %v6296_v43 = vunpack.i.h.bf16 %v9238_v48  ;;  %v6295_v29 = vunpack.i.l.bf16 %v9238_v48 }
 0x203   : > { %v1840_v60 = vsel %vm1836_vm8, %v1807_v20, %v6611_v16  ;;  %v1872_v24 = vsel %vm1869_vm10, %v1839_v34, %v6690_v11  ;;  %v6376_v54 = vunpack.i.h.bf16 %v9312_v57  ;;  %v6375_v15 = vunpack.i.l.bf16 %v9312_v57 }
 0x204   : > { %v1873_v50 = vsel %vm1869_vm10, %v1840_v60, %v6691_v53  ;;  %v1905_v1 = vsel %vm1902_vm11, %v1872_v24, %v6770_v28  ;;  %v6456_v16 = vunpack.i.h.bf16 %v9336_v14  ;;  %v6455_v46 = vunpack.i.l.bf16 %v9336_v14  ;;  %v8137_v53 = vld [vmem:[#allocation2 + $0x30] sm:$0xff] }
 0x205   : > { %v1906_v38 = vsel %vm1902_vm11, %v1873_v50, %v6771_v56  ;;  %v1677_v21 = vsel %vm493_vm0, %v8136_v8, %v6216_v13  ;;  %v1676_v19 = vsel %vm493_vm0, %v8137_v53, %v6215_v4  ;;  %v6536_v11 = vunpack.i.h.bf16 %v9445_v55  ;;  %v6774_v37 = vpop.permute.xlu0 %6773  ;;  %v13531_v8 = vld [vmem:[#allocation27_spill] sm:$0xff] }
 0x206   : > { %v1936_v39 = vpack.c.bf16 %v1906_v38, %v1905_v1  ;;  %v6535_v0 = vunpack.i.l.bf16 %v9445_v55  ;;  %v1710_v48 = vsel %vm1704_vm4, %v1677_v21, %v6296_v43  ;;  %v1709_v56 = vsel %vm1704_vm4, %v1676_v19, %v6295_v29 }
 0x207   : > { %v6616_v57 = vunpack.i.h.bf16 %v9514_v3  ;;  %v6615_v28 = vunpack.i.l.bf16 %v9514_v3  ;;  %v1742_v14 = vsel %vm1737_vm6, %v1709_v56, %v6375_v15  ;;  %v1743_v32 = vsel %vm1737_vm6, %v1710_v48, %v6376_v54  ;;  %v8139_v48 = vld [vmem:[#allocation2 + $0x48] sm:$0xff] }
 0x208   : > { %v6696_v20 = vunpack.i.h.bf16 %v9544_v42  ;;  %v6695_v34 = vunpack.i.l.bf16 %v9544_v42  ;;  %v1775_v60 = vsel %vm1770_vm7, %v1742_v14, %v6455_v46  ;;  %v1776_v55 = vsel %vm1770_vm7, %v1743_v32, %v6456_v16 }
 0x209   : > { %v6776_v24 = vunpack.i.h.bf16 %v6774_v37  ;;  %v6775_v50 = vunpack.i.l.bf16 %v6774_v37  ;;  %v1808_v1 = vsel %vm1803_vm9, %v1775_v60, %v6535_v0  ;;  %v1809_v38 = vsel %vm1803_vm9, %v1776_v55, %v6536_v11  ;;  %v8138_v0 = vld [vmem:[#allocation2 + $0x50] sm:$0xff] }
 0x20a   : > { %v1841_v3 = vsel %vm1836_vm8, %v1808_v1, %v6615_v28  ;;  %v6221_v54 = vunpack.i.h.bf16 %v9150_v6  ;;  %v6220_v15 = vunpack.i.l.bf16 %v9150_v6  ;;  %v6301_v16 = vunpack.i.h.bf16 %v9248_v52  ;;  %v6779_v28 = vpop.permute.xlu1 %6778 }
 0x20b   : > { %v1874_v13 = vsel %vm1869_vm10, %v1841_v3, %v6695_v34  ;;  %v6300_v46 = vunpack.i.l.bf16 %v9248_v52  ;;  %v6381_v21 = vunpack.i.h.bf16 %v13531_v8  ;;  %v6380_v53 = vunpack.i.l.bf16 %v13531_v8 }
 0x20c   : > { %v1907_v42 = vsel %vm1902_vm11, %v1874_v13, %v6775_v50  ;;  %v6461_v19 = vunpack.i.h.bf16 %v9384_v18  ;;  %v6460_v11 = vunpack.i.l.bf16 %v9384_v18  ;;  %v1679_v37 = vsel %vm493_vm0, %v8138_v0, %v6221_v54  ;;  %v8140_v0 = vld [vmem:[#allocation2 + $0x68] sm:$0xff] }
 0x20d   : > { %v1678_v6 = vsel %vm493_vm0, %v8139_v48, %v6220_v15  ;;  %v6541_v56 = vunpack.i.h.bf16 %v9453_v9  ;;  %v1712_v14 = vsel %vm1704_vm4, %v1679_v37, %v6301_v16  ;;  %v6621_v32 = vunpack.i.h.bf16 %v9498_v62  ;;  %v13533_v16 = vld [vmem:[#allocation8_spill] sm:$0xff] }
 0x20e   : > { %v1711_v52 = vsel %vm1704_vm4, %v1678_v6, %v6300_v46  ;;  %v1745_v18 = vsel %vm1737_vm6, %v1712_v14, %v6381_v21  ;;  %v6701_v60 = vunpack.i.h.bf16 %v9558_v30  ;;  %v6700_v55 = vunpack.i.l.bf16 %v9558_v30  ;;  %v8141_v48 = vld [vmem:[#allocation2 + $0x60] sm:$0xff] }
 0x20f   : > { %v1744_v34 = vsel %vm1737_vm6, %v1711_v52, %v6380_v53  ;;  %v6781_v50 = vunpack.i.h.bf16 %v6779_v28  ;;  %v6780_v1 = vunpack.i.l.bf16 %v6779_v28  ;;  %v6306_v46 = vunpack.i.h.bf16 %v13533_v16  ;;  %v6784_v28 = vpop.permute.xlu2 %6783 }
 0x210   : > { %v6305_v8 = vunpack.i.l.bf16 %v13533_v16  ;;  %v6386_v21 = vunpack.i.h.bf16 %v9316_v61  ;;  %v6385_v53 = vunpack.i.l.bf16 %v9316_v61  ;;  %v6626_v61 = vunpack.i.h.bf16 %v9518_v35 }
 0x211   : > { %6040 = vmatmul.msk.bf16.gmra.mxu0 %vm1971_vm12, %v1936_v39  ;;  %v1842_v39 = vsel %vm1836_vm8, %v1809_v38, %v6616_v57  ;;  %v6540_v57 = vunpack.i.l.bf16 %v9453_v9  ;;  %v1777_v9 = vsel %vm1770_vm7, %v1744_v34, %v6460_v11  ;;  %v6465_v11 = vunpack.i.l.bf16 %v9389_v58 }
 0x212   : > { %v1875_v4 = vsel %vm1869_vm10, %v1842_v39, %v6696_v20  ;;  %v6620_v20 = vunpack.i.l.bf16 %v9498_v62  ;;  %v6705_v34 = vunpack.i.l.bf16 %v9551_v33  ;;  %v6471_v16 = vunpack.i.h.bf16 %v9348_v41 }
 0x213   : > { %v1908_v43 = vsel %vm1902_vm11, %v1875_v4, %v6776_v24  ;;  %v1778_v24 = vsel %vm1770_vm7, %v1745_v18, %v6461_v19  ;;  %v1810_v38 = vsel %vm1803_vm9, %v1777_v9, %v6540_v57  ;;  %v6466_v19 = vunpack.i.h.bf16 %v9389_v58 }
 0x214   : > { %v1937_v29 = vpack.c.bf16 %v1908_v43, %v1907_v42  ;;  %v1811_v3 = vsel %vm1803_vm9, %v1778_v24, %v6541_v56  ;;  %v1843_v62 = vsel %vm1836_vm8, %v1810_v38, %v6620_v20  ;;  %v6546_v56 = vunpack.i.h.bf16 %v9419_v7 }
 0x215   : > { %v1844_v39 = vsel %vm1836_vm8, %v1811_v3, %v6621_v32  ;;  %v1876_v13 = vsel %vm1869_vm10, %v1843_v62, %v6700_v55  ;;  %v6545_v57 = vunpack.i.l.bf16 %v9419_v7  ;;  %v6625_v32 = vunpack.i.l.bf16 %v9518_v35 }
 0x216   : > { %v1877_v4 = vsel %vm1869_vm10, %v1844_v39, %v6701_v60  ;;  %v1909_v30 = vsel %vm1902_vm11, %v1876_v13, %v6780_v1  ;;  %v6706_v18 = vunpack.i.h.bf16 %v9551_v33  ;;  %v6786_v55 = vunpack.i.h.bf16 %v6784_v28  ;;  %v13534_v13 = vld [vmem:[#allocation18_spill] sm:$0xff] }
 0x217   : > { %v1910_v42 = vsel %vm1902_vm11, %v1877_v4, %v6781_v50  ;;  %v6785_v24 = vunpack.i.l.bf16 %v6784_v28  ;;  %v6231_v4 = vunpack.i.h.bf16 %v13534_v13  ;;  %v6711_v28 = vunpack.i.h.bf16 %v9556_v2 }
 0x218   : > { %v1938_v43 = vpack.c.bf16 %v1910_v42, %v1909_v30  ;;  %v6230_v30 = vunpack.i.l.bf16 %v13534_v13  ;;  %v13535_v42 = vld [vmem:[#allocation24_spill] sm:$0xff]  ;;  %v6475_v13 = vunpack.i.l.bf16 %v9395_v49 }
 0x221   : > { %6041 = vmatmul.msk.bf16.gmra.mxu0 %vm1971_vm12, %v1937_v29  ;;  %v13532_v29 = vld [vmem:[#allocation17_spill] sm:$0xff] }
 0x222   : > { %v6226_v54 = vunpack.i.h.bf16 %v13532_v29  ;;  %v6225_v15 = vunpack.i.l.bf16 %v13532_v29  ;;  %v6310_v29 = vunpack.i.l.bf16 %v13535_v42 }
 0x224   : > { %v1681_v37 = vsel %vm493_vm0, %v8140_v0, %v6226_v54  ;;  %v1680_v6 = vsel %vm493_vm0, %v8141_v48, %v6225_v15  ;;  %v6391_v54 = vunpack.i.h.bf16 %v9326_v23  ;;  %v6390_v15 = vunpack.i.l.bf16 %v9326_v23 }
 0x225   : > { %v1714_v52 = vsel %vm1704_vm4, %v1681_v37, %v6306_v46  ;;  %v1713_v14 = vsel %vm1704_vm4, %v1680_v6, %v6305_v8  ;;  %v6470_v46 = vunpack.i.l.bf16 %v9348_v41  ;;  %v8142_v8 = vld [vmem:[#allocation2 + $0x80] sm:$0xff]  ;;  %v6550_v0 = vunpack.i.l.bf16 %v9456_v45  ;;  %v6789_v37 = vpop.permute.xlu0 %6788 }
 0x226   : > { %v1747_v58 = vsel %vm1737_vm6, %v1714_v52, %v6386_v21  ;;  %v1746_v20 = vsel %vm1737_vm6, %v1713_v14, %v6385_v53  ;;  %v1683_v21 = vsel %vm493_vm0, %v8142_v8, %v6231_v4  ;;  %v8143_v53 = vld [vmem:[#allocation2 + $0x78] sm:$0xff]  ;;  %v6631_v23 = vunpack.i.h.bf16 %v9521_v5 }
 0x227   : > { %v1779_v60 = vsel %vm1770_vm7, %v1746_v20, %v6465_v11  ;;  %v1780_v7 = vsel %vm1770_vm7, %v1747_v58, %v6466_v19  ;;  %v1682_v19 = vsel %vm493_vm0, %v8143_v53, %v6230_v30  ;;  %v6551_v11 = vunpack.i.h.bf16 %v9456_v45  ;;  %v8144_v4 = vld [vmem:[#allocation2 + $0x98] sm:$0xff] }
 0x228   : > { %v1812_v9 = vsel %vm1803_vm9, %v1779_v60, %v6545_v57  ;;  %v1813_v50 = vsel %vm1803_vm9, %v1780_v7, %v6546_v56  ;;  %v1715_v6 = vsel %vm1704_vm4, %v1682_v19, %v6310_v29  ;;  %v6630_v56 = vunpack.i.l.bf16 %v9521_v5 }
 0x229   : > { %v1845_v35 = vsel %vm1836_vm8, %v1812_v9, %v6625_v32  ;;  %v1846_v1 = vsel %vm1836_vm8, %v1813_v50, %v6626_v61  ;;  %v1748_v41 = vsel %vm1737_vm6, %v1715_v6, %v6390_v15  ;;  %v6710_v52 = vunpack.i.l.bf16 %v9556_v2  ;;  %v6794_v15 = vpop.permute.xlu1 %6793 }
 0x22a   : > { %v1878_v38 = vsel %vm1869_vm10, %v1845_v35, %v6705_v34  ;;  %v1879_v3 = vsel %vm1869_vm10, %v1846_v1, %v6706_v18  ;;  %v1781_v14 = vsel %vm1770_vm7, %v1748_v41, %v6470_v46  ;;  %v6791_v61 = vunpack.i.h.bf16 %v6789_v37  ;;  %v13537_v35 = vld [vmem:[#allocation25_spill] sm:$0xff] }
 0x22b   : > { %v1911_v33 = vsel %vm1902_vm11, %v1878_v38, %v6785_v24  ;;  %v1912_v62 = vsel %vm1902_vm11, %v1879_v3, %v6786_v55  ;;  %v6790_v32 = vunpack.i.l.bf16 %v6789_v37  ;;  %v1814_v58 = vsel %vm1803_vm9, %v1781_v14, %v6550_v0  ;;  %v13536_v24 = vld [vmem:[#allocation10_spill] sm:$0xff]  ;;  %v13539_v14 = vld [vmem:[#allocation12_spill] sm:$0xff] }
 0x22c   : > { %v1939_v39 = vpack.c.bf16 %v1912_v62, %v1911_v33  ;;  %v1847_v5 = vsel %vm1836_vm8, %v1814_v58, %v6630_v56  ;;  %v6236_v9 = vunpack.i.h.bf16 %v13536_v24  ;;  %v6235_v50 = vunpack.i.l.bf16 %v13536_v24  ;;  %v13538_v3 = vld [vmem:[#allocation30_spill] sm:$0xff] }
 0x22d   : > { %v1880_v34 = vsel %vm1869_vm10, %v1847_v5, %v6710_v52  ;;  %v6316_v1 = vunpack.i.h.bf16 %v13537_v35  ;;  %v6315_v38 = vunpack.i.l.bf16 %v13537_v35  ;;  %v6396_v33 = vunpack.i.h.bf16 %v13538_v3  ;;  %v6799_v35 = vpop.permute.xlu2 %6798 }
 0x22e   : > { %v1913_v2 = vsel %vm1902_vm11, %v1880_v34, %v6790_v32  ;;  %v6395_v62 = vunpack.i.l.bf16 %v13538_v3  ;;  %v1685_v30 = vsel %vm493_vm0, %v8144_v4, %v6236_v9  ;;  %v6556_v29 = vunpack.i.h.bf16 %v9464_v12  ;;  %v13540_v32 = vld [vmem:[#allocation15_spill] sm:$0xff] }
 0x22f   : > { %v1718_v46 = vsel %vm1704_vm4, %v1685_v30, %v6316_v1  ;;  %v6636_v8 = vunpack.i.h.bf16 %v9512_v47  ;;  %v6716_v19 = vunpack.i.h.bf16 %v9566_v59  ;;  %v6796_v37 = vunpack.i.h.bf16 %v6794_v15 }
 0x230   : > { %v1751_v53 = vsel %vm1737_vm6, %v1718_v46, %v6396_v33  ;;  %v6321_v58 = vunpack.i.h.bf16 %v13540_v32  ;;  %v6401_v5 = vunpack.i.h.bf16 %v9330_v10  ;;  %v6481_v34 = vunpack.i.h.bf16 %v9401_v44 }
 0x231   : > { %6042 = vmatmul.msk.bf16.gmra.mxu0 %vm1971_vm12, %v1938_v43  ;;  %v6311_v43 = vunpack.i.h.bf16 %v13535_v42  ;;  %v8145_v42 = vld [vmem:[#allocation2 + $0x90] sm:$0xff]  ;;  %v6561_v9 = vunpack.i.h.bf16 %v9435_v17  ;;  %v6640_v3 = vunpack.i.l.bf16 %v9525_v25  ;;  %v6801_v4 = vunpack.i.h.bf16 %v6799_v35 }
 0x232   : > { %v6800_v30 = vunpack.i.l.bf16 %v6799_v35  ;;  %v13541_v46 = vmov 0.0  }
 0x233   : > { %v1716_v48 = vsel %vm1704_vm4, %v1683_v21, %v6311_v43  ;;  %v1684_v43 = vsel %vm493_vm0, %v8145_v42, %v6235_v50  ;;  %v6635_v21 = vunpack.i.l.bf16 %v9512_v47  ;;  %v6560_v50 = vunpack.i.l.bf16 %v9435_v17  ;;  %2223 = vst.msk [vmem:[#allocation3 + $0x28] sm:$0x3] %vm2219_vm13, %v13541_v46 }
 0x234   : > { %v1749_v57 = vsel %vm1737_vm6, %v1716_v48, %v6391_v54  ;;  %v6555_v54 = vunpack.i.l.bf16 %v9464_v12  ;;  %v6795_v48 = vunpack.i.l.bf16 %v6794_v15  ;;  %2220 = vst.msk [vmem:[#allocation3 + $0x10] sm:$0x3] %vm2219_vm13, %v13541_v46 }
 0x235   : > { %v1782_v45 = vsel %vm1770_vm7, %v1749_v57, %v6471_v16  ;;  %v1717_v16 = vsel %vm1704_vm4, %v1684_v43, %v6315_v38  ;;  %2226 = vst.msk [vmem:[#allocation3 + $0x40] sm:$0x3] %vm2219_vm13, %v13541_v46 }
 0x236   : > { %v1815_v20 = vsel %vm1803_vm9, %v1782_v45, %v6551_v11  ;;  %v6715_v11 = vunpack.i.l.bf16 %v9566_v59  ;;  %v6241_v45 = vunpack.i.h.bf16 %v13539_v14  ;;  %2229 = vst.msk [vmem:[#allocation3 + $0x58] sm:$0x3] %vm2219_vm13, %v13541_v46 }
 0x237   : > { %v1848_v18 = vsel %vm1836_vm8, %v1815_v20, %v6631_v23  ;;  %v6320_v20 = vunpack.i.l.bf16 %v13540_v32  ;;  %2232 = vst.msk [vmem:[#allocation3 + $0x70] sm:$0x3] %vm2219_vm13, %v13541_v46 }
 0x238   : > { %v1881_v60 = vsel %vm1869_vm10, %v1848_v18, %v6711_v28  ;;  %v6400_v18 = vunpack.i.l.bf16 %v9330_v10  ;;  %v6641_v10 = vunpack.i.h.bf16 %v9525_v25  ;;  %2235 = vst.msk [vmem:[#allocation3 + $0x88] sm:$0x3] %vm2219_vm13, %v13541_v46 }
 0x239   : > { %v1914_v7 = vsel %vm1902_vm11, %v1881_v60, %v6791_v61  ;;  %v6240_v61 = vunpack.i.l.bf16 %v13539_v14  ;;  %v6480_v60 = vunpack.i.l.bf16 %v9401_v44  ;;  %2238 = vst.msk [vmem:[#allocation3 + $0xa0] sm:$0x3] %vm2219_vm13, %v13541_v46 }
 0x23a   : > { %v1940_v55 = vpack.c.bf16 %v1914_v7, %v1913_v2  ;;  %v8146_v2 = vld [vmem:[#allocation2 + $0xb0] sm:$0xff]  ;;  %2241 = vst.msk [vmem:[#allocation3 + $0xb8] sm:$0x3] %vm2219_vm13, %v13541_v46 }
 0x23b   : > { %v1687_v7 = vsel %vm493_vm0, %v8146_v2, %v6241_v45  ;;  %2244 = vst.msk [vmem:[#allocation3 + $0xd0] sm:$0x3] %vm2219_vm13, %v13541_v46 }
 0x23c   : > { %v1720_v1 = vsel %vm1704_vm4, %v1687_v7, %v6321_v58  ;;  %2247 = vst.msk [vmem:[#allocation3 + $0xe8] sm:$0x3] %vm2219_vm13, %v13541_v46 }
 0x23d   : > { %v1753_v44 = vsel %vm1737_vm6, %v1720_v1, %v6401_v5  ;;  %2250 = vst.msk [vmem:[#allocation3 + $0x100] sm:$0x3] %vm2219_vm13, %v13541_v46 }
 0x23e   : > { %v1786_v17 = vsel %vm1770_vm7, %v1753_v44, %v6481_v34  ;;  %2253 = vst.msk [vmem:[#allocation3 + $0x118] sm:$0x3] %vm2219_vm13, %v13541_v46 }
 0x23f   : > { %v1819_v43 = vsel %vm1803_vm9, %v1786_v17, %v6561_v9  ;;  %2256 = vst.msk [vmem:[#allocation3 + $0x130] sm:$0x3] %vm2219_vm13, %v13541_v46  ;;  %v9885_v9 = vld [vmem:[%s13546_s2] ss:$0 sm:$0xff]  ;;  %v13549_v17 = vld [vmem:[#allocation28_spill] sm:$0xff] }
 0x240   : > { %2259 = vst.msk [vmem:[#allocation3 + $0x148] sm:$0x3] %vm2219_vm13, %v13541_v46 }
 0x241   : > { %6043 = vmatmul.msk.bf16.gmra.mxu0 %vm1971_vm12, %v1939_v39  ;;  %v6476_v39 = vunpack.i.h.bf16 %v9395_v49  ;;  %v1750_v49 = vsel %vm1737_vm6, %v1717_v16, %v6395_v62  ;;  %v6721_v62 = vunpack.i.h.bf16 %v9560_v31  ;;  %2262 = vst.msk [vmem:[#allocation3 + $0x160] sm:$0x3] %vm2219_vm13, %v13541_v46 }
 0x242   : > { %v1783_v0 = vsel %vm1770_vm7, %v1750_v49, %v6475_v13  ;;  %2265 = vst.msk [vmem:[#allocation3 + $0x178] sm:$0x3] %vm2219_vm13, %v13541_v46 }
 0x243   : > { %v1784_v12 = vsel %vm1770_vm7, %v1751_v53, %v6476_v39  ;;  %v1816_v6 = vsel %vm1803_vm9, %v1783_v0, %v6555_v54  ;;  %v6720_v39 = vunpack.i.l.bf16 %v9560_v31  ;;  %2268 = vst.msk [vmem:[#allocation3 + $0x190] sm:$0x3] %vm2219_vm13, %v13541_v46 }
 0x244   : > { %v1817_v23 = vsel %vm1803_vm9, %v1784_v12, %v6556_v29  ;;  %v1849_v47 = vsel %vm1836_vm8, %v1816_v6, %v6635_v21  ;;  %v1852_v29 = vsel %vm1836_vm8, %v1819_v43, %v6641_v10  ;;  %v13542_v21 = vld [vmem:[#allocation21_spill] sm:$0xff]  ;;  %v6406_v12 = vunpack.i.h.bf16 %v9338_v36  ;;  %v9898_v10 = vld [vmem:[%s13547_s3] ss:$0 sm:$0xff]  ;;  %2271 = vst.msk [vmem:[#allocation3 + $0x1a8] sm:$0x3] %vm2219_vm13, %v13541_v46 }
 0x245   : > { %v1850_v56 = vsel %vm1836_vm8, %v1817_v23, %v6636_v8  ;;  %v1882_v41 = vsel %vm1869_vm10, %v1849_v47, %v6715_v11  ;;  %v1885_v15 = vsel %vm1869_vm10, %v1852_v29, %v6721_v62  ;;  %v6246_v49 = vunpack.i.h.bf16 %v13542_v21  ;;  %v8148_v23 = vld [vmem:[#allocation2 + $0xc8] sm:$0xff] }
 0x246   : > { %v1883_v57 = vsel %vm1869_vm10, %v1850_v56, %v6716_v19  ;;  %v1915_v59 = vsel %vm1902_vm11, %v1882_v41, %v6795_v48  ;;  %v1918_v16 = vsel %vm1902_vm11, %v1885_v15, %v6801_v4  ;;  %v6245_v53 = vunpack.i.l.bf16 %v13542_v21  ;;  %v13543_v19 = vld [vmem:[#allocation26_spill] sm:$0xff]  ;;  %v8149_v56 = vld [vmem:[#allocation2 + $0xc0] sm:$0xff]  ;;  %v13548_v62 = vld [vmem:[#allocation9_spill] sm:$0xff] }
 0x247   : > { %v1916_v28 = vsel %vm1902_vm11, %v1883_v57, %v6796_v37  ;;  %v6326_v11 = vunpack.i.h.bf16 %v13543_v19  ;;  %v6325_v0 = vunpack.i.l.bf16 %v13543_v19  ;;  %v6405_v37 = vunpack.i.l.bf16 %v9338_v36  ;;  %v13551_v43 = vld [vmem:[#allocation33_spill] sm:$0xff]  ;;  %v8150_v15 = vld [vmem:[#allocation2 + $0xd8] sm:$0xff]  ;;  %v8151_v21 = vld [vmem:[#allocation2 + $0xe0] sm:$0xff] }
 0x248   : > { %v1941_v52 = vpack.c.bf16 %v1916_v28, %v1915_v59  ;;  %v6486_v48 = vunpack.i.h.bf16 %v9360_v22  ;;  %v6485_v6 = vunpack.i.l.bf16 %v9360_v22  ;;  %v1689_v47 = vsel %vm493_vm0, %v8148_v23, %v6246_v49  ;;  %v6804_v59 = vpop.permute.xlu0 %6803  ;;  %v13553_v19 = vld [vmem:[#allocation50_spill] sm:$0xff] }
 0x249   : > { %v1688_v41 = vsel %vm493_vm0, %v8149_v56, %v6245_v53  ;;  %v6566_v57 = vunpack.i.h.bf16 %v9470_v27  ;;  %v6565_v36 = vunpack.i.l.bf16 %v9470_v27  ;;  %v1722_v28 = vsel %vm1704_vm4, %v1689_v47, %v6326_v11  ;;  %v13545_v27 = vld [vmem:[#allocation63_spill] sm:$0xff] }
 0x24a   : > { %v1721_v22 = vsel %vm1704_vm4, %v1688_v41, %v6325_v0  ;;  %v1755_v32 = vsel %vm1737_vm6, %v1722_v28, %v6406_v12  ;;  %v6726_v58 = vunpack.i.h.bf16 %v13545_v27  ;;  %v6806_v34 = vunpack.i.h.bf16 %v6804_v59  ;;  %v6809_v12 = vpop.permute.xlu1 %6808 }
 0x24b   : > { %v6330_v4 = vunpack.i.l.bf16 %v13549_v17  ;;  %v6411_v29 = vunpack.i.h.bf16 %v13551_v43  ;;  %v6571_v11 = vunpack.i.h.bf16 %v13553_v19  ;;  %v6570_v0 = vunpack.i.l.bf16 %v13553_v19 }
 0x251   : > { %6044 = vmatmul.msk.bf16.gmra.mxu0 %vm1971_vm12, %v1940_v55  ;;  %v8147_v55 = vld [vmem:[#allocation2 + $0xa8] sm:$0xff] }
 0x252   : > { %v1686_v24 = vsel %vm493_vm0, %v8147_v55, %v6240_v61  ;;  %v1754_v61 = vsel %vm1737_vm6, %v1721_v22, %v6405_v37 }
 0x253   : > { %v1719_v38 = vsel %vm1704_vm4, %v1686_v24, %v6320_v20  ;;  %v6725_v20 = vunpack.i.l.bf16 %v13545_v27  ;;  %v1787_v5 = vsel %vm1770_vm7, %v1754_v61, %v6485_v6  ;;  %v13554_v6 = vld [vmem:[#allocation55_spill] sm:$0xff] }
 0x254   : > { %v1752_v33 = vsel %vm1737_vm6, %v1719_v38, %v6400_v18  ;;  %v1788_v18 = vsel %vm1770_vm7, %v1755_v32, %v6486_v48  ;;  %v1820_v2 = vsel %vm1803_vm9, %v1787_v5, %v6565_v36  ;;  %v6651_v23 = vunpack.i.h.bf16 %v13554_v6 }
 0x255   : > { %v1785_v13 = vsel %vm1770_vm7, %v1752_v33, %v6480_v60  ;;  %v6805_v60 = vunpack.i.l.bf16 %v6804_v59  ;;  %v1821_v7 = vsel %vm1803_vm9, %v1788_v18, %v6566_v57  ;;  %v6650_v47 = vunpack.i.l.bf16 %v13554_v6  ;;  %v13556_v18 = vld [vmem:[#allocation13_spill] sm:$0xff] }
 0x256   : > { %v1818_v42 = vsel %vm1803_vm9, %v1785_v13, %v6560_v50  ;;  %v6251_v13 = vunpack.i.h.bf16 %v13548_v62  ;;  %v6731_v57 = vunpack.i.h.bf16 %v9588_v26  ;;  %v6730_v36 = vunpack.i.l.bf16 %v9588_v26 }
 0x257   : > { %v1851_v25 = vsel %vm1836_vm8, %v1818_v42, %v6640_v3  ;;  %v6331_v42 = vunpack.i.h.bf16 %v13549_v17 }
 0x258   : > { %v1884_v54 = vsel %vm1869_vm10, %v1851_v25, %v6720_v39  ;;  %v6250_v39 = vunpack.i.l.bf16 %v13548_v62  ;;  %v6410_v25 = vunpack.i.l.bf16 %v13551_v43  ;;  %v1691_v49 = vsel %vm493_vm0, %v8151_v21, %v6251_v13  ;;  %v13559_v13 = vld [vmem:[#allocation44_spill] sm:$0xff] }
 0x259   : > { %v1917_v31 = vsel %vm1902_vm11, %v1884_v54, %v6800_v30  ;;  %v1724_v37 = vsel %vm1704_vm4, %v1691_v49, %v6331_v42  ;;  %v6496_v17 = vunpack.i.h.bf16 %v13559_v13  ;;  %v6495_v43 = vunpack.i.l.bf16 %v13559_v13 }
 0x25a   : > { %v1942_v8 = vpack.c.bf16 %v1918_v16, %v1917_v31  ;;  %v1690_v31 = vsel %vm493_vm0, %v8150_v15, %v6250_v39  ;;  %v13552_v16 = vld [vmem:[#allocation43_spill] sm:$0xff]  ;;  %v1757_v41 = vsel %vm1737_vm6, %v1724_v37, %v6411_v29 }
 0x25b   : > { %v6491_v46 = vunpack.i.h.bf16 %v13552_v16  ;;  %v1723_v53 = vsel %vm1704_vm4, %v1690_v31, %v6330_v4  ;;  %v8152_v31 = vld [vmem:[#allocation2 + $0xf8] sm:$0xff] }
 0x25c   : > { %v1756_v48 = vsel %vm1737_vm6, %v1723_v53, %v6410_v25 }
 0x25d   : > { %v1790_v22 = vsel %vm1770_vm7, %v1757_v41, %v6491_v46  ;;  %v8153_v46 = vld [vmem:[#allocation2 + $0xf0] sm:$0xff] }
 0x25e   : > { %v1823_v61 = vsel %vm1803_vm9, %v1790_v22, %v6571_v11 }
 0x261   : > { %6045 = vmatmul.msk.bf16.gmra.mxu0 %vm1971_vm12, %v1941_v52  ;;  %v13544_v52 = vld [vmem:[#allocation56_spill] sm:$0xff] }
 0x262   : > { %v6646_v14 = vunpack.i.h.bf16 %v13544_v52  ;;  %v6645_v45 = vunpack.i.l.bf16 %v13544_v52  ;;  %v6811_v52 = vunpack.i.h.bf16 %v6809_v12 }
 0x264   : > { %v1853_v55 = vsel %vm1836_vm8, %v1820_v2, %v6645_v45  ;;  %v1854_v24 = vsel %vm1836_vm8, %v1821_v7, %v6646_v14  ;;  %v6810_v14 = vunpack.i.l.bf16 %v6809_v12 }
 0x265   : > { %v1886_v50 = vsel %vm1869_vm10, %v1853_v55, %v6725_v20  ;;  %v1887_v35 = vsel %vm1869_vm10, %v1854_v24, %v6726_v58  ;;  %v1856_v58 = vsel %vm1836_vm8, %v1823_v61, %v6651_v23  ;;  %v9948_v55 = vld [vmem:[#allocation3] sm:$0xff]  ;;  %v9950_v24 = vld [vmem:[#allocation3 + $0x8] sm:$0xff]  ;;  %v13561_v23 = vld [vmem:[#allocation48_spill] sm:$0xff] }
 0x266   : > { %v1919_v1 = vsel %vm1902_vm11, %v1886_v50, %v6805_v60  ;;  %v1920_v38 = vsel %vm1902_vm11, %v1887_v35, %v6806_v34  ;;  %v1889_v5 = vsel %vm1869_vm10, %v1856_v58, %v6731_v57  ;;  %v6256_v34 = vunpack.i.h.bf16 %v13556_v18  ;;  %v13557_v50 = vld [vmem:[#allocation20_spill] sm:$0xff] }
 0x267   : > { %v1943_v33 = vpack.c.bf16 %v1920_v38, %v1919_v1  ;;  %v6255_v60 = vunpack.i.l.bf16 %v13556_v18  ;;  %v1922_v7 = vsel %vm1902_vm11, %v1889_v5, %v6811_v52  ;;  %v6336_v35 = vunpack.i.h.bf16 %v13557_v50  ;;  %v9957_v38 = vld [vmem:[#allocation3 + $0x10] sm:$0x3]  ;;  %v13563_v5 = vld [vmem:[#allocation64_spill] sm:$0xff] }
 0x268   : > { %v6335_v1 = vunpack.i.l.bf16 %v13557_v50  ;;  %v2410_v42 = vrot.slane %v9957_v38, 1  ;;  %v6575_v57 = vunpack.i.l.bf16 %v13561_v23  ;;  %v6736_v18 = vunpack.i.h.bf16 %v13563_v5 }
 0x271   : > { %6046 = vmatmul.msk.bf16.gmra.mxu0 %vm1971_vm12, %v1942_v8  ;;  %v6490_v8 = vunpack.i.l.bf16 %v13552_v16  ;;  %v1693_v16 = vsel %vm493_vm0, %v8152_v31, %v6256_v34  ;;  %v6735_v34 = vunpack.i.l.bf16 %v13563_v5 }
 0x272   : > { %v1726_v49 = vsel %vm1704_vm4, %v1693_v16, %v6336_v35 }
 0x273   : > { %v1789_v28 = vsel %vm1770_vm7, %v1756_v48, %v6490_v8  ;;  %v1692_v8 = vsel %vm493_vm0, %v8153_v46, %v6255_v60  ;;  %v13566_v46 = vld [vmem:[#allocation29_spill] sm:$0xff] }
 0x274   : > { %v1822_v45 = vsel %vm1803_vm9, %v1789_v28, %v6570_v0  ;;  %v1725_v53 = vsel %vm1704_vm4, %v1692_v8, %v6335_v1  ;;  %v6340_v8 = vunpack.i.l.bf16 %v13566_v46 }
 0x275   : > { %v1855_v27 = vsel %vm1836_vm8, %v1822_v45, %v6650_v47  ;;  %v6576_v47 = vunpack.i.h.bf16 %v13561_v23  ;;  %v13568_v23 = vld [vmem:[#allocation41_spill] sm:$0xff] }
 0x276   : > { %v1888_v20 = vsel %vm1869_vm10, %v1855_v27, %v6730_v36  ;;  %v13562_v36 = vld [vmem:[#allocation59_spill] sm:$0xff] }
 0x277   : > { %v1921_v2 = vsel %vm1902_vm11, %v1888_v20, %v6810_v14  ;;  %v6655_v20 = vunpack.i.l.bf16 %v13562_v36 }
 0x278   : > { %v1944_v29 = vpack.c.bf16 %v1922_v7, %v1921_v2 }
 0x27e   : > { %v2033_v3 = vpop.f32.mrf.mxu0 }
 0x27f   : > { %v2117_v44 = vmul.f32 %v9885_v9, %v2033_v3  ;;  %v2407_v3 = vrot.slane %v9948_v55, 1 }
 0x281   : > { %v9907_v30 = vadd.f32 %v9898_v10, %v2117_v44  ;;  %6047 = vmatmul.msk.bf16.gmra.mxu0 %vm1971_vm12, %v1943_v33  ;;  %v2408_v44 = vrot.slane %v9950_v24, 1  ;;  %v13558_v33 = vld [vmem:[#allocation37_spill] sm:$0xff] }
 0x282   : > { %v6416_v62 = vunpack.i.h.bf16 %v13558_v33  ;;  %v6415_v39 = vunpack.i.l.bf16 %v13558_v33 }
 0x283   : > { %13550 = vst [vmem:[#allocation27_spill] sm:$0xff] %v9907_v30  ;;  %v13326_v54 = vmax.f32 %v9907_v30, 0.0  ;;  %v2409_v15 = vsel %vm716_vm2, %v2407_v3, %v2408_v44  ;;  %v2411_v21 = vsel %vm716_vm2, %v2408_v44, %v2410_v42 }
 0x284   : > { %v6842_v0 = vpack.i.bf16 %v2411_v21, %v2409_v15  ;;  %v1759_v12 = vsel %vm1737_vm6, %v1726_v49, %v6416_v62  ;;  %v1758_v37 = vsel %vm1737_vm6, %v1725_v53, %v6415_v39  ;;  %v6341_v53 = vunpack.i.h.bf16 %v13566_v46 }
 0x285   : > { %2273 = vst.msk [vmem:[#allocation3 + $0x19] sm:$0xff] %vm1704_vm4, %v13326_v54  ;;  %v1791_v48 = vsel %vm1770_vm7, %v1758_v37, %v6495_v43  ;;  %v1792_v6 = vsel %vm1770_vm7, %v1759_v12, %v6496_v17  ;;  %v8154_v37 = vld [vmem:[#allocation2 + $0x108] sm:$0xff] }
 0x286   : > { %v2035_v56 = vpop.f32.mrf.mxu0  ;;  %6843 = vrot.lane.b32.xlu2 %v6842_v0, %s13314_s16  ;;  %v1824_v62 = vsel %vm1803_vm9, %v1791_v48, %v6575_v57  ;;  %v1825_v39 = vsel %vm1803_vm9, %v1792_v6, %v6576_v47  ;;  %v13567_v0 = vld [vmem:[#allocation38_spill] sm:$0xff]  ;;  %v6500_v47 = vunpack.i.l.bf16 %v13568_v23  ;;  %v6501_v57 = vunpack.i.h.bf16 %v13568_v23 }
 0x287   : > { %v2118_v59 = vmul.f32 %v9885_v9, %v2035_v56  ;;  %v6814_v56 = vpop.permute.xlu2 %6813  ;;  %v1857_v43 = vsel %vm1836_vm8, %v1824_v62, %v6655_v20  ;;  %v6420_v12 = vunpack.i.l.bf16 %v13567_v0  ;;  %v6421_v6 = vunpack.i.h.bf16 %v13567_v0 }
 0x288   : > { %v6816_v60 = vunpack.i.h.bf16 %v6814_v56  ;;  %v6815_v3 = vunpack.i.l.bf16 %v6814_v56  ;;  %v1890_v15 = vsel %vm1869_vm10, %v1857_v43, %v6735_v34 }
 0x289   : > { %v9937_v32 = vadd.f32 %v9898_v10, %v2118_v59  ;;  %v6656_v59 = vunpack.i.h.bf16 %v13562_v36  ;;  %v13569_v36 = vld [vmem:[#allocation51_spill] sm:$0xff] }
 0x28a   : > { %v1923_v21 = vsel %vm1902_vm11, %v1890_v15, %v6815_v3 }
 0x28b   : > { %13555 = vst [vmem:[#allocation17_spill] sm:$0xff] %v9937_v32  ;;  %v13325_v26 = vmax.f32 %v9937_v32, 0.0 }
 0x28c   : > { %v9977_v11 = vld [vmem:[#allocation3 + $0x18] sm:$0xff] }
 0x28d   : > { %2274 = vst.msk [vmem:[#allocation3 + $0x21] sm:$0xff] %vm1704_vm4, %v13325_v26  ;;  %v2412_v52 = vrot.slane %v9977_v11, 1  ;;  %v2588_v14 = vrot.slane %v9977_v11, 2 }
 0x28e   : > { %v2038_v4 = vpop.f32.mrf.mxu0 }
 0x28f   : > { %v2119_v25 = vmul.f32 %v9885_v9, %v2038_v4  ;;  %v13565_v4 = vld [vmem:[#allocation22_spill] sm:$0xff] }
 0x290   : > { %v6260_v42 = vunpack.i.l.bf16 %v13565_v4  ;;  %v6261_v16 = vunpack.i.h.bf16 %v13565_v4 }
 0x291   : > { %v9974_v19 = vadd.f32 %v9898_v10, %v2119_v25  ;;  %6048 = vmatmul.msk.bf16.gmra.mxu0 %vm1971_vm12, %v1944_v29  ;;  %v1858_v25 = vsel %vm1836_vm8, %v1825_v39, %v6656_v59  ;;  %v6580_v59 = vunpack.i.l.bf16 %v13569_v36 }
 0x292   : > { %v1891_v31 = vsel %vm1869_vm10, %v1858_v25, %v6736_v18  ;;  %v1694_v48 = vsel %vm493_vm0, %v8154_v37, %v6260_v42 }
 0x293   : > { %13560 = vst [vmem:[#allocation8_spill] sm:$0xff] %v9974_v19  ;;  %v13313_v41 = vmax.f32 %v9974_v19, 0.0  ;;  %v1924_v49 = vsel %vm1902_vm11, %v1891_v31, %v6816_v60 }
 0x294   : > { %v9988_v28 = vld [vmem:[#allocation3 + $0x20] sm:$0xff]  ;;  %v2310_v22 = vld [vmem:[#allocation3 + $0x28] sm:$0x3] }
 0x295   : > { %2275 = vst.msk [vmem:[#allocation3 + $0x31] sm:$0xff] %vm1704_vm4, %v13313_v41  ;;  %v2413_v45 = vrot.slane %v9988_v28, 1  ;;  %v2415_v61 = vrot.slane %v2310_v22, 1  ;;  %v2589_v27 = vrot.slane %v9988_v28, 2  ;;  %v2591_v58 = vrot.slane %v2310_v22, 2 }
 0x296   : > { %v2040_v2 = vpop.f32.mrf.mxu0 }
 0x297   : > { %v2120_v7 = vmul.f32 %v9885_v9, %v2040_v2  ;;  %v2414_v50 = vsel %vm716_vm2, %v2412_v52, %v2413_v45  ;;  %v2416_v35 = vsel %vm716_vm2, %v2413_v45, %v2415_v61  ;;  %v2590_v1 = vsel %vm893_vm3, %v2588_v14, %v2589_v27  ;;  %v8155_v14 = vld [vmem:[#allocation2 + $0x110] sm:$0xff] }
 0x298   : > { %v10004_v44 = vpack.i.bf16 %v2416_v35, %v2414_v50  ;;  %v2592_v33 = vsel %vm893_vm3, %v2589_v27, %v2591_v58  ;;  %v1945_v52 = vpack.c.bf16 %v1924_v49, %v1923_v21  ;;  %v1695_v45 = vsel %vm493_vm0, %v8155_v14, %v6261_v16  ;;  %v6819_v50 = vpop.permute.xlu0 %6818  ;;  %v13572_v16 = vld [vmem:[#allocation65_spill] sm:$0xff] }
 0x299   : > { %v10010_v13 = vadd.f32 %v9898_v10, %v2120_v7  ;;  %v10012_v17 = vpack.i.bf16 %v2592_v33, %v2590_v1  ;;  %v1727_v61 = vsel %vm1704_vm4, %v1694_v48, %v6340_v8  ;;  %v1728_v27 = vsel %vm1704_vm4, %v1695_v45, %v6341_v53  ;;  %v13571_v1 = vld [vmem:[#allocation58_spill] sm:$0xff] }
 0x29a   : > { %6848 = vrot.lane.b32.xlu0 %v10004_v44, %s13314_s16  ;;  %v1760_v58 = vsel %vm1737_vm6, %v1727_v61, %v6420_v12  ;;  %v1761_v18 = vsel %vm1737_vm6, %v1728_v27, %v6421_v6  ;;  %v6581_v2 = vunpack.i.h.bf16 %v13569_v36  ;;  %v6661_v3 = vunpack.i.h.bf16 %v13571_v1  ;;  %v13574_v36 = vld [vmem:[#allocation11_spill] sm:$0xff] }
 0x29b   : > { %13564 = vst [vmem:[#allocation18_spill] sm:$0xff] %v10010_v13  ;;  %v13312_v29 = vmax.f32 %v10010_v13, 0.0  ;;  %v1793_v34 = vsel %vm1770_vm7, %v1760_v58, %v6500_v47  ;;  %v1794_v60 = vsel %vm1770_vm7, %v1761_v18, %v6501_v57  ;;  %v6660_v33 = vunpack.i.l.bf16 %v13571_v1  ;;  %v13575_v58 = vld [vmem:[#allocation31_spill] sm:$0xff] }
 0x29c   : > { %v10045_v5 = vld [vmem:[#allocation3 + $0x30] sm:$0xff]  ;;  %v1826_v7 = vsel %vm1803_vm9, %v1793_v34, %v6580_v59  ;;  %v6741_v46 = vunpack.i.h.bf16 %v13572_v16  ;;  %v6740_v8 = vunpack.i.l.bf16 %v13572_v16  ;;  %v6821_v21 = vunpack.i.h.bf16 %v6819_v50 }
 0x29d   : > { %2276 = vst.msk [vmem:[#allocation3 + $0x39] sm:$0xff] %vm1704_vm4, %v13312_v29  ;;  %v2417_v4 = vrot.slane %v10045_v5, 1  ;;  %v2593_v42 = vrot.slane %v10045_v5, 2  ;;  %v6820_v49 = vunpack.i.l.bf16 %v6819_v50  ;;  %v1827_v47 = vsel %vm1803_vm9, %v1794_v60, %v6581_v2  ;;  %v8156_v1 = vld [vmem:[#allocation2 + $0x120] sm:$0xff] }
 0x29e   : > { %v2043_v56 = vpop.f32.mrf.mxu0  ;;  %v6265_v59 = vunpack.i.l.bf16 %v13574_v36  ;;  %v6266_v27 = vunpack.i.h.bf16 %v13574_v36  ;;  %v6345_v18 = vunpack.i.l.bf16 %v13575_v58  ;;  %v6346_v2 = vunpack.i.h.bf16 %v13575_v58 }
 0x29f   : > { %v2121_v22 = vmul.f32 %v9885_v9, %v2043_v56 }
 0x2a1   : > { %v10042_v20 = vadd.f32 %v9898_v10, %v2121_v22  ;;  %6049 = vmatmul.msk.bf16.gmra.mxu0 %vm1971_vm12, %v1945_v52  ;;  %v1859_v22 = vsel %vm1836_vm8, %v1826_v7, %v6660_v33  ;;  %v1860_v52 = vsel %vm1836_vm8, %v1827_v47, %v6661_v3  ;;  %v13576_v7 = vld [vmem:[#allocation35_spill] sm:$0xff]  ;;  %v1696_v3 = vsel %vm493_vm0, %v8156_v1, %v6265_v59 }
 0x2a2   : > { %v1892_v45 = vsel %vm1869_vm10, %v1859_v22, %v6740_v8  ;;  %v1893_v61 = vsel %vm1869_vm10, %v1860_v52, %v6741_v46  ;;  %v6425_v50 = vunpack.i.l.bf16 %v13576_v7  ;;  %v6426_v33 = vunpack.i.h.bf16 %v13576_v7  ;;  %v8157_v46 = vld [vmem:[#allocation2 + $0x128] sm:$0xff]  ;;  %v6824_v52 = vpop.permute.xlu1 %6823 }
 0x2a3   : > { %13570 = vst [vmem:[#allocation24_spill] sm:$0xff] %v10042_v20  ;;  %v13310_v35 = vmax.f32 %v10042_v20, 0.0  ;;  %v1925_v34 = vsel %vm1902_vm11, %v1892_v45, %v6820_v49  ;;  %v1926_v60 = vsel %vm1902_vm11, %v1893_v61, %v6821_v21  ;;  %v1697_v8 = vsel %vm493_vm0, %v8157_v46, %v6266_v27  ;;  %v13581_v61 = vld [vmem:[#allocation57_spill] sm:$0xff] }
 0x2a4   : > { %v10055_v62 = vld [vmem:[#allocation3 + $0x38] sm:$0xff]  ;;  %v2313_v39 = vld [vmem:[#allocation3 + $0x40] sm:$0x3]  ;;  %v1946_v16 = vpack.c.bf16 %v1926_v60, %v1925_v34  ;;  %v1729_v21 = vsel %vm1704_vm4, %v1696_v3, %v6345_v18  ;;  %v1730_v49 = vsel %vm1704_vm4, %v1697_v8, %v6346_v2  ;;  %v6666_v27 = vunpack.i.h.bf16 %v13581_v61 }
 0x2a5   : > { %2277 = vst.msk [vmem:[#allocation3 + $0x49] sm:$0xff] %vm1704_vm4, %v13310_v35  ;;  %v2418_v43 = vrot.slane %v10055_v62, 1  ;;  %v2420_v25 = vrot.slane %v2313_v39, 1  ;;  %v2594_v15 = vrot.slane %v10055_v62, 2  ;;  %v2596_v31 = vrot.slane %v2313_v39, 2  ;;  %v13577_v39 = vld [vmem:[#allocation45_spill] sm:$0xff] }
 0x2a6   : > { %v2045_v53 = vpop.f32.mrf.mxu0  ;;  %v6665_v58 = vunpack.i.l.bf16 %v13581_v61 }
 0x2a7   : > { %v2122_v0 = vmul.f32 %v9885_v9, %v2045_v53  ;;  %v2419_v12 = vsel %vm716_vm2, %v2417_v4, %v2418_v43  ;;  %v2421_v37 = vsel %vm716_vm2, %v2418_v43, %v2420_v25  ;;  %v2595_v48 = vsel %vm893_vm3, %v2593_v42, %v2594_v15  ;;  %v13578_v25 = vld [vmem:[#allocation52_spill] sm:$0xff] }
 0x2a8   : > { %v10070_v6 = vpack.i.bf16 %v2421_v37, %v2419_v12  ;;  %v2597_v23 = vsel %vm893_vm3, %v2594_v15, %v2596_v31  ;;  %v6505_v4 = vunpack.i.l.bf16 %v13577_v39  ;;  %v6506_v43 = vunpack.i.h.bf16 %v13577_v39  ;;  %v13580_v37 = vld [vmem:[#allocation16_spill] sm:$0xff] }
 0x2a9   : > { %v10075_v56 = vadd.f32 %v9898_v10, %v2122_v0  ;;  %v10077_v57 = vpack.i.bf16 %v2597_v23, %v2595_v48  ;;  %v6585_v15 = vunpack.i.l.bf16 %v13578_v25  ;;  %v1762_v53 = vsel %vm1737_vm6, %v1729_v21, %v6425_v50 }
 0x2aa   : > { %6853 = vrot.lane.b32.xlu1 %v10070_v6, %s13314_s16  ;;  %v6271_v48 = vunpack.i.h.bf16 %v13580_v37  ;;  %v1763_v23 = vsel %vm1737_vm6, %v1730_v49, %v6426_v33  ;;  %v1795_v47 = vsel %vm1770_vm7, %v1762_v53, %v6505_v4  ;;  %v6586_v59 = vunpack.i.h.bf16 %v13578_v25 }
 0x2ab   : > { %13573 = vst [vmem:[#allocation10_spill] sm:$0xff] %v10075_v56  ;;  %v13309_v14 = vmax.f32 %v10075_v56, 0.0  ;;  %v1796_v36 = vsel %vm1770_vm7, %v1763_v23, %v6506_v43  ;;  %v1828_v22 = vsel %vm1803_vm9, %v1795_v47, %v6585_v15  ;;  %v6746_v33 = vunpack.i.h.bf16 %v9606_v51  ;;  %v13583_v23 = vld [vmem:[#allocation19_spill] sm:$0xff] }
 0x2ac   : > { %v10110_v12 = vld [vmem:[#allocation3 + $0x48] sm:$0xff]  ;;  %v6745_v39 = vunpack.i.l.bf16 %v9606_v51  ;;  %v6826_v4 = vunpack.i.h.bf16 %v6824_v52  ;;  %v1829_v21 = vsel %vm1803_vm9, %v1796_v36, %v6586_v59  ;;  %v6270_v53 = vunpack.i.l.bf16 %v13580_v37 }
 0x2ad   : > { %2278 = vst.msk [vmem:[#allocation3 + $0x51] sm:$0xff] %vm1704_vm4, %v13309_v14  ;;  %v2422_v60 = vrot.slane %v10110_v12, 1  ;;  %v2598_v2 = vrot.slane %v10110_v12, 2  ;;  %v6351_v47 = vunpack.i.h.bf16 %v13583_v23  ;;  %v1862_v61 = vsel %vm1836_vm8, %v1829_v21, %v6666_v27  ;;  %v13585_v27 = vld [vmem:[#allocation46_spill] sm:$0xff] }
 0x2ae   : > { %v2048_v42 = vpop.f32.mrf.mxu0  ;;  %v1895_v59 = vsel %vm1869_vm10, %v1862_v61, %v6746_v33  ;;  %v6829_v61 = vpop.permute.xlu2 %6828 }
 0x2af   : > { %v2123_v31 = vmul.f32 %v9885_v9, %v2048_v42  ;;  %v6825_v42 = vunpack.i.l.bf16 %v6824_v52  ;;  %v1861_v52 = vsel %vm1836_vm8, %v1828_v22, %v6665_v58  ;;  %v1928_v22 = vsel %vm1902_vm11, %v1895_v59, %v6826_v4 }
 0x2b0   : > { %v1894_v36 = vsel %vm1869_vm10, %v1861_v52, %v6745_v39  ;;  %v6511_v58 = vunpack.i.h.bf16 %v13585_v27  ;;  %v8159_v39 = vld [vmem:[#allocation2 + $0x138] sm:$0xff] }
 0x2b1   : > { %v10107_v0 = vadd.f32 %v9898_v10, %v2123_v31  ;;  %6050 = vmatmul.msk.bf16.gmra.mxu0 %vm1971_vm12, %v1946_v16 }
 0x2b3   : > { %13579 = vst [vmem:[#allocation25_spill] sm:$0xff] %v10107_v0  ;;  %v13307_v45 = vmax.f32 %v10107_v0, 0.0 }
 0x2b4   : > { %v10121_v18 = vld [vmem:[#allocation3 + $0x50] sm:$0xff]  ;;  %v2316_v34 = vld [vmem:[#allocation3 + $0x58] sm:$0x3] }
 0x2b5   : > { %2279 = vst.msk [vmem:[#allocation3 + $0x61] sm:$0xff] %vm1704_vm4, %v13307_v45  ;;  %v2423_v7 = vrot.slane %v10121_v18, 1  ;;  %v2425_v50 = vrot.slane %v2316_v34, 1  ;;  %v2599_v1 = vrot.slane %v10121_v18, 2  ;;  %v2601_v3 = vrot.slane %v2316_v34, 2 }
 0x2b6   : > { %v2050_v43 = vpop.f32.mrf.mxu0  ;;  %v6350_v34 = vunpack.i.l.bf16 %v13583_v23 }
 0x2b7   : > { %v2124_v25 = vmul.f32 %v9885_v9, %v2050_v43  ;;  %v2424_v15 = vsel %vm716_vm2, %v2422_v60, %v2423_v7  ;;  %v2426_v31 = vsel %vm716_vm2, %v2423_v7, %v2425_v50  ;;  %v2600_v16 = vsel %vm893_vm3, %v2598_v2, %v2599_v1  ;;  %v13584_v2 = vld [vmem:[#allocation39_spill] sm:$0xff] }
 0x2b8   : > { %v10136_v46 = vpack.i.bf16 %v2426_v31, %v2424_v15  ;;  %v2602_v8 = vsel %vm893_vm3, %v2599_v1, %v2601_v3  ;;  %v6431_v7 = vunpack.i.h.bf16 %v13584_v2  ;;  %v6430_v37 = vunpack.i.l.bf16 %v13584_v2  ;;  %v8158_v3 = vld [vmem:[#allocation2 + $0x140] sm:$0xff] }
 0x2b9   : > { %v10141_v49 = vadd.f32 %v9898_v10, %v2124_v25  ;;  %v10143_v51 = vpack.i.bf16 %v2602_v8, %v2600_v16  ;;  %v1927_v50 = vsel %vm1902_vm11, %v1894_v36, %v6825_v42  ;;  %v6510_v1 = vunpack.i.l.bf16 %v13585_v27  ;;  %v13586_v25 = vld [vmem:[#allocation49_spill] sm:$0xff]  ;;  %v13591_v27 = vld [vmem:[#allocation66_spill] sm:$0xff] }
 0x2ba   : > { %6858 = vrot.lane.b32.xlu2 %v10136_v46, %s13314_s16  ;;  %v1699_v33 = vsel %vm493_vm0, %v8158_v3, %v6271_v48  ;;  %v1698_v43 = vsel %vm493_vm0, %v8159_v39, %v6270_v53  ;;  %v6591_v15 = vunpack.i.h.bf16 %v13586_v25  ;;  %v6590_v42 = vunpack.i.l.bf16 %v13586_v25 }
 0x2bb   : > { %13582 = vst [vmem:[#allocation30_spill] sm:$0xff] %v10141_v49  ;;  %v13304_v60 = vmax.f32 %v10141_v49, 0.0  ;;  %v1732_v4 = vsel %vm1704_vm4, %v1699_v33, %v6351_v47  ;;  %v1731_v16 = vsel %vm1704_vm4, %v1698_v43, %v6350_v34  ;;  %v1947_v21 = vpack.c.bf16 %v1928_v22, %v1927_v50  ;;  %v13588_v34 = vld [vmem:[#allocation23_spill] sm:$0xff] }
 0x2bc   : > { %v1765_v23 = vsel %vm1737_vm6, %v1732_v4, %v6431_v7  ;;  %v1764_v52 = vsel %vm1737_vm6, %v1731_v16, %v6430_v37  ;;  %v10179_v47 = vld [vmem:[#allocation3 + $0x60] sm:$0xff]  ;;  %v6276_v59 = vunpack.i.h.bf16 %v13588_v34  ;;  %v6750_v3 = vunpack.i.l.bf16 %v13591_v27 }
 0x2bd   : > { %2280 = vst.msk [vmem:[#allocation3 + $0x69] sm:$0xff] %vm1704_vm4, %v13304_v60  ;;  %v1797_v48 = vsel %vm1770_vm7, %v1764_v52, %v6510_v1  ;;  %v1798_v53 = vsel %vm1770_vm7, %v1765_v23, %v6511_v58  ;;  %v13590_v37 = vld [vmem:[#allocation62_spill] sm:$0xff]  ;;  %v6751_v58 = vunpack.i.h.bf16 %v13591_v27  ;;  %v6831_v33 = vunpack.i.h.bf16 %v6829_v61 }
 0x2be   : > { %v2053_v31 = vpop.f32.mrf.mxu0  ;;  %v1830_v2 = vsel %vm1803_vm9, %v1797_v48, %v6590_v42  ;;  %v1831_v7 = vsel %vm1803_vm9, %v1798_v53, %v6591_v15  ;;  %v6671_v50 = vunpack.i.h.bf16 %v13590_v37  ;;  %v6670_v22 = vunpack.i.l.bf16 %v13590_v37 }
 0x2bf   : > { %v2125_v8 = vmul.f32 %v9885_v9, %v2053_v31  ;;  %v2427_v25 = vrot.slane %v10179_v47, 1  ;;  %v2603_v15 = vrot.slane %v10179_v47, 2  ;;  %v2583_v23 = vrot.slane %v9948_v55, 2 }
 0x2c0   : > { %v2584_v52 = vrot.slane %v9950_v24, 2  ;;  %v2586_v48 = vrot.slane %v9957_v38, 2  ;;  %v6275_v38 = vunpack.i.l.bf16 %v13588_v34 }
 0x2c1   : > { %v10176_v36 = vadd.f32 %v9898_v10, %v2125_v8  ;;  %6051 = vmatmul.msk.bf16.gmra.mxu0 %vm1971_vm12, %v1947_v21  ;;  %v6830_v8 = vunpack.i.l.bf16 %v6829_v61  ;;  %v1863_v61 = vsel %vm1836_vm8, %v1830_v2, %v6670_v22 }
 0x2c2   : > { %6883 = vrot.lane.b32.xlu2 %v10077_v57, %s13589_s23  ;;  %v2585_v2 = vsel %vm893_vm3, %v2583_v23, %v2584_v52  ;;  %v2587_v22 = vsel %vm893_vm3, %v2584_v52, %v2586_v48  ;;  %v8161_v23 = vld [vmem:[#allocation2 + $0x150] sm:$0xff] }
 0x2c3   : > { %13587 = vst [vmem:[#allocation12_spill] sm:$0xff] %v10176_v36  ;;  %v13303_v1 = vmax.f32 %v10176_v36, 0.0  ;;  %v1700_v52 = vsel %vm493_vm0, %v8161_v23, %v6275_v38  ;;  %v13595_v48 = vld [vmem:[#allocation42_spill] sm:$0xff] }
 0x2c4   : > { %v10191_v39 = vld [vmem:[#allocation3 + $0x68] sm:$0xff]  ;;  %v2319_v43 = vld [vmem:[#allocation3 + $0x70] sm:$0x3] }
 0x2c5   : > { %2281 = vst.msk [vmem:[#allocation3 + $0x79] sm:$0xff] %vm1704_vm4, %v13303_v1  ;;  %v2428_v42 = vrot.slane %v10191_v39, 1  ;;  %v2430_v31 = vrot.slane %v2319_v43, 1  ;;  %v2604_v4 = vrot.slane %v10191_v39, 2  ;;  %v2606_v16 = vrot.slane %v2319_v43, 2 }
 0x2c6   : > { %v2055_v21 = vpop.f32.mrf.mxu0 }
 0x2c7   : > { %v2126_v53 = vmul.f32 %v9885_v9, %v2055_v21  ;;  %v2429_v37 = vsel %vm716_vm2, %v2427_v25, %v2428_v42  ;;  %v2431_v27 = vsel %vm716_vm2, %v2428_v42, %v2430_v31  ;;  %v2605_v1 = vsel %vm893_vm3, %v2603_v15, %v2604_v4  ;;  %v13593_v31 = vld [vmem:[#allocation32_spill] sm:$0xff] }
 0x2c8   : > { %v10207_v60 = vpack.i.bf16 %v2431_v27, %v2429_v37  ;;  %v2607_v43 = vsel %vm893_vm3, %v2604_v4, %v2606_v16  ;;  %v1864_v21 = vsel %vm1836_vm8, %v1831_v7, %v6671_v50  ;;  %v1896_v25 = vsel %vm1869_vm10, %v1863_v61, %v6750_v3  ;;  %v8160_v50 = vld [vmem:[#allocation2 + $0x158] sm:$0xff]  ;;  %v13594_v16 = vld [vmem:[#allocation40_spill] sm:$0xff] }
 0x2c9   : > { %v10212_v55 = vadd.f32 %v9898_v10, %v2126_v53  ;;  %v10214_v24 = vpack.i.bf16 %v2607_v43, %v2605_v1  ;;  %v1897_v15 = vsel %vm1869_vm10, %v1864_v21, %v6751_v58  ;;  %v6356_v1 = vunpack.i.h.bf16 %v13593_v31  ;;  %v13596_v43 = vld [vmem:[#allocation53_spill] sm:$0xff] }
 0x2ca   : > { %6863 = vrot.lane.b32.xlu0 %v10207_v60, %s13314_s16  ;;  %v6355_v4 = vunpack.i.l.bf16 %v13593_v31  ;;  %v1929_v34 = vsel %vm1902_vm11, %v1896_v25, %v6830_v8  ;;  %v1930_v7 = vsel %vm1902_vm11, %v1897_v15, %v6831_v33  ;;  %v1701_v3 = vsel %vm493_vm0, %v8160_v50, %v6276_v59 }
 0x2cb   : > { %13592 = vst [vmem:[#allocation15_spill] sm:$0xff] %v10212_v55  ;;  %v13306_v42 = vmax.f32 %v10212_v55, 0.0  ;;  %v6436_v53 = vunpack.i.h.bf16 %v13594_v16  ;;  %v6435_v58 = vunpack.i.l.bf16 %v13594_v16  ;;  %v6516_v37 = vunpack.i.h.bf16 %v13595_v48 }
 0x2cc   : > { %v6515_v8 = vunpack.i.l.bf16 %v13595_v48  ;;  %v6867_v33 = vpack.i.bf16 %v2587_v22, %v2585_v2  ;;  %v6596_v61 = vunpack.i.h.bf16 %v13596_v43  ;;  %v6595_v59 = vunpack.i.l.bf16 %v13596_v43  ;;  %v10249_v2 = vld [vmem:[#allocation3 + $0x78] sm:$0xff] }
 0x2cd   : > { %2282 = vst.msk [vmem:[#allocation3 + $0x81] sm:$0xff] %vm1704_vm4, %v13306_v42  ;;  %v1948_v25 = vpack.c.bf16 %v1930_v7, %v1929_v34  ;;  %v1734_v15 = vsel %vm1704_vm4, %v1701_v3, %v6356_v1  ;;  %v1733_v31 = vsel %vm1704_vm4, %v1700_v52, %v6355_v4  ;;  %v13598_v34 = vld [vmem:[#allocation61_spill] sm:$0xff]  ;;  %v6834_v3 = vpop.permute.xlu0 %6833  ;;  %v6756_v52 = vunpack.i.h.bf16 %v9597_v40 }
 0x2ce   : > { %v2058_v27 = vpop.f32.mrf.mxu0  ;;  %v1766_v50 = vsel %vm1737_vm6, %v1733_v31, %v6435_v58  ;;  %v1767_v38 = vsel %vm1737_vm6, %v1734_v15, %v6436_v53  ;;  %v6676_v7 = vunpack.i.h.bf16 %v13598_v34  ;;  %v6675_v58 = vunpack.i.l.bf16 %v13598_v34 }
 0x2cf   : > { %v2127_v21 = vmul.f32 %v9885_v9, %v2058_v27  ;;  %v1799_v22 = vsel %vm1770_vm7, %v1766_v50, %v6515_v8  ;;  %v1800_v23 = vsel %vm1770_vm7, %v1767_v38, %v6516_v37  ;;  %v2608_v37 = vrot.slane %v10249_v2, 2 }
 0x2d0   : > { %v1832_v1 = vsel %vm1803_vm9, %v1799_v22, %v6595_v59  ;;  %v1833_v4 = vsel %vm1803_vm9, %v1800_v23, %v6596_v61  ;;  %v2432_v27 = vrot.slane %v10249_v2, 1  ;;  %v6835_v15 = vunpack.i.l.bf16 %v6834_v3 }
 0x2d1   : > { %v10246_v16 = vadd.f32 %v9898_v10, %v2127_v21  ;;  %6052 = vmatmul.msk.bf16.gmra.mxu0 %vm1971_vm12, %v1948_v25  ;;  %v6755_v21 = vunpack.i.l.bf16 %v9597_v40  ;;  %v6836_v25 = vunpack.i.h.bf16 %v6834_v3  ;;  %v13600_v40 = vld [vmem:[#allocation14_spill] sm:$0xff] }
 0x2d2   : > { %6868 = vrot.lane.b32.xlu0 %v6867_v33, %s13589_s23  ;;  %v6281_v3 = vunpack.i.h.bf16 %v13600_v40  ;;  %v6280_v45 = vunpack.i.l.bf16 %v13600_v40 }
 0x2d3   : > { %13597 = vst [vmem:[#allocation21_spill] sm:$0xff] %v10246_v16  ;;  %v13305_v53 = vmax.f32 %v10246_v16, 0.0 }
 0x2d4   : > { %v10260_v48 = vld [vmem:[#allocation3 + $0x80] sm:$0xff]  ;;  %v2322_v8 = vld [vmem:[#allocation3 + $0x88] sm:$0x3] }
 0x2d5   : > { %2283 = vst.msk [vmem:[#allocation3 + $0x91] sm:$0xff] %vm1704_vm4, %v13305_v53  ;;  %v2609_v33 = vrot.slane %v10260_v48, 2  ;;  %v2611_v43 = vrot.slane %v2322_v8, 2  ;;  %v2433_v61 = vrot.slane %v10260_v48, 1  ;;  %v2435_v59 = vrot.slane %v2322_v8, 1 }
 0x2d6   : > { %v2060_v31 = vpop.f32.mrf.mxu0 }
 0x2d7   : > { %v2128_v50 = vmul.f32 %v9885_v9, %v2060_v31  ;;  %v2610_v38 = vsel %vm893_vm3, %v2608_v37, %v2609_v33  ;;  %v2612_v22 = vsel %vm893_vm3, %v2609_v33, %v2611_v43  ;;  %v2434_v23 = vsel %vm716_vm2, %v2432_v27, %v2433_v61  ;;  %v13601_v43 = vld [vmem:[#allocation34_spill] sm:$0xff] }
 0x2d8   : > { %v10274_v34 = vpack.i.bf16 %v2612_v22, %v2610_v38  ;;  %v2436_v53 = vsel %vm716_vm2, %v2433_v61, %v2435_v59  ;;  %v1865_v31 = vsel %vm1836_vm8, %v1832_v1, %v6675_v58  ;;  %v1866_v37 = vsel %vm1836_vm8, %v1833_v4, %v6676_v7  ;;  %v13602_v58 = vld [vmem:[#allocation36_spill] sm:$0xff] }
 0x2d9   : > { %v10278_v42 = vadd.f32 %v9898_v10, %v2128_v50  ;;  %v10280_v8 = vpack.i.bf16 %v2436_v53, %v2434_v23  ;;  %v1898_v27 = vsel %vm1869_vm10, %v1865_v31, %v6755_v21  ;;  %v1899_v33 = vsel %vm1869_vm10, %v1866_v37, %v6756_v52  ;;  %v8162_v52 = vld [vmem:[#allocation2 + $0x170] sm:$0xff]  ;;  %v8163_v38 = vld [vmem:[#allocation2 + $0x168] sm:$0xff]  ;;  %v13603_v23 = vld [vmem:[#allocation47_spill] sm:$0xff] }
 0x2da   : > { %6888 = vrot.lane.b32.xlu0 %v10143_v51, %s13589_s23  ;;  %6898 = vrot.lane.b32.xlu2 %v10274_v34, %s13589_s23  ;;  %v6361_v61 = vunpack.i.h.bf16 %v13601_v43  ;;  %v6360_v1 = vunpack.i.l.bf16 %v13601_v43  ;;  %v1931_v4 = vsel %vm1902_vm11, %v1898_v27, %v6835_v15  ;;  %v1932_v7 = vsel %vm1902_vm11, %v1899_v33, %v6836_v25  ;;  %v13604_v25 = vld [vmem:[#allocation54_spill] sm:$0xff] }
 0x2db   : > { %13599 = vst [vmem:[#allocation26_spill] sm:$0xff] %v10278_v42  ;;  %v13308_v53 = vmax.f32 %v10278_v42, 0.0  ;;  %6873 = vrot.lane.b32.xlu1 %v10280_v8, %s13314_s16  ;;  %v6441_v59 = vunpack.i.h.bf16 %v13602_v58  ;;  %v6440_v50 = vunpack.i.l.bf16 %v13602_v58  ;;  %v1703_v21 = vsel %vm493_vm0, %v8162_v52, %v6281_v3 }
 0x2dc   : > { %v1702_v22 = vsel %vm493_vm0, %v8163_v38, %v6280_v45  ;;  %v6521_v40 = vunpack.i.h.bf16 %v13603_v23  ;;  %v6520_v15 = vunpack.i.l.bf16 %v13603_v23  ;;  %v6601_v37 = vunpack.i.h.bf16 %v13604_v25  ;;  %v10319_v38 = vld [vmem:[#allocation3 + $0x90] sm:$0xff] }
 0x2dd   : > { %2284 = vst.msk [vmem:[#allocation3 + $0x99] sm:$0xff] %vm1704_vm4, %v13308_v53  ;;  %v6600_v27 = vunpack.i.l.bf16 %v13604_v25  ;;  %v1949_v43 = vpack.c.bf16 %v1932_v7, %v1931_v4  ;;  %v1735_v58 = vsel %vm1704_vm4, %v1702_v22, %v6360_v1  ;;  %v1736_v53 = vsel %vm1704_vm4, %v1703_v21, %v6361_v61  ;;  %v13606_v61 = vld [vmem:[#allocation60_spill] sm:$0xff] }
 0x2de   : > { %v2063_v31 = vpop.f32.mrf.mxu0  ;;  %v1768_v3 = vsel %vm1737_vm6, %v1735_v58, %v6440_v50  ;;  %v1769_v45 = vsel %vm1737_vm6, %v1736_v53, %v6441_v59  ;;  %v6681_v7 = vunpack.i.h.bf16 %v13606_v61  ;;  %v6839_v50 = vpop.permute.xlu1 %6838  ;;  %v6680_v59 = vunpack.i.l.bf16 %v13606_v61 }
 0x2df   : > { %v2129_v33 = vmul.f32 %v9885_v9, %v2063_v31  ;;  %v1801_v23 = vsel %vm1770_vm7, %v1768_v3, %v6520_v15  ;;  %v1802_v31 = vsel %vm1770_vm7, %v1769_v45, %v6521_v40  ;;  %v6761_v21 = vunpack.i.h.bf16 %v9633_v63 }
 0x2e0   : > { %v1834_v4 = vsel %vm1803_vm9, %v1801_v23, %v6600_v27  ;;  %v1835_v1 = vsel %vm1803_vm9, %v1802_v31, %v6601_v37  ;;  %v2613_v40 = vrot.slane %v10319_v38, 2  ;;  %v2437_v25 = vrot.slane %v10319_v38, 1 }
 0x2e1   : > { %v10316_v52 = vadd.f32 %v9898_v10, %v2129_v33  ;;  %6053 = vmatmul.msk.bf16.gmra.mxu0 %vm1971_vm12, %v1949_v43  ;;  %v6760_v58 = vunpack.i.l.bf16 %v9633_v63  ;;  %v6841_v3 = vunpack.i.h.bf16 %v6839_v50  ;;  %v6840_v45 = vunpack.i.l.bf16 %v6839_v50 }
 0x2e2   : > { %v1867_v63 = vsel %vm1836_vm8, %v1834_v4, %v6680_v59  ;;  %v1868_v50 = vsel %vm1836_vm8, %v1835_v1, %v6681_v7  ;;  %vm3555_vm0 = vcmask 457728   ;;  %vm3673_vm6 = vcmask 588800  }
 0x2e3   : > { %13605 = vst [vmem:[#allocation56_spill] sm:$0xff] %v10316_v52  ;;  %v13311_v53 = vmax.f32 %v10316_v52, 0.0  ;;  %6878 = vrot.lane.b32.xlu1 %v10012_v17, %s13589_s23 }
 0x2e4   : > { %v10331_v22 = vld [vmem:[#allocation3 + $0x98] sm:$0xff]  ;;  %v2325_v15 = vld [vmem:[#allocation3 + $0xa0] sm:$0x3] }
 0x2e5   : > { %2285 = vst.msk [vmem:[#allocation3 + $0xa9] sm:$0xff] %vm1704_vm4, %v13311_v53  ;;  %v2614_v37 = vrot.slane %v10331_v22, 2  ;;  %v2616_v27 = vrot.slane %v2325_v15, 2  ;;  %v2438_v33 = vrot.slane %v10331_v22, 1  ;;  %v2440_v43 = vrot.slane %v2325_v15, 1 }
 0x2e6   : > { %v2065_v23 = vpop.f32.mrf.mxu0 }
 0x2e7   : > { %v2130_v31 = vmul.f32 %v9885_v9, %v2065_v23  ;;  %v2615_v61 = vsel %vm893_vm3, %v2613_v40, %v2614_v37  ;;  %v2617_v14 = vsel %vm893_vm3, %v2614_v37, %v2616_v27  ;;  %v2439_v35 = vsel %vm716_vm2, %v2437_v25, %v2438_v33 }
 0x2e8   : > { %v10345_v53 = vpack.i.bf16 %v2617_v14, %v2615_v61  ;;  %v2441_v29 = vsel %vm716_vm2, %v2438_v33, %v2440_v43  ;;  %v1900_v40 = vsel %vm1869_vm10, %v1867_v63, %v6760_v58  ;;  %v1901_v25 = vsel %vm1869_vm10, %v1868_v50, %v6761_v21 }
 0x2e9   : > { %v10349_v41 = vadd.f32 %v9898_v10, %v2130_v31  ;;  %v10351_v15 = vpack.i.bf16 %v2441_v29, %v2439_v35  ;;  %v1933_v29 = vsel %vm1902_vm11, %v1900_v40, %v6840_v45  ;;  %v1934_v35 = vsel %vm1902_vm11, %v1901_v25, %v6841_v3 }
 0x2ea   : > { %6908 = vrot.lane.b32.xlu0 %v10345_v53, %s13589_s23  ;;  %v1950_v7 = vpack.c.bf16 %v1934_v35, %v1933_v29  ;;  %v6912_v21 = vpack.i.bf16 %v9988_v28, %v9977_v11  ;;  %v6917_v37 = vpack.i.bf16 %v10055_v62, %v10045_v5  ;;  %v6942_v35 = vpack.i.bf16 %v10260_v48, %v10249_v2 }
 0x2eb   : > { %13607 = vst [vmem:[#allocation63_spill] sm:$0xff] %v10349_v41  ;;  %v13324_v14 = vmax.f32 %v10349_v41, 0.0  ;;  %6893 = vrot.lane.b32.xlu1 %v10214_v24, %s13589_s23  ;;  %6903 = vrot.lane.b32.xlu2 %v10351_v15, %s13314_s16  ;;  %v6937_v48 = vpack.i.bf16 %v10191_v39, %v10179_v47 }
 0x2ec   : > { %v10378_v27 = vld [vmem:[#allocation3 + $0xa8] sm:$0xff] }
 0x2ed   : > { %2286 = vst.msk [vmem:[#allocation3 + $0xb1] sm:$0xff] %vm1704_vm4, %v13324_v14  ;;  %v2618_v3 = vrot.slane %v10378_v27, 2  ;;  %v2442_v45 = vrot.slane %v10378_v27, 1 }
 0x2ee   : > { %v2068_v4 = vpop.f32.mrf.mxu0 }
 0x2ef   : > { %v2131_v1 = vmul.f32 %v9885_v9, %v2068_v4 }
 0x2f1   : > { %v10371_v59 = vadd.f32 %v9898_v10, %v2131_v1  ;;  %6054 = vmatmul.msk.bf16.gmra.mxu0 %vm1971_vm12, %v1950_v7 }
 0x2f3   : > { %13608 = vst [vmem:[#allocation9_spill] sm:$0xff] %v10371_v59  ;;  %v13322_v33 = vmax.f32 %v10371_v59, 0.0  ;;  %6913 = vrot.lane.b32.xlu1 %v6912_v21, %s13609_s17  ;;  %6918 = vrot.lane.b32.xlu2 %v6917_v37, %s13609_s17 }
 0x2f4   : > { %v10383_v43 = vld [vmem:[#allocation3 + $0xb0] sm:$0xff]  ;;  %v2328_v58 = vld [vmem:[#allocation3 + $0xb8] sm:$0x3] }
 0x2f5   : > { %2287 = vst.msk [vmem:[#allocation3 + $0xc1] sm:$0xff] %vm1704_vm4, %v13322_v33  ;;  %v2619_v11 = vrot.slane %v10383_v43, 2  ;;  %v2621_v28 = vrot.slane %v2328_v58, 2  ;;  %v2443_v5 = vrot.slane %v10383_v43, 1  ;;  %v2445_v62 = vrot.slane %v2328_v58, 1 }
 0x2f6   : > { %v2070_v23 = vpop.f32.mrf.mxu0  ;;  %v6927_v58 = vpack.i.bf16 %v10121_v18, %v10110_v12 }
 0x2f7   : > { %v2132_v31 = vmul.f32 %v9885_v9, %v2070_v23  ;;  %v2620_v61 = vsel %vm893_vm3, %v2618_v3, %v2619_v11  ;;  %v2622_v63 = vsel %vm893_vm3, %v2619_v11, %v2621_v28  ;;  %v2444_v50 = vsel %vm716_vm2, %v2442_v45, %v2443_v5 }
 0x2f8   : > { %v10396_v40 = vpack.i.bf16 %v2622_v63, %v2620_v61  ;;  %v2446_v25 = vsel %vm716_vm2, %v2443_v5, %v2445_v62  ;;  %v10434_v62 = vld [vmem:[%s13546_s2] ss:$0 sm:$0xff]  ;;  %s13740_s2 = smov 64  }
 0x2f9   : > { %v10400_v29 = vadd.f32 %v9898_v10, %v2132_v31  ;;  %v10404_v4 = vpack.i.bf16 %v2446_v25, %v2444_v50 }
 0x2fb   : > { %13610 = vst [vmem:[#allocation28_spill] sm:$0xff] %v10400_v29  ;;  %v13321_v1 = vmax.f32 %v10400_v29, 0.0  ;;  %6943 = vrot.lane.b32.xlu2 %v6942_v35, %s13609_s17  ;;  %6933 = vrot.lane.b32.xlu1 %v10396_v40, %s13589_s23  ;;  %v10448_v35 = vld [vmem:[%s13547_s3] ss:$0 sm:$0xff]  ;;  %s13743_s3 = smov 48  }
 0x2fc   : > { %6923 = vrot.lane.b32.xlu0 %v10404_v4, %s13314_s16  ;;  %v2329_v37 = vld [vmem:[#allocation3 + $0xc0] sm:$0xff]  ;;  %s13615_s16 = smov 32  }
 0x2fd   : > { %2288 = vst.msk [vmem:[#allocation3 + $0xc9] sm:$0xff] %vm1704_vm4, %v13321_v1  ;;  %v2447_v28 = vrot.slane %v2329_v37, 1 }
 0x2fe   : > { %v2073_v7 = vpop.f32.mrf.mxu0 }
 0x2ff   : > { %v2133_v21 = vmul.f32 %v9885_v9, %v2073_v7  ;;  %v2623_v9 = vrot.slane %v2329_v37, 2 }
 0x301   : > { %v10417_v2 = vadd.f32 %v9898_v10, %v2133_v21 }
 0x303   : > { %13611 = vst [vmem:[#allocation33_spill] sm:$0xff] %v10417_v2  ;;  %v13319_v3 = vmax.f32 %v10417_v2, 0.0  ;;  %6938 = vrot.lane.b32.xlu1 %v6937_v48, %s13609_s17  ;;  %v10457_v48 = vpack.i.bf16 %v10331_v22, %v10319_v38  ;;  %v10475_v22 = vpack.i.bf16 %v10383_v43, %v10378_v27 }
 0x304   : > { %6928 = vrot.lane.b32.xlu0 %v6927_v58, %s13609_s17  ;;  %v2330_v45 = vld [vmem:[#allocation3 + $0xc8] sm:$0xff]  ;;  %v2331_v11 = vld [vmem:[#allocation3 + $0xd0] sm:$0x3] }
 0x305   : > { %2289 = vst.msk [vmem:[#allocation3 + $0xd9] sm:$0xff] %vm1704_vm4, %v13319_v3  ;;  %v10429_v10 = vpack.i.bf16 %v2330_v45, %v2329_v37  ;;  %v2448_v47 = vrot.slane %v2330_v45, 1  ;;  %v2450_v39 = vrot.slane %v2331_v11, 1  ;;  %v2624_v5 = vrot.slane %v2330_v45, 2 }
 0x306   : > { %v2075_v12 = vpop.f32.mrf.mxu0  ;;  %v2626_v18 = vrot.slane %v2331_v11, 2 }
 0x307   : > { %v2134_v23 = vmul.f32 %v10434_v62, %v2075_v12  ;;  %6963 = vrot.lane.b32.xlu2 %v10429_v10, %s13609_s17  ;;  %v2449_v31 = vsel %vm716_vm2, %v2447_v28, %v2448_v47  ;;  %v2451_v61 = vsel %vm716_vm2, %v2448_v47, %v2450_v39  ;;  %v2625_v63 = vsel %vm893_vm3, %v2623_v9, %v2624_v5 }
 0x308   : > { %v10442_v50 = vpack.i.bf16 %v2451_v61, %v2449_v31  ;;  %v2627_v25 = vsel %vm893_vm3, %v2624_v5, %v2626_v18 }
 0x309   : > { %v10451_v7 = vadd.f32 %v10448_v35, %v2134_v23  ;;  %v10453_v21 = vpack.i.bf16 %v2627_v25, %v2625_v63 }
 0x30b   : > { %13612 = vst [vmem:[#allocation43_spill] sm:$0xff] %v10451_v7  ;;  %v13318_v37 = vmax.f32 %v10451_v7, 0.0  ;;  %6953 = vrot.lane.b32.xlu1 %v10442_v50, %s13613_s25 }
 0x30c   : > { %6948 = vrot.lane.b32.xlu0 %v10457_v48, %s13609_s17  ;;  %v2332_v11 = vld [vmem:[#allocation3 + $0xd8] sm:$0xff] }
 0x30d   : > { %2290 = vst.msk [vmem:[#allocation3 + $0xe1] sm:$0xff] %vm1704_vm4, %v13318_v37  ;;  %v2628_v5 = vrot.slane %v2332_v11, 2  ;;  %v2452_v27 = vrot.slane %v2332_v11, 1 }
 0x30e   : > { %v2078_v58 = vpop.f32.mrf.mxu0 }
 0x30f   : > { %v2135_v45 = vmul.f32 %v10434_v62, %v2078_v58  ;;  %6968 = vrot.lane.b32.xlu2 %v10453_v21, %s13589_s23 }
 0x311   : > { %v10471_v38 = vadd.f32 %v10448_v35, %v2135_v45 }
 0x313   : > { %13614 = vst [vmem:[#allocation50_spill] sm:$0xff] %v10471_v38  ;;  %v13317_v28 = vmax.f32 %v10471_v38, 0.0  ;;  %6958 = vrot.lane.b32.xlu1 %v10475_v22, %s13609_s17 }
 0x314   : > { %v2333_v9 = vld [vmem:[#allocation3 + $0xe0] sm:$0xff]  ;;  %v2334_v47 = vld [vmem:[#allocation3 + $0xe8] sm:$0x3] }
 0x315   : > { %2291 = vst.msk [vmem:[#allocation3 + $0xf1] sm:$0xff] %vm1704_vm4, %v13317_v28  ;;  %v10483_v39 = vpack.i.bf16 %v2333_v9, %v2332_v11  ;;  %v2629_v12 = vrot.slane %v2333_v9, 2  ;;  %v2631_v23 = vrot.slane %v2334_v47, 2  ;;  %v2453_v43 = vrot.slane %v2333_v9, 1 }
 0x316   : > { %v2080_v18 = vpop.f32.mrf.mxu0  ;;  %v2455_v31 = vrot.slane %v2334_v47, 1 }
 0x317   : > { %v2136_v61 = vmul.f32 %v10434_v62, %v2080_v18  ;;  %6973 = vrot.lane.b32.xlu2 %v10004_v44, %s13615_s16  ;;  %6978 = vrot.lane.b32.xlu0 %v10483_v39, %s13609_s17  ;;  %v2630_v63 = vsel %vm893_vm3, %v2628_v5, %v2629_v12  ;;  %v2632_v25 = vsel %vm893_vm3, %v2629_v12, %v2631_v23  ;;  %v10512_v18 = vpop.permute.xlu2 %6843 }
 0x318   : > { %v2454_v58 = vsel %vm716_vm2, %v2452_v27, %v2453_v43  ;;  %v2456_v45 = vsel %vm716_vm2, %v2453_v43, %v2455_v31  ;;  %v10497_v9 = vpack.i.bf16 %v2632_v25, %v2630_v63 }
 0x319   : > { %v10495_v11 = vadd.f32 %v10448_v35, %v2136_v61  ;;  %v10499_v47 = vpack.i.bf16 %v2456_v45, %v2454_v58 }
 0x31b   : > { %13616 = vst [vmem:[#allocation55_spill] sm:$0xff] %v10495_v11  ;;  %v13316_v44 = vmax.f32 %v10495_v11, 0.0  ;;  %6998 = vrot.lane.b32.xlu1 %v10136_v46, %s13615_s16 }
 0x31c   : > { %v2335_v27 = vld [vmem:[#allocation3 + $0xf0] sm:$0xff] }
 0x31d   : > { %2292 = vst.msk [vmem:[#allocation3 + $0xf9] sm:$0xff] %vm1704_vm4, %v13316_v44  ;;  %v2633_v63 = vrot.slane %v2335_v27, 2  ;;  %v2457_v28 = vrot.slane %v2335_v27, 1 }
 0x31e   : > { %v2083_v5 = vpop.f32.mrf.mxu0 }
 0x31f   : > { %v2137_v12 = vmul.f32 %v10434_v62, %v2083_v5  ;;  %6988 = vrot.lane.b32.xlu0 %v10497_v9, %s13589_s23  ;;  %6983 = vrot.lane.b32.xlu2 %v10499_v47, %s13613_s25  ;;  %v10541_v33 = vpop.permute.xlu2 %6858 }
 0x320   : > { %13619 = vst [vmem:[#allocation37_spill] sm:$0xff] %v10541_v33 }
 0x321   : > { %v10515_v23 = vadd.f32 %v10448_v35, %v2137_v12 }
 0x323   : > { %13617 = vst [vmem:[#allocation13_spill] sm:$0xff] %v10515_v23  ;;  %v13320_v43 = vmax.f32 %v10515_v23, 0.0 }
 0x324   : > { %v2336_v31 = vld [vmem:[#allocation3 + $0xf8] sm:$0xff]  ;;  %v2337_v61 = vld [vmem:[#allocation3 + $0x100] sm:$0x3] }
 0x325   : > { %2293 = vst.msk [vmem:[#allocation3 + $0x109] sm:$0xff] %vm1704_vm4, %v13320_v43  ;;  %v10521_v25 = vpack.i.bf16 %v2336_v31, %v2335_v27  ;;  %v2634_v58 = vrot.slane %v2336_v31, 2  ;;  %v2636_v45 = vrot.slane %v2337_v61, 2  ;;  %v2458_v5 = vrot.slane %v2336_v31, 1 }
 0x326   : > { %v2085_v44 = vpop.f32.mrf.mxu0  ;;  %v2460_v37 = vrot.slane %v2337_v61, 1 }
 0x327   : > { %v2138_v12 = vmul.f32 %v10434_v62, %v2085_v44  ;;  %6993 = vrot.lane.b32.xlu0 %v10070_v6, %s13615_s16  ;;  %7003 = vrot.lane.b32.xlu2 %v10207_v60, %s13615_s16  ;;  %v2635_v3 = vsel %vm893_vm3, %v2633_v63, %v2634_v58  ;;  %v2637_v43 = vsel %vm893_vm3, %v2634_v58, %v2636_v45 }
 0x328   : > { %7008 = vrot.lane.b32.xlu1 %v10521_v25, %s13609_s17  ;;  %v2459_v31 = vsel %vm716_vm2, %v2457_v28, %v2458_v5  ;;  %v2461_v27 = vsel %vm716_vm2, %v2458_v5, %v2460_v37  ;;  %v10534_v61 = vpack.i.bf16 %v2637_v43, %v2635_v3 }
 0x329   : > { %v10537_v44 = vadd.f32 %v10448_v35, %v2138_v12  ;;  %v10539_v1 = vpack.i.bf16 %v2461_v27, %v2459_v31  ;;  %v10558_v12 = vpop.permute.xlu2 %6883 }
 0x32b   : > { %13618 = vst [vmem:[#allocation20_spill] sm:$0xff] %v10537_v44  ;;  %v13323_v63 = vmax.f32 %v10537_v44, 0.0 }
 0x32c   : > { %v2338_v37 = vld [vmem:[#allocation3 + $0x108] sm:$0xff] }
 0x32d   : > { %2294 = vst.msk [vmem:[#allocation3 + $0x111] sm:$0xff] %vm1704_vm4, %v13323_v63  ;;  %v2638_v27 = vrot.slane %v2338_v37, 2  ;;  %v2462_v26 = vrot.slane %v2338_v37, 1 }
 0x32e   : > { %v2088_v58 = vpop.f32.mrf.mxu0 }
 0x32f   : > { %v2139_v28 = vmul.f32 %v10434_v62, %v2088_v58  ;;  %7033 = vrot.lane.b32.xlu2 %v10404_v4, %s13615_s16  ;;  %7013 = vrot.lane.b32.xlu0 %v10539_v1, %s13613_s25 }
 0x330   : > { %7023 = vrot.lane.b32.xlu1 %v10534_v61, %s13589_s23 }
 0x331   : > { %v10555_v3 = vadd.f32 %v10448_v35, %v2139_v28 }
 0x333   : > { %13620 = vst [vmem:[#allocation44_spill] sm:$0xff] %v10555_v3  ;;  %v13329_v43 = vmax.f32 %v10555_v3, 0.0 }
 0x334   : > { %v2339_v45 = vld [vmem:[#allocation3 + $0x110] sm:$0xff]  ;;  %v2340_v5 = vld [vmem:[#allocation3 + $0x118] sm:$0x3]  ;;  %v10584_v38 = vpop.permute.xlu2 %6898 }
 0x335   : > { %2295 = vst.msk [vmem:[#allocation3 + $0x121] sm:$0xff] %vm1704_vm4, %v13329_v43  ;;  %v10563_v31 = vpack.i.bf16 %v2339_v45, %v2338_v37  ;;  %v2639_v58 = vrot.slane %v2339_v45, 2  ;;  %v2641_v14 = vrot.slane %v2340_v5, 2  ;;  %v2463_v28 = vrot.slane %v2339_v45, 1 }
 0x336   : > { %v2090_v63 = vpop.f32.mrf.mxu0  ;;  %v2465_v54 = vrot.slane %v2340_v5, 1  ;;  %13622 = vst [vmem:[#allocation59_spill] sm:$0xff] %v10584_v38 }
 0x337   : > { %v2140_v44 = vmul.f32 %v10434_v62, %v2090_v63  ;;  %7018 = vrot.lane.b32.xlu0 %v10280_v8, %s13615_s16  ;;  %7043 = vrot.lane.b32.xlu2 %v10563_v31, %s13609_s17  ;;  %v2640_v3 = vsel %vm893_vm3, %v2638_v27, %v2639_v58  ;;  %v2642_v43 = vsel %vm893_vm3, %v2639_v58, %v2641_v14  ;;  %v10602_v58 = vpop.permute.xlu1 %6853 }
 0x338   : > { %7028 = vrot.lane.b32.xlu1 %v10351_v15, %s13615_s16  ;;  %v2464_v23 = vsel %vm716_vm2, %v2462_v26, %v2463_v28  ;;  %v2466_v37 = vsel %vm716_vm2, %v2463_v28, %v2465_v54  ;;  %v10579_v63 = vpack.i.bf16 %v2642_v43, %v2640_v3 }
 0x339   : > { %v10577_v45 = vadd.f32 %v10448_v35, %v2140_v44  ;;  %v10581_v5 = vpack.i.bf16 %v2466_v37, %v2464_v23  ;;  %v10599_v23 = vpop.permute.xlu0 %6848 }
 0x33b   : > { %13621 = vst [vmem:[#allocation48_spill] sm:$0xff] %v10577_v45  ;;  %v13333_v11 = vmax.f32 %v10577_v45, 0.0 }
 0x33c   : > { %v2341_v3 = vld [vmem:[#allocation3 + $0x120] sm:$0xff] }
 0x33d   : > { %2296 = vst.msk [vmem:[#allocation3 + $0x129] sm:$0xff] %vm1704_vm4, %v13333_v11  ;;  %v2643_v11 = vrot.slane %v2341_v3, 2 }
 0x33e   : > { %v2093_v14 = vpop.f32.mrf.mxu0 }
 0x33f   : > { %v2141_v26 = vmul.f32 %v10434_v62, %v2093_v14  ;;  %7038 = vrot.lane.b32.xlu0 %v10442_v50, %s13615_s16  ;;  %7058 = vrot.lane.b32.xlu2 %v10579_v63, %s13589_s23 }
 0x340   : > { %7048 = vrot.lane.b32.xlu1 %v10581_v5, %s13613_s25 }
 0x341   : > { %v10597_v54 = vadd.f32 %v10448_v35, %v2141_v26  ;;  %v10625_v52 = vpop.permute.xlu0 %6863 }
 0x342   : > { %13626 = vst [vmem:[#allocation38_spill] sm:$0xff] %v10625_v52 }
 0x343   : > { %13623 = vst [vmem:[#allocation64_spill] sm:$0xff] %v10597_v54  ;;  %v13339_v44 = vmax.f32 %v10597_v54, 0.0  ;;  %v2467_v54 = vrot.slane %v2341_v3, 1 }
 0x344   : > { %v2342_v43 = vld [vmem:[#allocation3 + $0x128] sm:$0xff]  ;;  %v2343_v27 = vld [vmem:[#allocation3 + $0x130] sm:$0x3] }
 0x345   : > { %2297 = vst.msk [vmem:[#allocation3 + $0x139] sm:$0xff] %vm1704_vm4, %v13339_v44  ;;  %v10607_v28 = vpop.permute.xlu2 %6903  ;;  %v10609_v37 = vpack.i.bf16 %v2342_v43, %v2341_v3  ;;  %v2644_v14 = vrot.slane %v2342_v43, 2  ;;  %v2646_v45 = vrot.slane %v2343_v27, 2  ;;  %v2468_v7 = vrot.slane %v2342_v43, 1 }
 0x346   : > { %13624 = vst [vmem:[#allocation22_spill] sm:$0xff] %v10607_v28  ;;  %v2095_v26 = vpop.f32.mrf.mxu0  ;;  %v2470_v29 = vrot.slane %v2343_v27, 1 }
 0x347   : > { %v2142_v2 = vmul.f32 %v10434_v62, %v2095_v26  ;;  %7063 = vrot.lane.b32.xlu2 %v10539_v1, %s13615_s16  ;;  %7068 = vrot.lane.b32.xlu0 %v10609_v37, %s13609_s17  ;;  %v2645_v44 = vsel %vm893_vm3, %v2643_v11, %v2644_v14  ;;  %v2647_v59 = vsel %vm893_vm3, %v2644_v14, %v2646_v45 }
 0x348   : > { %7053 = vrot.lane.b32.xlu1 %v10499_v47, %s13615_s16  ;;  %v2469_v43 = vsel %vm716_vm2, %v2467_v54, %v2468_v7  ;;  %v2471_v26 = vsel %vm716_vm2, %v2468_v7, %v2470_v29  ;;  %v10627_v42 = vpack.i.bf16 %v2647_v59, %v2645_v44 }
 0x349   : > { %v10621_v41 = vadd.f32 %v10448_v35, %v2142_v2  ;;  %v10630_v27 = vpack.i.bf16 %v2471_v26, %v2469_v43  ;;  %v10650_v44 = vpop.permute.xlu0 %6868 }
 0x34b   : > { %13625 = vst [vmem:[#allocation29_spill] sm:$0xff] %v10621_v41  ;;  %v13344_v3 = vmax.f32 %v10621_v41, 0.0 }
 0x34c   : > { %v2344_v7 = vld [vmem:[#allocation3 + $0x138] sm:$0xff] }
 0x34d   : > { %2298 = vst.msk [vmem:[#allocation3 + $0x141] sm:$0xff] %vm1704_vm4, %v13344_v3  ;;  %v10635_v11 = vpop.permute.xlu1 %6873  ;;  %v10637_v45 = vpop.permute.xlu2 %6918  ;;  %v2648_v55 = vrot.slane %v2344_v7, 2  ;;  %v2472_v36 = vrot.slane %v2344_v7, 1 }
 0x34e   : > { %13627 = vst [vmem:[#allocation41_spill] sm:$0xff] %v10635_v11  ;;  %v2098_v2 = vpop.f32.mrf.mxu0 }
 0x34f   : > { %v2143_v54 = vmul.f32 %v10434_v62, %v2098_v2  ;;  %7078 = vrot.lane.b32.xlu0 %v10627_v42, %s13589_s23  ;;  %7073 = vrot.lane.b32.xlu2 %v10630_v27, %s13613_s25 }
 0x350   : > { %7088 = vrot.lane.b32.xlu1 %v10630_v27, %s13615_s16 }
 0x351   : > { %v10647_v59 = vadd.f32 %v10448_v35, %v2143_v54 }
 0x353   : > { %13628 = vst [vmem:[#allocation51_spill] sm:$0xff] %v10647_v59  ;;  %v13350_v29 = vmax.f32 %v10647_v59, 0.0 }
 0x354   : > { %v2345_v14 = vld [vmem:[#allocation3 + $0x140] sm:$0xff]  ;;  %v2346_v43 = vld [vmem:[#allocation3 + $0x148] sm:$0x3] }
 0x355   : > { %2299 = vst.msk [vmem:[#allocation3 + $0x151] sm:$0xff] %vm1704_vm4, %v13350_v29  ;;  %v10655_v26 = vpop.permute.xlu1 %6878  ;;  %v10657_v2 = vpack.i.bf16 %v2345_v14, %v2344_v7  ;;  %v2649_v3 = vrot.slane %v2345_v14, 2  ;;  %v2651_v41 = vrot.slane %v2346_v43, 2  ;;  %v2473_v16 = vrot.slane %v2345_v14, 1  ;;  %v10669_v7 = vpop.permute.xlu2 %6943 }
 0x356   : > { %v2100_v54 = vpop.f32.mrf.mxu0  ;;  %v2475_v29 = vrot.slane %v2346_v43, 1  ;;  %13629 = vst [vmem:[#allocation58_spill] sm:$0xff] %v10669_v7 }
 0x357   : > { %v2144_v49 = vmul.f32 %v10434_v62, %v2100_v54  ;;  %7083 = vrot.lane.b32.xlu0 %v10581_v5, %s13615_s16  ;;  %7118 = vrot.lane.b32.xlu2 %v10143_v51, %s13405_s30  ;;  %v2650_v59 = vsel %vm893_vm3, %v2648_v55, %v2649_v3  ;;  %v2652_v14 = vsel %vm893_vm3, %v2649_v3, %v2651_v41 }
 0x358   : > { %7093 = vrot.lane.b32.xlu1 %v10657_v2, %s13609_s17  ;;  %v2474_v0 = vsel %vm716_vm2, %v2472_v36, %v2473_v16  ;;  %v2476_v56 = vsel %vm716_vm2, %v2473_v16, %v2475_v29  ;;  %v10678_v43 = vpack.i.bf16 %v2652_v14, %v2650_v59  ;;  %v10685_v36 = vpop.permute.xlu0 %6888 }
 0x359   : > { %v10672_v54 = vadd.f32 %v10448_v35, %v2144_v49  ;;  %v10676_v13 = vpack.i.bf16 %v2476_v56, %v2474_v0  ;;  %13632 = vst [vmem:[#allocation31_spill] sm:$0xff] %v10685_v36 }
 0x35b   : > { %13630 = vst [vmem:[#allocation65_spill] sm:$0xff] %v10672_v54  ;;  %v13356_v20 = vmax.f32 %v10672_v54, 0.0 }
 0x35c   : > { %v2347_v16 = vld [vmem:[#allocation3 + $0x150] sm:$0xff] }
 0x35d   : > { %2300 = vst.msk [vmem:[#allocation3 + $0x159] sm:$0xff] %vm1704_vm4, %v13356_v20  ;;  %v10683_v41 = vpop.permute.xlu1 %6893  ;;  %v2653_v14 = vrot.slane %v2347_v16, 2 }
 0x35e   : > { %13631 = vst [vmem:[#allocation11_spill] sm:$0xff] %v10683_v41  ;;  %v2103_v55 = vpop.f32.mrf.mxu0 }
 0x35f   : > { %v2145_v49 = vmul.f32 %v10434_v62, %v2103_v55  ;;  %7123 = vrot.lane.b32.xlu2 %v10676_v13, %s13615_s16  ;;  %7098 = vrot.lane.b32.xlu0 %v10676_v13, %s13613_s25 }
 0x360   : > { %7108 = vrot.lane.b32.xlu1 %v10678_v43, %s13589_s23  ;;  %v10707_v32 = vpop.permute.xlu0 %6908 }
 0x361   : > { %v10695_v56 = vadd.f32 %v10448_v35, %v2145_v49  ;;  %v10697_v0 = vpop.permute.xlu2 %6963  ;;  %13635 = vst [vmem:[#allocation52_spill] sm:$0xff] %v10707_v32 }
 0x362   : > { %13634 = vst [vmem:[#allocation45_spill] sm:$0xff] %v10697_v0  ;;  %v2477_v0 = vrot.slane %v2347_v16, 1 }
 0x363   : > { %13633 = vst [vmem:[#allocation35_spill] sm:$0xff] %v10695_v56  ;;  %v13364_v3 = vmax.f32 %v10695_v56, 0.0 }
 0x364   : > { %v2348_v59 = vld [vmem:[#allocation3 + $0x158] sm:$0xff]  ;;  %v2349_v29 = vld [vmem:[#allocation3 + $0x160] sm:$0x3] }
 0x365   : > { %2301 = vst.msk [vmem:[#allocation3 + $0x169] sm:$0xff] %vm1704_vm4, %v13364_v3  ;;  %v10703_v55 = vpop.permute.xlu1 %6913  ;;  %v10705_v20 = vpack.i.bf16 %v2348_v59, %v2347_v16  ;;  %v2654_v54 = vrot.slane %v2348_v59, 2  ;;  %v2656_v19 = vrot.slane %v2349_v29, 2  ;;  %v2478_v49 = vrot.slane %v2348_v59, 1 }
 0x366   : > { %v2105_v30 = vpop.f32.mrf.mxu0  ;;  %v2480_v28 = vrot.slane %v2349_v29, 1 }
 0x367   : > { %v2146_v38 = vmul.f32 %v10434_v62, %v2105_v30  ;;  %7103 = vrot.lane.b32.xlu0 %v10012_v17, %s13405_s30  ;;  %7128 = vrot.lane.b32.xlu2 %v10705_v20, %s13609_s17  ;;  %v2655_v3 = vsel %vm893_vm3, %v2653_v14, %v2654_v54  ;;  %v2657_v56 = vsel %vm893_vm3, %v2654_v54, %v2656_v19 }
 0x368   : > { %7113 = vrot.lane.b32.xlu1 %v10077_v57, %s13405_s30  ;;  %v2479_v59 = vsel %vm716_vm2, %v2477_v0, %v2478_v49  ;;  %v2481_v30 = vsel %vm716_vm2, %v2478_v49, %v2480_v28  ;;  %v10725_v17 = vpack.i.bf16 %v2657_v56, %v2655_v3 }
 0x369   : > { %v10720_v16 = vadd.f32 %v10448_v35, %v2146_v38  ;;  %v10722_v29 = vpop.permute.xlu2 %6968  ;;  %v10728_v11 = vpack.i.bf16 %v2481_v30, %v2479_v59 }
 0x36a   : > { %13637 = vst [vmem:[#allocation57_spill] sm:$0xff] %v10722_v29 }
 0x36b   : > { %13636 = vst [vmem:[#allocation16_spill] sm:$0xff] %v10720_v16  ;;  %v13368_v32 = vmax.f32 %v10720_v16, 0.0 }
 0x36c   : > { %v2350_v3 = vld [vmem:[#allocation3 + $0x168] sm:$0xff] }
 0x36d   : > { %2302 = vst.msk [vmem:[#allocation3 + $0x171] sm:$0xff] %vm1704_vm4, %v13368_v32  ;;  %v10733_v19 = vpop.permute.xlu1 %6933  ;;  %v2482_v30 = vrot.slane %v2350_v3, 1  ;;  %v2658_v52 = vrot.slane %v2350_v3, 2 }
 0x36e   : > { %13638 = vst [vmem:[#allocation19_spill] sm:$0xff] %v10733_v19  ;;  %v10735_v54 = vpop.permute.xlu0 %6923  ;;  %v2108_v38 = vpop.f32.mrf.mxu0 }
 0x36f   : > { %13639 = vst [vmem:[#allocation39_spill] sm:$0xff] %v10735_v54  ;;  %v2147_v0 = vmul.f32 %v10434_v62, %v2108_v38  ;;  %7138 = vrot.lane.b32.xlu2 %v10725_v17, %s13589_s23  ;;  %7143 = vrot.lane.b32.xlu0 %v10728_v11, %s13615_s16 }
 0x370   : > { %7133 = vrot.lane.b32.xlu1 %v10728_v11, %s13613_s25 }
 0x371   : > { %v10745_v28 = vadd.f32 %v10448_v35, %v2147_v0  ;;  %v10747_v56 = vpop.permute.xlu2 %6973 }
 0x373   : > { %13640 = vst [vmem:[#allocation46_spill] sm:$0xff] %v10745_v28  ;;  %v13377_v14 = vmax.f32 %v10745_v28, 0.0 }
 0x374   : > { %v2351_v49 = vld [vmem:[#allocation3 + $0x170] sm:$0xff]  ;;  %v2352_v59 = vld [vmem:[#allocation3 + $0x178] sm:$0x3] }
 0x375   : > { %2303 = vst.msk [vmem:[#allocation3 + $0x181] sm:$0xff] %vm1704_vm4, %v13377_v14  ;;  %v10753_v38 = vpop.permute.xlu1 %6938  ;;  %v10755_v32 = vpack.i.bf16 %v2351_v49, %v2350_v3  ;;  %v2483_v16 = vrot.slane %v2351_v49, 1  ;;  %v2485_v29 = vrot.slane %v2352_v59, 1  ;;  %v2659_v0 = vrot.slane %v2351_v49, 2 }
 0x376   : > { %13641 = vst [vmem:[#allocation49_spill] sm:$0xff] %v10753_v38  ;;  %v2110_v19 = vpop.f32.mrf.mxu0  ;;  %v2661_v54 = vrot.slane %v2352_v59, 2  ;;  %v10757_v7 = vpop.permute.xlu0 %6928 }
 0x377   : > { %13642 = vst [vmem:[#allocation23_spill] sm:$0xff] %v10757_v7  ;;  %v2148_v41 = vmul.f32 %v10434_v62, %v2110_v19  ;;  %7148 = vrot.lane.b32.xlu0 %v10755_v32, %s13609_s17  ;;  %v2484_v28 = vsel %vm716_vm2, %v2482_v30, %v2483_v16  ;;  %v2486_v14 = vsel %vm716_vm2, %v2483_v16, %v2485_v29 }
 0x378   : > { %7168 = vrot.lane.b32.xlu1 %v10274_v34, %s13405_s30  ;;  %v10771_v59 = vpack.i.bf16 %v2486_v14, %v2484_v28  ;;  %v2660_v62 = vsel %vm893_vm3, %v2658_v52, %v2659_v0  ;;  %v2662_v19 = vsel %vm893_vm3, %v2659_v0, %v2661_v54 }
 0x379   : > { %v10767_v38 = vadd.f32 %v10448_v35, %v2148_v41  ;;  %v10769_v49 = vpop.permute.xlu2 %6983  ;;  %v10778_v3 = vpack.i.bf16 %v2662_v19, %v2660_v62 }
 0x37a   : > { %13644 = vst [vmem:[#allocation66_spill] sm:$0xff] %v10769_v49  ;;  %7153 = vrot.lane.b32.xlu2 %v10771_v59, %s13613_s25 }
 0x37b   : > { %13643 = vst [vmem:[#allocation62_spill] sm:$0xff] %v10767_v38  ;;  %v13380_v36 = vmax.f32 %v10767_v38, 0.0 }
 0x37c   : > { %v2353_v16 = vld [vmem:[#allocation3 + $0x180] sm:$0xff] }
 0x37d   : > { %2304 = vst.msk [vmem:[#allocation3 + $0x189] sm:$0xff] %vm1704_vm4, %v13380_v36  ;;  %v10783_v35 = vpop.permute.xlu1 %6953  ;;  %v2858_v28 = vrot.slane %v2353_v16, 1  ;;  %v2959_v0 = vrot.slane %v2353_v16, 2 }
 0x37e   : > { %13645 = vst [vmem:[#allocation32_spill] sm:$0xff] %v10783_v35  ;;  %v10789_v52 = vpop.permute.xlu0 %6948 }
 0x37f   : > { %7158 = vrot.lane.b32.xlu0 %v10778_v3, %s13589_s23  ;;  %13646 = vst [vmem:[#allocation40_spill] sm:$0xff] %v10789_v52 }
 0x380   : > { %7183 = vrot.lane.b32.xlu1 %v10771_v59, %s13615_s16 }
 0x381   : > { %v10791_v41 = vpop.permute.xlu2 %7003 }
 0x382   : > { %13647 = vst [vmem:[#allocation42_spill] sm:$0xff] %v10791_v41  ;;  %7173 = vrot.lane.b32.xlu2 %v10345_v53, %s13405_s30 }
 0x384   : > { %v2354_v29 = vld [vmem:[#allocation3 + $0x188] sm:$0xff]  ;;  %v2355_v54 = vld [vmem:[#allocation3 + $0x190] sm:$0x3] }
 0x385   : > { %v2859_v14 = vrot.slane %v2354_v29, 1  ;;  %v2861_v30 = vrot.slane %v2355_v54, 1  ;;  %v2960_v62 = vrot.slane %v2354_v29, 2  ;;  %v2962_v19 = vrot.slane %v2355_v54, 2  ;;  %v10800_v35 = vpop.permute.xlu1 %6958 }
 0x386   : > { %13648 = vst [vmem:[#allocation53_spill] sm:$0xff] %v10800_v35  ;;  %v10881_v35 = vld [vmem:[#allocation3 + $0x78] sm:$0xff] }
 0x387   : > { %7163 = vrot.lane.b32.xlu0 %v10214_v24, %s13405_s30  ;;  %v2860_v36 = vsel %vm716_vm2, %v2858_v28, %v2859_v14  ;;  %v2862_v38 = vsel %vm716_vm2, %v2859_v14, %v2861_v30  ;;  %v2961_v49 = vsel %vm893_vm3, %v2959_v0, %v2960_v62  ;;  %v2963_v52 = vsel %vm893_vm3, %v2960_v62, %v2962_v19  ;;  %v10853_v62 = vld [vmem:[#allocation3 + $0x30] sm:$0xff]  ;;  %v10855_v19 = vld [vmem:[#allocation3 + $0x38] sm:$0xff] }
 0x388   : > { %7188 = vrot.lane.b32.xlu1 %v10453_v21, %s13405_s30  ;;  %v10809_v54 = vpack.i.bf16 %v2862_v38, %v2860_v36  ;;  %v10811_v7 = vpack.i.bf16 %v2963_v52, %v2961_v49  ;;  %v10815_v28 = vpack.i.bf16 %v2354_v29, %v2353_v16  ;;  %13662 = vst [vmem:[#allocation73_spill] sm:$0xff] %v10881_v35 }
 0x389   : > { %v10805_v41 = vpop.permute.xlu0 %6978  ;;  %v10807_v33 = vpop.permute.xlu2 %7033 }
 0x38a   : > { %13649 = vst [vmem:[#allocation61_spill] sm:$0xff] %v10805_v41  ;;  %7193 = vrot.lane.b32.xlu2 %v10497_v9, %s13405_s30  ;;  %v10875_v41 = vld [vmem:[#allocation3 + $0x60] sm:$0xff] }
 0x38b   : > { %13650 = vst [vmem:[#allocation14_spill] sm:$0xff] %v10807_v33  ;;  %v10877_v33 = vld [vmem:[#allocation3 + $0x68] sm:$0xff] }
 0x38d   : > { %v10825_v0 = vpop.permute.xlu1 %6998 }
 0x38f   : > { %7178 = vrot.lane.b32.xlu0 %v10396_v40, %s13405_s30 }
 0x390   : > { %7203 = vrot.lane.b32.xlu1 %v10815_v28, %s13609_s17 }
 0x391   : > { %v10821_v14 = vpop.permute.xlu0 %6988  ;;  %v10823_v30 = vpop.permute.xlu2 %7043 }
 0x392   : > { %13651 = vst [vmem:[#allocation34_spill] sm:$0xff] %v10821_v14  ;;  %7213 = vrot.lane.b32.xlu2 %v10809_v54, %s13615_s16 }
 0x393   : > { %13652 = vst [vmem:[#allocation36_spill] sm:$0xff] %v10823_v30 }
 0x397   : > { %7198 = vrot.lane.b32.xlu0 %v10534_v61, %s13405_s30 }
 0x398   : > { %7208 = vrot.lane.b32.xlu1 %v10579_v63, %s13405_s30 }
 0x399   : > { %v10833_v36 = vpop.permute.xlu0 %6993  ;;  %v10835_v38 = vpop.permute.xlu2 %7058 }
 0x39a   : > { %13653 = vst [vmem:[#allocation47_spill] sm:$0xff] %v10835_v38  ;;  %v10837_v49 = vpop.permute.xlu1 %7008  ;;  %7218 = vrot.lane.b32.xlu2 %v10627_v42, %s13405_s30  ;;  %v7242_v38 = vpack.i.bf16 %v10855_v19, %v10853_v62 }
 0x39b   : > { %13654 = vst [vmem:[#allocation54_spill] sm:$0xff] %v10837_v49 }
 0x39f   : > { %7223 = vrot.lane.b32.xlu0 %v10678_v43, %s13405_s30 }
 0x3a0   : > { %7228 = vrot.lane.b32.xlu1 %v10725_v17, %s13405_s30 }
 0x3a1   : > { %v10845_v52 = vpop.permute.xlu0 %7013  ;;  %v10847_v16 = vpop.permute.xlu2 %7063 }
 0x3a2   : > { %13655 = vst [vmem:[#allocation60_spill] sm:$0xff] %v10845_v52  ;;  %v10849_v29 = vpop.permute.xlu1 %7023  ;;  %7233 = vrot.lane.b32.xlu2 %v10778_v3, %s13405_s30  ;;  %v10864_v52 = vld [vmem:[#allocation3 + $0x48] sm:$0xff] }
 0x3a3   : > { %13656 = vst [vmem:[#allocation67_spill] sm:$0xff] %v10847_v16 }
 0x3a4   : > { %13657 = vst [vmem:[#allocation68_spill] sm:$0xff] %v10849_v29  ;;  %v10866_v29 = vld [vmem:[#allocation3 + $0x50] sm:$0xff] }
 0x3a5   : > { %13659 = vst [vmem:[#allocation70_spill] sm:$0xff] %v10864_v52  ;;  %v7247_v16 = vpack.i.bf16 %v10866_v29, %v10864_v52 }
 0x3a7   : > { %7238 = vrot.lane.b32.xlu0 %v10811_v7, %s13405_s30  ;;  %s13415_s30 = smov 56  }
 0x3a8   : > { %7243 = vrot.lane.b32.xlu1 %v7242_v38, %s13407_s26  ;;  %v7252_v38 = vpack.i.bf16 %v10877_v33, %v10875_v41 }
 0x3a9   : > { %v10862_v30 = vpop.permute.xlu0 %7018  ;;  %v10872_v14 = vpop.permute.xlu2 %7073 }
 0x3aa   : > { %13658 = vst [vmem:[#allocation69_spill] sm:$0xff] %v10862_v30  ;;  %v10870_v49 = vpop.permute.xlu1 %7028  ;;  %7248 = vrot.lane.b32.xlu2 %v7247_v16, %s13407_s26  ;;  %v10883_v30 = vld [vmem:[#allocation3 + $0x80] sm:$0xff] }
 0x3ab   : > { %13660 = vst [vmem:[#allocation71_spill] sm:$0xff] %v10870_v49  ;;  %v7257_v52 = vpack.i.bf16 %v10883_v30, %v10881_v35 }
 0x3ac   : > { %13661 = vst [vmem:[#allocation72_spill] sm:$0xff] %v10872_v14 }
 0x3af   : > { %7253 = vrot.lane.b32.xlu0 %v7252_v38, %s13407_s26 }
 0x3b0   : > { %7258 = vrot.lane.b32.xlu1 %v7257_v52, %s13407_s26 }
 0x3b1   : > { %v10889_v14 = vpop.permute.xlu0 %7038  ;;  %v10895_v49 = vpop.permute.xlu2 %7118 }
 0x3b2   : > { %v10891_v16 = vpop.permute.xlu1 %7048  ;;  %7263 = vrot.lane.b32.xlu2 %v10457_v48, %s13407_s26 }
 0x3b7   : > { %7268 = vrot.lane.b32.xlu0 %v10475_v22, %s13407_s26 }
 0x3b8   : > { %7273 = vrot.lane.b32.xlu1 %v10429_v10, %s13407_s26 }
 0x3b9   : > { %v10901_v35 = vpop.permute.xlu0 %7068  ;;  %v10907_v52 = vpop.permute.xlu2 %7123 }
 0x3ba   : > { %v10903_v38 = vpop.permute.xlu1 %7053  ;;  %7278 = vrot.lane.b32.xlu2 %v10483_v39, %s13407_s26  ;;  %13663 = vst [vmem:[#allocation74_spill] sm:$0xff] %v10907_v52  ;;  %v2357_v52 = vld [vmem:[#allocation3 + $0x1a0] sm:$0xff] }
 0x3bf   : > { %7283 = vrot.lane.b32.xlu0 %v10521_v25, %s13407_s26  ;;  %v2356_v25 = vld [vmem:[#allocation3 + $0x198] sm:$0xff] }
 0x3c0   : > { %7288 = vrot.lane.b32.xlu1 %v10563_v31, %s13407_s26 }
 0x3c1   : > { %v10913_v48 = vpop.permute.xlu0 %7078  ;;  %v10923_v10 = vpop.permute.xlu2 %7128 }
 0x3c2   : > { %13664 = vst [vmem:[#allocation75_spill] sm:$0xff] %v10913_v48  ;;  %v10915_v22 = vpop.permute.xlu1 %7088  ;;  %7293 = vrot.lane.b32.xlu2 %v10609_v37, %s13407_s26  ;;  %v7317_v48 = vpack.i.bf16 %v2357_v52, %v2356_v25 }
 0x3c3   : > { %13665 = vst [vmem:[#allocation76_spill] sm:$0xff] %v10915_v22 }
 0x3c4   : > { %13666 = vst [vmem:[#allocation77_spill] sm:$0xff] %v10923_v10  ;;  %v6976_v10 = vunpack.i.h.bf16 %v10747_v56 }
 0x3c7   : > { %7298 = vrot.lane.b32.xlu0 %v10657_v2, %s13407_s26 }
 0x3c8   : > { %7303 = vrot.lane.b32.xlu1 %v10705_v20, %s13407_s26 }
 0x3c9   : > { %v10925_v39 = vpop.permute.xlu0 %7083  ;;  %v10938_v2 = vpop.permute.xlu2 %7138 }
 0x3ca   : > { %v10927_v31 = vpop.permute.xlu1 %7093  ;;  %7308 = vrot.lane.b32.xlu2 %v10755_v32, %s13407_s26  ;;  %13670 = vst [vmem:[#allocation81_spill] sm:$0xff] %v10938_v2 }
 0x3cb   : > { %13667 = vst [vmem:[#allocation78_spill] sm:$0xff] %v10927_v31 }
 0x3cf   : > { %7313 = vrot.lane.b32.xlu0 %v10815_v28, %s13407_s26 }
 0x3d0   : > { %7318 = vrot.lane.b32.xlu1 %v7317_v48, %s13407_s26  ;;  %s13417_s26 = smov 64  }
 0x3d1   : > { %v10934_v37 = vpop.permute.xlu0 %7098 }
 0x3d2   : > { %13668 = vst [vmem:[#allocation79_spill] sm:$0xff] %v10934_v37  ;;  %v10936_v20 = vpop.permute.xlu1 %7108  ;;  %7323 = vrot.lane.b32.xlu2 %v10070_v6, %s13415_s30 }
 0x3d3   : > { %13669 = vst [vmem:[#allocation80_spill] sm:$0xff] %v10936_v20  ;;  %v6851_v20 = vunpack.i.h.bf16 %v10599_v23 }
 0x3d4   : > { %v10950_v48 = vpop.permute.xlu2 %7153 }
 0x3d5   : > { %13671 = vst [vmem:[#allocation82_spill] sm:$0xff] %v10950_v48 }
 0x3d7   : > { %7328 = vrot.lane.b32.xlu0 %v10136_v46, %s13415_s30 }
 0x3d8   : > { %7333 = vrot.lane.b32.xlu1 %v10207_v60, %s13415_s30 }
 0x3d9   : > { %v10946_v32 = vpop.permute.xlu0 %7103 }
 0x3da   : > { %v10948_v28 = vpop.permute.xlu1 %7113  ;;  %7338 = vrot.lane.b32.xlu2 %v10280_v8, %s13415_s30  ;;  %v7106_v37 = vunpack.i.h.bf16 %v10946_v32 }
 0x3dc   : > { %v10964_v60 = vpop.permute.xlu2 %7173 }
 0x3df   : > { %7343 = vrot.lane.b32.xlu0 %v10077_v57, %s13417_s26 }
 0x3e0   : > { %7348 = vrot.lane.b32.xlu1 %v10351_v15, %s13415_s30 }
 0x3e1   : > { %v10958_v6 = vpop.permute.xlu0 %7143 }
 0x3e2   : > { %13672 = vst [vmem:[#allocation83_spill] sm:$0xff] %v10958_v6  ;;  %v10960_v46 = vpop.permute.xlu1 %7133  ;;  %7353 = vrot.lane.b32.xlu2 %v10143_v51, %s13417_s26  ;;  %v6915_v6 = vunpack.i.l.bf16 %v10703_v55 }
 0x3e3   : > { %13673 = vst [vmem:[#allocation84_spill] sm:$0xff] %v10960_v46 }
 0x3e4   : > { %v10976_v15 = vpop.permute.xlu2 %7193 }
 0x3e7   : > { %7358 = vrot.lane.b32.xlu0 %v10404_v4, %s13415_s30 }
 0x3e8   : > { %7363 = vrot.lane.b32.xlu1 %v10442_v50, %s13415_s30 }
 0x3e9   : > { %v10970_v8 = vpop.permute.xlu0 %7148 }
 0x3ea   : > { %13674 = vst [vmem:[#allocation85_spill] sm:$0xff] %v10970_v8  ;;  %v10972_v57 = vpop.permute.xlu1 %7168  ;;  %7368 = vrot.lane.b32.xlu2 %v10214_v24, %s13417_s26 }
 0x3ec   : > { %v10992_v24 = vpop.permute.xlu2 %7213 }
 0x3ed   : > { %13677 = vst [vmem:[#allocation88_spill] sm:$0xff] %v10992_v24  ;;  %v3260_v24 = vrot.slane %v2356_v25, 2 }
 0x3ef   : > { %7373 = vrot.lane.b32.xlu0 %v10499_v47, %s13415_s30  ;;  %v2358_v47 = vld [vmem:[#allocation3 + $0x1a8] sm:$0x3] }
 0x3f0   : > { %7378 = vrot.lane.b32.xlu1 %v10539_v1, %s13415_s30  ;;  %v3162_v48 = vrot.slane %v2358_v47, 1 }
 0x3f1   : > { %v10982_v51 = vpop.permute.xlu0 %7158 }
 0x3f2   : > { %13675 = vst [vmem:[#allocation86_spill] sm:$0xff] %v10982_v51  ;;  %7383 = vrot.lane.b32.xlu2 %v10274_v34, %s13417_s26  ;;  %v10986_v4 = vpop.permute.xlu1 %7183  ;;  %v3160_v51 = vrot.slane %v2357_v52, 1 }
 0x3f3   : > { %13676 = vst [vmem:[#allocation87_spill] sm:$0xff] %v10986_v4 }
 0x3f4   : > { %v3163_v2 = vsel %vm716_vm2, %v3160_v51, %v3162_v48 }
 0x3f7   : > { %7388 = vrot.lane.b32.xlu0 %v10581_v5, %s13415_s30  ;;  %v11006_v5 = vpop.permute.xlu2 %7218 }
 0x3f8   : > { %7393 = vrot.lane.b32.xlu1 %v10345_v53, %s13417_s26  ;;  %13678 = vst [vmem:[#allocation89_spill] sm:$0xff] %v11006_v5  ;;  %v3261_v53 = vrot.slane %v2357_v52, 2 }
 0x3f9   : > { %v10994_v50 = vpop.permute.xlu0 %7163 }
 0x3fa   : > { %7398 = vrot.lane.b32.xlu2 %v10630_v27, %s13415_s30  ;;  %v10998_v1 = vpop.permute.xlu1 %7188  ;;  %v3159_v27 = vrot.slane %v2356_v25, 1 }
 0x3ff   : > { %7403 = vrot.lane.b32.xlu0 %v10676_v13, %s13415_s30  ;;  %v3263_v13 = vrot.slane %v2358_v47, 2  ;;  %v11024_v47 = vpop.permute.xlu2 %7233 }
 0x400   : > { %7408 = vrot.lane.b32.xlu1 %v10396_v40, %s13417_s26  ;;  %v3262_v40 = vsel %vm893_vm3, %v3260_v24, %v3261_v53  ;;  %13680 = vst [vmem:[#allocation91_spill] sm:$0xff] %v11024_v47  ;;  %v6870_v47 = vunpack.i.l.bf16 %v10650_v44 }
 0x401   : > { %v11004_v34 = vpop.permute.xlu0 %7178  ;;  %v3264_v52 = vsel %vm893_vm3, %v3261_v53, %v3263_v13  ;;  %v6144_v53 = vld [vmem:[%s13684_s4 + $0x18] sm:$0xff] }
 0x402   : > { %7413 = vrot.lane.b32.xlu2 %v10728_v11, %s13415_s30  ;;  %v11015_v4 = vpop.permute.xlu1 %7203  ;;  %v3161_v11 = vsel %vm716_vm2, %v3159_v27, %v3160_v51  ;;  %v7477_v25 = vpack.i.bf16 %v3264_v52, %v3262_v40  ;;  %v6143_v27 = vld [vmem:[%s13684_s4 + $0x10] sm:$0xff] }
 0x403   : > { %13679 = vst [vmem:[#allocation90_spill] sm:$0xff] %v11015_v4  ;;  %v6871_v4 = vunpack.i.h.bf16 %v10650_v44  ;;  %v7105_v44 = vunpack.i.l.bf16 %v10946_v32  ;;  %v6850_v32 = vunpack.i.l.bf16 %v10599_v23 }
 0x407   : > { %7418 = vrot.lane.b32.xlu0 %v10771_v59, %s13415_s30  ;;  %v7437_v59 = vpack.i.bf16 %v3163_v2, %v3161_v11  ;;  %v11035_v48 = vpop.permute.xlu2 %7248  ;;  %v6142_v11 = vld [vmem:[%s13684_s4 + $0x8] sm:$0xff] }
 0x408   : > { %7423 = vrot.lane.b32.xlu1 %v10453_v21, %s13417_s26 }
 0x409   : > { %v11017_v8 = vpop.permute.xlu0 %7198 }
 0x40a   : > { %7428 = vrot.lane.b32.xlu2 %v10809_v54, %s13415_s30  ;;  %v11031_v24 = vpop.permute.xlu1 %7208 }
 0x40f   : > { %7433 = vrot.lane.b32.xlu0 %v10497_v9, %s13417_s26 }
 0x410   : > { %7438 = vrot.lane.b32.xlu1 %v7437_v59, %s13415_s30 }
 0x411   : > { %v11029_v21 = vpop.permute.xlu0 %7223 }
 0x412   : > { %13681 = vst [vmem:[#allocation92_spill] sm:$0xff] %v11029_v21  ;;  %7443 = vrot.lane.b32.xlu2 %v10534_v61, %s13417_s26  ;;  %v11045_v9 = vpop.permute.xlu1 %7228  ;;  %v11051_v61 = vpop.permute.xlu2 %7263 }
 0x413   : > { %13683 = vst [vmem:[#allocation94_spill] sm:$0xff] %v11045_v9  ;;  %v8175_v9 = vld [vmem:[#allocation3] sm:$0xff] }
 0x417   : > { %7448 = vrot.lane.b32.xlu0 %v10579_v63, %s13417_s26 }
 0x418   : > { %7453 = vrot.lane.b32.xlu1 %v10627_v42, %s13417_s26  ;;  %v3645_v42 = vld [vmem:[%s13684_s4 + $0x20] sm:$0xf] }
 0x419   : > { %v11041_v54 = vpop.permute.xlu0 %7238  ;;  %v3663_v63 = vunpack.c.l.b16 %v3645_v42 }
 0x41a   : > { %13682 = vst [vmem:[#allocation93_spill] sm:$0xff] %v11041_v54  ;;  %7458 = vrot.lane.b32.xlu2 %v10678_v43, %s13417_s26  ;;  %v7244_v51 = vpop.permute.xlu1 %7243 }
 0x41b   : > { %v3668_v43 = vpack.c.b16 %v3663_v63, %v3663_v63 }
 0x41f   : > { %7463 = vrot.lane.b32.xlu0 %v10725_v17, %s13417_s26  ;;  %v3724_v17 = vsel %vm3722_vm14, %v3668_v43, 0 }
 0x420   : > { %7468 = vrot.lane.b32.xlu1 %v10778_v3, %s13417_s26  ;;  %3729 = vmatpush.bf16.msra.mxu1 %v3724_v17 }
 0x421   : > { %v11053_v2 = vpop.permute.xlu0 %7253 }
 0x422   : > { %7473 = vrot.lane.b32.xlu2 %v10811_v7, %s13417_s26  ;;  %v11067_v7 = vpop.permute.xlu2 %7278  ;;  %v11072_v13 = vpop.permute.xlu1 %7258 }
 0x424   : > { %3730 = vmatpush.bf16.msra.mxu1 %v6144_v53  ;;  %v6846_v53 = vunpack.i.h.bf16 %v10512_v18 }
 0x427   : > { %7478 = vrot.lane.b32.xlu0 %v7477_v25, %s13417_s26  ;;  %v6141_v25 = vld [vmem:[%s13684_s4] sm:$0xff]  ;;  %s13747_s26 = smov 56  }
 0x428   : > { %3731 = vmatpush.bf16.msra.mxu1 %v6143_v27  ;;  %v6845_v27 = vunpack.i.l.bf16 %v10512_v18  ;;  %v6975_v18 = vunpack.i.l.bf16 %v10747_v56 }
 0x429   : > { %v11062_v3 = vpop.permute.xlu0 %7268 }
 0x42a   : > { %v11079_v52 = vpop.permute.xlu2 %7293  ;;  %v11086_v42 = vpop.permute.xlu1 %7273 }
 0x42c   : > { %3732 = vmatpush.bf16.msra.mxu1 %v6142_v11 }
 0x430   : > { %3733 = vmatpush.bf16.msra.mxu1 %v6141_v25  ;;  %v8174_v25 = vld [vmem:[#allocation3 + $0x8] sm:$0xff] }
 0x431   : > { %v11074_v40 = vpop.permute.xlu0 %7283  ;;  %v3362_v46 = vsel %vm1704_vm4, %v8174_v25, %v6846_v53  ;;  %v7246_v25 = vunpack.i.h.bf16 %v7244_v51 }
 0x432   : > { %v11088_v63 = vpop.permute.xlu2 %7308  ;;  %v11092_v17 = vpop.permute.xlu1 %7288  ;;  %v3394_v21 = vsel %vm1770_vm7, %v3362_v46, %v6871_v4 }
 0x433   : > { %13686 = vst [vmem:[#allocation96_spill] sm:$0xff] %v11088_v63  ;;  %v3361_v63 = vsel %vm1704_vm4, %v8175_v9, %v6845_v27  ;;  %v7245_v9 = vunpack.i.l.bf16 %v7244_v51 }
 0x434   : > { %v3393_v53 = vsel %vm1770_vm7, %v3361_v63, %v6870_v47 }
 0x439   : > { %v11084_v59 = vpop.permute.xlu0 %7298 }
 0x43a   : > { %13685 = vst [vmem:[#allocation95_spill] sm:$0xff] %v11084_v59  ;;  %v7324_v11 = vpop.permute.xlu2 %7323  ;;  %v11113_v5 = vpop.permute.xlu1 %7303 }
 0x43b   : > { %v7326_v31 = vunpack.i.h.bf16 %v7324_v11  ;;  %v7325_v59 = vunpack.i.l.bf16 %v7324_v11 }
 0x441   : > { %v11090_v43 = vpop.permute.xlu0 %7313 }
 0x442   : > { %13687 = vst [vmem:[#allocation97_spill] sm:$0xff] %v11090_v43  ;;  %v6916_v43 = vunpack.i.h.bf16 %v10703_v55  ;;  %v3425_v55 = vsel %vm1836_vm8, %v3393_v53, %v6915_v6  ;;  %v8176_v53 = vld [vmem:[#allocation3 + $0x20] sm:$0xff] }
 0x443   : > { %v3457_v22 = vsel %vm1902_vm11, %v3425_v55, %v6975_v18  ;;  %v6995_v55 = vunpack.i.l.bf16 %v10833_v36 }
 0x444   : > { %v3426_v27 = vsel %vm1836_vm8, %v3394_v21, %v6916_v43  ;;  %v3490_v4 = vsel %vm3489_vm15, %v3457_v22, %v7105_v44  ;;  %v11123_v43 = vpop.permute.xlu2 %7338 }
 0x445   : > { %v3458_v56 = vsel %vm1902_vm11, %v3426_v27, %v6976_v10  ;;  %v3523_v21 = vsel %vm3522_vm1, %v3490_v4, %v7245_v9  ;;  %v6881_v10 = vunpack.i.h.bf16 %v10655_v26  ;;  %v8177_v9 = vld [vmem:[#allocation3 + $0x18] sm:$0xff]  ;;  %v7116_v4 = vunpack.i.h.bf16 %v10948_v28 }
 0x446   : > { %v3491_v46 = vsel %vm3489_vm15, %v3458_v56, %v7106_v37  ;;  %v3556_v11 = vsel %vm3555_vm0, %v3523_v21, %v7325_v59  ;;  %v6880_v37 = vunpack.i.l.bf16 %v10655_v26  ;;  %v3363_v27 = vsel %vm1704_vm4, %v8177_v9, %v6850_v32 }
 0x447   : > { %v3524_v6 = vsel %vm3522_vm1, %v3491_v46, %v7246_v25  ;;  %v3364_v25 = vsel %vm1704_vm4, %v8176_v53, %v6851_v20  ;;  %v6996_v26 = vunpack.i.h.bf16 %v10833_v36  ;;  %v6921_v56 = vunpack.i.h.bf16 %v10637_v45 }
 0x448   : > { %v3557_v23 = vsel %vm3555_vm0, %v3524_v6, %v7326_v31  ;;  %v3396_v59 = vsel %vm1770_vm7, %v3364_v25, %v6881_v10  ;;  %v3395_v31 = vsel %vm1770_vm7, %v3363_v27, %v6880_v37  ;;  %v6920_v46 = vunpack.i.l.bf16 %v10637_v45 }
 0x449   : > { %v11096_v54 = vpop.permute.xlu0 %7328  ;;  %v7115_v20 = vunpack.i.l.bf16 %v10948_v28  ;;  %v7251_v32 = vunpack.i.h.bf16 %v11035_v48  ;;  %v7250_v6 = vunpack.i.l.bf16 %v11035_v48  ;;  %v6856_v9 = vunpack.i.h.bf16 %v10602_v58 }
 0x44a   : > { %v3427_v21 = vsel %vm1836_vm8, %v3395_v31, %v6920_v46  ;;  %v7331_v36 = vunpack.i.h.bf16 %v11096_v54  ;;  %v6855_v27 = vunpack.i.l.bf16 %v10602_v58  ;;  %v7001_v58 = vunpack.i.h.bf16 %v10825_v0 }
 0x44b   : > { %v3459_v10 = vsel %vm1902_vm11, %v3427_v21, %v6995_v55  ;;  %v6885_v55 = vunpack.i.l.bf16 %v10558_v12  ;;  %v7121_v21 = vunpack.i.h.bf16 %v10895_v49 }
 0x44c   : > { %v3365_v46 = vsel %vm1704_vm4, %v10853_v62, %v6855_v27  ;;  %v7256_v62 = vunpack.i.h.bf16 %v11053_v2 }
 0x451   : > { %v7344_v47 = vpop.permute.xlu0 %7343 }
 0x452   : > { %v7346_v51 = vunpack.i.h.bf16 %v7344_v47  ;;  %v7345_v63 = vunpack.i.l.bf16 %v7344_v47  ;;  %v11141_v47 = vpop.permute.xlu1 %7318 }
 0x454   : > { %v3589_v22 = vsel %vm3588_vm5, %v3556_v11, %v7345_v63  ;;  %v3590_v18 = vsel %vm3588_vm5, %v3557_v23, %v7346_v51  ;;  %v3428_v51 = vsel %vm1836_vm8, %v3396_v59, %v6921_v56  ;;  %v7330_v63 = vunpack.i.l.bf16 %v11096_v54  ;;  %v7354_v23 = vpop.permute.xlu2 %7353 }
 0x455   : > { %v3621_v44 = vpack.c.bf16 %v3590_v18, %v3589_v22  ;;  %v3460_v45 = vsel %vm1902_vm11, %v3428_v51, %v6996_v26  ;;  %v3492_v11 = vsel %vm3489_vm15, %v3459_v10, %v7115_v20  ;;  %v7355_v53 = vunpack.i.l.bf16 %v7354_v23 }
 0x456   : > { %v3493_v28 = vsel %vm3489_vm15, %v3460_v45, %v7116_v4  ;;  %v3525_v48 = vsel %vm3522_vm1, %v3492_v11, %v7250_v6  ;;  %v6886_v26 = vunpack.i.h.bf16 %v10558_v12  ;;  %v3366_v56 = vsel %vm1704_vm4, %v10855_v19, %v6856_v9  ;;  %v13688_v4 = vld [vmem:[#allocation23_spill] sm:$0xff] }
 0x457   : > { %6071 = vmatmul.msk.bf16.vlgmr.msra.gmra.mxu1 %vm3673_vm6, %v3621_v44  ;;  %v3526_v37 = vsel %vm3522_vm1, %v3493_v28, %v7251_v32  ;;  %v3558_v22 = vsel %vm3555_vm0, %v3525_v48, %v7330_v63  ;;  %v7356_v44 = vunpack.i.h.bf16 %v7354_v23  ;;  %v6931_v20 = vunpack.i.h.bf16 %v13688_v4 }
 0x458   : > { %v3559_v18 = vsel %vm3555_vm0, %v3526_v37, %v7331_v36  ;;  %v3591_v54 = vsel %vm3588_vm5, %v3558_v22, %v7355_v53  ;;  %v6930_v32 = vunpack.i.l.bf16 %v13688_v4  ;;  %v7000_v6 = vunpack.i.l.bf16 %v10825_v0 }
 0x459   : > { %v3592_v25 = vsel %vm3588_vm5, %v3559_v18, %v7356_v44  ;;  %v7120_v12 = vunpack.i.l.bf16 %v10895_v49  ;;  %v3398_v51 = vsel %vm1770_vm7, %v3366_v56, %v6886_v26  ;;  %v3397_v19 = vsel %vm1770_vm7, %v3365_v46, %v6885_v55  ;;  %v13690_v56 = vld [vmem:[#allocation31_spill] sm:$0xff] }
 0x45a   : > { %v7334_v59 = vpop.permute.xlu1 %7333  ;;  %v3622_v31 = vpack.c.bf16 %v3592_v25, %v3591_v54  ;;  %v7255_v36 = vunpack.i.l.bf16 %v11053_v2  ;;  %v3430_v63 = vsel %vm1836_vm8, %v3398_v51, %v6931_v20  ;;  %v3429_v45 = vsel %vm1836_vm8, %v3397_v19, %v6930_v32  ;;  %v13691_v20 = vld [vmem:[#allocation49_spill] sm:$0xff]  ;;  %v13693_v19 = vld [vmem:[#allocation70_spill] sm:$0xff] }
 0x45b   : > { %v7336_v10 = vunpack.i.h.bf16 %v7334_v59  ;;  %v7335_v28 = vunpack.i.l.bf16 %v7334_v59  ;;  %v3462_v0 = vsel %vm1902_vm11, %v3430_v63, %v7001_v58  ;;  %v3461_v11 = vsel %vm1902_vm11, %v3429_v45, %v7000_v6  ;;  %v13689_v59 = vld [vmem:[#allocation37_spill] sm:$0xff]  ;;  %v13692_v6 = vld [vmem:[#allocation42_spill] sm:$0xff] }
 0x45c   : > { %v3495_v49 = vsel %vm3489_vm15, %v3462_v0, %v7121_v21  ;;  %v3494_v23 = vsel %vm3489_vm15, %v3461_v11, %v7120_v12  ;;  %v7369_v37 = vpop.permute.xlu2 %7368  ;;  %v6860_v26 = vunpack.i.l.bf16 %v13689_v59  ;;  %v6891_v46 = vunpack.i.h.bf16 %v13690_v56 }
 0x45d   : > { %v3528_v22 = vsel %vm3522_vm1, %v3495_v49, %v7256_v62  ;;  %v3527_v2 = vsel %vm3522_vm1, %v3494_v23, %v7255_v36  ;;  %v7371_v53 = vunpack.i.h.bf16 %v7369_v37  ;;  %v7370_v54 = vunpack.i.l.bf16 %v7369_v37 }
 0x45e   : > { %v3560_v18 = vsel %vm3555_vm0, %v3527_v2, %v7335_v28  ;;  %v3561_v44 = vsel %vm3555_vm0, %v3528_v22, %v7336_v10  ;;  %v6890_v4 = vunpack.i.l.bf16 %v13690_v56  ;;  %v6941_v32 = vunpack.i.h.bf16 %v13691_v20 }
 0x45f   : > { %v3593_v25 = vsel %vm3588_vm5, %v3560_v18, %v7370_v54  ;;  %v3594_v9 = vsel %vm3588_vm5, %v3561_v44, %v7371_v53  ;;  %v6940_v58 = vunpack.i.l.bf16 %v13691_v20  ;;  %v7006_v21 = vunpack.i.h.bf16 %v13692_v6 }
 0x460   : > { %v3623_v27 = vpack.c.bf16 %v3594_v9, %v3593_v25  ;;  %v7005_v12 = vunpack.i.l.bf16 %v13692_v6  ;;  %v3367_v62 = vsel %vm1704_vm4, %v13693_v19, %v6860_v26  ;;  %v7166_v36 = vunpack.i.h.bf16 %v10994_v50  ;;  %v13696_v19 = vld [vmem:[#allocation69_spill] sm:$0xff] }
 0x461   : > { %v7165_v63 = vunpack.i.l.bf16 %v10994_v50  ;;  %v3399_v28 = vsel %vm1770_vm7, %v3367_v62, %v6890_v4  ;;  %v7261_v0 = vunpack.i.h.bf16 %v11072_v13  ;;  %v7260_v11 = vunpack.i.l.bf16 %v11072_v13  ;;  %v13695_v4 = vld [vmem:[#allocation11_spill] sm:$0xff] }
 0x462   : > { %v11184_v48 = vpop.permute.xlu1 %7348  ;;  %v7341_v23 = vunpack.i.h.bf16 %v11123_v43  ;;  %v7340_v37 = vunpack.i.l.bf16 %v11123_v43  ;;  %v6896_v20 = vunpack.i.h.bf16 %v13695_v4  ;;  %v7021_v62 = vunpack.i.h.bf16 %v13696_v19 }
 0x464   : > { %v7384_v45 = vpop.permute.xlu2 %7383 }
 0x465   : > { %v7386_v2 = vunpack.i.h.bf16 %v7384_v45  ;;  %v7385_v18 = vunpack.i.l.bf16 %v7384_v45 }
 0x467   : > { %6072 = vmatmul.msk.bf16.gmra.mxu1 %vm3673_vm6, %v3622_v31  ;;  %v6861_v31 = vunpack.i.h.bf16 %v13689_v59 }
 0x469   : > { %v3368_v51 = vsel %vm1704_vm4, %v10866_v29, %v6861_v31  ;;  %v3431_v29 = vsel %vm1836_vm8, %v3399_v28, %v6940_v58  ;;  %v13694_v31 = vld [vmem:[#allocation38_spill] sm:$0xff]  ;;  %v7171_v28 = vunpack.i.h.bf16 %v10972_v57 }
 0x46a   : > { %v11194_v55 = vpop.permute.xlu1 %7363  ;;  %v3400_v10 = vsel %vm1770_vm7, %v3368_v51, %v6891_v46  ;;  %v3463_v50 = vsel %vm1902_vm11, %v3431_v29, %v7005_v12  ;;  %v6866_v26 = vunpack.i.h.bf16 %v13694_v31  ;;  %v6865_v56 = vunpack.i.l.bf16 %v13694_v31 }
 0x46b   : > { %v3432_v49 = vsel %vm1836_vm8, %v3400_v10, %v6941_v32  ;;  %v3496_v53 = vsel %vm3489_vm15, %v3463_v50, %v7165_v63  ;;  %v6895_v32 = vunpack.i.l.bf16 %v13695_v4  ;;  %v13697_v63 = vld [vmem:[#allocation58_spill] sm:$0xff] }
 0x46c   : > { %v3464_v22 = vsel %vm1902_vm11, %v3432_v49, %v7006_v21  ;;  %v3529_v54 = vsel %vm3522_vm1, %v3496_v53, %v7260_v11  ;;  %v3370_v58 = vsel %vm1704_vm4, %v10877_v33, %v6866_v26  ;;  %v3369_v6 = vsel %vm1704_vm4, %v10875_v41, %v6865_v56  ;;  %v11238_v21 = vpop.permute.xlu0 %7358 }
 0x46d   : > { %v3497_v44 = vsel %vm3489_vm15, %v3464_v22, %v7166_v36  ;;  %v3562_v9 = vsel %vm3555_vm0, %v3529_v54, %v7340_v37  ;;  %v3402_v12 = vsel %vm1770_vm7, %v3370_v58, %v6896_v20  ;;  %v3401_v51 = vsel %vm1770_vm7, %v3369_v6, %v6895_v32  ;;  %v13700_v20 = vld [vmem:[#allocation40_spill] sm:$0xff]  ;;  %v13701_v6 = vld [vmem:[#allocation59_spill] sm:$0xff] }
 0x46e   : > { %v3530_v13 = vsel %vm3522_vm1, %v3497_v44, %v7261_v0  ;;  %v7020_v36 = vunpack.i.l.bf16 %v13696_v19  ;;  %v6946_v45 = vunpack.i.h.bf16 %v13697_v63  ;;  %v6945_v10 = vunpack.i.l.bf16 %v13697_v63  ;;  %v13702_v19 = vld [vmem:[#allocation71_spill] sm:$0xff] }
 0x46f   : > { %v3563_v43 = vsel %vm3555_vm0, %v3530_v13, %v7341_v23  ;;  %v7170_v33 = vunpack.i.l.bf16 %v10972_v57  ;;  %v7266_v41 = vunpack.i.h.bf16 %v11051_v61  ;;  %v7265_v11 = vunpack.i.l.bf16 %v11051_v61 }
 0x470   : > { %v3596_v59 = vsel %vm3588_vm5, %v3563_v43, %v7386_v2  ;;  %v3433_v49 = vsel %vm1836_vm8, %v3401_v51, %v6945_v10  ;;  %v3434_v29 = vsel %vm1836_vm8, %v3402_v12, %v6946_v45  ;;  %v7351_v23 = vunpack.i.h.bf16 %v11184_v48 }
 0x471   : > { %v7350_v37 = vunpack.i.l.bf16 %v11184_v48  ;;  %v3466_v22 = vsel %vm1902_vm11, %v3434_v29, %v7021_v62  ;;  %v3465_v50 = vsel %vm1902_vm11, %v3433_v49, %v7020_v36  ;;  %v6951_v32 = vunpack.i.h.bf16 %v13700_v20 }
 0x472   : > { %v11223_v25 = vpop.permute.xlu1 %7378  ;;  %v3499_v57 = vsel %vm3489_vm15, %v3466_v22, %v7171_v28  ;;  %v3498_v44 = vsel %vm3489_vm15, %v3465_v50, %v7170_v33  ;;  %v6950_v58 = vunpack.i.l.bf16 %v13700_v20  ;;  %v6901_v12 = vunpack.i.h.bf16 %v13701_v6  ;;  %v13706_v20 = vld [vmem:[#allocation14_spill] sm:$0xff] }
 0x473   : > { %v3532_v61 = vsel %vm3522_vm1, %v3499_v57, %v7266_v41  ;;  %v3531_v53 = vsel %vm3522_vm1, %v3498_v44, %v7265_v11  ;;  %v6900_v51 = vunpack.i.l.bf16 %v13701_v6  ;;  %v7031_v62 = vunpack.i.h.bf16 %v13702_v19  ;;  %v8178_v6 = vld [vmem:[#allocation3 + $0x98] sm:$0xff] }
 0x474   : > { %v3564_v13 = vsel %vm3555_vm0, %v3531_v53, %v7350_v37  ;;  %v3565_v54 = vsel %vm3555_vm0, %v3532_v61, %v7351_v23  ;;  %v11264_v43 = vpop.permute.xlu0 %7373  ;;  %v7030_v36 = vunpack.i.l.bf16 %v13702_v19  ;;  %v7176_v63 = vunpack.i.h.bf16 %v10964_v60 }
 0x475   : > { %v7175_v45 = vunpack.i.l.bf16 %v10964_v60  ;;  %v7271_v33 = vunpack.i.h.bf16 %v11062_v3  ;;  %v7361_v49 = vunpack.i.h.bf16 %v11238_v21  ;;  %v7360_v29 = vunpack.i.l.bf16 %v11238_v21 }
 0x477   : > { %6073 = vmatmul.msk.bf16.gmra.mxu1 %vm3673_vm6, %v3623_v27  ;;  %v3595_v27 = vsel %vm3588_vm5, %v3562_v9, %v7385_v18 }
 0x478   : > { %v3624_v46 = vpack.c.bf16 %v3596_v59, %v3595_v27  ;;  %v13698_v27 = vld [vmem:[#allocation41_spill] sm:$0xff] }
 0x479   : > { %v6876_v59 = vunpack.i.h.bf16 %v13698_v27  ;;  %v6875_v31 = vunpack.i.l.bf16 %v13698_v27 }
 0x47a   : > { %v7394_v0 = vpop.permute.xlu1 %7393 }
 0x47b   : > { %v7396_v2 = vunpack.i.h.bf16 %v7394_v0  ;;  %v7395_v18 = vunpack.i.l.bf16 %v7394_v0  ;;  %v3372_v56 = vsel %vm1704_vm4, %v10883_v30, %v6876_v59  ;;  %v7270_v0 = vunpack.i.l.bf16 %v11062_v3  ;;  %v13704_v59 = vld [vmem:[#allocation52_spill] sm:$0xff] }
 0x47c   : > { %v3404_v28 = vsel %vm1770_vm7, %v3372_v56, %v6901_v12  ;;  %v11289_v23 = vpop.permute.xlu0 %7388  ;;  %v13705_v56 = vld [vmem:[#allocation53_spill] sm:$0xff] }
 0x47d   : > { %v3597_v48 = vsel %vm3588_vm5, %v3564_v13, %v7395_v18  ;;  %v3598_v9 = vsel %vm3588_vm5, %v3565_v54, %v7396_v2  ;;  %v3436_v41 = vsel %vm1836_vm8, %v3404_v28, %v6951_v32  ;;  %v13703_v54 = vld [vmem:[#allocation22_spill] sm:$0xff]  ;;  %v7036_v32 = vunpack.i.h.bf16 %v13706_v20 }
 0x47e   : > { %v3625_v26 = vpack.c.bf16 %v3598_v9, %v3597_v48  ;;  %v3468_v60 = vsel %vm1902_vm11, %v3436_v41, %v7031_v62  ;;  %v6906_v48 = vunpack.i.h.bf16 %v13703_v54  ;;  %v6905_v9 = vunpack.i.l.bf16 %v13703_v54  ;;  %v11322_v41 = vpop.permute.xlu2 %7398  ;;  %v13708_v54 = vld [vmem:[#allocation19_spill] sm:$0xff] }
 0x47f   : > { %v3501_v2 = vsel %vm3489_vm15, %v3468_v60, %v7176_v63  ;;  %v7181_v62 = vunpack.i.h.bf16 %v11004_v34  ;;  %v7275_v28 = vunpack.i.l.bf16 %v11086_v42 }
 0x480   : > { %v3534_v18 = vsel %vm3522_vm1, %v3501_v2, %v7271_v33  ;;  %v3374_v12 = vsel %vm1704_vm4, %v8178_v6, %v6906_v48  ;;  %v6936_v48 = vunpack.i.h.bf16 %v13708_v54  ;;  %v13709_v6 = vld [vmem:[#allocation45_spill] sm:$0xff] }
 0x481   : > { %v3567_v21 = vsel %vm3555_vm0, %v3534_v18, %v7361_v49  ;;  %v7365_v49 = vunpack.i.l.bf16 %v11194_v55 }
 0x482   : > { %v7409_v30 = vpop.permute.xlu1 %7408 }
 0x483   : > { %v7411_v22 = vunpack.i.h.bf16 %v7409_v30  ;;  %v7410_v50 = vunpack.i.l.bf16 %v7409_v30 }
 0x484   : > { %v11303_v27 = vpop.permute.xlu0 %7403 }
 0x485   : > { %v3600_v53 = vsel %vm3588_vm5, %v3567_v21, %v7411_v22  ;;  %v13707_v21 = vld [vmem:[#allocation39_spill] sm:$0xff] }
 0x487   : > { %6074 = vmatmul.msk.bf16.gmra.mxu1 %vm3673_vm6, %v3624_v46  ;;  %v13699_v46 = vld [vmem:[#allocation73_spill] sm:$0xff] }
 0x488   : > { %v3371_v4 = vsel %vm1704_vm4, %v13699_v46, %v6875_v31  ;;  %v6911_v31 = vunpack.i.h.bf16 %v13704_v59  ;;  %v6961_v46 = vunpack.i.h.bf16 %v13705_v56 }
 0x489   : > { %v3403_v10 = vsel %vm1770_vm7, %v3371_v4, %v6900_v51  ;;  %v6960_v4 = vunpack.i.l.bf16 %v13705_v56  ;;  %v8179_v51 = vld [vmem:[#allocation3 + $0x90] sm:$0xff] }
 0x48a   : > { %v3435_v11 = vsel %vm1836_vm8, %v3403_v10, %v6950_v58  ;;  %v7035_v58 = vunpack.i.l.bf16 %v13706_v20  ;;  %v3373_v19 = vsel %vm1704_vm4, %v8179_v51, %v6905_v9  ;;  %v7424_v63 = vpop.permute.xlu1 %7423  ;;  %v3406_v30 = vsel %vm1770_vm7, %v3374_v12, %v6911_v31 }
 0x48b   : > { %v3467_v37 = vsel %vm1902_vm11, %v3435_v11, %v7030_v36  ;;  %v7180_v36 = vunpack.i.l.bf16 %v11004_v34  ;;  %v7276_v10 = vunpack.i.h.bf16 %v11086_v42  ;;  %v3438_v33 = vsel %vm1836_vm8, %v3406_v30, %v6961_v46  ;;  %v11344_v46 = vpop.permute.xlu2 %7413 }
 0x48c   : > { %v3500_v3 = vsel %vm3489_vm15, %v3467_v37, %v7175_v45  ;;  %v7366_v11 = vunpack.i.h.bf16 %v11194_v55  ;;  %v3470_v34 = vsel %vm1902_vm11, %v3438_v33, %v7036_v32  ;;  %v7426_v60 = vunpack.i.h.bf16 %v7424_v63 }
 0x48d   : > { %v3533_v57 = vsel %vm3522_vm1, %v3500_v3, %v7270_v0  ;;  %v7425_v37 = vunpack.i.l.bf16 %v7424_v63  ;;  %v3503_v22 = vsel %vm3489_vm15, %v3470_v34, %v7181_v62  ;;  %v11332_v3 = vpop.permute.xlu0 %7418  ;;  %v6935_v9 = vunpack.i.l.bf16 %v13708_v54 }
 0x48e   : > { %v3566_v44 = vsel %vm3555_vm0, %v3533_v57, %v7360_v29  ;;  %v7041_v32 = vunpack.i.h.bf16 %v10889_v14  ;;  %v6966_v12 = vunpack.i.h.bf16 %v13709_v6  ;;  %v6965_v51 = vunpack.i.l.bf16 %v13709_v6 }
 0x48f   : > { %v3599_v61 = vsel %vm3588_vm5, %v3566_v44, %v7410_v50  ;;  %v3536_v50 = vsel %vm3522_vm1, %v3503_v22, %v7276_v10  ;;  %v7190_v62 = vunpack.i.l.bf16 %v10998_v1  ;;  %v7281_v63 = vunpack.i.h.bf16 %v11067_v7 }
 0x490   : > { %v3626_v13 = vpack.c.bf16 %v3600_v53, %v3599_v61  ;;  %v3569_v55 = vsel %vm3555_vm0, %v3536_v50, %v7366_v11  ;;  %v6926_v61 = vunpack.i.h.bf16 %v13707_v21  ;;  %v6925_v53 = vunpack.i.l.bf16 %v13707_v21  ;;  %v13710_v50 = vld [vmem:[#allocation32_spill] sm:$0xff]  ;;  %v8183_v21 = vld [vmem:[#allocation3 + $0xc0] sm:$0xff] }
 0x491   : > { %v3602_v44 = vsel %vm3588_vm5, %v3569_v55, %v7426_v60  ;;  %v7286_v6 = vunpack.i.h.bf16 %v11074_v40 }
 0x493   : > { %v11367_v60 = vpop.permute.xlu2 %7428 }
 0x497   : > { %6075 = vmatmul.msk.bf16.gmra.mxu1 %vm3673_vm6, %v3625_v26  ;;  %v6910_v26 = vunpack.i.l.bf16 %v13704_v59  ;;  %v8180_v59 = vld [vmem:[#allocation3 + $0xb0] sm:$0xff] }
 0x498   : > { %v3376_v31 = vsel %vm1704_vm4, %v8180_v59, %v6926_v61 }
 0x499   : > { %v3405_v45 = vsel %vm1770_vm7, %v3373_v19, %v6910_v26  ;;  %v8181_v26 = vld [vmem:[#allocation3 + $0xa8] sm:$0xff]  ;;  %v7191_v19 = vunpack.i.h.bf16 %v10998_v1 }
 0x49a   : > { %v3437_v0 = vsel %vm1836_vm8, %v3405_v45, %v6960_v4  ;;  %v3375_v56 = vsel %vm1704_vm4, %v8181_v26, %v6925_v53  ;;  %v3408_v4 = vsel %vm1770_vm7, %v3376_v31, %v6936_v48  ;;  %v7280_v45 = vunpack.i.l.bf16 %v11067_v7  ;;  %v13711_v53 = vld [vmem:[#allocation61_spill] sm:$0xff] }
 0x49b   : > { %v3469_v29 = vsel %vm1902_vm11, %v3437_v0, %v7035_v58  ;;  %v3407_v20 = vsel %vm1770_vm7, %v3375_v56, %v6935_v9  ;;  %v7040_v58 = vunpack.i.l.bf16 %v10889_v14  ;;  %v3440_v10 = vsel %vm1836_vm8, %v3408_v4, %v6966_v12  ;;  %v13712_v48 = vld [vmem:[#allocation57_spill] sm:$0xff] }
 0x49c   : > { %v3502_v42 = vsel %vm3489_vm15, %v3469_v29, %v7180_v36  ;;  %v7434_v36 = vpop.permute.xlu0 %7433  ;;  %v3439_v30 = vsel %vm1836_vm8, %v3407_v20, %v6965_v51  ;;  %v7375_v14 = vunpack.i.l.bf16 %v11264_v43  ;;  %v3472_v33 = vsel %vm1902_vm11, %v3440_v10, %v7041_v32  ;;  %v7444_v20 = vpop.permute.xlu2 %7443 }
 0x49d   : > { %v3535_v2 = vsel %vm3522_vm1, %v3502_v42, %v7275_v28  ;;  %v7376_v28 = vunpack.i.h.bf16 %v11264_v43  ;;  %v3471_v0 = vsel %vm1902_vm11, %v3439_v30, %v7040_v58  ;;  %v7436_v11 = vunpack.i.h.bf16 %v7434_v36 }
 0x49e   : > { %v3568_v18 = vsel %vm3555_vm0, %v3535_v2, %v7365_v49  ;;  %v7435_v49 = vunpack.i.l.bf16 %v7434_v36  ;;  %v3505_v1 = vsel %vm3489_vm15, %v3472_v33, %v7191_v19  ;;  %v3504_v34 = vsel %vm3489_vm15, %v3471_v0, %v7190_v62 }
 0x49f   : > { %v3601_v57 = vsel %vm3588_vm5, %v3568_v18, %v7425_v37  ;;  %v3538_v7 = vsel %vm3522_vm1, %v3505_v1, %v7281_v63  ;;  %v3537_v29 = vsel %vm3522_vm1, %v3504_v34, %v7280_v45  ;;  %v6956_v2 = vunpack.i.h.bf16 %v13710_v50 }
 0x4a0   : > { %v3570_v37 = vsel %vm3555_vm0, %v3537_v29, %v7375_v14  ;;  %v3571_v43 = vsel %vm3555_vm0, %v3538_v7, %v7376_v28  ;;  %v6955_v18 = vunpack.i.l.bf16 %v13710_v50  ;;  %v6980_v54 = vunpack.i.l.bf16 %v13711_v53  ;;  %v11403_v14 = vld [vmem:[%s13200_s5] ss:$0 sm:$0xff]  ;;  %v13713_v29 = vld [vmem:[#allocation66_spill] sm:$0xff] }
 0x4a1   : > { %v3603_v22 = vsel %vm3588_vm5, %v3570_v37, %v7435_v49  ;;  %v3604_v42 = vsel %vm3588_vm5, %v3571_v43, %v7436_v11  ;;  %v6971_v9 = vunpack.i.h.bf16 %v13712_v48  ;;  %v6970_v59 = vunpack.i.l.bf16 %v13712_v48  ;;  %v11412_v49 = vld [vmem:[%s13201_s6] ss:$0 sm:$0xff] }
 0x4a2   : > { %v3628_v55 = vpack.c.bf16 %v3604_v42, %v3603_v22  ;;  %v3377_v61 = vsel %vm1704_vm4, %v8183_v21, %v6955_v18  ;;  %v7056_v31 = vunpack.i.h.bf16 %v10903_v38  ;;  %v7055_v26 = vunpack.i.l.bf16 %v10903_v38  ;;  %v13714_v22 = vld [vmem:[#allocation34_spill] sm:$0xff] }
 0x4a3   : > { %v7196_v56 = vunpack.i.h.bf16 %v10976_v15  ;;  %v7195_v4 = vunpack.i.l.bf16 %v10976_v15  ;;  %v3409_v32 = vsel %vm1770_vm7, %v3377_v61, %v6970_v59  ;;  %v7285_v12 = vunpack.i.l.bf16 %v11074_v40  ;;  %v13715_v18 = vld [vmem:[#allocation54_spill] sm:$0xff] }
 0x4a4   : > { %v3441_v19 = vsel %vm1836_vm8, %v3409_v32, %v6980_v54  ;;  %v7381_v62 = vunpack.i.h.bf16 %v11223_v25  ;;  %v7380_v38 = vunpack.i.l.bf16 %v11223_v25  ;;  %v7446_v63 = vunpack.i.h.bf16 %v7444_v20  ;;  %v8184_v21 = vld [vmem:[#allocation3 + $0xe0] sm:$0xff]  ;;  %v13716_v54 = vld [vmem:[#allocation67_spill] sm:$0xff] }
 0x4a5   : > { %v3473_v15 = vsel %vm1902_vm11, %v3441_v19, %v7055_v26  ;;  %v7445_v45 = vunpack.i.l.bf16 %v7444_v20  ;;  %v6986_v37 = vunpack.i.h.bf16 %v13713_v29  ;;  %v6985_v43 = vunpack.i.l.bf16 %v13713_v29 }
 0x4a6   : > { %v3506_v10 = vsel %vm3489_vm15, %v3473_v15, %v7195_v4  ;;  %v6991_v42 = vunpack.i.h.bf16 %v13714_v22  ;;  %v6990_v50 = vunpack.i.l.bf16 %v13714_v22  ;;  %v7066_v48 = vunpack.i.h.bf16 %v13716_v54  ;;  %v7449_v4 = vpop.permute.xlu0 %7448 }
 0x4a7   : > { %6076 = vmatmul.msk.bf16.gmra.mxu1 %vm3673_vm6, %v3626_v13  ;;  %v3627_v13 = vpack.c.bf16 %v3602_v44, %v3601_v57  ;;  %v8182_v57 = vld [vmem:[#allocation3 + $0xc8] sm:$0xff]  ;;  %v3539_v28 = vsel %vm3522_vm1, %v3506_v10, %v7285_v12  ;;  %v3380_v61 = vsel %vm1704_vm4, %v8184_v21, %v6986_v37  ;;  %v7201_v26 = vunpack.i.h.bf16 %v11017_v8 }
 0x4a8   : > { %v3378_v44 = vsel %vm1704_vm4, %v8182_v57, %v6956_v2  ;;  %v3572_v25 = vsel %vm3555_vm0, %v3539_v28, %v7380_v38  ;;  %v7010_v57 = vunpack.i.l.bf16 %v13715_v18  ;;  %v7390_v38 = vunpack.i.l.bf16 %v11289_v23  ;;  %v13718_v28 = vld [vmem:[#allocation68_spill] sm:$0xff] }
 0x4a9   : > { %v3410_v58 = vsel %vm1770_vm7, %v3378_v44, %v6971_v9  ;;  %v3605_v0 = vsel %vm3588_vm5, %v3572_v25, %v7445_v45  ;;  %v7065_v9 = vunpack.i.l.bf16 %v13716_v54  ;;  %v7450_v45 = vunpack.i.l.bf16 %v7449_v4 }
 0x4aa   : > { %v7026_v25 = vunpack.i.h.bf16 %v13718_v28  ;;  %v7025_v37 = vunpack.i.l.bf16 %v13718_v28 }
 0x4b7   : > { %6077 = vmatmul.msk.bf16.gmra.mxu1 %vm3673_vm6, %v3627_v13  ;;  %v6981_v13 = vunpack.i.h.bf16 %v13711_v53  ;;  %v8185_v53 = vld [vmem:[#allocation3 + $0xd8] sm:$0xff] }
 0x4b9   : > { %v3442_v51 = vsel %vm1836_vm8, %v3410_v58, %v6981_v13  ;;  %v3379_v13 = vsel %vm1704_vm4, %v8185_v53, %v6985_v43  ;;  %v7291_v58 = vunpack.i.h.bf16 %v11092_v17 }
 0x4ba   : > { %v3474_v36 = vsel %vm1902_vm11, %v3442_v51, %v7056_v31  ;;  %v3411_v59 = vsel %vm1770_vm7, %v3379_v13, %v6990_v50  ;;  %v3412_v31 = vsel %vm1770_vm7, %v3380_v61, %v6991_v42  ;;  %v13717_v51 = vld [vmem:[#allocation60_spill] sm:$0xff] }
 0x4bb   : > { %v3507_v30 = vsel %vm3489_vm15, %v3474_v36, %v7196_v56  ;;  %v7200_v56 = vunpack.i.l.bf16 %v11017_v8  ;;  %v3443_v32 = vsel %vm1836_vm8, %v3411_v59, %v7010_v57  ;;  %v7016_v19 = vunpack.i.h.bf16 %v13717_v51  ;;  %v8187_v42 = vld [vmem:[#allocation3 + $0xf0] sm:$0xff]  ;;  %v11470_v59 = vld [vmem:[#allocation3 + $0x8] sm:$0xff] }
 0x4bc   : > { %v3540_v40 = vsel %vm3522_vm1, %v3507_v30, %v7286_v6  ;;  %v7290_v6 = vunpack.i.l.bf16 %v11092_v17  ;;  %v3475_v15 = vsel %vm1902_vm11, %v3443_v32, %v7065_v9  ;;  %v7015_v30 = vunpack.i.l.bf16 %v13717_v51  ;;  %v11468_v9 = vld [vmem:[#allocation3] sm:$0xff] }
 0x4bd   : > { %v3573_v33 = vsel %vm3555_vm0, %v3540_v40, %v7381_v62  ;;  %v7391_v62 = vunpack.i.h.bf16 %v11289_v23  ;;  %v3508_v17 = vsel %vm3489_vm15, %v3475_v15, %v7200_v56  ;;  %v7211_v51 = vunpack.i.h.bf16 %v11031_v24 }
 0x4be   : > { %v3606_v11 = vsel %vm3588_vm5, %v3573_v33, %v7446_v63  ;;  %v7451_v63 = vunpack.i.h.bf16 %v7449_v4  ;;  %v3541_v33 = vsel %vm3522_vm1, %v3508_v17, %v7290_v6  ;;  %v3381_v50 = vsel %vm1704_vm4, %v8187_v42, %v7015_v30 }
 0x4bf   : > { %v3629_v7 = vpack.c.bf16 %v3606_v11, %v3605_v0  ;;  %v8186_v0 = vld [vmem:[#allocation3 + $0xf8] sm:$0xff]  ;;  %v3413_v53 = vsel %vm1770_vm7, %v3381_v50, %v7025_v37  ;;  %v4053_v4 = vrot.slane %v11468_v9, 1  ;;  %v7295_v17 = vunpack.i.l.bf16 %v11079_v52 }
 0x4c0   : > { %v3382_v11 = vsel %vm1704_vm4, %v8186_v0, %v7016_v19  ;;  %v7210_v19 = vunpack.i.l.bf16 %v11031_v24 }
 0x4c7   : > { %6078 = vmatmul.msk.bf16.gmra.mxu1 %vm3673_vm6, %v3628_v55  ;;  %v7011_v55 = vunpack.i.h.bf16 %v13715_v18 }
 0x4c9   : > { %v3444_v20 = vsel %vm1836_vm8, %v3412_v31, %v7011_v55  ;;  %v13719_v55 = vld [vmem:[#allocation36_spill] sm:$0xff]  ;;  %v11472_v31 = vld [vmem:[#allocation3 + $0x10] sm:$0x3] }
 0x4ca   : > { %v3476_v36 = vsel %vm1902_vm11, %v3444_v20, %v7066_v48  ;;  %v7046_v57 = vunpack.i.h.bf16 %v13719_v55  ;;  %v7045_v13 = vunpack.i.l.bf16 %v13719_v55  ;;  %v4054_v20 = vrot.slane %v11470_v59, 1 }
 0x4cb   : > { %v3509_v10 = vsel %vm3489_vm15, %v3476_v36, %v7201_v26  ;;  %v7085_v26 = vunpack.i.l.bf16 %v10925_v39  ;;  %v4056_v32 = vrot.slane %v11472_v31, 1 }
 0x4cc   : > { %v3542_v23 = vsel %vm3522_vm1, %v3509_v10, %v7291_v58  ;;  %v3445_v58 = vsel %vm1836_vm8, %v3413_v53, %v7045_v13  ;;  %v7296_v10 = vunpack.i.h.bf16 %v11079_v52  ;;  %v7071_v53 = vunpack.i.h.bf16 %v10901_v35 }
 0x4cd   : > { %v3477_v24 = vsel %vm1902_vm11, %v3445_v58, %v7085_v26 }
 0x4ce   : > { %v3510_v52 = vsel %vm3489_vm15, %v3477_v24, %v7210_v19 }
 0x4d4   : > { %v3735_v1 = vpop.f32.mrf.mxu1 }
 0x4d5   : > { %v3819_v34 = vmul.f32 %v11403_v14, %v3735_v1  ;;  %v3575_v1 = vsel %vm3555_vm0, %v3542_v23, %v7391_v62 }
 0x4d6   : > { %v3608_v22 = vsel %vm3588_vm5, %v3575_v1, %v7451_v63 }
 0x4d7   : > { %v3855_v2 = vadd.f32 %v11412_v49, %v3819_v34  ;;  %6079 = vmatmul.msk.bf16.gmra.mxu1 %vm3673_vm6, %v3629_v7  ;;  %v3574_v34 = vsel %vm3555_vm0, %v3541_v33, %v7390_v38  ;;  %v11452_v7 = vpop.permute.xlu1 %7438  ;;  %v4055_v38 = vsel %vm716_vm2, %v4053_v4, %v4054_v20  ;;  %v8189_v4 = vld [vmem:[#allocation3 + $0x108] sm:$0xff] }
 0x4d8   : > { %v3607_v43 = vsel %vm3588_vm5, %v3574_v34, %v7450_v45 }
 0x4d9   : > { %v3887_v44 = vmax.f32 %v3855_v2, 0.0  ;;  %v3414_v2 = vsel %vm1770_vm7, %v3382_v11, %v7026_v25  ;;  %v3630_v61 = vpack.c.bf16 %v3608_v22, %v3607_v43  ;;  %v7400_v25 = vunpack.i.l.bf16 %v11322_v41 }
 0x4da   : > { %v3446_v54 = vsel %vm1836_vm8, %v3414_v2, %v7046_v57  ;;  %v3543_v43 = vsel %vm3522_vm1, %v3510_v52, %v7295_v17  ;;  %v7051_v22 = vunpack.i.h.bf16 %v10891_v16 }
 0x4db   : > { %3919 = vst.msk [vmem:[#allocation3 + $0x19] sm:$0xff] %vm1704_vm4, %v3887_v44  ;;  %v7086_v44 = vunpack.i.h.bf16 %v10925_v39  ;;  %v3576_v42 = vsel %vm3555_vm0, %v3543_v43, %v7400_v25 }
 0x4dc   : > { %v3737_v12 = vpop.f32.mrf.mxu1 }
 0x4dd   : > { %v3820_v8 = vmul.f32 %v11403_v14, %v3737_v12  ;;  %v3478_v6 = vsel %vm1902_vm11, %v3446_v54, %v7086_v44 }
 0x4df   : > { %v3856_v40 = vadd.f32 %v11412_v49, %v3820_v8  ;;  %v4057_v8 = vsel %vm716_vm2, %v4054_v20, %v4056_v32  ;;  %v7454_v36 = vpop.permute.xlu1 %7453  ;;  %v7070_v20 = vunpack.i.l.bf16 %v10901_v35  ;;  %v13721_v32 = vld [vmem:[#allocation76_spill] sm:$0xff] }
 0x4e0   : > { %v7482_v30 = vpack.i.bf16 %v4057_v8, %v4055_v38  ;;  %v7456_v11 = vunpack.i.h.bf16 %v7454_v36  ;;  %v7455_v1 = vunpack.i.l.bf16 %v7454_v36  ;;  %v7091_v58 = vunpack.i.h.bf16 %v13721_v32 }
 0x4e1   : > { %v3888_v29 = vmax.f32 %v3856_v40, 0.0  ;;  %v7401_v40 = vunpack.i.h.bf16 %v11322_v41  ;;  %v7090_v19 = vunpack.i.l.bf16 %v13721_v32 }
 0x4e2   : > { %v11475_v56 = vld [vmem:[#allocation3 + $0x18] sm:$0xff]  ;;  %7483 = vrot.lane.b32.xlu1 %v7482_v30, %s13613_s25  ;;  %v3609_v55 = vsel %vm3588_vm5, %v3576_v42, %v7455_v1 }
 0x4e3   : > { %3920 = vst.msk [vmem:[#allocation3 + $0x21] sm:$0xff] %vm1704_vm4, %v3888_v29  ;;  %v4058_v15 = vrot.slane %v11475_v56, 1  ;;  %v3511_v29 = vsel %vm3489_vm15, %v3478_v6, %v7211_v51 }
 0x4e4   : > { %v3740_v18 = vpop.f32.mrf.mxu1  ;;  %v3544_v41 = vsel %vm3522_vm1, %v3511_v29, %v7296_v10  ;;  %v7406_v29 = vunpack.i.h.bf16 %v11303_v27 }
 0x4e5   : > { %v3821_v21 = vmul.f32 %v11403_v14, %v3740_v18  ;;  %v3577_v50 = vsel %vm3555_vm0, %v3544_v41, %v7401_v40  ;;  %v7050_v18 = vunpack.i.l.bf16 %v10891_v16  ;;  %v7459_v40 = vpop.permute.xlu2 %7458 }
 0x4e6   : > { %v3610_v57 = vsel %vm3588_vm5, %v3577_v50, %v7456_v11  ;;  %v7461_v42 = vunpack.i.h.bf16 %v7459_v40  ;;  %v7460_v50 = vunpack.i.l.bf16 %v7459_v40 }
 0x4e7   : > { %v3857_v48 = vadd.f32 %v11412_v49, %v3821_v21  ;;  %6080 = vmatmul.msk.bf16.gmra.mxu1 %vm3673_vm6, %v3630_v61  ;;  %v8188_v21 = vld [vmem:[#allocation3 + $0x110] sm:$0xff]  ;;  %v3631_v54 = vpack.c.bf16 %v3610_v57, %v3609_v55  ;;  %v3383_v16 = vsel %vm1704_vm4, %v8189_v4, %v7050_v18 }
 0x4e8   : > { %v3384_v61 = vsel %vm1704_vm4, %v8188_v21, %v7051_v22  ;;  %v13724_v18 = vld [vmem:[#allocation72_spill] sm:$0xff] }
 0x4e9   : > { %v3889_v12 = vmax.f32 %v3857_v48, 0.0  ;;  %v13720_v48 = vld [vmem:[#allocation47_spill] sm:$0xff]  ;;  %v7076_v55 = vunpack.i.h.bf16 %v13724_v18 }
 0x4ea   : > { %v11484_v62 = vld [vmem:[#allocation3 + $0x20] sm:$0xff]  ;;  %v11486_v39 = vld [vmem:[#allocation3 + $0x28] sm:$0x3]  ;;  %v7061_v26 = vunpack.i.h.bf16 %v13720_v48  ;;  %v7060_v6 = vunpack.i.l.bf16 %v13720_v48 }
 0x4eb   : > { %3921 = vst.msk [vmem:[#allocation3 + $0x31] sm:$0xff] %vm1704_vm4, %v3889_v12  ;;  %v4059_v63 = vrot.slane %v11484_v62, 1  ;;  %v4061_v45 = vrot.slane %v11486_v39, 1 }
 0x4ec   : > { %v3742_v28 = vpop.f32.mrf.mxu1  ;;  %v3416_v51 = vsel %vm1770_vm7, %v3384_v61, %v7061_v26  ;;  %v3415_v8 = vsel %vm1770_vm7, %v3383_v16, %v7060_v6  ;;  %v13725_v61 = vld [vmem:[#allocation75_spill] sm:$0xff] }
 0x4ed   : > { %v3822_v23 = vmul.f32 %v11403_v14, %v3742_v28  ;;  %v4060_v33 = vsel %vm716_vm2, %v4058_v15, %v4059_v63  ;;  %v4062_v0 = vsel %vm716_vm2, %v4059_v63, %v4061_v45  ;;  %v3448_v36 = vsel %vm1836_vm8, %v3416_v51, %v7071_v53  ;;  %v13722_v45 = vld [vmem:[#allocation89_spill] sm:$0xff]  ;;  %v8190_v51 = vld [vmem:[#allocation3 + $0x128] sm:$0xff] }
 0x4ee   : > { %v11503_v34 = vpack.i.bf16 %v4062_v0, %v4060_v33  ;;  %v3447_v35 = vsel %vm1836_vm8, %v3415_v8, %v7070_v20  ;;  %v3480_v63 = vsel %vm1902_vm11, %v3448_v36, %v7091_v58  ;;  %v7221_v30 = vunpack.i.h.bf16 %v13722_v45  ;;  %v13723_v0 = vld [vmem:[#allocation95_spill] sm:$0xff]  ;;  %v13726_v20 = vld [vmem:[#allocation78_spill] sm:$0xff] }
 0x4ef   : > { %v3858_v37 = vadd.f32 %v11412_v49, %v3822_v23  ;;  %v7220_v17 = vunpack.i.l.bf16 %v13722_v45  ;;  %v3479_v33 = vsel %vm1902_vm11, %v3447_v35, %v7090_v19  ;;  %v7301_v11 = vunpack.i.h.bf16 %v13723_v0  ;;  %v8191_v8 = vld [vmem:[#allocation3 + $0x120] sm:$0xff] }
 0x4f0   : > { %7488 = vrot.lane.b32.xlu2 %v11503_v34, %s13613_s25  ;;  %v7300_v1 = vunpack.i.l.bf16 %v13723_v0  ;;  %v3513_v57 = vsel %vm3489_vm15, %v3480_v63, %v7221_v30  ;;  %v7081_v53 = vunpack.i.h.bf16 %v13725_v61  ;;  %v7080_v48 = vunpack.i.l.bf16 %v13725_v61 }
 0x4f1   : > { %v3890_v2 = vmax.f32 %v3858_v37, 0.0  ;;  %v7405_v37 = vunpack.i.l.bf16 %v11303_v27  ;;  %v7075_v27 = vunpack.i.l.bf16 %v13724_v18  ;;  %v7096_v32 = vunpack.i.h.bf16 %v13726_v20 }
 0x4f2   : > { %v11531_v38 = vld [vmem:[#allocation3 + $0x30] sm:$0xff]  ;;  %v7095_v58 = vunpack.i.l.bf16 %v13726_v20  ;;  %v3386_v19 = vsel %vm1704_vm4, %v8190_v51, %v7076_v55  ;;  %v4232_v20 = vrot.slane %v11472_v31, 2 }
 0x4f3   : > { %3922 = vst.msk [vmem:[#allocation3 + $0x39] sm:$0xff] %vm1704_vm4, %v3890_v2  ;;  %v4063_v28 = vrot.slane %v11531_v38, 1  ;;  %v3385_v36 = vsel %vm1704_vm4, %v8191_v8, %v7075_v27  ;;  %v3418_v63 = vsel %vm1770_vm7, %v3386_v19, %v7081_v53  ;;  %v7416_v53 = vunpack.i.h.bf16 %v11344_v46  ;;  %v13730_v51 = vld [vmem:[#allocation80_spill] sm:$0xff] }
 0x4f4   : > { %v3745_v44 = vpop.f32.mrf.mxu1  ;;  %v3417_v35 = vsel %vm1770_vm7, %v3385_v36, %v7080_v48  ;;  %v4229_v48 = vrot.slane %v11468_v9, 2  ;;  %v7111_v19 = vunpack.i.h.bf16 %v13730_v51 }
 0x4f5   : > { %v3823_v13 = vmul.f32 %v11403_v14, %v3745_v44  ;;  %v3512_v44 = vsel %vm3489_vm15, %v3479_v33, %v7220_v17  ;;  %v3450_v17 = vsel %vm1836_vm8, %v3418_v63, %v7096_v32  ;;  %v3449_v40 = vsel %vm1836_vm8, %v3417_v35, %v7095_v58 }
 0x4f7   : > { %v3859_v12 = vadd.f32 %v11412_v49, %v3823_v13  ;;  %6081 = vmatmul.msk.bf16.gmra.mxu1 %vm3673_vm6, %v3631_v54  ;;  %v3545_v13 = vsel %vm3522_vm1, %v3512_v44, %v7300_v1  ;;  %v3546_v54 = vsel %vm3522_vm1, %v3513_v57, %v7301_v11  ;;  %v7305_v57 = vunpack.i.l.bf16 %v11113_v5  ;;  %v7464_v44 = vpop.permute.xlu0 %7463 }
 0x4f8   : > { %v3578_v26 = vsel %vm3555_vm0, %v3545_v13, %v7405_v37  ;;  %v3579_v4 = vsel %vm3555_vm0, %v3546_v54, %v7406_v29  ;;  %v7415_v13 = vunpack.i.l.bf16 %v11344_v46  ;;  %v7466_v32 = vunpack.i.h.bf16 %v7464_v44 }
 0x4f9   : > { %v3891_v15 = vmax.f32 %v3859_v12, 0.0  ;;  %v3611_v6 = vsel %vm3588_vm5, %v3578_v26, %v7460_v50  ;;  %v3612_v12 = vsel %vm3588_vm5, %v3579_v4, %v7461_v42  ;;  %v7306_v50 = vunpack.i.h.bf16 %v11113_v5 }
 0x4fa   : > { %v11538_v24 = vld [vmem:[#allocation3 + $0x38] sm:$0xff]  ;;  %v11540_v10 = vld [vmem:[#allocation3 + $0x40] sm:$0x3]  ;;  %v3632_v30 = vpack.c.bf16 %v3612_v12, %v3611_v6  ;;  %v4230_v26 = vrot.slane %v11470_v59, 2  ;;  %v7465_v58 = vunpack.i.l.bf16 %v7464_v44 }
 0x4fb   : > { %3923 = vst.msk [vmem:[#allocation3 + $0x49] sm:$0xff] %vm1704_vm4, %v3891_v15  ;;  %v4064_v25 = vrot.slane %v11538_v24, 1  ;;  %v4066_v23 = vrot.slane %v11540_v10, 1 }
 0x4fc   : > { %v3747_v52 = vpop.f32.mrf.mxu1  ;;  %v4231_v35 = vsel %vm893_vm3, %v4229_v48, %v4230_v26  ;;  %v4233_v63 = vsel %vm893_vm3, %v4230_v26, %v4232_v20 }
 0x4fd   : > { %v3824_v41 = vmul.f32 %v11403_v14, %v3747_v52  ;;  %v4065_v43 = vsel %vm716_vm2, %v4063_v28, %v4064_v25  ;;  %v4067_v22 = vsel %vm716_vm2, %v4064_v25, %v4066_v23  ;;  %v13727_v28 = vld [vmem:[#allocation92_spill] sm:$0xff]  ;;  %v13728_v23 = vld [vmem:[#allocation74_spill] sm:$0xff] }
 0x4fe   : > { %v11555_v2 = vpack.i.bf16 %v4067_v22, %v4065_v43  ;;  %v7226_v25 = vunpack.i.h.bf16 %v13727_v28  ;;  %v7126_v33 = vunpack.i.h.bf16 %v13728_v23  ;;  %v7125_v0 = vunpack.i.l.bf16 %v13728_v23 }
 0x4ff   : > { %v3860_v21 = vadd.f32 %v11412_v49, %v3824_v41  ;;  %v13729_v41 = vld [vmem:[#allocation79_spill] sm:$0xff]  ;;  %v7225_v42 = vunpack.i.l.bf16 %v13727_v28 }
 0x500   : > { %7493 = vrot.lane.b32.xlu0 %v11555_v2, %s13613_s25  ;;  %v3481_v29 = vsel %vm1902_vm11, %v3449_v40, %v7125_v0  ;;  %v3482_v52 = vsel %vm1902_vm11, %v3450_v17, %v7126_v33  ;;  %v7101_v43 = vunpack.i.h.bf16 %v13729_v41  ;;  %v7100_v12 = vunpack.i.l.bf16 %v13729_v41  ;;  %v13731_v33 = vld [vmem:[#allocation77_spill] sm:$0xff] }
 0x501   : > { %v3892_v16 = vmax.f32 %v3860_v21, 0.0  ;;  %v3515_v22 = vsel %vm3489_vm15, %v3482_v52, %v7226_v25  ;;  %v3514_v46 = vsel %vm3489_vm15, %v3481_v29, %v7225_v42  ;;  %v8193_v25 = vld [vmem:[#allocation3 + $0x138] sm:$0xff]  ;;  %v7131_v0 = vunpack.i.h.bf16 %v13731_v33 }
 0x502   : > { %v11587_v1 = vld [vmem:[#allocation3 + $0x48] sm:$0xff]  ;;  %v3548_v9 = vsel %vm3522_vm1, %v3515_v22, %v7306_v50  ;;  %v3547_v8 = vsel %vm3522_vm1, %v3514_v46, %v7305_v57  ;;  %v3387_v23 = vsel %vm1704_vm4, %v8193_v25, %v7100_v12  ;;  %v7512_v29 = vpack.i.bf16 %v4233_v63, %v4231_v35 }
 0x503   : > { %3924 = vst.msk [vmem:[#allocation3 + $0x51] sm:$0xff] %vm1704_vm4, %v3892_v16  ;;  %v4068_v21 = vrot.slane %v11587_v1, 1  ;;  %v3581_v36 = vsel %vm3555_vm0, %v3548_v9, %v7416_v53  ;;  %v3580_v31 = vsel %vm3555_vm0, %v3547_v8, %v7415_v13  ;;  %v13733_v57 = vld [vmem:[#allocation94_spill] sm:$0xff]  ;;  %v4237_v53 = vrot.slane %v11486_v39, 2  ;;  %v7469_v39 = vpop.permute.xlu1 %7468  ;;  %v13734_v8 = vld [vmem:[#allocation96_spill] sm:$0xff] }
 0x504   : > { %v3750_v15 = vpop.f32.mrf.mxu1  ;;  %v3613_v40 = vsel %vm3588_vm5, %v3580_v31, %v7465_v58  ;;  %v3614_v28 = vsel %vm3588_vm5, %v3581_v36, %v7466_v32  ;;  %v7231_v44 = vunpack.i.h.bf16 %v13733_v57  ;;  %v7230_v32 = vunpack.i.l.bf16 %v13733_v57 }
 0x505   : > { %v3825_v45 = vmul.f32 %v11403_v14, %v3750_v15  ;;  %v3633_v22 = vpack.c.bf16 %v3614_v28, %v3613_v40  ;;  %v7311_v36 = vunpack.i.h.bf16 %v13734_v8  ;;  %v7310_v31 = vunpack.i.l.bf16 %v13734_v8 }
 0x506   : > { %v7420_v35 = vunpack.i.l.bf16 %v11332_v3  ;;  %v7470_v28 = vunpack.i.l.bf16 %v7469_v39 }
 0x507   : > { %v3861_v11 = vadd.f32 %v11412_v49, %v3825_v45  ;;  %6082 = vmatmul.msk.bf16.gmra.mxu1 %vm3673_vm6, %v3632_v30  ;;  %v7110_v45 = vunpack.i.l.bf16 %v13730_v51  ;;  %v8192_v30 = vld [vmem:[#allocation3 + $0x140] sm:$0xff] }
 0x508   : > { %v3388_v17 = vsel %vm1704_vm4, %v8192_v30, %v7101_v43 }
 0x509   : > { %v3893_v37 = vmax.f32 %v3861_v11, 0.0  ;;  %v3420_v52 = vsel %vm1770_vm7, %v3388_v17, %v7111_v19  ;;  %v3419_v42 = vsel %vm1770_vm7, %v3387_v23, %v7110_v45  ;;  %v7471_v45 = vunpack.i.h.bf16 %v7469_v39 }
 0x50a   : > { %v11595_v18 = vld [vmem:[#allocation3 + $0x50] sm:$0xff]  ;;  %v11597_v55 = vld [vmem:[#allocation3 + $0x58] sm:$0x3]  ;;  %v3452_v13 = vsel %vm1836_vm8, %v3420_v52, %v7131_v0 }
 0x50b   : > { %3925 = vst.msk [vmem:[#allocation3 + $0x61] sm:$0xff] %vm1704_vm4, %v3893_v37  ;;  %v4069_v27 = vrot.slane %v11595_v18, 1  ;;  %v4071_v61 = vrot.slane %v11597_v55, 1  ;;  %v13732_v37 = vld [vmem:[#allocation83_spill] sm:$0xff] }
 0x50c   : > { %v3752_v54 = vpop.f32.mrf.mxu1  ;;  %v7146_v41 = vunpack.i.h.bf16 %v13732_v37  ;;  %v7145_v50 = vunpack.i.l.bf16 %v13732_v37 }
 0x50d   : > { %v3826_v5 = vmul.f32 %v11403_v14, %v3752_v54  ;;  %v4070_v4 = vsel %vm716_vm2, %v4068_v21, %v4069_v27  ;;  %v4072_v16 = vsel %vm716_vm2, %v4069_v27, %v4071_v61  ;;  %v4235_v21 = vrot.slane %v11484_v62, 2 }
 0x50e   : > { %v11612_v6 = vpack.i.bf16 %v4072_v16, %v4070_v4  ;;  %v7130_v27 = vunpack.i.l.bf16 %v13731_v33  ;;  %v4234_v54 = vrot.slane %v11475_v56, 2 }
 0x50f   : > { %v3862_v59 = vadd.f32 %v11412_v49, %v3826_v5  ;;  %v3484_v5 = vsel %vm1902_vm11, %v3452_v13, %v7146_v41  ;;  %v4238_v9 = vsel %vm893_vm3, %v4235_v21, %v4237_v53 }
 0x510   : > { %7498 = vrot.lane.b32.xlu1 %v11612_v6, %s13613_s25  ;;  %v3451_v26 = vsel %vm1836_vm8, %v3419_v42, %v7130_v27  ;;  %v3517_v20 = vsel %vm3489_vm15, %v3484_v5, %v7231_v44  ;;  %v4236_v58 = vsel %vm893_vm3, %v4234_v54, %v4235_v21  ;;  %v8194_v54 = vld [vmem:[#allocation3 + $0x158] sm:$0xff]  ;;  %v8195_v5 = vld [vmem:[#allocation3 + $0x150] sm:$0xff] }
 0x511   : > { %v3894_v15 = vmax.f32 %v3862_v59, 0.0  ;;  %v3483_v16 = vsel %vm1902_vm11, %v3451_v26, %v7145_v50  ;;  %v11671_v25 = vpack.i.bf16 %v4238_v9, %v4236_v58  ;;  %v3550_v41 = vsel %vm3522_vm1, %v3517_v20, %v7311_v36  ;;  %v13738_v20 = vld [vmem:[#allocation85_spill] sm:$0xff] }
 0x512   : > { %v11647_v48 = vld [vmem:[#allocation3 + $0x60] sm:$0xff]  ;;  %v3516_v33 = vsel %vm3489_vm15, %v3483_v16, %v7230_v32  ;;  %v7151_v32 = vunpack.i.h.bf16 %v13738_v20  ;;  %v7150_v39 = vunpack.i.l.bf16 %v13738_v20  ;;  %v7517_v36 = vpack.i.bf16 %v11484_v62, %v11475_v56  ;;  %v7474_v56 = vpop.permute.xlu2 %7473 }
 0x513   : > { %3926 = vst.msk [vmem:[#allocation3 + $0x69] sm:$0xff] %vm1704_vm4, %v3894_v15  ;;  %v4073_v59 = vrot.slane %v11647_v48, 1  ;;  %v7421_v15 = vunpack.i.h.bf16 %v11332_v3  ;;  %v4242_v3 = vrot.slane %v11540_v10, 2  ;;  %v4239_v10 = vrot.slane %v11531_v38, 2 }
 0x514   : > { %v3755_v11 = vpop.f32.mrf.mxu1 }
 0x515   : > { %v3827_v43 = vmul.f32 %v11403_v14, %v3755_v11  ;;  %v4240_v11 = vrot.slane %v11538_v24, 2  ;;  %v3583_v42 = vsel %vm3555_vm0, %v3550_v41, %v7421_v15 }
 0x516   : > { %v3616_v44 = vsel %vm3588_vm5, %v3583_v42, %v7471_v45  ;;  %v7431_v42 = vunpack.i.h.bf16 %v11367_v60 }
 0x517   : > { %v3863_v61 = vadd.f32 %v11412_v49, %v3827_v43  ;;  %6083 = vmatmul.msk.bf16.gmra.mxu1 %vm3673_vm6, %v3633_v22  ;;  %v3549_v22 = vsel %vm3522_vm1, %v3516_v33, %v7310_v31  ;;  %v4241_v21 = vsel %vm893_vm3, %v4239_v10, %v4240_v11  ;;  %v4243_v27 = vsel %vm893_vm3, %v4240_v11, %v4242_v3 }
 0x518   : > { %7513 = vrot.lane.b32.xlu1 %v7512_v29, %s13589_s23  ;;  %v13735_v29 = vld [vmem:[#allocation84_spill] sm:$0xff]  ;;  %v3582_v43 = vsel %vm3555_vm0, %v3549_v22, %v7420_v35  ;;  %v11704_v8 = vpack.i.bf16 %v4243_v27, %v4241_v21  ;;  %v7476_v10 = vunpack.i.h.bf16 %v7474_v56 }
 0x519   : > { %v3895_v4 = vmax.f32 %v3863_v61, 0.0  ;;  %v7136_v52 = vunpack.i.h.bf16 %v13735_v29  ;;  %v7135_v37 = vunpack.i.l.bf16 %v13735_v29  ;;  %v3615_v57 = vsel %vm3588_vm5, %v3582_v43, %v7470_v28  ;;  %v13737_v61 = vld [vmem:[#allocation81_spill] sm:$0xff]  ;;  %v13741_v28 = vld [vmem:[#allocation91_spill] sm:$0xff] }
 0x51a   : > { %v11655_v12 = vld [vmem:[#allocation3 + $0x68] sm:$0xff]  ;;  %v11657_v46 = vld [vmem:[#allocation3 + $0x70] sm:$0x3]  ;;  %v7141_v53 = vunpack.i.h.bf16 %v13737_v61  ;;  %v7140_v13 = vunpack.i.l.bf16 %v13737_v61  ;;  %v3634_v58 = vpack.c.bf16 %v3616_v44, %v3615_v57  ;;  %v7236_v33 = vunpack.i.h.bf16 %v13741_v28  ;;  %v13742_v29 = vld [vmem:[#allocation97_spill] sm:$0xff] }
 0x51b   : > { %3927 = vst.msk [vmem:[#allocation3 + $0x79] sm:$0xff] %vm1704_vm4, %v3895_v4  ;;  %v4074_v51 = vrot.slane %v11655_v12, 1  ;;  %v4076_v19 = vrot.slane %v11657_v46, 1  ;;  %v3390_v26 = vsel %vm1704_vm4, %v8194_v54, %v7136_v52  ;;  %v3389_v4 = vsel %vm1704_vm4, %v8195_v5, %v7135_v37 }
 0x51c   : > { %v3757_v63 = vpop.f32.mrf.mxu1  ;;  %v3421_v15 = vsel %vm1770_vm7, %v3389_v4, %v7140_v13  ;;  %v3422_v35 = vsel %vm1770_vm7, %v3390_v26, %v7141_v53  ;;  %v7316_v52 = vunpack.i.h.bf16 %v13742_v29  ;;  %v7315_v43 = vunpack.i.l.bf16 %v13742_v29 }
 0x51d   : > { %v3828_v30 = vmul.f32 %v11403_v14, %v3757_v63  ;;  %v4075_v17 = vsel %vm716_vm2, %v4073_v59, %v4074_v51  ;;  %v4077_v40 = vsel %vm716_vm2, %v4074_v51, %v4076_v19  ;;  %v13739_v59 = vld [vmem:[#allocation87_spill] sm:$0xff]  ;;  %v3454_v45 = vsel %vm1836_vm8, %v3422_v35, %v7151_v32 }
 0x51e   : > { %v11673_v23 = vpack.i.bf16 %v4077_v40, %v4075_v17  ;;  %v7186_v51 = vunpack.i.h.bf16 %v13739_v59  ;;  %v7185_v19 = vunpack.i.l.bf16 %v13739_v59  ;;  %v7475_v44 = vunpack.i.l.bf16 %v7474_v56  ;;  %v13745_v59 = vld [vmem:[#allocation86_spill] sm:$0xff]  ;;  %v8196_v56 = vld [vmem:[#allocation3 + $0x170] sm:$0xff] }
 0x51f   : > { %v3864_v0 = vadd.f32 %v11412_v49, %v3828_v30  ;;  %v3453_v30 = vsel %vm1836_vm8, %v3421_v15, %v7150_v39  ;;  %v11740_v53 = vpack.i.bf16 %v11538_v24, %v11531_v38  ;;  %v13744_v39 = vld [vmem:[#allocation82_spill] sm:$0xff] }
 0x520   : > { %7528 = vrot.lane.b32.xlu1 %v11671_v25, %s13736_s1  ;;  %7503 = vrot.lane.b32.xlu2 %v11673_v23, %s13613_s25  ;;  %v3486_v17 = vsel %vm1902_vm11, %v3454_v45, %v7186_v51  ;;  %v3485_v40 = vsel %vm1902_vm11, %v3453_v30, %v7185_v19  ;;  %v7161_v51 = vunpack.i.h.bf16 %v13745_v59  ;;  %v7160_v19 = vunpack.i.l.bf16 %v13745_v59 }
 0x521   : > { %v3896_v50 = vmax.f32 %v3864_v0, 0.0  ;;  %v7235_v0 = vunpack.i.l.bf16 %v13741_v28  ;;  %v3519_v54 = vsel %vm3489_vm15, %v3486_v17, %v7236_v33  ;;  %v8197_v17 = vld [vmem:[#allocation3 + $0x168] sm:$0xff] }
 0x522   : > { %v11715_v63 = vld [vmem:[#allocation3 + $0x78] sm:$0xff]  ;;  %v3552_v4 = vsel %vm3522_vm1, %v3519_v54, %v7316_v52  ;;  %v7441_v54 = vunpack.i.h.bf16 %v11452_v7 }
 0x523   : > { %3928 = vst.msk [vmem:[#allocation3 + $0x81] sm:$0xff] %vm1704_vm4, %v3896_v50  ;;  %v4078_v37 = vrot.slane %v11715_v63, 1  ;;  %v7430_v50 = vunpack.i.l.bf16 %v11367_v60  ;;  %v3518_v26 = vsel %vm3489_vm15, %v3485_v40, %v7235_v0  ;;  %v3585_v24 = vsel %vm3555_vm0, %v3552_v4, %v7431_v42 }
 0x524   : > { %v3760_v16 = vpop.f32.mrf.mxu1  ;;  %v3551_v5 = vsel %vm3522_vm1, %v3518_v26, %v7315_v43  ;;  %v3618_v32 = vsel %vm3588_vm5, %v3585_v24, %v7476_v10  ;;  %v13749_v43 = vld [vmem:[#allocation88_spill] sm:$0xff]  ;;  %v7440_v26 = vunpack.i.l.bf16 %v11452_v7 }
 0x525   : > { %v3829_v9 = vmul.f32 %v11403_v14, %v3760_v16  ;;  %v3584_v38 = vsel %vm3555_vm0, %v3551_v5, %v7430_v50  ;;  %v7216_v42 = vunpack.i.h.bf16 %v13749_v43  ;;  %v7215_v50 = vunpack.i.l.bf16 %v13749_v43 }
 0x526   : > { %v3617_v20 = vsel %vm3588_vm5, %v3584_v38, %v7475_v44  ;;  %v7587_v38 = vpack.i.bf16 %v11595_v18, %v11587_v1 }
 0x527   : > { %v3865_v31 = vadd.f32 %v11412_v49, %v3829_v9  ;;  %6084 = vmatmul.msk.bf16.gmra.mxu1 %vm3673_vm6, %v3634_v58  ;;  %v7156_v58 = vunpack.i.h.bf16 %v13744_v39  ;;  %v7155_v9 = vunpack.i.l.bf16 %v13744_v39  ;;  %v3635_v45 = vpack.c.bf16 %v3618_v32, %v3617_v20 }
 0x528   : > { %7543 = vrot.lane.b32.xlu1 %v11704_v8, %s13740_s2  ;;  %7518 = vrot.lane.b32.xlu2 %v7517_v36, %s13609_s17  ;;  %v4247_v20 = vrot.slane %v11597_v55, 2 }
 0x529   : > { %v3897_v62 = vmax.f32 %v3865_v31, 0.0  ;;  %v13746_v31 = vld [vmem:[#allocation90_spill] sm:$0xff]  ;;  %v3391_v40 = vsel %vm1704_vm4, %v8197_v17, %v7155_v9  ;;  %v4250_v17 = vrot.slane %v11655_v12, 2 }
 0x52a   : > { %v11723_v11 = vld [vmem:[#allocation3 + $0x80] sm:$0xff]  ;;  %v11725_v3 = vld [vmem:[#allocation3 + $0x88] sm:$0x3]  ;;  %v7206_v15 = vunpack.i.h.bf16 %v13746_v31  ;;  %v7205_v35 = vunpack.i.l.bf16 %v13746_v31  ;;  %v3423_v33 = vsel %vm1770_vm7, %v3391_v40, %v7160_v19  ;;  %v4252_v40 = vrot.slane %v11657_v46, 2 }
 0x52b   : > { %3929 = vst.msk [vmem:[#allocation3 + $0x91] sm:$0xff] %vm1704_vm4, %v3897_v62  ;;  %v4079_v41 = vrot.slane %v11723_v11, 1  ;;  %v4081_v22 = vrot.slane %v11725_v3, 1  ;;  %v3392_v62 = vsel %vm1704_vm4, %v8196_v56, %v7156_v58 }
 0x52c   : > { %v3762_v57 = vpop.f32.mrf.mxu1  ;;  %v3424_v0 = vsel %vm1770_vm7, %v3392_v62, %v7161_v51  ;;  %v3455_v52 = vsel %vm1836_vm8, %v3423_v33, %v7205_v35  ;;  %v7602_v35 = vpack.i.bf16 %v11655_v12, %v11647_v48 }
 0x52d   : > { %v3830_v21 = vmul.f32 %v11403_v14, %v3762_v57  ;;  %v4080_v27 = vsel %vm716_vm2, %v4078_v37, %v4079_v41  ;;  %v4082_v61 = vsel %vm716_vm2, %v4079_v41, %v4081_v22  ;;  %v3456_v29 = vsel %vm1836_vm8, %v3424_v0, %v7206_v15  ;;  %v13748_v37 = vld [vmem:[#allocation93_spill] sm:$0xff]  ;;  %v7479_v57 = vpop.permute.xlu0 %7478 }
 0x52e   : > { %v11742_v13 = vpack.i.bf16 %v4082_v61, %v4080_v27  ;;  %v7240_v41 = vunpack.i.l.bf16 %v13748_v37  ;;  %v7241_v10 = vunpack.i.h.bf16 %v13748_v37  ;;  %v3488_v44 = vsel %vm1902_vm11, %v3456_v29, %v7216_v42 }
 0x52f   : > { %v3866_v60 = vadd.f32 %v11412_v49, %v3830_v21  ;;  %v7321_v21 = vunpack.i.h.bf16 %v11141_v47  ;;  %v7320_v27 = vunpack.i.l.bf16 %v11141_v47  ;;  %v7481_v5 = vunpack.i.h.bf16 %v7479_v57 }
 0x530   : > { %7558 = vrot.lane.b32.xlu1 %v11555_v2, %s13615_s16  ;;  %7533 = vrot.lane.b32.xlu2 %v11740_v53, %s13743_s3  ;;  %v7480_v4 = vunpack.i.l.bf16 %v7479_v57  ;;  %v3521_v24 = vsel %vm3489_vm15, %v3488_v44, %v7241_v10  ;;  %v4245_v47 = vrot.slane %v11595_v18, 2  ;;  %v4244_v18 = vrot.slane %v11587_v1, 2 }
 0x531   : > { %v3898_v16 = vmax.f32 %v3866_v60, 0.0  ;;  %7508 = vrot.lane.b32.xlu0 %v11742_v13, %s13613_s25  ;;  %v3554_v39 = vsel %vm3522_vm1, %v3521_v24, %v7321_v21  ;;  %v4253_v0 = vsel %vm893_vm3, %v4250_v17, %v4252_v40  ;;  %v4255_v37 = vrot.slane %v11723_v11, 2 }
 0x532   : > { %v3587_v58 = vsel %vm3555_vm0, %v3554_v39, %v7441_v54  ;;  %v4246_v51 = vsel %vm893_vm3, %v4244_v18, %v4245_v47  ;;  %v4248_v19 = vsel %vm893_vm3, %v4245_v47, %v4247_v20 }
 0x533   : > { %3930 = vst.msk [vmem:[#allocation3 + $0x99] sm:$0xff] %vm1704_vm4, %v3898_v16  ;;  %v3620_v59 = vsel %vm3588_vm5, %v3587_v58, %v7481_v5 }
 0x534   : > { %v3765_v36 = vpop.f32.mrf.mxu1 }
 0x535   : > { %v3831_v30 = vmul.f32 %v11403_v14, %v3765_v36 }
 0x537   : > { %v3867_v28 = vadd.f32 %v11412_v49, %v3831_v30  ;;  %6085 = vmatmul.msk.bf16.gmra.mxu1 %vm3673_vm6, %v3635_v45 }
 0x538   : > { %7573 = vrot.lane.b32.xlu1 %v11612_v6, %s13747_s26  ;;  %7548 = vrot.lane.b32.xlu2 %v11671_v25, %s13589_s23  ;;  %v3487_v25 = vsel %vm1902_vm11, %v3455_v52, %v7215_v50 }
 0x539   : > { %v3899_v22 = vmax.f32 %v3867_v28, 0.0  ;;  %7523 = vrot.lane.b32.xlu0 %v11503_v34, %s13615_s16  ;;  %v3520_v34 = vsel %vm3489_vm15, %v3487_v25, %v7240_v41  ;;  %v4254_v41 = vrot.slane %v11715_v63, 2 }
 0x53a   : > { %v3553_v32 = vsel %vm3522_vm1, %v3520_v34, %v7320_v27  ;;  %v3970_v25 = vld [vmem:[#allocation3 + $0x98] sm:$0xff]  ;;  %v3971_v44 = vld [vmem:[#allocation3 + $0xa0] sm:$0x3]  ;;  %v7637_v27 = vpack.i.bf16 %v11723_v11, %v11715_v63 }
 0x53b   : > { %3931 = vst.msk [vmem:[#allocation3 + $0xa9] sm:$0xff] %vm1704_vm4, %v3899_v22  ;;  %v3586_v7 = vsel %vm3555_vm0, %v3553_v32, %v7440_v26  ;;  %v4256_v22 = vsel %vm893_vm3, %v4254_v41, %v4255_v37  ;;  %v4084_v54 = vrot.slane %v3970_v25, 1  ;;  %v4086_v26 = vrot.slane %v3971_v44, 1 }
 0x53c   : > { %v3767_v61 = vpop.f32.mrf.mxu1  ;;  %v3619_v55 = vsel %vm3588_vm5, %v3586_v7, %v7480_v4  ;;  %v11888_v7 = vld [vmem:[%s13201_s6] ss:$0 sm:$0xff]  ;;  %v4260_v58 = vrot.slane %v3970_v25, 2 }
 0x53d   : > { %v3832_v60 = vmul.f32 %v11403_v14, %v3767_v61  ;;  %v3636_v31 = vpack.c.bf16 %v3620_v59, %v3619_v55  ;;  %v3969_v61 = vld [vmem:[#allocation3 + $0x90] sm:$0xff]  ;;  %v4087_v63 = vsel %vm716_vm2, %v4084_v54, %v4086_v26  ;;  %v6147_v26 = vld [vmem:[%s13202_s7 + $0x10] sm:$0xff] }
 0x53e   : > { %v4083_v5 = vrot.slane %v3969_v61, 1  ;;  %v7692_v39 = vpack.i.bf16 %v3970_v25, %v3969_v61  ;;  %v4259_v59 = vrot.slane %v3969_v61, 2 }
 0x53f   : > { %v3868_v16 = vadd.f32 %v11412_v49, %v3832_v60 }
 0x540   : > { %7588 = vrot.lane.b32.xlu1 %v7587_v38, %s13609_s17  ;;  %7563 = vrot.lane.b32.xlu2 %v11704_v8, %s13736_s1  ;;  %v4085_v4 = vsel %vm716_vm2, %v4083_v5, %v4084_v54 }
 0x541   : > { %v3900_v9 = vmax.f32 %v3868_v16, 0.0  ;;  %7538 = vrot.lane.b32.xlu0 %v11555_v2, %s13747_s26  ;;  %v7577_v2 = vpack.i.bf16 %v4248_v19, %v4246_v51  ;;  %v7677_v24 = vpack.i.bf16 %v4087_v63, %v4085_v4  ;;  %v4261_v19 = vsel %vm893_vm3, %v4259_v59, %v4260_v58 }
 0x543   : > { %3932 = vst.msk [vmem:[#allocation3 + $0xb1] sm:$0xff] %vm1704_vm4, %v3900_v9  ;;  %v4262_v9 = vrot.slane %v3971_v44, 2 }
 0x544   : > { %v3770_v36 = vpop.f32.mrf.mxu1 }
 0x545   : > { %v3833_v15 = vmul.f32 %v11403_v14, %v3770_v36  ;;  %v4263_v36 = vsel %vm893_vm3, %v4260_v58, %v4262_v9 }
 0x547   : > { %v3869_v1 = vadd.f32 %v11412_v49, %v3833_v15  ;;  %6086 = vmatmul.msk.bf16.gmra.mxu1 %vm3673_vm6, %v3636_v31 }
 0x548   : > { %7603 = vrot.lane.b32.xlu1 %v7602_v35, %s13743_s3  ;;  %7578 = vrot.lane.b32.xlu2 %v7577_v2, %s13740_s2 }
 0x549   : > { %v3901_v45 = vmax.f32 %v3869_v1, 0.0  ;;  %7553 = vrot.lane.b32.xlu0 %v11740_v53, %s13609_s17  ;;  %v4249_v53 = vrot.slane %v11647_v48, 2  ;;  %v11908_v1 = vpack.i.bf16 %v4263_v36, %v4261_v19 }
 0x54a   : > { %v11876_v20 = vpop.permute.xlu2 %7488  ;;  %v11903_v31 = vld [vmem:[#allocation3 + $0xb0] sm:$0xff]  ;;  %v11925_v40 = vld [vmem:[#allocation3 + $0xb8] sm:$0x3] }
 0x54b   : > { %3933 = vst.msk [vmem:[#allocation3 + $0xc1] sm:$0xff] %vm1704_vm4, %v3901_v45  ;;  %v4251_v33 = vsel %vm893_vm3, %v4249_v53, %v4250_v17  ;;  %v5287_v53 = vld [vmem:[%s13202_s7 + $0x20] sm:$0xf] }
 0x54c   : > { %v3772_v30 = vpop.f32.mrf.mxu1  ;;  %v7632_v46 = vpack.i.bf16 %v4253_v0, %v4251_v33  ;;  %v5305_v33 = vunpack.c.l.b16 %v5287_v53 }
 0x54d   : > { %v3834_v56 = vmul.f32 %v11403_v14, %v3772_v30 }
 0x54f   : > { %v3870_v62 = vadd.f32 %v11412_v49, %v3834_v56 }
 0x550   : > { %7618 = vrot.lane.b32.xlu1 %v7577_v2, %s13589_s23  ;;  %7593 = vrot.lane.b32.xlu2 %v11612_v6, %s13615_s16  ;;  %v4257_v6 = vrot.slane %v11725_v3, 2 }
 0x551   : > { %v3902_v28 = vmax.f32 %v3870_v62, 0.0  ;;  %7568 = vrot.lane.b32.xlu0 %v7587_v38, %s13743_s3 }
 0x552   : > { %v4258_v43 = vsel %vm893_vm3, %v4255_v37, %v4257_v6  ;;  %v11954_v44 = vld [vmem:[#allocation3 + $0xc0] sm:$0xff] }
 0x553   : > { %3934 = vst.msk [vmem:[#allocation3 + $0xc9] sm:$0xff] %vm1704_vm4, %v3902_v28  ;;  %v11851_v50 = vpack.i.bf16 %v4258_v43, %v4256_v22  ;;  %v4093_v54 = vrot.slane %v11954_v44, 1 }
 0x554   : > { %v3775_v29 = vpop.f32.mrf.mxu1  ;;  %v11894_v18 = vpop.permute.xlu1 %7483 }
 0x555   : > { %v3835_v12 = vmul.f32 %v11403_v14, %v3775_v29  ;;  %v4089_v29 = vrot.slane %v11903_v31, 1 }
 0x557   : > { %v3871_v52 = vadd.f32 %v11412_v49, %v3835_v12  ;;  %v4091_v12 = vrot.slane %v11925_v40, 1 }
 0x558   : > { %7633 = vrot.lane.b32.xlu1 %v7632_v46, %s13736_s1  ;;  %7608 = vrot.lane.b32.xlu2 %v11673_v23, %s13747_s26 }
 0x559   : > { %v3903_v48 = vmax.f32 %v3871_v52, 0.0  ;;  %7583 = vrot.lane.b32.xlu0 %v11704_v8, %s13589_s23  ;;  %v4092_v43 = vsel %vm716_vm2, %v4089_v29, %v4091_v12  ;;  %v7485_v12 = vunpack.i.l.bf16 %v11894_v18 }
 0x55b   : > { %3935 = vst.msk [vmem:[#allocation3 + $0xd9] sm:$0xff] %vm1704_vm4, %v3903_v48 }
 0x55c   : > { %v3777_v42 = vpop.f32.mrf.mxu1 }
 0x55d   : > { %v3836_v3 = vmul.f32 %v11403_v14, %v3777_v42  ;;  %v6148_v42 = vld [vmem:[%s13202_s7 + $0x18] sm:$0xff] }
 0x55f   : > { %v3872_v10 = vadd.f32 %v11412_v49, %v3836_v3 }
 0x560   : > { %7623 = vrot.lane.b32.xlu2 %v7602_v35, %s13609_s17  ;;  %7648 = vrot.lane.b32.xlu1 %v11851_v50, %s13740_s2 }
 0x561   : > { %v3904_v8 = vmax.f32 %v3872_v10, 0.0  ;;  %7598 = vrot.lane.b32.xlu0 %v7577_v2, %s13736_s1  ;;  %v11906_v2 = vld [vmem:[#allocation3 + $0xa8] sm:$0xff] }
 0x562   : > { %v4088_v37 = vrot.slane %v11906_v2, 1  ;;  %v11949_v10 = vld [vmem:[#allocation3 + $0xc8] sm:$0xff] }
 0x563   : > { %3936 = vst.msk [vmem:[#allocation3 + $0xe1] sm:$0xff] %vm1704_vm4, %v3904_v8  ;;  %v3977_v8 = vld [vmem:[#allocation3 + $0xd0] sm:$0x3] }
 0x564   : > { %v3780_v57 = vpop.f32.mrf.mxu1  ;;  %v4090_v22 = vsel %vm716_vm2, %v4088_v37, %v4089_v29  ;;  %v4096_v61 = vrot.slane %v3977_v8, 1  ;;  %v7486_v29 = vunpack.i.h.bf16 %v11894_v18  ;;  %v8200_v18 = vld [vmem:[#allocation3 + $0x8] sm:$0xff] }
 0x565   : > { %v3837_v21 = vmul.f32 %v11403_v14, %v3780_v57  ;;  %v11952_v25 = vpack.i.bf16 %v4092_v43, %v4090_v22  ;;  %v12028_v22 = vld [vmem:[#allocation3 + $0xd8] sm:$0xff] }
 0x567   : > { %v3873_v34 = vadd.f32 %v11412_v49, %v3837_v21 }
 0x568   : > { %7638 = vrot.lane.b32.xlu2 %v7637_v27, %s13743_s3  ;;  %7663 = vrot.lane.b32.xlu1 %v11742_v13, %s13615_s16 }
 0x569   : > { %v3905_v60 = vmax.f32 %v3873_v34, 0.0  ;;  %7613 = vrot.lane.b32.xlu0 %v7632_v46, %s13740_s2 }
 0x56b   : > { %3937 = vst.msk [vmem:[#allocation3 + $0xf1] sm:$0xff] %vm1704_vm4, %v3905_v60 }
 0x56c   : > { %v3782_v11 = vpop.f32.mrf.mxu1 }
 0x56d   : > { %v3838_v38 = vmul.f32 %v11403_v14, %v3782_v11  ;;  %v11882_v14 = vld [vmem:[%s13200_s5] ss:$0 sm:$0xff] }
 0x56f   : > { %v3874_v16 = vadd.f32 %v11412_v49, %v3838_v38 }
 0x570   : > { %7653 = vrot.lane.b32.xlu2 %v7632_v46, %s13589_s23  ;;  %7678 = vrot.lane.b32.xlu1 %v7677_v24, %s13747_s26  ;;  %v5310_v46 = vpack.c.b16 %v5305_v33, %v5305_v33 }
 0x571   : > { %v3906_v47 = vmax.f32 %v3874_v16, 0.0  ;;  %7628 = vrot.lane.b32.xlu0 %v11673_v23, %s13615_s16 }
 0x572   : > { %v5364_v41 = vsel %vm3722_vm14, %v5310_v46, 0 }
 0x573   : > { %3938 = vst.msk [vmem:[#allocation3 + $0xf9] sm:$0xff] %vm1704_vm4, %v3906_v47  ;;  %5369 = vmatpush.bf16.msra.mxu2 %v5364_v41  ;;  %v4265_v47 = vrot.slane %v11903_v31, 2 }
 0x574   : > { %v3785_v32 = vpop.f32.mrf.mxu1 }
 0x575   : > { %v3839_v49 = vmul.f32 %v11882_v14, %v3785_v32  ;;  %v4267_v32 = vrot.slane %v11925_v40, 2 }
 0x577   : > { %v3875_v23 = vadd.f32 %v11888_v7, %v3839_v49  ;;  %5370 = vmatpush.bf16.msra.mxu2 %v6148_v42  ;;  %v4268_v19 = vsel %vm893_vm3, %v4265_v47, %v4267_v32 }
 0x578   : > { %7668 = vrot.lane.b32.xlu2 %v11851_v50, %s13736_s1  ;;  %7693 = vrot.lane.b32.xlu1 %v7692_v39, %s13609_s17 }
 0x579   : > { %v3907_v55 = vmax.f32 %v3875_v23, 0.0  ;;  %7643 = vrot.lane.b32.xlu0 %v11742_v13, %s13747_s26  ;;  %v11912_v13 = vpack.i.bf16 %v11903_v31, %v11906_v2  ;;  %v6145_v23 = vld [vmem:[%s13202_s7] sm:$0xff] }
 0x57a   : > { %v11898_v51 = vpop.permute.xlu2 %7503 }
 0x57b   : > { %3939 = vst.msk [vmem:[#allocation3 + $0x109] sm:$0xff] %vm1704_vm4, %v3907_v55  ;;  %5371 = vmatpush.bf16.msra.mxu2 %v6147_v26  ;;  %v11998_v55 = vpop.permute.xlu0 %7493 }
 0x57c   : > { %v3787_v15 = vpop.f32.mrf.mxu1 }
 0x57d   : > { %v3840_v35 = vmul.f32 %v11882_v14, %v3787_v15 }
 0x57f   : > { %v3876_v45 = vadd.f32 %v11888_v7, %v3840_v35 }
 0x580   : > { %7683 = vrot.lane.b32.xlu2 %v11908_v1, %s13740_s2  ;;  %7708 = vrot.lane.b32.xlu1 %v11912_v13, %s13743_s3 }
 0x581   : > { %v3908_v30 = vmax.f32 %v3876_v45, 0.0  ;;  %7658 = vrot.lane.b32.xlu0 %v7637_v27, %s13609_s17  ;;  %v4094_v27 = vrot.slane %v11949_v10, 1 }
 0x582   : > { %v11920_v56 = vpop.permute.xlu1 %7498  ;;  %v11922_v62 = vpop.permute.xlu2 %7518 }
 0x583   : > { %3940 = vst.msk [vmem:[#allocation3 + $0x111] sm:$0xff] %vm1704_vm4, %v3908_v30  ;;  %v4095_v4 = vsel %vm716_vm2, %v4093_v54, %v4094_v27  ;;  %v4097_v63 = vsel %vm716_vm2, %v4094_v27, %v4096_v61  ;;  %v4269_v30 = vrot.slane %v11954_v44, 2  ;;  %v8201_v27 = vld [vmem:[#allocation3] sm:$0xff] }
 0x584   : > { %v3790_v17 = vpop.f32.mrf.mxu1  ;;  %v5007_v61 = vsel %vm1704_vm4, %v8201_v27, %v7485_v12 }
 0x585   : > { %v3841_v28 = vmul.f32 %v11882_v14, %v3790_v17 }
 0x587   : > { %v3877_v0 = vadd.f32 %v11888_v7, %v3841_v28 }
 0x588   : > { %7698 = vrot.lane.b32.xlu2 %v7677_v24, %s13615_s16  ;;  %7723 = vrot.lane.b32.xlu1 %v7677_v24, %s13613_s25  ;;  %v11979_v24 = vpack.i.bf16 %v4097_v63, %v4095_v4 }
 0x589   : > { %v3909_v52 = vmax.f32 %v3877_v0, 0.0  ;;  %7673 = vrot.lane.b32.xlu0 %v7692_v39, %s13743_s3  ;;  %v4264_v39 = vrot.slane %v11906_v2, 2  ;;  %v4270_v2 = vrot.slane %v11949_v10, 2  ;;  %v12019_v0 = vld [vmem:[#allocation3 + $0xe0] sm:$0xff] }
 0x58a   : > { %v11938_v6 = vpop.permute.xlu1 %7513  ;;  %v11940_v48 = vpop.permute.xlu2 %7533  ;;  %v4275_v43 = vrot.slane %v12019_v0, 2 }
 0x58b   : > { %3941 = vst.msk [vmem:[#allocation3 + $0x121] sm:$0xff] %vm1704_vm4, %v3909_v52  ;;  %v4266_v59 = vsel %vm893_vm3, %v4264_v39, %v4265_v47  ;;  %v4271_v53 = vsel %vm893_vm3, %v4269_v30, %v4270_v2  ;;  %v12023_v52 = vld [vmem:[#allocation3 + $0xe8] sm:$0x3]  ;;  %v7516_v42 = vunpack.i.h.bf16 %v11938_v6 }
 0x58c   : > { %v3792_v3 = vpop.f32.mrf.mxu1  ;;  %v7742_v15 = vpack.i.bf16 %v4268_v19, %v4266_v59  ;;  %v7772_v19 = vpack.i.bf16 %v11949_v10, %v11954_v44 }
 0x58d   : > { %v3842_v57 = vmul.f32 %v11882_v14, %v3792_v3  ;;  %v7515_v3 = vunpack.i.l.bf16 %v11938_v6  ;;  %v4274_v6 = vrot.slane %v12028_v22, 2 }
 0x58f   : > { %v3878_v21 = vadd.f32 %v11888_v7, %v3842_v57  ;;  %v4277_v57 = vrot.slane %v12023_v52, 2  ;;  %v5039_v63 = vsel %vm1770_vm7, %v5007_v61, %v7515_v3 }
 0x590   : > { %7738 = vrot.lane.b32.xlu1 %v11952_v25, %s13615_s16  ;;  %7713 = vrot.lane.b32.xlu2 %v11952_v25, %s13747_s26 }
 0x591   : > { %v3910_v34 = vmax.f32 %v3878_v21, 0.0  ;;  %7688 = vrot.lane.b32.xlu0 %v11851_v50, %s13589_s23  ;;  %v6146_v50 = vld [vmem:[%s13202_s7 + $0x8] sm:$0xff]  ;;  %v5008_v21 = vsel %vm1704_vm4, %v8200_v18, %v7486_v29  ;;  %v7787_v18 = vpack.i.bf16 %v12019_v0, %v12028_v22 }
 0x592   : > { %v11968_v60 = vpop.permute.xlu1 %7528  ;;  %v11970_v5 = vpop.permute.xlu2 %7548  ;;  %5372 = vmatpush.bf16.msra.mxu2 %v6146_v50  ;;  %v5040_v4 = vsel %vm1770_vm7, %v5008_v21, %v7516_v42 }
 0x593   : > { %3942 = vst.msk [vmem:[#allocation3 + $0x129] sm:$0xff] %vm1704_vm4, %v3910_v34 }
 0x594   : > { %v3795_v11 = vpop.f32.mrf.mxu1 }
 0x595   : > { %v3843_v38 = vmul.f32 %v11882_v14, %v3795_v11  ;;  %v4276_v11 = vsel %vm893_vm3, %v4274_v6, %v4275_v43  ;;  %v7490_v6 = vunpack.i.l.bf16 %v11876_v20 }
 0x596   : > { %5373 = vmatpush.bf16.msra.mxu2 %v6145_v23 }
 0x597   : > { %v3879_v16 = vadd.f32 %v11888_v7, %v3843_v38  ;;  %v4278_v38 = vsel %vm893_vm3, %v4275_v43, %v4277_v57 }
 0x598   : > { %7728 = vrot.lane.b32.xlu2 %v11908_v1, %s13589_s23  ;;  %7753 = vrot.lane.b32.xlu1 %v11979_v24, %s13747_s26 }
 0x599   : > { %v3911_v49 = vmax.f32 %v3879_v16, 0.0  ;;  %7703 = vrot.lane.b32.xlu0 %v11908_v1, %s13736_s1  ;;  %v4272_v1 = vrot.slane %v3977_v8, 2  ;;  %v7521_v16 = vunpack.i.h.bf16 %v11922_v62 }
 0x59a   : > { %v11994_v58 = vpop.permute.xlu1 %7543  ;;  %v11996_v9 = vpop.permute.xlu2 %7563 }
 0x59b   : > { %3943 = vst.msk [vmem:[#allocation3 + $0x139] sm:$0xff] %vm1704_vm4, %v3911_v49  ;;  %v4273_v33 = vsel %vm893_vm3, %v4270_v2, %v4272_v1  ;;  %v5072_v59 = vsel %vm1836_vm8, %v5040_v4, %v7521_v16  ;;  %v7530_v2 = vunpack.i.l.bf16 %v11968_v60  ;;  %v7546_v29 = vunpack.i.h.bf16 %v11994_v58 }
 0x59c   : > { %v3797_v36 = vpop.f32.mrf.mxu1  ;;  %v12026_v41 = vpack.i.bf16 %v4273_v33, %v4271_v53  ;;  %v7536_v53 = vunpack.i.h.bf16 %v11940_v48  ;;  %v7545_v43 = vunpack.i.l.bf16 %v11994_v58  ;;  %v7491_v58 = vunpack.i.h.bf16 %v11876_v20  ;;  %v12107_v20 = vld [vmem:[#allocation3 + $0xf8] sm:$0xff] }
 0x59d   : > { %v3844_v31 = vmul.f32 %v11882_v14, %v3797_v36  ;;  %v12060_v36 = vpack.i.bf16 %v4278_v38, %v4276_v11  ;;  %v4099_v16 = vrot.slane %v12019_v0, 1 }
 0x59f   : > { %v3880_v35 = vadd.f32 %v11888_v7, %v3844_v31 }
 0x5a0   : > { %7743 = vrot.lane.b32.xlu2 %v7742_v15, %s13736_s1  ;;  %7768 = vrot.lane.b32.xlu1 %v7742_v15, %s13589_s23 }
 0x5a1   : > { %v3912_v45 = vmax.f32 %v3880_v35, 0.0  ;;  %7718 = vrot.lane.b32.xlu0 %v7742_v15, %s13740_s2  ;;  %v7531_v35 = vunpack.i.h.bf16 %v11968_v60  ;;  %v7535_v60 = vunpack.i.l.bf16 %v11940_v48 }
 0x5a2   : > { %v12010_v17 = vpop.permute.xlu1 %7558  ;;  %v12012_v40 = vpop.permute.xlu2 %7578 }
 0x5a3   : > { %3944 = vst.msk [vmem:[#allocation3 + $0x141] sm:$0xff] %vm1704_vm4, %v3912_v45  ;;  %v12015_v28 = vpop.permute.xlu0 %7508 }
 0x5a4   : > { %v3800_v46 = vpop.f32.mrf.mxu1 }
 0x5a5   : > { %v3845_v37 = vmul.f32 %v11882_v14, %v3800_v46 }
 0x5a7   : > { %v3881_v8 = vadd.f32 %v11888_v7, %v3845_v37 }
 0x5a8   : > { %7758 = vrot.lane.b32.xlu2 %v12026_v41, %s13740_s2  ;;  %7783 = vrot.lane.b32.xlu1 %v12026_v41, %s13736_s1 }
 0x5a9   : > { %v3913_v34 = vmax.f32 %v3881_v8, 0.0  ;;  %7733 = vrot.lane.b32.xlu0 %v11912_v13, %s13609_s17  ;;  %v7520_v13 = vunpack.i.l.bf16 %v11922_v62 }
 0x5aa   : > { %v12044_v54 = vpop.permute.xlu1 %7573  ;;  %v12046_v26 = vpop.permute.xlu2 %7593 }
 0x5ab   : > { %3945 = vst.msk [vmem:[#allocation3 + $0x151] sm:$0xff] %vm1704_vm4, %v3913_v34  ;;  %v7524_v50 = vpop.permute.xlu0 %7523  ;;  %v5071_v23 = vsel %vm1836_vm8, %v5039_v63, %v7520_v13  ;;  %v7551_v63 = vunpack.i.h.bf16 %v11970_v5 }
 0x5ac   : > { %v7526_v47 = vunpack.i.h.bf16 %v7524_v50  ;;  %v7525_v32 = vunpack.i.l.bf16 %v7524_v50  ;;  %v3802_v49 = vpop.f32.mrf.mxu1  ;;  %v7550_v50 = vunpack.i.l.bf16 %v11970_v5 }
 0x5ad   : > { %v3846_v39 = vmul.f32 %v11882_v14, %v3802_v49 }
 0x5ae   : > { %v5104_v31 = vsel %vm1902_vm11, %v5072_v59, %v7526_v47  ;;  %v5103_v15 = vsel %vm1902_vm11, %v5071_v23, %v7525_v32  ;;  %v4101_v47 = vrot.slane %v12023_v52, 1  ;;  %v4098_v23 = vrot.slane %v12028_v22, 1  ;;  %v8203_v59 = vld [vmem:[#allocation3 + $0x18] sm:$0xff] }
 0x5af   : > { %v3882_v62 = vadd.f32 %v11888_v7, %v3846_v39  ;;  %v5136_v10 = vsel %vm3489_vm15, %v5104_v31, %v7531_v35  ;;  %v5135_v44 = vsel %vm3489_vm15, %v5103_v15, %v7530_v2  ;;  %v12114_v31 = vld [vmem:[#allocation3 + $0xf0] sm:$0xff] }
 0x5b0   : > { %7773 = vrot.lane.b32.xlu2 %v7772_v19, %s13609_s17  ;;  %7798 = vrot.lane.b32.xlu1 %v12060_v36, %s13740_s2  ;;  %v5167_v42 = vsel %vm3522_vm1, %v5135_v44, %v7535_v60  ;;  %v5168_v3 = vsel %vm3522_vm1, %v5136_v10, %v7536_v53  ;;  %v12120_v52 = vpack.i.bf16 %v12107_v20, %v12114_v31  ;;  %v7561_v44 = vunpack.i.h.bf16 %v12010_v17 }
 0x5b1   : > { %v3914_v1 = vmax.f32 %v3882_v62, 0.0  ;;  %7748 = vrot.lane.b32.xlu0 %v7772_v19, %s13743_s3  ;;  %v5009_v19 = vsel %vm1704_vm4, %v8203_v59, %v7490_v6  ;;  %v4100_v35 = vsel %vm716_vm2, %v4098_v23, %v4099_v16  ;;  %v4102_v10 = vsel %vm716_vm2, %v4099_v16, %v4101_v47 }
 0x5b2   : > { %v12073_v45 = vpop.permute.xlu1 %7588  ;;  %v12075_v30 = vpop.permute.xlu2 %7608  ;;  %v5041_v62 = vsel %vm1770_vm7, %v5009_v19, %v7550_v50  ;;  %v7560_v53 = vunpack.i.l.bf16 %v12010_v17  ;;  %v7566_v17 = vunpack.i.h.bf16 %v11996_v9  ;;  %v7495_v23 = vunpack.i.l.bf16 %v11998_v55 }
 0x5b3   : > { %3946 = vst.msk [vmem:[#allocation3 + $0x159] sm:$0xff] %vm1704_vm4, %v3914_v1  ;;  %v7539_v33 = vpop.permute.xlu0 %7538 }
 0x5b4   : > { %v7541_v12 = vunpack.i.h.bf16 %v7539_v33  ;;  %v7540_v46 = vunpack.i.l.bf16 %v7539_v33  ;;  %v3805_v37 = vpop.f32.mrf.mxu1 }
 0x5b5   : > { %v3847_v8 = vmul.f32 %v11882_v14, %v3805_v37  ;;  %v7817_v37 = vpack.i.bf16 %v4102_v10, %v4100_v35  ;;  %v8204_v10 = vld [vmem:[#allocation3 + $0x38] sm:$0xff] }
 0x5b6   : > { %v5199_v57 = vsel %vm3555_vm0, %v5167_v42, %v7540_v46  ;;  %v5200_v48 = vsel %vm3555_vm0, %v5168_v3, %v7541_v12  ;;  %v7576_v3 = vunpack.i.h.bf16 %v12044_v54 }
 0x5b7   : > { %v3883_v21 = vadd.f32 %v11888_v7, %v3847_v8  ;;  %v5231_v27 = vsel %vm3588_vm5, %v5199_v57, %v7545_v43  ;;  %v5232_v61 = vsel %vm3588_vm5, %v5200_v48, %v7546_v29  ;;  %v7565_v43 = vunpack.i.l.bf16 %v11996_v9  ;;  %v12145_v48 = vld [vmem:[#allocation3 + $0x100] sm:$0x3] }
 0x5b8   : > { %7788 = vrot.lane.b32.xlu2 %v7787_v18, %s13743_s3  ;;  %7813 = vrot.lane.b32.xlu1 %v7787_v18, %s13609_s17  ;;  %v5263_v34 = vpack.c.bf16 %v5232_v61, %v5231_v27  ;;  %v4104_v18 = vrot.slane %v12107_v20, 1  ;;  %v4106_v16 = vrot.slane %v12145_v48, 1 }
 0x5b9   : > { %v3915_v4 = vmax.f32 %v3883_v21, 0.0  ;;  %7763 = vrot.lane.b32.xlu0 %v11952_v25, %s13613_s25  ;;  %v8202_v25 = vld [vmem:[#allocation3 + $0x20] sm:$0xff]  ;;  %v7575_v21 = vunpack.i.l.bf16 %v12044_v54 }
 0x5ba   : > { %6103 = vmatmul.msk.bf16.vlgmr.msra.gmra.mxu2 %vm3673_vm6, %v5263_v34  ;;  %v12101_v11 = vpop.permute.xlu1 %7603  ;;  %v12103_v38 = vpop.permute.xlu2 %7623  ;;  %v5010_v32 = vsel %vm1704_vm4, %v8202_v25, %v7491_v58  ;;  %v7581_v58 = vunpack.i.h.bf16 %v12012_v40  ;;  %v7580_v34 = vunpack.i.l.bf16 %v12012_v40 }
 0x5bb   : > { %3947 = vst.msk [vmem:[#allocation3 + $0x169] sm:$0xff] %vm1704_vm4, %v3915_v4  ;;  %v7554_v13 = vpop.permute.xlu0 %7553  ;;  %v5042_v15 = vsel %vm1770_vm7, %v5010_v32, %v7551_v63  ;;  %v4103_v32 = vrot.slane %v12114_v31, 1 }
 0x5bc   : > { %v7556_v49 = vunpack.i.h.bf16 %v7554_v13  ;;  %v7555_v5 = vunpack.i.l.bf16 %v7554_v13  ;;  %v3807_v39 = vpop.f32.mrf.mxu1 }
 0x5bd   : > { %v3848_v0 = vmul.f32 %v11882_v14, %v3807_v39  ;;  %v4105_v19 = vsel %vm716_vm2, %v4103_v32, %v4104_v18 }
 0x5be   : > { %v5074_v2 = vsel %vm1836_vm8, %v5042_v15, %v7556_v49  ;;  %v5073_v22 = vsel %vm1836_vm8, %v5041_v62, %v7555_v5  ;;  %v7496_v49 = vunpack.i.h.bf16 %v11998_v55 }
 0x5bf   : > { %v3884_v1 = vadd.f32 %v11888_v7, %v3848_v0  ;;  %v5106_v33 = vsel %vm1902_vm11, %v5074_v2, %v7561_v44  ;;  %v5105_v29 = vsel %vm1902_vm11, %v5073_v22, %v7560_v53  ;;  %v4107_v0 = vsel %vm716_vm2, %v4104_v18, %v4106_v16  ;;  %v12176_v2 = vld [vmem:[#allocation3 + $0x110] sm:$0xff]  ;;  %v12178_v22 = vld [vmem:[#allocation3 + $0x118] sm:$0x3]  ;;  %v12184_v53 = vld [vmem:[#allocation3 + $0x108] sm:$0xff] }
 0x5c0   : > { %7803 = vrot.lane.b32.xlu2 %v11979_v24, %s13613_s25  ;;  %7828 = vrot.lane.b32.xlu1 %v12120_v52, %s13743_s3  ;;  %v5137_v27 = vsel %vm3489_vm15, %v5105_v29, %v7565_v43  ;;  %v5138_v61 = vsel %vm3489_vm15, %v5106_v33, %v7566_v17  ;;  %v5012_v55 = vsel %vm1704_vm4, %v8204_v10, %v7496_v49  ;;  %v4111_v17 = vrot.slane %v12178_v22, 1 }
 0x5c1   : > { %v3916_v60 = vmax.f32 %v3884_v1, 0.0  ;;  %7778 = vrot.lane.b32.xlu0 %v11979_v24, %s13615_s16  ;;  %v12182_v44 = vpack.i.bf16 %v4107_v0, %v4105_v19  ;;  %v7611_v49 = vunpack.i.h.bf16 %v12075_v30 }
 0x5c2   : > { %v12137_v12 = vpop.permute.xlu1 %7618  ;;  %v12139_v46 = vpop.permute.xlu2 %7638 }
 0x5c3   : > { %3948 = vst.msk [vmem:[#allocation3 + $0x171] sm:$0xff] %vm1704_vm4, %v3916_v60  ;;  %v7569_v42 = vpop.permute.xlu0 %7568  ;;  %v8205_v60 = vld [vmem:[#allocation3 + $0x30] sm:$0xff] }
 0x5c4   : > { %v7571_v8 = vunpack.i.h.bf16 %v7569_v42  ;;  %v7570_v24 = vunpack.i.l.bf16 %v7569_v42  ;;  %v3810_v57 = vpop.f32.mrf.mxu1  ;;  %v5011_v33 = vsel %vm1704_vm4, %v8205_v60, %v7495_v23  ;;  %v7591_v42 = vunpack.i.h.bf16 %v12073_v45 }
 0x5c5   : > { %v3849_v9 = vmul.f32 %v11882_v14, %v3810_v57  ;;  %v7610_v23 = vunpack.i.l.bf16 %v12075_v30  ;;  %v4285_v60 = vrot.slane %v12176_v2, 2  ;;  %v7621_v30 = vunpack.i.h.bf16 %v12137_v12 }
 0x5c6   : > { %v5169_v6 = vsel %vm3522_vm1, %v5137_v27, %v7570_v24  ;;  %v5170_v4 = vsel %vm3522_vm1, %v5138_v61, %v7571_v8 }
 0x5c7   : > { %v3885_v63 = vadd.f32 %v11888_v7, %v3849_v9  ;;  %v5201_v50 = vsel %vm3555_vm0, %v5169_v6, %v7575_v21  ;;  %v5202_v54 = vsel %vm3555_vm0, %v5170_v4, %v7576_v3  ;;  %v7590_v3 = vunpack.i.l.bf16 %v12073_v45 }
 0x5c8   : > { %7818 = vrot.lane.b32.xlu2 %v7817_v37, %s13615_s16  ;;  %7843 = vrot.lane.b32.xlu1 %v7817_v37, %s13613_s25  ;;  %v5233_v13 = vsel %vm3588_vm5, %v5201_v50, %v7580_v34  ;;  %v5234_v40 = vsel %vm3588_vm5, %v5202_v54, %v7581_v58  ;;  %v7596_v9 = vunpack.i.h.bf16 %v12046_v26  ;;  %v4280_v6 = vrot.slane %v12107_v20, 2 }
 0x5c9   : > { %v3917_v47 = vmax.f32 %v3885_v63, 0.0  ;;  %7793 = vrot.lane.b32.xlu0 %v7817_v37, %s13747_s26  ;;  %v5264_v25 = vpack.c.bf16 %v5234_v40, %v5233_v13  ;;  %v4109_v37 = vrot.slane %v12176_v2, 1  ;;  %v4282_v4 = vrot.slane %v12145_v48, 2 }
 0x5ca   : > { %v12167_v5 = vpop.permute.xlu1 %7633  ;;  %v12169_v39 = vpop.permute.xlu2 %7653  ;;  %v4279_v40 = vrot.slane %v12114_v31, 2 }
 0x5cb   : > { %3949 = vst.msk [vmem:[#allocation3 + $0x181] sm:$0xff] %vm1704_vm4, %v3917_v47  ;;  %v7584_v59 = vpop.permute.xlu0 %7583  ;;  %6104 = vmatmul.msk.bf16.gmra.mxu2 %vm3673_vm6, %v5264_v25  ;;  %v4112_v45 = vsel %vm716_vm2, %v4109_v37, %v4111_v17  ;;  %v7605_v47 = vunpack.i.l.bf16 %v12101_v11  ;;  %v4283_v48 = vsel %vm893_vm3, %v4280_v6, %v4282_v4  ;;  %v8206_v17 = vld [vmem:[#allocation3 + $0x50] sm:$0xff] }
 0x5cc   : > { %v7586_v15 = vunpack.i.h.bf16 %v7584_v59  ;;  %v7585_v62 = vunpack.i.l.bf16 %v7584_v59  ;;  %v3812_v35 = vpop.f32.mrf.mxu1  ;;  %v4281_v20 = vsel %vm893_vm3, %v4279_v40, %v4280_v6  ;;  %v7636_v40 = vunpack.i.h.bf16 %v12167_v5 }
 0x5cd   : > { %v3850_v1 = vmul.f32 %v11882_v14, %v3812_v35 }
 0x5ce   : > { %v5044_v43 = vsel %vm1770_vm7, %v5012_v55, %v7586_v15  ;;  %v5043_v14 = vsel %vm1770_vm7, %v5011_v33, %v7585_v62  ;;  %v7501_v15 = vunpack.i.h.bf16 %v11920_v56  ;;  %v7620_v33 = vunpack.i.l.bf16 %v12137_v12 }
 0x5cf   : > { %v3886_v29 = vadd.f32 %v11888_v7, %v3850_v1  ;;  %v4108_v7 = vrot.slane %v12184_v53, 1  ;;  %v5076_v18 = vsel %vm1836_vm8, %v5044_v43, %v7591_v42  ;;  %v5075_v21 = vsel %vm1836_vm8, %v5043_v14, %v7590_v3  ;;  %v8207_v14 = vld [vmem:[#allocation3 + $0x48] sm:$0xff] }
 0x5d0   : > { %7858 = vrot.lane.b32.xlu1 %v12182_v44, %s13615_s16  ;;  %7833 = vrot.lane.b32.xlu2 %v12182_v44, %s13747_s26  ;;  %v5108_v50 = vsel %vm1902_vm11, %v5076_v18, %v7596_v9  ;;  %v7500_v1 = vunpack.i.l.bf16 %v11920_v56  ;;  %v4284_v56 = vrot.slane %v12184_v53, 2  ;;  %v5014_v43 = vsel %vm1704_vm4, %v8206_v17, %v7501_v15 }
 0x5d1   : > { %v3918_v8 = vmax.f32 %v3886_v29, 0.0  ;;  %7808 = vrot.lane.b32.xlu0 %v12026_v41, %s13589_s23  ;;  %v4110_v61 = vsel %vm716_vm2, %v4108_v7, %v4109_v37  ;;  %v7595_v41 = vunpack.i.l.bf16 %v12046_v26  ;;  %v7606_v26 = vunpack.i.h.bf16 %v12101_v11 }
 0x5d2   : > { %v12201_v24 = vpop.permute.xlu2 %7668  ;;  %v12203_v57 = vpop.permute.xlu1 %7648  ;;  %v12216_v54 = vpack.i.bf16 %v4112_v45, %v4110_v61  ;;  %v4287_v37 = vrot.slane %v12178_v22, 2  ;;  %v5013_v42 = vsel %vm1704_vm4, %v8207_v14, %v7500_v1  ;;  %v5046_v22 = vsel %vm1770_vm7, %v5014_v43, %v7621_v30 }
 0x5d3   : > { %3950 = vst.msk [vmem:[#allocation3 + $0x189] sm:$0xff] %vm1704_vm4, %v3918_v8  ;;  %v7599_v27 = vpop.permute.xlu0 %7598  ;;  %v5107_v63 = vsel %vm1902_vm11, %v5075_v21, %v7595_v41  ;;  %v5045_v8 = vsel %vm1770_vm7, %v5013_v42, %v7620_v33  ;;  %v4286_v18 = vsel %vm893_vm3, %v4284_v56, %v4285_v60  ;;  %v7625_v61 = vunpack.i.l.bf16 %v12103_v38  ;;  %v12266_v41 = vld [vmem:[#allocation3 + $0x128] sm:$0xff] }
 0x5d4   : > { %v7601_v58 = vunpack.i.h.bf16 %v7599_v27  ;;  %v7600_v34 = vunpack.i.l.bf16 %v7599_v27  ;;  %v4288_v21 = vsel %vm893_vm3, %v4285_v60, %v4287_v37  ;;  %v7626_v27 = vunpack.i.h.bf16 %v12103_v38  ;;  %v8208_v42 = vld [vmem:[#allocation3 + $0x68] sm:$0xff] }
 0x5d5   : > { %v12272_v4 = vpack.i.bf16 %v4288_v21, %v4286_v18  ;;  %v4290_v38 = vrot.slane %v12266_v41, 2  ;;  %v7650_v15 = vunpack.i.l.bf16 %v12203_v57  ;;  %v7506_v33 = vunpack.i.h.bf16 %v11898_v51 }
 0x5d6   : > { %v5139_v16 = vsel %vm3489_vm15, %v5107_v63, %v7600_v34  ;;  %v5140_v13 = vsel %vm3489_vm15, %v5108_v50, %v7601_v58  ;;  %v12268_v58 = vld [vmem:[#allocation3 + $0x130] sm:$0x3]  ;;  %v5077_v34 = vsel %vm1836_vm8, %v5045_v8, %v7625_v61  ;;  %v5078_v6 = vsel %vm1836_vm8, %v5046_v22, %v7626_v27  ;;  %v12274_v63 = vld [vmem:[#allocation3 + $0x120] sm:$0xff] }
 0x5d7   : > { %v5171_v25 = vsel %vm3522_vm1, %v5139_v16, %v7605_v47  ;;  %v5172_v31 = vsel %vm3522_vm1, %v5140_v13, %v7606_v26  ;;  %v4292_v13 = vrot.slane %v12268_v58, 2  ;;  %v7635_v26 = vunpack.i.l.bf16 %v12167_v5  ;;  %v8209_v8 = vld [vmem:[#allocation3 + $0x60] sm:$0xff] }
 0x5d8   : > { %7848 = vrot.lane.b32.xlu2 %v12060_v36, %s13589_s23  ;;  %7873 = vrot.lane.b32.xlu1 %v12216_v54, %s13747_s26  ;;  %v5203_v62 = vsel %vm3555_vm0, %v5171_v25, %v7610_v23  ;;  %v5204_v35 = vsel %vm3555_vm0, %v5172_v31, %v7611_v49  ;;  %v4289_v47 = vrot.slane %v12274_v63, 2  ;;  %v7641_v5 = vunpack.i.h.bf16 %v12139_v46 }
 0x5d9   : > { %7823 = vrot.lane.b32.xlu0 %v12060_v36, %s13736_s1  ;;  %v7837_v36 = vpack.i.bf16 %v4283_v48, %v4281_v20  ;;  %v7640_v49 = vunpack.i.l.bf16 %v12139_v46  ;;  %v7892_v46 = vpack.i.bf16 %v12176_v2, %v12184_v53  ;;  %v7656_v2 = vunpack.i.h.bf16 %v12169_v39 }
 0x5da   : > { %v12233_v32 = vpop.permute.xlu1 %7663  ;;  %v12235_v11 = vpop.permute.xlu2 %7683  ;;  %v7655_v53 = vunpack.i.l.bf16 %v12169_v39  ;;  %v5016_v22 = vsel %vm1704_vm4, %v8208_v42, %v7506_v33  ;;  %v7907_v39 = vpack.i.bf16 %v12266_v41, %v12274_v63  ;;  %v12384_v33 = vld [vmem:[#allocation3 + $0x148] sm:$0x3] }
 0x5db   : > { %v7614_v59 = vpop.permute.xlu0 %7613  ;;  %v7666_v61 = vunpack.i.h.bf16 %v12233_v32 }
 0x5dc   : > { %v7616_v19 = vunpack.i.h.bf16 %v7614_v59  ;;  %v7615_v0 = vunpack.i.l.bf16 %v7614_v59  ;;  %v4291_v59 = vsel %vm893_vm3, %v4289_v47, %v4290_v38 }
 0x5de   : > { %v5235_v10 = vsel %vm3588_vm5, %v5203_v62, %v7615_v0  ;;  %v5236_v55 = vsel %vm3588_vm5, %v5204_v35, %v7616_v19  ;;  %v4293_v19 = vsel %vm893_vm3, %v4290_v38, %v4292_v13  ;;  %v7671_v38 = vunpack.i.h.bf16 %v12201_v24 }
 0x5df   : > { %v5265_v29 = vpack.c.bf16 %v5236_v55, %v5235_v10  ;;  %v12307_v55 = vpack.i.bf16 %v4293_v19, %v4291_v59 }
 0x5e0   : > { %7863 = vrot.lane.b32.xlu2 %v7837_v36, %s13736_s1  ;;  %7888 = vrot.lane.b32.xlu1 %v7837_v36, %s13589_s23 }
 0x5e1   : > { %6105 = vmatmul.msk.bf16.gmra.mxu2 %vm3673_vm6, %v5265_v29  ;;  %7838 = vrot.lane.b32.xlu0 %v7837_v36, %s13740_s2  ;;  %v7651_v36 = vunpack.i.h.bf16 %v12203_v57  ;;  %v7505_v29 = vunpack.i.l.bf16 %v11898_v51 }
 0x5e2   : > { %v12256_v12 = vpop.permute.xlu2 %7698  ;;  %v12258_v3 = vpop.permute.xlu1 %7678 }
 0x5e3   : > { %v7629_v7 = vpop.permute.xlu0 %7628  ;;  %v5015_v51 = vsel %vm1704_vm4, %v8209_v8, %v7505_v29  ;;  %v8210_v29 = vld [vmem:[#allocation3 + $0x80] sm:$0xff] }
 0x5e4   : > { %v7631_v45 = vunpack.i.h.bf16 %v7629_v7  ;;  %v7630_v9 = vunpack.i.l.bf16 %v7629_v7  ;;  %v5048_v7 = vsel %vm1770_vm7, %v5016_v22, %v7656_v2  ;;  %v5047_v18 = vsel %vm1770_vm7, %v5015_v51, %v7655_v53  ;;  %v8211_v53 = vld [vmem:[#allocation3 + $0x78] sm:$0xff] }
 0x5e6   : > { %v5110_v50 = vsel %vm1902_vm11, %v5078_v6, %v7631_v45  ;;  %v5109_v16 = vsel %vm1902_vm11, %v5077_v34, %v7630_v9  ;;  %v7665_v45 = vunpack.i.l.bf16 %v12233_v32  ;;  %v12338_v9 = vld [vmem:[#allocation3 + $0x140] sm:$0xff]  ;;  %v7670_v32 = vunpack.i.l.bf16 %v12201_v24 }
 0x5e7   : > { %v5142_v20 = vsel %vm3489_vm15, %v5110_v50, %v7636_v40  ;;  %v5141_v48 = vsel %vm3489_vm15, %v5109_v16, %v7635_v26  ;;  %v12348_v40 = vld [vmem:[#allocation3 + $0x138] sm:$0xff]  ;;  %v7685_v24 = vunpack.i.l.bf16 %v12235_v11 }
 0x5e8   : > { %7878 = vrot.lane.b32.xlu2 %v12272_v4, %s13740_s2  ;;  %7903 = vrot.lane.b32.xlu1 %v12272_v4, %s13736_s1  ;;  %v5173_v62 = vsel %vm3522_vm1, %v5141_v48, %v7640_v49  ;;  %v5174_v35 = vsel %vm3522_vm1, %v5142_v20, %v7641_v5  ;;  %v7681_v20 = vunpack.i.h.bf16 %v12258_v3  ;;  %v7680_v48 = vunpack.i.l.bf16 %v12258_v3 }
 0x5e9   : > { %7853 = vrot.lane.b32.xlu0 %v12120_v52, %s13609_s17  ;;  %v4116_v3 = vrot.slane %v12268_v58, 1  ;;  %v7511_v58 = vunpack.i.h.bf16 %v12015_v28  ;;  %v4118_v51 = vrot.slane %v12348_v40, 1 }
 0x5ea   : > { %v12291_v25 = vpop.permute.xlu1 %7693  ;;  %v12293_v31 = vpop.permute.xlu2 %7713 }
 0x5eb   : > { %v7644_v23 = vpop.permute.xlu0 %7643  ;;  %v5018_v2 = vsel %vm1704_vm4, %v8210_v29, %v7511_v58  ;;  %v7696_v22 = vunpack.i.h.bf16 %v12291_v25  ;;  %v7695_v8 = vunpack.i.l.bf16 %v12291_v25  ;;  %v7700_v25 = vunpack.i.l.bf16 %v12256_v12 }
 0x5ec   : > { %v7646_v52 = vunpack.i.h.bf16 %v7644_v23  ;;  %v7645_v0 = vunpack.i.l.bf16 %v7644_v23  ;;  %v7686_v23 = vunpack.i.h.bf16 %v12235_v11 }
 0x5ee   : > { %v5205_v1 = vsel %vm3555_vm0, %v5173_v62, %v7645_v0  ;;  %v5206_v10 = vsel %vm3555_vm0, %v5174_v35, %v7646_v52  ;;  %v4113_v35 = vrot.slane %v12274_v63, 1 }
 0x5ef   : > { %v5237_v60 = vsel %vm3588_vm5, %v5205_v1, %v7650_v15  ;;  %v5238_v30 = vsel %vm3588_vm5, %v5206_v10, %v7651_v36  ;;  %v4114_v36 = vrot.slane %v12266_v41, 1  ;;  %v7510_v10 = vunpack.i.l.bf16 %v12015_v28 }
 0x5f0   : > { %7893 = vrot.lane.b32.xlu2 %v7892_v46, %s13609_s17  ;;  %7918 = vrot.lane.b32.xlu1 %v12307_v55, %s13740_s2  ;;  %v5266_v57 = vpack.c.bf16 %v5238_v30, %v5237_v60  ;;  %v4119_v28 = vrot.slane %v12338_v9, 1 }
 0x5f1   : > { %7868 = vrot.lane.b32.xlu0 %v7892_v46, %s13743_s3  ;;  %v4115_v60 = vsel %vm716_vm2, %v4113_v35, %v4114_v36  ;;  %v4117_v30 = vsel %vm716_vm2, %v4114_v36, %v4116_v3 }
 0x5f2   : > { %6106 = vmatmul.msk.bf16.gmra.mxu2 %vm3673_vm6, %v5266_v57  ;;  %v12320_v37 = vpop.permute.xlu1 %7708  ;;  %v12322_v56 = vpop.permute.xlu2 %7728  ;;  %v7937_v63 = vpack.i.bf16 %v4117_v30, %v4115_v60 }
 0x5f3   : > { %v7659_v17 = vpop.permute.xlu0 %7658 }
 0x5f4   : > { %v7661_v43 = vunpack.i.h.bf16 %v7659_v17  ;;  %v7660_v14 = vunpack.i.l.bf16 %v7659_v17  ;;  %v5017_v17 = vsel %vm1704_vm4, %v8211_v53, %v7510_v10 }
 0x5f6   : > { %v5080_v21 = vsel %vm1836_vm8, %v5048_v7, %v7661_v43  ;;  %v5079_v27 = vsel %vm1836_vm8, %v5047_v18, %v7660_v14  ;;  %v4121_v43 = vrot.slane %v12384_v33, 1 }
 0x5f7   : > { %v5112_v34 = vsel %vm1902_vm11, %v5080_v21, %v7666_v61  ;;  %v5111_v6 = vsel %vm1902_vm11, %v5079_v27, %v7665_v45  ;;  %v4120_v61 = vsel %vm716_vm2, %v4118_v51, %v4119_v28 }
 0x5f8   : > { %7908 = vrot.lane.b32.xlu2 %v7907_v39, %s13743_s3  ;;  %7933 = vrot.lane.b32.xlu1 %v7907_v39, %s13609_s17  ;;  %v5143_v5 = vsel %vm3489_vm15, %v5111_v6, %v7670_v32  ;;  %v5144_v49 = vsel %vm3489_vm15, %v5112_v34, %v7671_v38  ;;  %v4122_v45 = vsel %vm716_vm2, %v4119_v28, %v4121_v43  ;;  %v7701_v34 = vunpack.i.h.bf16 %v12256_v12  ;;  %v12408_v32 = vld [vmem:[#allocation3 + $0x158] sm:$0xff]  ;;  %v8213_v28 = vld [vmem:[#allocation3 + $0x90] sm:$0xff] }
 0x5f9   : > { %7883 = vrot.lane.b32.xlu0 %v12182_v44, %s13613_s25  ;;  %v12352_v44 = vpack.i.bf16 %v12338_v9, %v12348_v40  ;;  %v4124_v12 = vrot.slane %v12408_v32, 1 }
 0x5fa   : > { %v12342_v50 = vpop.permute.xlu1 %7723  ;;  %v12344_v16 = vpop.permute.xlu2 %7743 }
 0x5fb   : > { %v7674_v13 = vpop.permute.xlu0 %7673 }
 0x5fc   : > { %v7676_v26 = vunpack.i.h.bf16 %v7674_v13  ;;  %v7675_v47 = vunpack.i.l.bf16 %v7674_v13  ;;  %v12410_v13 = vld [vmem:[#allocation3 + $0x160] sm:$0x3] }
 0x5fe   : > { %v5176_v59 = vsel %vm3522_vm1, %v5144_v49, %v7676_v26  ;;  %v5175_v19 = vsel %vm3522_vm1, %v5143_v5, %v7675_v47 }
 0x5ff   : > { %v5207_v52 = vsel %vm3555_vm0, %v5175_v19, %v7680_v48  ;;  %v5208_v0 = vsel %vm3555_vm0, %v5176_v59, %v7681_v20  ;;  %v12414_v20 = vpack.i.bf16 %v4122_v45, %v4120_v61  ;;  %v12416_v48 = vld [vmem:[#allocation3 + $0x150] sm:$0xff]  ;;  %v7710_v59 = vunpack.i.l.bf16 %v12320_v37 }
 0x600   : > { %7923 = vrot.lane.b32.xlu2 %v12216_v54, %s13613_s25  ;;  %7948 = vrot.lane.b32.xlu1 %v12352_v44, %s13743_s3  ;;  %v5239_v11 = vsel %vm3588_vm5, %v5207_v52, %v7685_v24  ;;  %v5240_v15 = vsel %vm3588_vm5, %v5208_v0, %v7686_v23  ;;  %v4126_v23 = vrot.slane %v12410_v13, 1  ;;  %v7711_v24 = vunpack.i.h.bf16 %v12320_v37 }
 0x601   : > { %7898 = vrot.lane.b32.xlu0 %v12216_v54, %s13615_s16  ;;  %v5267_v62 = vpack.c.bf16 %v5240_v15, %v5239_v11  ;;  %v4123_v19 = vrot.slane %v12416_v48, 1  ;;  %v7716_v37 = vunpack.i.h.bf16 %v12293_v31  ;;  %v7715_v11 = vunpack.i.l.bf16 %v12293_v31 }
 0x602   : > { %v12375_v1 = vpop.permute.xlu1 %7738  ;;  %v12377_v41 = vpop.permute.xlu2 %7758  ;;  %v4127_v35 = vsel %vm716_vm2, %v4124_v12, %v4126_v23  ;;  %v7726_v31 = vunpack.i.h.bf16 %v12342_v50  ;;  %v7745_v23 = vunpack.i.l.bf16 %v12344_v16 }
 0x603   : > { %v7689_v46 = vpop.permute.xlu0 %7688  ;;  %6107 = vmatmul.msk.bf16.gmra.mxu2 %vm3673_vm6, %v5267_v62  ;;  %v4125_v62 = vsel %vm716_vm2, %v4123_v19, %v4124_v12 }
 0x604   : > { %v7691_v57 = vunpack.i.h.bf16 %v7689_v46  ;;  %v7690_v54 = vunpack.i.l.bf16 %v7689_v46 }
 0x606   : > { %v5050_v14 = vsel %vm1770_vm7, %v5018_v2, %v7691_v57  ;;  %v5049_v42 = vsel %vm1770_vm7, %v5017_v17, %v7690_v54  ;;  %v12445_v57 = vpack.i.bf16 %v4127_v35, %v4125_v62  ;;  %v4295_v54 = vrot.slane %v12338_v9, 2 }
 0x607   : > { %v5081_v39 = vsel %vm1836_vm8, %v5049_v42, %v7695_v8  ;;  %v5082_v21 = vsel %vm1836_vm8, %v5050_v14, %v7696_v22  ;;  %v4297_v2 = vrot.slane %v12384_v33, 2  ;;  %v4294_v9 = vrot.slane %v12348_v40, 2 }
 0x608   : > { %7938 = vrot.lane.b32.xlu2 %v7937_v63, %s13615_s16  ;;  %7963 = vrot.lane.b32.xlu1 %v7937_v63, %s13613_s25  ;;  %v5113_v26 = vsel %vm1902_vm11, %v5081_v39, %v7700_v25  ;;  %v5114_v47 = vsel %vm1902_vm11, %v5082_v21, %v7701_v34  ;;  %v7731_v8 = vunpack.i.h.bf16 %v12322_v56  ;;  %v4300_v39 = vrot.slane %v12408_v32, 2 }
 0x609   : > { %7913 = vrot.lane.b32.xlu0 %v7937_v63, %s13747_s26  ;;  %v7725_v63 = vunpack.i.l.bf16 %v12342_v50  ;;  %v8212_v50 = vld [vmem:[#allocation3 + $0x98] sm:$0xff]  ;;  %v4296_v42 = vsel %vm893_vm3, %v4294_v9, %v4295_v54  ;;  %v4298_v22 = vsel %vm893_vm3, %v4295_v54, %v4297_v2  ;;  %v4302_v21 = vrot.slane %v12410_v13, 2 }
 0x60a   : > { %v12398_v7 = vpop.permute.xlu2 %7773  ;;  %v12400_v18 = vpop.permute.xlu1 %7753  ;;  %v5020_v33 = vsel %vm1704_vm4, %v8212_v50, %v7726_v31  ;;  %v7982_v45 = vpack.i.bf16 %v4298_v22, %v4296_v42  ;;  %v8012_v42 = vpack.i.bf16 %v12408_v32, %v12416_v48  ;;  %v5607_v22 = vld [vmem:[%s13205_s10] sm:$0xf] }
 0x60b   : > { %v7704_v27 = vpop.permute.xlu0 %7703  ;;  %v5019_v43 = vsel %vm1704_vm4, %v8213_v28, %v7725_v63  ;;  %v5052_v61 = vsel %vm1770_vm7, %v5020_v33, %v7731_v8  ;;  %v8214_v8 = vld [vmem:[#allocation3 + $0xb0] sm:$0xff] }
 0x60c   : > { %v7706_v6 = vunpack.i.h.bf16 %v7704_v27  ;;  %v7705_v38 = vunpack.i.l.bf16 %v7704_v27 }
 0x60e   : > { %v5145_v5 = vsel %vm3489_vm15, %v5113_v26, %v7705_v38  ;;  %v5146_v49 = vsel %vm3489_vm15, %v5114_v47, %v7706_v6  ;;  %v4299_v6 = vrot.slane %v12416_v48, 2  ;;  %v7741_v38 = vunpack.i.h.bf16 %v12375_v1 }
 0x60f   : > { %v5177_v52 = vsel %vm3522_vm1, %v5145_v5, %v7710_v59  ;;  %v5178_v0 = vsel %vm3522_vm1, %v5146_v49, %v7711_v24  ;;  %v4303_v26 = vsel %vm893_vm3, %v4300_v39, %v4302_v21 }
 0x610   : > { %7978 = vrot.lane.b32.xlu1 %v12414_v20, %s13615_s16  ;;  %7953 = vrot.lane.b32.xlu2 %v12414_v20, %s13747_s26  ;;  %v5209_v10 = vsel %vm3555_vm0, %v5177_v52, %v7715_v11  ;;  %v5210_v46 = vsel %vm3555_vm0, %v5178_v0, %v7716_v37  ;;  %v4301_v13 = vsel %vm893_vm3, %v4299_v6, %v4300_v39  ;;  %v12493_v0 = vld [vmem:[#allocation3 + $0x170] sm:$0xff]  ;;  %v12495_v37 = vld [vmem:[#allocation3 + $0x178] sm:$0x3]  ;;  %v7756_v11 = vunpack.i.h.bf16 %v12400_v18 }
 0x611   : > { %7928 = vrot.lane.b32.xlu0 %v12272_v4, %s13589_s23  ;;  %v12491_v52 = vpack.i.bf16 %v4303_v26, %v4301_v13  ;;  %v4307_v54 = vrot.slane %v12495_v37, 2  ;;  %v5657_v39 = vsel %vm3722_vm14, %v5607_v22, 0  ;;  %v7775_v6 = vunpack.i.l.bf16 %v12398_v7 }
 0x612   : > { %v12433_v36 = vpop.permute.xlu1 %7768  ;;  %v12435_v3 = vpop.permute.xlu2 %7788  ;;  %5666 = vmatpush.bf16.msra.mxu3 %v5657_v39 }
 0x613   : > { %v7719_v15 = vpop.permute.xlu0 %7718  ;;  %v7771_v32 = vunpack.i.h.bf16 %v12433_v36  ;;  %v7770_v48 = vunpack.i.l.bf16 %v12433_v36 }
 0x614   : > { %v7721_v4 = vunpack.i.h.bf16 %v7719_v15  ;;  %v7720_v58 = vunpack.i.l.bf16 %v7719_v15  ;;  %v7755_v15 = vunpack.i.l.bf16 %v12400_v18  ;;  %v4305_v18 = vrot.slane %v12493_v0, 2 }
 0x616   : > { %v5241_v60 = vsel %vm3588_vm5, %v5209_v10, %v7720_v58  ;;  %v5242_v30 = vsel %vm3588_vm5, %v5210_v46, %v7721_v4  ;;  %v7761_v4 = vunpack.i.h.bf16 %v12377_v41  ;;  %v12505_v46 = vld [vmem:[#allocation3 + $0x168] sm:$0xff]  ;;  %v4308_v28 = vsel %vm893_vm3, %v4305_v18, %v4307_v54 }
 0x617   : > { %v5268_v29 = vpack.c.bf16 %v5242_v30, %v5241_v60  ;;  %v8027_v26 = vpack.i.bf16 %v12493_v0, %v12505_v46 }
 0x618   : > { %7968 = vrot.lane.b32.xlu2 %v12307_v55, %s13589_s23  ;;  %7993 = vrot.lane.b32.xlu1 %v12445_v57, %s13747_s26 }
 0x619   : > { %6108 = vmatmul.msk.bf16.gmra.mxu2 %vm3673_vm6, %v5268_v29  ;;  %7943 = vrot.lane.b32.xlu0 %v12307_v55, %s13736_s1  ;;  %v7730_v55 = vunpack.i.l.bf16 %v12322_v56  ;;  %v7740_v56 = vunpack.i.l.bf16 %v12375_v1  ;;  %v7746_v1 = vunpack.i.h.bf16 %v12344_v16  ;;  %v7760_v16 = vunpack.i.l.bf16 %v12377_v41 }
 0x61a   : > { %v12459_v53 = vpop.permute.xlu1 %7783  ;;  %v12461_v17 = vpop.permute.xlu2 %7803  ;;  %v4304_v29 = vrot.slane %v12505_v46, 2 }
 0x61b   : > { %v7734_v14 = vpop.permute.xlu0 %7733  ;;  %v5051_v27 = vsel %vm1770_vm7, %v5019_v43, %v7730_v55 }
 0x61c   : > { %v7736_v40 = vunpack.i.h.bf16 %v7734_v14  ;;  %v7735_v51 = vunpack.i.l.bf16 %v7734_v14  ;;  %v4306_v33 = vsel %vm893_vm3, %v4304_v29, %v4305_v18  ;;  %v12583_v18 = vld [vmem:[#allocation3 + $0x180] sm:$0xff] }
 0x61e   : > { %v5083_v34 = vsel %vm1836_vm8, %v5051_v27, %v7735_v51  ;;  %v5084_v25 = vsel %vm1836_vm8, %v5052_v61, %v7736_v40  ;;  %v8215_v40 = vld [vmem:[#allocation3 + $0xa8] sm:$0xff] }
 0x61f   : > { %v5115_v47 = vsel %vm1902_vm11, %v5083_v34, %v7740_v56  ;;  %v5116_v5 = vsel %vm1902_vm11, %v5084_v25, %v7741_v38  ;;  %v7776_v25 = vunpack.i.h.bf16 %v12398_v7 }
 0x620   : > { %7983 = vrot.lane.b32.xlu2 %v7982_v45, %s13736_s1  ;;  %8008 = vrot.lane.b32.xlu1 %v7982_v45, %s13589_s23  ;;  %v5147_v62 = vsel %vm3489_vm15, %v5115_v47, %v7745_v23  ;;  %v5148_v35 = vsel %vm3489_vm15, %v5116_v5, %v7746_v1  ;;  %v7786_v1 = vunpack.i.h.bf16 %v12459_v53  ;;  %v7785_v23 = vunpack.i.l.bf16 %v12459_v53 }
 0x621   : > { %7958 = vrot.lane.b32.xlu0 %v7982_v45, %s13740_s2 }
 0x622   : > { %v12485_v49 = vpop.permute.xlu1 %7798  ;;  %v12487_v12 = vpop.permute.xlu2 %7818 }
 0x623   : > { %v7749_v24 = vpop.permute.xlu0 %7748 }
 0x624   : > { %v7751_v59 = vunpack.i.h.bf16 %v7749_v24  ;;  %v7750_v19 = vunpack.i.l.bf16 %v7749_v24 }
 0x626   : > { %v5180_v58 = vsel %vm3522_vm1, %v5148_v35, %v7751_v59  ;;  %v5179_v10 = vsel %vm3522_vm1, %v5147_v62, %v7750_v19  ;;  %v12571_v62 = vld [vmem:[#allocation3 + $0x188] sm:$0xff] }
 0x627   : > { %v5211_v60 = vsel %vm3555_vm0, %v5179_v10, %v7755_v15  ;;  %v5212_v30 = vsel %vm3555_vm0, %v5180_v58, %v7756_v11  ;;  %v7791_v11 = vunpack.i.h.bf16 %v12435_v3  ;;  %v7790_v15 = vunpack.i.l.bf16 %v12435_v3 }
 0x628   : > { %7998 = vrot.lane.b32.xlu2 %v12491_v52, %s13740_s2  ;;  %8023 = vrot.lane.b32.xlu1 %v12491_v52, %s13736_s1  ;;  %v5243_v41 = vsel %vm3588_vm5, %v5211_v60, %v7760_v16  ;;  %v5244_v31 = vsel %vm3588_vm5, %v5212_v30, %v7761_v4  ;;  %v4129_v16 = vrot.slane %v12493_v0, 1  ;;  %v7801_v58 = vunpack.i.h.bf16 %v12485_v49 }
 0x629   : > { %7973 = vrot.lane.b32.xlu0 %v12352_v44, %s13609_s17  ;;  %v5269_v63 = vpack.c.bf16 %v5244_v31, %v5243_v41  ;;  %v12529_v44 = vpack.i.bf16 %v4308_v28, %v4306_v33  ;;  %v7800_v10 = vunpack.i.l.bf16 %v12485_v49  ;;  %v12589_v31 = vpack.i.bf16 %v12571_v62, %v12583_v18 }
 0x62a   : > { %v12520_v2 = vpop.permute.xlu1 %7813  ;;  %v12522_v9 = vpop.permute.xlu2 %7833  ;;  %v4131_v0 = vrot.slane %v12495_v37, 1  ;;  %v4128_v37 = vrot.slane %v12505_v46, 1  ;;  %v7805_v28 = vunpack.i.l.bf16 %v12461_v17 }
 0x62b   : > { %v7764_v50 = vpop.permute.xlu0 %7763  ;;  %6109 = vmatmul.msk.bf16.gmra.mxu2 %vm3673_vm6, %v5269_v63 }
 0x62c   : > { %v7766_v43 = vunpack.i.h.bf16 %v7764_v50  ;;  %v7765_v14 = vunpack.i.l.bf16 %v7764_v50  ;;  %v12598_v50 = vld [vmem:[%s13204_s9] ss:$0 sm:$0xff]  ;;  %v4132_v22 = vsel %vm716_vm2, %v4129_v16, %v4131_v0 }
 0x62e   : > { %v5022_v55 = vsel %vm1704_vm4, %v8214_v8, %v7766_v43  ;;  %v5021_v51 = vsel %vm1704_vm4, %v8215_v40, %v7765_v14  ;;  %v7806_v8 = vunpack.i.h.bf16 %v12461_v17 }
 0x62f   : > { %v5053_v61 = vsel %vm1770_vm7, %v5021_v51, %v7770_v48  ;;  %v5054_v45 = vsel %vm1770_vm7, %v5022_v55, %v7771_v32  ;;  %v4504_v48 = vrot.slane %v12583_v18, 1 }
 0x630   : > { %8013 = vrot.lane.b32.xlu2 %v8012_v42, %s13609_s17  ;;  %8038 = vrot.lane.b32.xlu1 %v12529_v44, %s13740_s2  ;;  %v5085_v36 = vsel %vm1836_vm8, %v5053_v61, %v7775_v6  ;;  %v5086_v13 = vsel %vm1836_vm8, %v5054_v45, %v7776_v25  ;;  %v8216_v61 = vld [vmem:[#allocation3 + $0xc0] sm:$0xff]  ;;  %v4505_v25 = vrot.slane %v12571_v62, 1  ;;  %v8217_v6 = vld [vmem:[#allocation3 + $0xc8] sm:$0xff] }
 0x631   : > { %7988 = vrot.lane.b32.xlu0 %v8012_v42, %s13743_s3  ;;  %v4130_v42 = vsel %vm716_vm2, %v4128_v37, %v4129_v16  ;;  %v5023_v45 = vsel %vm1704_vm4, %v8216_v61, %v7805_v28  ;;  %v5024_v17 = vsel %vm1704_vm4, %v8217_v6, %v7806_v8  ;;  %v7820_v16 = vunpack.i.l.bf16 %v12487_v12 }
 0x632   : > { %v12543_v21 = vpop.permute.xlu1 %7828  ;;  %v12545_v27 = vpop.permute.xlu2 %7848  ;;  %v8057_v32 = vpack.i.bf16 %v4132_v22, %v4130_v42  ;;  %v4606_v6 = vrot.slane %v12571_v62, 2 }
 0x633   : > { %v7779_v34 = vpop.permute.xlu0 %7778  ;;  %v7830_v37 = vunpack.i.l.bf16 %v12543_v21  ;;  %v7831_v42 = vunpack.i.h.bf16 %v12543_v21 }
 0x634   : > { %v7781_v38 = vunpack.i.h.bf16 %v7779_v34  ;;  %v7780_v56 = vunpack.i.l.bf16 %v7779_v34 }
 0x636   : > { %v5117_v47 = vsel %vm1902_vm11, %v5085_v36, %v7780_v56  ;;  %v5118_v5 = vsel %vm1902_vm11, %v5086_v13, %v7781_v38  ;;  %v7815_v36 = vunpack.i.l.bf16 %v12520_v2  ;;  %v13750_v13 = vld [vmem:[#allocation27_spill] sm:$0xff] }
 0x637   : > { %v5149_v7 = vsel %vm3489_vm15, %v5117_v47, %v7785_v23  ;;  %v5150_v24 = vsel %vm3489_vm15, %v5118_v5, %v7786_v1  ;;  %v7816_v23 = vunpack.i.h.bf16 %v12520_v2 }
 0x638   : > { %8028 = vrot.lane.b32.xlu2 %v8027_v26, %s13743_s3  ;;  %8053 = vrot.lane.b32.xlu1 %v8027_v26, %s13609_s17  ;;  %v5181_v60 = vsel %vm3522_vm1, %v5149_v7, %v7790_v15  ;;  %v5182_v3 = vsel %vm3522_vm1, %v5150_v24, %v7791_v11  ;;  %v13751_v26 = vmax.f32 %v13750_v13, 0.0  ;;  %v13752_v24 = vld [vmem:[#allocation17_spill] sm:$0xff] }
 0x639   : > { %8003 = vrot.lane.b32.xlu0 %v12414_v20, %s13613_s25  ;;  %v12576_v20 = vld [vmem:[%s13203_s8] ss:$0 sm:$0xff]  ;;  %v13753_v11 = vmax.f32 %v13752_v24, 0.0 }
 0x63a   : > { %v12565_v59 = vpop.permute.xlu1 %7843  ;;  %v12567_v19 = vpop.permute.xlu2 %7863 }
 0x63b   : > { %v7794_v53 = vpop.permute.xlu0 %7793  ;;  %v7845_v62 = vunpack.i.l.bf16 %v12565_v59 }
 0x63c   : > { %v7796_v35 = vunpack.i.h.bf16 %v7794_v53  ;;  %v7795_v4 = vunpack.i.l.bf16 %v7794_v53 }
 0x63d   : > { %v5375_v30 = vpop.f32.mrf.mxu2 }
 0x63e   : > { %v5214_v54 = vsel %vm3555_vm0, %v5182_v3, %v7796_v35  ;;  %v5213_v41 = vsel %vm3555_vm0, %v5181_v60, %v7795_v4  ;;  %v5459_v29 = vmul.f32 %v12576_v20, %v5375_v30  ;;  %v4506_v35 = vsel %vm716_vm2, %v4504_v48, %v4505_v25  ;;  %v12670_v48 = vld [vmem:[#allocation3 + $0x1a8] sm:$0x3] }
 0x63f   : > { %v5245_v63 = vsel %vm3588_vm5, %v5213_v41, %v7800_v10  ;;  %v5246_v49 = vsel %vm3588_vm5, %v5214_v54, %v7801_v58  ;;  %v7821_v4 = vunpack.i.h.bf16 %v12487_v12  ;;  %v4808_v13 = vrot.slane %v12670_v48, 1 }
 0x640   : > { %8043 = vrot.lane.b32.xlu2 %v12445_v57, %s13613_s25  ;;  %8068 = vrot.lane.b32.xlu1 %v12589_v31, %s13743_s3  ;;  %v5270_v33 = vpack.c.bf16 %v5246_v49, %v5245_v63  ;;  %v5495_v46 = vadd.f32 %v12598_v50, %v5459_v29 }
 0x641   : > { %8018 = vrot.lane.b32.xlu0 %v12445_v57, %s13615_s16  ;;  %v12617_v57 = vld [vmem:[#allocation3 + $0x190] sm:$0x3] }
 0x642   : > { %6110 = vmatmul.msk.bf16.gmra.mxu2 %vm3673_vm6, %v5270_v33  ;;  %v12609_v43 = vpop.permute.xlu1 %7858  ;;  %v12611_v14 = vpop.permute.xlu2 %7878  ;;  %v4507_v56 = vrot.slane %v12617_v57, 1  ;;  %v5527_v47 = vadd.f32 %v5495_v46, %v13751_v26  ;;  %v12662_v46 = vld [vmem:[#allocation3 + $0x1a0] sm:$0xff]  ;;  %v7846_v26 = vunpack.i.h.bf16 %v12565_v59 }
 0x643   : > { %v7809_v55 = vpop.permute.xlu0 %7808 }
 0x644   : > { %v7811_v40 = vunpack.i.h.bf16 %v7809_v55  ;;  %v7810_v51 = vunpack.i.l.bf16 %v7809_v55  ;;  %v4508_v2 = vsel %vm716_vm2, %v4505_v25, %v4507_v56  ;;  %v5559_v3 = vmax.f32 %v5527_v47, 0.0  ;;  %v12660_v55 = vld [vmem:[#allocation3 + $0x198] sm:$0xff] }
 0x645   : > { %v5377_v39 = vpop.f32.mrf.mxu2  ;;  %v8097_v12 = vpack.i.bf16 %v4508_v2, %v4506_v35  ;;  %v13754_v35 = vld [vmem:[#allocation8_spill] sm:$0xff] }
 0x646   : > { %v5460_v34 = vmul.f32 %v12576_v20, %v5377_v39  ;;  %v5055_v38 = vsel %vm1770_vm7, %v5023_v45, %v7810_v51  ;;  %v5056_v5 = vsel %vm1770_vm7, %v5024_v17, %v7811_v40  ;;  %v7835_v40 = vunpack.i.l.bf16 %v12522_v9  ;;  %v8219_v2 = vld [vmem:[#allocation3 + $0xd8] sm:$0xff] }
 0x647   : > { %v5087_v7 = vsel %vm1836_vm8, %v5055_v38, %v7815_v36  ;;  %v5088_v58 = vsel %vm1836_vm8, %v5056_v5, %v7816_v23  ;;  %v4806_v39 = vrot.slane %v12662_v46, 1 }
 0x648   : > { %v5496_v1 = vadd.f32 %v12598_v50, %v5460_v34  ;;  %8058 = vrot.lane.b32.xlu2 %v8057_v32, %s13615_s16  ;;  %8083 = vrot.lane.b32.xlu1 %v8057_v32, %s13613_s25  ;;  %v5119_v0 = vsel %vm1902_vm11, %v5087_v7, %v7820_v16  ;;  %v5120_v63 = vsel %vm1902_vm11, %v5088_v58, %v7821_v4  ;;  %v13755_v4 = vmax.f32 %v13754_v35, 0.0  ;;  %s8254_s25 = scalar_lea.hbm %s13210_s15, 2 }
 0x649   : > { %8033 = vrot.lane.b32.xlu0 %v8057_v32, %s13747_s26  ;;  %v4805_v32 = vrot.slane %v12660_v55, 1  ;;  %v4809_v24 = vsel %vm716_vm2, %v4806_v39, %v4808_v13  ;;  %v4907_v35 = vrot.slane %v12662_v46, 2 }
 0x64a   : > { %v5528_v15 = vadd.f32 %v5496_v1, %v13753_v11  ;;  %v12638_v53 = vpop.permute.xlu1 %7873  ;;  %v12644_v60 = vpop.permute.xlu2 %7893  ;;  %v4608_v1 = vrot.slane %v12617_v57, 2  ;;  %v4605_v11 = vrot.slane %v12583_v18, 2  ;;  %v8218_v18 = vld [vmem:[#allocation3 + $0xe0] sm:$0xff] }
 0x64b   : > { %v7824_v10 = vpop.permute.xlu0 %7823  ;;  %v4807_v36 = vsel %vm716_vm2, %v4805_v32, %v4806_v39  ;;  %v7861_v32 = vunpack.i.h.bf16 %v12609_v43  ;;  %v7875_v13 = vunpack.i.l.bf16 %v12638_v53 }
 0x64c   : > { %v7826_v30 = vunpack.i.h.bf16 %v7824_v10  ;;  %v7825_v54 = vunpack.i.l.bf16 %v7824_v10  ;;  %v5560_v41 = vmax.f32 %v5528_v15, 0.0  ;;  %v8112_v15 = vpack.i.bf16 %v4809_v24, %v4807_v36 }
 0x64d   : > { %v4607_v57 = vsel %vm893_vm3, %v4605_v11, %v4606_v6  ;;  %v5026_v10 = vsel %vm1704_vm4, %v8218_v18, %v7846_v26  ;;  %v7876_v36 = vunpack.i.h.bf16 %v12638_v53 }
 0x64e   : > { %v5151_v49 = vsel %vm3489_vm15, %v5119_v0, %v7825_v54  ;;  %v5380_v29 = vpop.f32.mrf.mxu2  ;;  %v5591_v33 = vpack.c.bf16 %v5560_v41, %v5559_v3  ;;  %v5152_v28 = vsel %vm3489_vm15, %v5120_v63, %v7826_v30  ;;  %v5025_v3 = vsel %vm1704_vm4, %v8219_v2, %v7845_v62  ;;  %v13756_v30 = vld [vmem:[#allocation18_spill] sm:$0xff] }
 0x64f   : > { %v5183_v22 = vsel %vm3522_vm1, %v5151_v49, %v7830_v37  ;;  %v5461_v8 = vmul.f32 %v12576_v20, %v5380_v29  ;;  %v5184_v21 = vsel %vm3522_vm1, %v5152_v28, %v7831_v42  ;;  %v13757_v54 = vmax.f32 %v13756_v30, 0.0 }
 0x650   : > { %6119 = vmatmul.msk.bf16.vlgmr.msra.gmra.mxu3 %vm1704_vm4, %v5591_v33  ;;  %8098 = vrot.lane.b32.xlu1 %v8097_v12, %s13615_s16  ;;  %v5215_v25 = vsel %vm3555_vm0, %v5183_v22, %v7835_v40  ;;  %v4609_v63 = vsel %vm893_vm3, %v4606_v6, %v4608_v1  ;;  %v7850_v49 = vunpack.i.l.bf16 %v12545_v27  ;;  %v4909_v2 = vrot.slane %v12670_v48, 2  ;;  %s5966_s16 = scalar_lea.hbm %s13210_s15, %s8413_s22 }
 0x651   : > { %8048 = vrot.lane.b32.xlu0 %v12491_v52, %s13589_s23  ;;  %8073 = vrot.lane.b32.xlu2 %v8097_v12, %s13747_s26  ;;  %v7836_v52 = vunpack.i.h.bf16 %v12522_v9  ;;  %v5497_v17 = vadd.f32 %v12598_v50, %v5461_v8  ;;  %v8077_v39 = vpack.i.bf16 %v4609_v63, %v4607_v57  ;;  %v13758_v63 = vld [vmem:[#allocation24_spill] sm:$0xff]  ;;  %s5970_s4 = sshll.u32 %s5966_s16, 4  ;;  %s5971_s4 = int_to_ptr.hbm [resolvable:$true] %s5970_s4 }
 0x652   : > { %v12666_v51 = vpop.permute.xlu1 %7888  ;;  %v12676_v38 = vpop.permute.xlu2 %7908  ;;  %v5057_v28 = vsel %vm1770_vm7, %v5025_v3, %v7850_v49  ;;  %s8248_s0 = sshra.s32 %s5971_s4, 4  ;;  %s8249_s0 = int_to_ptr.hbm [resolvable:$true] %s8248_s0 }
 0x653   : > { %v7839_v61 = vpop.permute.xlu0 %7838  ;;  %v5216_v56 = vsel %vm3555_vm0, %v5184_v21, %v7836_v52  ;;  %v5529_v16 = vadd.f32 %v5497_v17, %v13755_v4  ;;  %v4906_v4 = vrot.slane %v12660_v55, 2  ;;  %s8250_s30 = scalar_lea.hbm %s8249_s0, 1  ;;  %p8255_p0 = scmp.lt.s32.totalorder %s8249_s0, %s13210_s15 }
 0x654   : > { %v7841_v45 = vunpack.i.h.bf16 %v7839_v61  ;;  %v7840_v34 = vunpack.i.l.bf16 %v7839_v61  ;;  %p8251_p11 = scmp.ne.s32.totalorder %s8249_s0, %s8250_s30  ;;  %p8256_p1 = scmp.lt.s32.totalorder %s8254_s25, %s8250_s30 }
 0x655   : > { %v5561_v12 = vmax.f32 %v5529_v16, 0.0  ;;  %v4908_v30 = vsel %vm893_vm3, %v4906_v4, %v4907_v35 }
 0x656   : > { %v5382_v9 = vpop.f32.mrf.mxu2  ;;  %v5247_v47 = vsel %vm3588_vm5, %v5215_v25, %v7840_v34  ;;  %v5248_v5 = vsel %vm3588_vm5, %v5216_v56, %v7841_v45  ;;  %v7866_v34 = vunpack.i.h.bf16 %v12567_v19  ;;  %v7865_v25 = vunpack.i.l.bf16 %v12567_v19  ;;  %p8252_p12 = pnand %p8251_p11, %p8430_p5  ;;  %p8257_p2 = por %p8256_p1, %p8255_p0 }
 0x657   : > { %v5462_v23 = vmul.f32 %v12576_v20, %v5382_v9  ;;  %v5271_v7 = vpack.c.bf16 %v5248_v5, %v5247_v47  ;;  %v7881_v47 = vunpack.i.h.bf16 %v12611_v14  ;;  %v7880_v5 = vunpack.i.l.bf16 %v12611_v14 }
 0x658   : > { %8113 = vrot.lane.b32.xlu1 %v8112_v15, %s13747_s26  ;;  %p8253_p13 = pneg %p8252_p12 }
 0x659   : > { %v5498_v58 = vadd.f32 %v12598_v50, %v5462_v23  ;;  %6111 = vmatmul.msk.bf16.gmra.mxu2 %vm3673_vm6, %v5271_v7  ;;  %8063 = vrot.lane.b32.xlu0 %v12529_v44, %s13736_s1 }
 0x65a   : > { %8088 = vrot.lane.b32.xlu2 %v12529_v44, %s13589_s23  ;;  %v12697_v59 = vpop.permute.xlu1 %7903  ;;  %v7851_v44 = vunpack.i.h.bf16 %v12545_v27  ;;  %v12712_v40 = vpop.permute.xlu2 %7923  ;;  %v7860_v27 = vunpack.i.l.bf16 %v12609_v43  ;;  %s485_s23 = sand.u32 1, %s8288_s19   ;;  %p8258_p3 = pnand %p8257_p2, %p8253_p13 }
 0x65b   : > { %v5530_v41 = vadd.f32 %v5498_v58, %v13757_v54  ;;  %v7854_v0 = vpop.permute.xlu0 %7853  ;;  %v4910_v54 = vsel %vm893_vm3, %v4907_v35, %v4909_v2  ;;  %vm5955_vm3 = vcmask 73728   ;;  %s5958_s27 = scalar_lea.sflag [#allocation5], %s485_s23 }
 0x65c   : > { %v7856_v29 = vunpack.i.h.bf16 %v7854_v0  ;;  %v7855_v33 = vunpack.i.l.bf16 %v7854_v0  ;;  %v5058_v42 = vsel %vm1770_vm7, %v5026_v10, %v7851_v44  ;;  %v8117_v0 = vpack.i.bf16 %v4910_v54, %v4908_v30 }
 0x65d   : > { %v5562_v37 = vmax.f32 %v5530_v41, 0.0  ;;  %v13759_v44 = vmax.f32 %v13758_v63, 0.0 }
 0x65e   : > { %v5089_v22 = vsel %vm1836_vm8, %v5057_v28, %v7855_v33  ;;  %v5090_v8 = vsel %vm1836_vm8, %v5058_v42, %v7856_v29  ;;  %v8220_v29 = vld [vmem:[#allocation3 + $0xf8] sm:$0xff] }
 0x65f   : > { %v5592_v21 = vpack.c.bf16 %v5562_v37, %v5561_v12  ;;  %v5121_v52 = vsel %vm1902_vm11, %v5089_v22, %v7860_v27  ;;  %v5122_v61 = vsel %vm1902_vm11, %v5090_v8, %v7861_v32  ;;  %v8221_v12 = vld [vmem:[#allocation3 + $0xf0] sm:$0xff]  ;;  %v7891_v37 = vunpack.i.h.bf16 %v12666_v51 }
 0x660   : > { %v5153_v26 = vsel %vm3489_vm15, %v5121_v52, %v7865_v25  ;;  %v5154_v9 = vsel %vm3489_vm15, %v5122_v61, %v7866_v34  ;;  %v7896_v22 = vunpack.i.h.bf16 %v12644_v60  ;;  %v7895_v8 = vunpack.i.l.bf16 %v12644_v60 }
 0x661   : > { %6120 = vmatmul.msk.bf16.gmra.mxu3 %vm1704_vm4, %v5592_v21  ;;  %8078 = vrot.lane.b32.xlu0 %v8077_v39, %s13740_s2 }
 0x662   : > { %8103 = vrot.lane.b32.xlu2 %v8077_v39, %s13736_s1  ;;  %v12721_v45 = vpop.permute.xlu1 %7918  ;;  %v12738_v11 = vpop.permute.xlu2 %7938 }
 0x663   : > { %v7869_v6 = vpop.permute.xlu0 %7868 }
 0x664   : > { %v7871_v17 = vunpack.i.h.bf16 %v7869_v6  ;;  %v7870_v56 = vunpack.i.l.bf16 %v7869_v6  ;;  %v5385_v43 = vpop.f32.mrf.mxu2 }
 0x665   : > { %v5463_v7 = vmul.f32 %v12576_v20, %v5385_v43 }
 0x666   : > { %v5186_v1 = vsel %vm3522_vm1, %v5154_v9, %v7871_v17  ;;  %v5185_v19 = vsel %vm3522_vm1, %v5153_v26, %v7870_v56  ;;  %v7905_v26 = vunpack.i.l.bf16 %v12697_v59 }
 0x667   : > { %v5217_v62 = vsel %vm3555_vm0, %v5185_v19, %v7875_v13  ;;  %v5218_v23 = vsel %vm3555_vm0, %v5186_v1, %v7876_v36  ;;  %v5499_v58 = vadd.f32 %v12598_v50, %v5463_v7  ;;  %v7906_v13 = vunpack.i.h.bf16 %v12697_v59 }
 0x668   : > { %v5249_v53 = vsel %vm3588_vm5, %v5217_v62, %v7880_v5  ;;  %v5250_v24 = vsel %vm3588_vm5, %v5218_v23, %v7881_v47  ;;  %v7911_v1 = vunpack.i.h.bf16 %v12676_v38  ;;  %v7910_v19 = vunpack.i.l.bf16 %v12676_v38 }
 0x669   : > { %8093 = vrot.lane.b32.xlu0 %v12589_v31, %s13609_s17  ;;  %v5272_v14 = vpack.c.bf16 %v5250_v24, %v5249_v53  ;;  %v8107_v31 = vpack.i.bf16 %v12662_v46, %v12660_v55  ;;  %v5531_v49 = vadd.f32 %v5499_v58, %v13759_v44  ;;  %v7890_v55 = vunpack.i.l.bf16 %v12666_v51  ;;  %v13760_v46 = vld [vmem:[#allocation10_spill] sm:$0xff] }
 0x66a   : > { %v12742_v15 = vpop.permute.xlu1 %7933  ;;  %v13761_v28 = vmax.f32 %v13760_v46, 0.0  ;;  %8118 = vrot.lane.b32.xlu2 %v8117_v0, %s13740_s2  ;;  %v12769_v32 = vpop.permute.xlu2 %7953  ;;  %v7921_v24 = vunpack.i.h.bf16 %v12721_v45  ;;  %v7920_v59 = vunpack.i.l.bf16 %v12721_v45  ;;  %v13762_v45 = vld [vmem:[#allocation25_spill] sm:$0xff]  ;;  %v7926_v44 = vunpack.i.h.bf16 %v12712_v40 }
 0x66b   : > { %v7884_v16 = vpop.permute.xlu0 %7883  ;;  %6112 = vmatmul.msk.bf16.gmra.mxu2 %vm3673_vm6, %v5272_v14  ;;  %v5563_v52 = vmax.f32 %v5531_v49, 0.0  ;;  %v7925_v49 = vunpack.i.l.bf16 %v12712_v40 }
 0x66c   : > { %v7886_v57 = vunpack.i.h.bf16 %v7884_v16  ;;  %v7885_v18 = vunpack.i.l.bf16 %v7884_v16  ;;  %v5387_v10 = vpop.f32.mrf.mxu2 }
 0x66d   : > { %v5464_v3 = vmul.f32 %v12576_v20, %v5387_v10 }
 0x66e   : > { %v5028_v33 = vsel %vm1704_vm4, %v8220_v29, %v7886_v57  ;;  %v5027_v48 = vsel %vm1704_vm4, %v8221_v12, %v7885_v18 }
 0x66f   : > { %v5500_v41 = vadd.f32 %v12598_v50, %v5464_v3  ;;  %v5059_v21 = vsel %vm1770_vm7, %v5027_v48, %v7890_v55  ;;  %v5060_v39 = vsel %vm1770_vm7, %v5028_v33, %v7891_v37  ;;  %v13763_v3 = vmax.f32 %v13762_v45, 0.0 }
 0x670   : > { %v5091_v17 = vsel %vm1836_vm8, %v5059_v21, %v7895_v8  ;;  %v5092_v56 = vsel %vm1836_vm8, %v5060_v39, %v7896_v22  ;;  %v8223_v22 = vld [vmem:[#allocation3 + $0x108] sm:$0xff] }
 0x671   : > { %v5532_v42 = vadd.f32 %v5500_v41, %v13761_v28  ;;  %8108 = vrot.lane.b32.xlu0 %v8107_v31, %s13743_s3  ;;  %v13764_v41 = vld [vmem:[#allocation30_spill] sm:$0xff]  ;;  %v8222_v28 = vld [vmem:[#allocation3 + $0x110] sm:$0xff]  ;;  %v5029_v8 = vsel %vm1704_vm4, %v8223_v22, %v7925_v49  ;;  %s486_s3 = scalar_lea.vmem [#allocation4], %s485_s23 }
 0x672   : > { %v12771_v34 = vpop.permute.xlu1 %7948  ;;  %v12788_v14 = vpop.permute.xlu2 %7968  ;;  %v13765_v0 = vmax.f32 %v13764_v41, 0.0  ;;  %s5968_s26 = sshll.u32 %s486_s3, 4  ;;  %s5969_s26 = int_to_ptr.vmem [resolvable:$true] %s5968_s26 }
 0x673   : > { %v7899_v27 = vpop.permute.xlu0 %7898  ;;  %v5564_v25 = vmax.f32 %v5532_v42, 0.0  ;;  %v5030_v42 = vsel %vm1704_vm4, %v8222_v28, %v7926_v44  ;;  %v7970_v28 = vunpack.i.l.bf16 %v12788_v14 }
 0x674   : > { %v7901_v51 = vunpack.i.h.bf16 %v7899_v27  ;;  %v7900_v61 = vunpack.i.l.bf16 %v7899_v27 }
 0x675   : > { %v5390_v6 = vpop.f32.mrf.mxu2  ;;  %v5593_v43 = vpack.c.bf16 %v5564_v25, %v5563_v52  ;;  %v7936_v52 = vunpack.i.h.bf16 %v12742_v15 }
 0x676   : > { %v5123_v60 = vsel %vm1902_vm11, %v5091_v17, %v7900_v61  ;;  %v5124_v36 = vsel %vm1902_vm11, %v5092_v56, %v7901_v51  ;;  %v5465_v9 = vmul.f32 %v12576_v20, %v5390_v6  ;;  %v7935_v51 = vunpack.i.l.bf16 %v12742_v15 }
 0x677   : > { %6121 = vmatmul.msk.bf16.gmra.mxu3 %vm1704_vm4, %v5593_v43  ;;  %v5155_v47 = vsel %vm3489_vm15, %v5123_v60, %v7905_v26  ;;  %v5156_v5 = vsel %vm3489_vm15, %v5124_v36, %v7906_v13  ;;  %v7941_v56 = vunpack.i.h.bf16 %v12738_v11  ;;  %v7940_v43 = vunpack.i.l.bf16 %v12738_v11 }
 0x678   : > { %v5501_v23 = vadd.f32 %v12598_v50, %v5465_v9  ;;  %v5187_v35 = vsel %vm3522_vm1, %v5155_v47, %v7910_v19  ;;  %v5188_v4 = vsel %vm3522_vm1, %v5156_v5, %v7911_v1  ;;  %v7951_v19 = vunpack.i.h.bf16 %v12771_v34 }
 0x67a   : > { %v12794_v57 = vpop.permute.xlu1 %7963  ;;  %v5533_v31 = vadd.f32 %v5501_v23, %v13763_v3  ;;  %v12809_v21 = vpop.permute.xlu2 %7983  ;;  %v13766_v23 = vld [vmem:[#allocation12_spill] sm:$0xff] }
 0x67b   : > { %v7914_v62 = vpop.permute.xlu0 %7913 }
 0x67c   : > { %v7916_v7 = vunpack.i.h.bf16 %v7914_v62  ;;  %v7915_v53 = vunpack.i.l.bf16 %v7914_v62  ;;  %v5565_v33 = vmax.f32 %v5533_v31, 0.0  ;;  %v7950_v62 = vunpack.i.l.bf16 %v12771_v34 }
 0x67d   : > { %v5392_v16 = vpop.f32.mrf.mxu2 }
 0x67e   : > { %v5220_v58 = vsel %vm3555_vm0, %v5188_v4, %v7916_v7  ;;  %v5219_v38 = vsel %vm3555_vm0, %v5187_v35, %v7915_v53  ;;  %v5466_v18 = vmul.f32 %v12576_v20, %v5392_v16  ;;  %v13767_v7 = vmax.f32 %v13766_v23, 0.0 }
 0x67f   : > { %v5251_v10 = vsel %vm3588_vm5, %v5219_v38, %v7920_v59  ;;  %v5252_v2 = vsel %vm3588_vm5, %v5220_v58, %v7921_v24  ;;  %v7956_v16 = vunpack.i.h.bf16 %v12769_v32  ;;  %v7955_v58 = vunpack.i.l.bf16 %v12769_v32  ;;  %v13768_v38 = vld [vmem:[#allocation15_spill] sm:$0xff] }
 0x680   : > { %v5502_v30 = vadd.f32 %v12598_v50, %v5466_v18  ;;  %v5273_v54 = vpack.c.bf16 %v5252_v2, %v5251_v10  ;;  %v13769_v18 = vmax.f32 %v13768_v38, 0.0  ;;  %v7965_v32 = vunpack.i.l.bf16 %v12794_v57 }
 0x682   : > { %v5534_v63 = vadd.f32 %v5502_v30, %v13765_v0  ;;  %6113 = vmatmul.msk.bf16.gmra.mxu2 %vm3673_vm6, %v5273_v54  ;;  %v12813_v40 = vpop.permute.xlu1 %7978  ;;  %v12831_v11 = vpop.permute.xlu2 %7998 }
 0x683   : > { %v7929_v29 = vpop.permute.xlu0 %7928 }
 0x684   : > { %v7931_v12 = vunpack.i.h.bf16 %v7929_v29  ;;  %v7930_v48 = vunpack.i.l.bf16 %v7929_v29  ;;  %v5566_v37 = vmax.f32 %v5534_v63, 0.0  ;;  %v7966_v63 = vunpack.i.h.bf16 %v12794_v57  ;;  %v8224_v29 = vld [vmem:[#allocation3 + $0x128] sm:$0xff] }
 0x686   : > { %v5395_v55 = vpop.f32.mrf.mxu2  ;;  %v5594_v46 = vpack.c.bf16 %v5566_v37, %v5565_v33  ;;  %v5062_v39 = vsel %vm1770_vm7, %v5030_v42, %v7931_v12  ;;  %v5061_v27 = vsel %vm1770_vm7, %v5029_v8, %v7930_v48  ;;  %v5032_v33 = vsel %vm1704_vm4, %v8224_v29, %v7966_v63  ;;  %v8225_v12 = vld [vmem:[#allocation3 + $0x120] sm:$0xff]  ;;  %v8227_v29 = vld [vmem:[#allocation3 + $0x138] sm:$0xff] }
 0x687   : > { %v5467_v61 = vmul.f32 %v12576_v20, %v5395_v55  ;;  %v5094_v25 = vsel %vm1836_vm8, %v5062_v39, %v7936_v52  ;;  %v5093_v6 = vsel %vm1836_vm8, %v5061_v27, %v7935_v51  ;;  %v5031_v48 = vsel %vm1704_vm4, %v8225_v12, %v7965_v32 }
 0x688   : > { %6122 = vmatmul.msk.bf16.gmra.mxu3 %vm1704_vm4, %v5594_v46  ;;  %v5125_v26 = vsel %vm1902_vm11, %v5093_v6, %v7940_v43  ;;  %v5126_v9 = vsel %vm1902_vm11, %v5094_v25, %v7941_v56  ;;  %v7971_v46 = vunpack.i.h.bf16 %v12788_v14  ;;  %v5063_v39 = vsel %vm1770_vm7, %v5031_v48, %v7970_v28 }
 0x689   : > { %v5503_v13 = vadd.f32 %v12598_v50, %v5467_v61  ;;  %v7981_v25 = vunpack.i.h.bf16 %v12813_v40  ;;  %v7980_v6 = vunpack.i.l.bf16 %v12813_v40  ;;  %v7986_v56 = vunpack.i.h.bf16 %v12809_v21 }
 0x68a   : > { %v7994_v4 = vpop.permute.xlu1 %7993  ;;  %v12852_v37 = vpop.permute.xlu2 %8013  ;;  %v5064_v27 = vsel %vm1770_vm7, %v5032_v33, %v7971_v46  ;;  %v7985_v43 = vunpack.i.l.bf16 %v12809_v21 }
 0x68b   : > { %v7944_v17 = vpop.permute.xlu0 %7943  ;;  %v5535_v53 = vadd.f32 %v5503_v13, %v13767_v7  ;;  %v7996_v13 = vunpack.i.h.bf16 %v7994_v4 }
 0x68c   : > { %v7946_v60 = vunpack.i.h.bf16 %v7944_v17  ;;  %v7945_v36 = vunpack.i.l.bf16 %v7944_v17 }
 0x68d   : > { %v5567_v3 = vmax.f32 %v5535_v53, 0.0 }
 0x68e   : > { %v5397_v15 = vpop.f32.mrf.mxu2  ;;  %v5157_v47 = vsel %vm3489_vm15, %v5125_v26, %v7945_v36  ;;  %v5158_v5 = vsel %vm3489_vm15, %v5126_v9, %v7946_v60 }
 0x68f   : > { %v5468_v1 = vmul.f32 %v12576_v20, %v5397_v15  ;;  %v5189_v59 = vsel %vm3522_vm1, %v5157_v47, %v7950_v62  ;;  %v5190_v35 = vsel %vm3522_vm1, %v5158_v5, %v7951_v19  ;;  %v7995_v47 = vunpack.i.l.bf16 %v7994_v4 }
 0x690   : > { %v5221_v30 = vsel %vm3555_vm0, %v5189_v59, %v7955_v58  ;;  %v5222_v54 = vsel %vm3555_vm0, %v5190_v35, %v7956_v16  ;;  %v8001_v19 = vunpack.i.h.bf16 %v12831_v11  ;;  %v8000_v62 = vunpack.i.l.bf16 %v12831_v11 }
 0x691   : > { %v5504_v24 = vadd.f32 %v12598_v50, %v5468_v1 }
 0x692   : > { %v8009_v57 = vpop.permute.xlu1 %8008  ;;  %v12873_v23 = vpop.permute.xlu2 %8028 }
 0x693   : > { %v5536_v10 = vadd.f32 %v5504_v24, %v13769_v18  ;;  %v7959_v34 = vpop.permute.xlu0 %7958  ;;  %v13770_v24 = vld [vmem:[#allocation21_spill] sm:$0xff]  ;;  %v13772_v18 = vld [vmem:[#allocation26_spill] sm:$0xff]  ;;  %v8011_v12 = vunpack.i.h.bf16 %v8009_v57  ;;  %v8010_v48 = vunpack.i.l.bf16 %v8009_v57 }
 0x694   : > { %v7961_v2 = vunpack.i.h.bf16 %v7959_v34  ;;  %v7960_v45 = vunpack.i.l.bf16 %v7959_v34  ;;  %v13771_v59 = vmax.f32 %v13770_v24, 0.0 }
 0x695   : > { %v5568_v31 = vmax.f32 %v5536_v10, 0.0  ;;  %v13773_v10 = vmax.f32 %v13772_v18, 0.0 }
 0x696   : > { %v5253_v41 = vsel %vm3588_vm5, %v5221_v30, %v7960_v45  ;;  %v5254_v0 = vsel %vm3588_vm5, %v5222_v54, %v7961_v2 }
 0x697   : > { %v5274_v44 = vpack.c.bf16 %v5254_v0, %v5253_v41  ;;  %v5595_v49 = vpack.c.bf16 %v5568_v31, %v5567_v3 }
 0x699   : > { %6114 = vmatmul.msk.bf16.gmra.mxu2 %vm3673_vm6, %v5274_v44  ;;  %6123 = vmatmul.msk.bf16.gmra.mxu3 %vm1704_vm4, %v5595_v49  ;;  %v8226_v44 = vld [vmem:[#allocation3 + $0x140] sm:$0xff] }
 0x69a   : > { %v8024_v21 = vpop.permute.xlu1 %8023  ;;  %v12888_v63 = vpop.permute.xlu2 %8043 }
 0x69b   : > { %v7974_v55 = vpop.permute.xlu0 %7973 }
 0x69c   : > { %v7976_v42 = vunpack.i.h.bf16 %v7974_v55  ;;  %v7975_v22 = vunpack.i.l.bf16 %v7974_v55  ;;  %v5400_v8 = vpop.f32.mrf.mxu2 }
 0x69d   : > { %v5469_v61 = vmul.f32 %v12576_v20, %v5400_v8  ;;  %v8015_v8 = vunpack.i.l.bf16 %v12852_v37 }
 0x69e   : > { %v5095_v52 = vsel %vm1836_vm8, %v5063_v39, %v7975_v22  ;;  %v5096_v51 = vsel %vm1836_vm8, %v5064_v27, %v7976_v42  ;;  %v8016_v22 = vunpack.i.h.bf16 %v12852_v37 }
 0x69f   : > { %v5127_v14 = vsel %vm1902_vm11, %v5095_v52, %v7980_v6  ;;  %v5128_v17 = vsel %vm1902_vm11, %v5096_v51, %v7981_v25  ;;  %v5505_v60 = vadd.f32 %v12598_v50, %v5469_v61 }
 0x6a0   : > { %v5159_v5 = vsel %vm3489_vm15, %v5127_v14, %v7985_v43  ;;  %v5160_v40 = vsel %vm3489_vm15, %v5128_v17, %v7986_v56  ;;  %v8026_v17 = vunpack.i.h.bf16 %v8024_v21  ;;  %v8025_v56 = vunpack.i.l.bf16 %v8024_v21  ;;  %v13774_v43 = vld [vmem:[#allocation56_spill] sm:$0xff] }
 0x6a1   : > { %v5537_v35 = vadd.f32 %v5505_v60, %v13771_v59  ;;  %v13775_v60 = vmax.f32 %v13774_v43, 0.0 }
 0x6a2   : > { %v8039_v32 = vpop.permute.xlu1 %8038 }
 0x6a3   : > { %v7989_v36 = vpop.permute.xlu0 %7988  ;;  %v5569_v45 = vmax.f32 %v5537_v35, 0.0  ;;  %v8041_v21 = vunpack.i.h.bf16 %v8039_v32 }
 0x6a4   : > { %v7991_v26 = vunpack.i.h.bf16 %v7989_v36  ;;  %v7990_v9 = vunpack.i.l.bf16 %v7989_v36  ;;  %v5402_v15 = vpop.f32.mrf.mxu2 }
 0x6a5   : > { %v5470_v1 = vmul.f32 %v12576_v20, %v5402_v15 }
 0x6a6   : > { %v5192_v7 = vsel %vm3522_vm1, %v5160_v40, %v7991_v26  ;;  %v5191_v53 = vsel %vm3522_vm1, %v5159_v5, %v7990_v9  ;;  %v8030_v5 = vunpack.i.l.bf16 %v12873_v23  ;;  %v13776_v40 = vld [vmem:[#allocation63_spill] sm:$0xff] }
 0x6a7   : > { %v5223_v4 = vsel %vm3555_vm0, %v5191_v53, %v7995_v47  ;;  %v5224_v16 = vsel %vm3555_vm0, %v5192_v7, %v7996_v13  ;;  %v5506_v58 = vadd.f32 %v12598_v50, %v5470_v1  ;;  %v8059_v13 = vpop.permute.xlu2 %8058  ;;  %v8031_v47 = vunpack.i.h.bf16 %v12873_v23 }
 0x6a8   : > { %v5255_v38 = vsel %vm3588_vm5, %v5223_v4, %v8000_v62  ;;  %v5256_v11 = vsel %vm3588_vm5, %v5224_v16, %v8001_v19  ;;  %v13777_v1 = vmax.f32 %v13776_v40, 0.0  ;;  %v8040_v7 = vunpack.i.l.bf16 %v8039_v32 }
 0x6a9   : > { %v5538_v34 = vadd.f32 %v5506_v58, %v13773_v10  ;;  %v5275_v2 = vpack.c.bf16 %v5256_v11, %v5255_v38 }
 0x6aa   : > { %v8054_v26 = vpop.permute.xlu1 %8053 }
 0x6ab   : > { %v5570_v3 = vmax.f32 %v5538_v34, 0.0  ;;  %v8004_v31 = vpop.permute.xlu0 %8003  ;;  %6115 = vmatmul.msk.bf16.gmra.mxu2 %vm3673_vm6, %v5275_v2  ;;  %v8046_v34 = vunpack.i.h.bf16 %v12888_v63  ;;  %v8045_v2 = vunpack.i.l.bf16 %v12888_v63  ;;  %v8055_v63 = vunpack.i.l.bf16 %v8054_v26 }
 0x6ac   : > { %v8006_v30 = vunpack.i.h.bf16 %v8004_v31  ;;  %v8005_v54 = vunpack.i.l.bf16 %v8004_v31 }
 0x6ad   : > { %v5596_v41 = vpack.c.bf16 %v5570_v3, %v5569_v45 }
 0x6ae   : > { %v5405_v0 = vpop.f32.mrf.mxu2  ;;  %v5034_v49 = vsel %vm1704_vm4, %v8226_v44, %v8006_v30  ;;  %v5033_v33 = vsel %vm1704_vm4, %v8227_v29, %v8005_v54  ;;  %v8229_v44 = vld [vmem:[#allocation3 + $0x150] sm:$0xff] }
 0x6af   : > { %6124 = vmatmul.msk.bf16.gmra.mxu3 %vm1704_vm4, %v5596_v41  ;;  %v5471_v55 = vmul.f32 %v12576_v20, %v5405_v0  ;;  %v5065_v46 = vsel %vm1770_vm7, %v5033_v33, %v8010_v48  ;;  %v5066_v28 = vsel %vm1770_vm7, %v5034_v49, %v8011_v12  ;;  %v8074_v3 = vpop.permute.xlu2 %8073  ;;  %v8228_v0 = vld [vmem:[#allocation3 + $0x158] sm:$0xff]  ;;  %v5035_v49 = vsel %vm1704_vm4, %v8229_v44, %v8045_v2  ;;  %v12959_v44 = vld [vmem:[%s13207_s12] ss:$0 sm:$0xff] }
 0x6b0   : > { %v5097_v51 = vsel %vm1836_vm8, %v5065_v46, %v8015_v8  ;;  %v5098_v61 = vsel %vm1836_vm8, %v5066_v28, %v8016_v22  ;;  %v5036_v32 = vsel %vm1704_vm4, %v8228_v0, %v8046_v34  ;;  %v8056_v48 = vunpack.i.h.bf16 %v8054_v26  ;;  %v12949_v34 = vld [vmem:[%s13206_s11] ss:$0 sm:$0xff] }
 0x6b1   : > { %v5507_v52 = vadd.f32 %v12598_v50, %v5471_v55  ;;  %v8061_v55 = vunpack.i.h.bf16 %v8059_v13  ;;  %v8060_v22 = vunpack.i.l.bf16 %v8059_v13  ;;  %v8076_v40 = vunpack.i.h.bf16 %v8074_v3 }
 0x6b2   : > { %v8069_v31 = vpop.permute.xlu1 %8068 }
 0x6b3   : > { %v8019_v42 = vpop.permute.xlu0 %8018  ;;  %v5539_v37 = vadd.f32 %v5507_v52, %v13775_v60  ;;  %v8070_v43 = vunpack.i.l.bf16 %v8069_v31  ;;  %v13778_v60 = vld [vmem:[#allocation9_spill] sm:$0xff] }
 0x6b4   : > { %v8021_v39 = vunpack.i.h.bf16 %v8019_v42  ;;  %v8020_v27 = vunpack.i.l.bf16 %v8019_v42 }
 0x6b5   : > { %v5571_v59 = vmax.f32 %v5539_v37, 0.0  ;;  %v13779_v37 = vmax.f32 %v13778_v60, 0.0 }
 0x6b6   : > { %v5407_v57 = vpop.f32.mrf.mxu2  ;;  %v5129_v25 = vsel %vm1902_vm11, %v5097_v51, %v8020_v27  ;;  %v5130_v6 = vsel %vm1902_vm11, %v5098_v61, %v8021_v39 }
 0x6b7   : > { %v5472_v14 = vmul.f32 %v12576_v20, %v5407_v57  ;;  %v5161_v9 = vsel %vm3489_vm15, %v5129_v25, %v8025_v56  ;;  %v5162_v15 = vsel %vm3489_vm15, %v5130_v6, %v8026_v17  ;;  %v8089_v51 = vpop.permute.xlu2 %8088  ;;  %v8071_v56 = vunpack.i.h.bf16 %v8069_v31 }
 0x6b8   : > { %v5193_v4 = vsel %vm3522_vm1, %v5161_v9, %v8030_v5  ;;  %v5194_v16 = vsel %vm3522_vm1, %v5162_v15, %v8031_v47  ;;  %v13780_v15 = vld [vmem:[#allocation28_spill] sm:$0xff]  ;;  %v8091_v2 = vunpack.i.h.bf16 %v8089_v51 }
 0x6b9   : > { %v5508_v36 = vadd.f32 %v12598_v50, %v5472_v14  ;;  %v13781_v47 = vmax.f32 %v13780_v15, 0.0 }
 0x6ba   : > { %v8084_v61 = vpop.permute.xlu1 %8083 }
 0x6bb   : > { %v5540_v19 = vadd.f32 %v5508_v36, %v13777_v1  ;;  %v8034_v62 = vpop.permute.xlu0 %8033  ;;  %v8075_v1 = vunpack.i.l.bf16 %v8074_v3  ;;  %v8230_v3 = vld [vmem:[#allocation3 + $0x170] sm:$0xff] }
 0x6bc   : > { %v8036_v53 = vunpack.i.h.bf16 %v8034_v62  ;;  %v8035_v24 = vunpack.i.l.bf16 %v8034_v62 }
 0x6bd   : > { %v5572_v35 = vmax.f32 %v5540_v19, 0.0 }
 0x6be   : > { %v5226_v58 = vsel %vm3555_vm0, %v5194_v16, %v8036_v53  ;;  %v5225_v38 = vsel %vm3555_vm0, %v5193_v4, %v8035_v24 }
 0x6bf   : > { %v5597_v11 = vpack.c.bf16 %v5572_v35, %v5571_v59  ;;  %v5257_v23 = vsel %vm3588_vm5, %v5225_v38, %v8040_v7  ;;  %v5258_v18 = vsel %vm3588_vm5, %v5226_v58, %v8041_v21  ;;  %v8086_v38 = vunpack.i.h.bf16 %v8084_v61 }
 0x6c0   : > { %v5276_v10 = vpack.c.bf16 %v5258_v18, %v5257_v23  ;;  %v8104_v18 = vpop.permute.xlu2 %8103 }
 0x6c1   : > { %6125 = vmatmul.msk.bf16.gmra.mxu3 %vm1704_vm4, %v5597_v11  ;;  %v8085_v11 = vunpack.i.l.bf16 %v8084_v61  ;;  %v5038_v31 = vsel %vm1704_vm4, %v8230_v3, %v8086_v38 }
 0x6c2   : > { %6116 = vmatmul.msk.bf16.gmra.mxu2 %vm3673_vm6, %v5276_v10  ;;  %v8099_v10 = vpop.permute.xlu1 %8098 }
 0x6c3   : > { %v8049_v45 = vpop.permute.xlu0 %8048 }
 0x6c4   : > { %v8051_v30 = vunpack.i.h.bf16 %v8049_v45  ;;  %v8050_v54 = vunpack.i.l.bf16 %v8049_v45  ;;  %v8090_v45 = vunpack.i.l.bf16 %v8089_v51  ;;  %v8106_v51 = vunpack.i.h.bf16 %v8104_v18 }
 0x6c5   : > { %v5410_v41 = vpop.f32.mrf.mxu2 }
 0x6c6   : > { %v5068_v29 = vsel %vm1770_vm7, %v5036_v32, %v8051_v30  ;;  %v5067_v33 = vsel %vm1770_vm7, %v5035_v49, %v8050_v54  ;;  %v5473_v12 = vmul.f32 %v12576_v20, %v5410_v41  ;;  %v8231_v30 = vld [vmem:[#allocation3 + $0x168] sm:$0xff] }
 0x6c7   : > { %v5100_v46 = vsel %vm1836_vm8, %v5068_v29, %v8056_v48  ;;  %v5099_v28 = vsel %vm1836_vm8, %v5067_v33, %v8055_v63  ;;  %v5037_v54 = vsel %vm1704_vm4, %v8231_v30, %v8085_v11  ;;  %v13784_v11 = vld [vmem:[#allocation43_spill] sm:$0xff] }
 0x6c8   : > { %v5509_v8 = vadd.f32 %v12598_v50, %v5473_v12  ;;  %v5131_v57 = vsel %vm1902_vm11, %v5099_v28, %v8060_v22  ;;  %v5132_v25 = vsel %vm1902_vm11, %v5100_v46, %v8061_v55  ;;  %v5069_v63 = vsel %vm1770_vm7, %v5037_v54, %v8090_v45 }
 0x6c9   : > { %v5070_v55 = vsel %vm1770_vm7, %v5038_v31, %v8091_v2  ;;  %v8101_v22 = vunpack.i.h.bf16 %v8099_v10 }
 0x6ca   : > { %v5541_v36 = vadd.f32 %v5509_v8, %v13779_v37  ;;  %v8100_v8 = vunpack.i.l.bf16 %v8099_v10 }
 0x6cb   : > { %v8064_v42 = vpop.permute.xlu0 %8063 }
 0x6cc   : > { %v8066_v39 = vunpack.i.h.bf16 %v8064_v42  ;;  %v8065_v27 = vunpack.i.l.bf16 %v8064_v42  ;;  %v5573_v21 = vmax.f32 %v5541_v36, 0.0 }
 0x6cd   : > { %v5412_v52 = vpop.f32.mrf.mxu2 }
 0x6ce   : > { %v5474_v6 = vmul.f32 %v12576_v20, %v5412_v52  ;;  %v5163_v14 = vsel %vm3489_vm15, %v5131_v57, %v8065_v27  ;;  %v5164_v17 = vsel %vm3489_vm15, %v5132_v25, %v8066_v39  ;;  %v8114_v27 = vpop.permute.xlu1 %8113  ;;  %v8119_v52 = vpop.permute.xlu2 %8118 }
 0x6cf   : > { %v5195_v26 = vsel %vm3522_vm1, %v5163_v14, %v8070_v43  ;;  %v5196_v9 = vsel %vm3522_vm1, %v5164_v17, %v8071_v56  ;;  %v8105_v14 = vunpack.i.l.bf16 %v8104_v18  ;;  %v8116_v56 = vunpack.i.h.bf16 %v8114_v27 }
 0x6d0   : > { %v5510_v13 = vadd.f32 %v12598_v50, %v5474_v6  ;;  %v5227_v59 = vsel %vm3555_vm0, %v5195_v26, %v8075_v1  ;;  %v5228_v35 = vsel %vm3555_vm0, %v5196_v9, %v8076_v40  ;;  %v8115_v43 = vunpack.i.l.bf16 %v8114_v27 }
 0x6d1   : > { %v8121_v60 = vunpack.i.h.bf16 %v8119_v52  ;;  %v8120_v15 = vunpack.i.l.bf16 %v8119_v52 }
 0x6d2   : > { %v5542_v5 = vadd.f32 %v5510_v13, %v13781_v47 }
 0x6d3   : > { %v5668_v19 = vpop.f32.mrf.mxu3  ;;  %v8079_v62 = vpop.permute.xlu0 %8078 }
 0x6d4   : > { %v5574_v7 = vmax.f32 %v5542_v5, 0.0  ;;  %v8081_v53 = vunpack.i.h.bf16 %v8079_v62  ;;  %v8080_v24 = vunpack.i.l.bf16 %v8079_v62  ;;  %v5752_v32 = vmul.f32 %v12949_v34, %v5668_v19  ;;  %v13782_v62 = vld [vmem:[#allocation33_spill] sm:$0xff] }
 0x6d6   : > { %v5259_v4 = vsel %vm3588_vm5, %v5227_v59, %v8080_v24  ;;  %v5260_v16 = vsel %vm3588_vm5, %v5228_v35, %v8081_v53  ;;  %v5598_v58 = vpack.c.bf16 %v5574_v7, %v5573_v21  ;;  %v5788_v39 = vadd.f32 %v12959_v44, %v5752_v32  ;;  %v12996_v32 = vld [vmem:[%s13203_s8] ss:$0 sm:$0xff] }
 0x6d7   : > { %v5277_v23 = vpack.c.bf16 %v5260_v16, %v5259_v4  ;;  %v13783_v21 = vmax.f32 %v13782_v62, 0.0 }
 0x6d8   : > { %6126 = vmatmul.msk.bf16.gmra.mxu3 %vm1704_vm4, %v5598_v58  ;;  %v5820_v37 = vmax.f32 %v5788_v39, 0.0  ;;  %v13788_v39 = vld [vmem:[#allocation55_spill] sm:$0xff] }
 0x6d9   : > { %6117 = vmatmul.msk.bf16.gmra.mxu2 %vm3673_vm6, %v5277_v23  ;;  %v13785_v23 = vmax.f32 %v13784_v11, 0.0  ;;  %v13789_v27 = vmax.f32 %v13788_v39, 0.0 }
 0x6da   : > { %v5852_v38 = vsel %vm1770_vm7, %v5820_v37, 0.0 }
 0x6db   : > { %v5670_v41 = vpop.f32.mrf.mxu3  ;;  %v8094_v0 = vpop.permute.xlu0 %8093 }
 0x6dc   : > { %v5753_v49 = vmul.f32 %v12949_v34, %v5670_v41  ;;  %v8096_v29 = vunpack.i.h.bf16 %v8094_v0  ;;  %v8095_v33 = vunpack.i.l.bf16 %v8094_v0  ;;  %v5415_v12 = vpop.f32.mrf.mxu2 }
 0x6dd   : > { %v5475_v46 = vmul.f32 %v12576_v20, %v5415_v12 }
 0x6de   : > { %v5789_v48 = vadd.f32 %v12959_v44, %v5753_v49  ;;  %v5101_v28 = vsel %vm1836_vm8, %v5069_v63, %v8095_v33  ;;  %v5102_v42 = vsel %vm1836_vm8, %v5070_v55, %v8096_v29  ;;  %v13003_v33 = vld [vmem:[%s13204_s9] ss:$0 sm:$0xff] }
 0x6df   : > { %v5133_v57 = vsel %vm1902_vm11, %v5101_v28, %v8100_v8  ;;  %v5134_v25 = vsel %vm1902_vm11, %v5102_v42, %v8101_v22  ;;  %v5511_v6 = vadd.f32 %v12598_v50, %v5475_v46  ;;  %v13786_v46 = vld [vmem:[#allocation50_spill] sm:$0xff] }
 0x6e0   : > { %v5821_v61 = vmax.f32 %v5789_v48, 0.0  ;;  %v5165_v47 = vsel %vm3489_vm15, %v5133_v57, %v8105_v14  ;;  %v5166_v5 = vsel %vm3489_vm15, %v5134_v25, %v8106_v51  ;;  %v13787_v28 = vmax.f32 %v13786_v46, 0.0 }
 0x6e1   : > { %v5543_v7 = vadd.f32 %v5511_v6, %v13783_v21 }
 0x6e2   : > { %v5853_v19 = vsel %vm1770_vm7, %v5821_v61, 0.0 }
 0x6e3   : > { %v8109_v17 = vpop.permute.xlu0 %8108  ;;  %v5854_v45 = vadd.f32 %v5853_v19, %v5852_v38  ;;  %v5575_v3 = vmax.f32 %v5543_v7, 0.0  ;;  %v5930_v19 = vld [vmem:[%s13208_s13 + $0x8] sm:$0xff] }
 0x6e4   : > { %v8111_v36 = vunpack.i.h.bf16 %v8109_v17  ;;  %v8110_v13 = vunpack.i.l.bf16 %v8109_v17  ;;  %v5417_v26 = vpop.f32.mrf.mxu2  ;;  %v5673_v9 = vpop.f32.mrf.mxu3  ;;  %5949 = vmatpush.msrb.mxu3 %v5930_v19  ;;  %v13792_v38 = vld [vmem:[#allocation20_spill] sm:$0xff] }
 0x6e5   : > { %v5476_v40 = vmul.f32 %v12576_v20, %v5417_v26  ;;  %v5754_v1 = vmul.f32 %v12949_v34, %v5673_v9  ;;  %v13793_v11 = vmax.f32 %v13792_v38, 0.0 }
 0x6e6   : > { %v5197_v53 = vsel %vm3522_vm1, %v5165_v47, %v8110_v13  ;;  %v5198_v24 = vsel %vm3522_vm1, %v5166_v5, %v8111_v36 }
 0x6e7   : > { %v5512_v59 = vadd.f32 %v12598_v50, %v5476_v40  ;;  %v5790_v35 = vadd.f32 %v12959_v44, %v5754_v1  ;;  %v5229_v4 = vsel %vm3555_vm0, %v5197_v53, %v8115_v43  ;;  %v5230_v16 = vsel %vm3555_vm0, %v5198_v24, %v8116_v56  ;;  %v13790_v24 = vld [vmem:[#allocation13_spill] sm:$0xff] }
 0x6e8   : > { %v5261_v20 = vsel %vm3588_vm5, %v5229_v4, %v8120_v15  ;;  %v5262_v58 = vsel %vm3588_vm5, %v5230_v16, %v8121_v60 }
 0x6e9   : > { %v5544_v18 = vadd.f32 %v5512_v59, %v13785_v23  ;;  %v5822_v10 = vmax.f32 %v5790_v35, 0.0  ;;  %v5278_v2 = vpack.c.bf16 %v5262_v58, %v5261_v20  ;;  %v13791_v59 = vmax.f32 %v13790_v24, 0.0 }
 0x6eb   : > { %v5576_v50 = vmax.f32 %v5544_v18, 0.0  ;;  %v5855_v31 = vsel %vm1770_vm7, %v5822_v10, 0.0  ;;  %6118 = vmatmul.msk.bf16.gmra.mxu2 %vm3673_vm6, %v5278_v2 }
 0x6ec   : > { %v5856_v30 = vadd.f32 %v5855_v31, %v5854_v45  ;;  %v5675_v0 = vpop.f32.mrf.mxu3 }
 0x6ed   : > { %v5599_v54 = vpack.c.bf16 %v5576_v50, %v5575_v3  ;;  %v5755_v29 = vmul.f32 %v12949_v34, %v5675_v0 }
 0x6ee   : > { %v5420_v41 = vpop.f32.mrf.mxu2 }
 0x6ef   : > { %6127 = vmatmul.msk.bf16.gmra.mxu3 %vm1704_vm4, %v5599_v54  ;;  %v5477_v49 = vmul.f32 %v12996_v32, %v5420_v41  ;;  %v5791_v48 = vadd.f32 %v12959_v44, %v5755_v29 }
 0x6f1   : > { %v5513_v12 = vadd.f32 %v13003_v33, %v5477_v49  ;;  %v5823_v8 = vmax.f32 %v5791_v48, 0.0 }
 0x6f3   : > { %v5545_v42 = vadd.f32 %v5513_v12, %v13787_v28  ;;  %v5857_v6 = vsel %vm1770_vm7, %v5823_v8, 0.0 }
 0x6f4   : > { %v5858_v43 = vadd.f32 %v5857_v6, %v5856_v30 }
 0x6f5   : > { %v5577_v57 = vmax.f32 %v5545_v42, 0.0 }
 0x6f6   : > { %v5422_v63 = vpop.f32.mrf.mxu2 }
 0x6f7   : > { %v5478_v55 = vmul.f32 %v12996_v32, %v5422_v63 }
 0x6f9   : > { %v5514_v22 = vadd.f32 %v13003_v33, %v5478_v55 }
 0x6fa   : > { %v5678_v51 = vpop.f32.mrf.mxu3 }
 0x6fb   : > { %v5546_v52 = vadd.f32 %v5514_v22, %v13789_v27  ;;  %v5756_v61 = vmul.f32 %v12949_v34, %v5678_v51  ;;  %v13794_v22 = vld [vmem:[#allocation44_spill] sm:$0xff] }
 0x6fc   : > { %v13795_v8 = vmax.f32 %v13794_v22, 0.0 }
 0x6fd   : > { %v5578_v25 = vmax.f32 %v5546_v52, 0.0  ;;  %v5792_v14 = vadd.f32 %v12959_v44, %v5756_v61 }
 0x6ff   : > { %v5600_v17 = vpack.c.bf16 %v5578_v25, %v5577_v57  ;;  %v5824_v56 = vmax.f32 %v5792_v14, 0.0  ;;  %v13796_v57 = vld [vmem:[#allocation48_spill] sm:$0xff] }
 0x700   : > { %v13797_v25 = vmax.f32 %v13796_v57, 0.0 }
 0x701   : > { %6128 = vmatmul.msk.bf16.gmra.mxu3 %vm1704_vm4, %v5600_v17  ;;  %v5859_v60 = vsel %vm1770_vm7, %v5824_v56, 0.0 }
 0x702   : > { %v5860_v37 = vadd.f32 %v5859_v60, %v5858_v43  ;;  %v5680_v36 = vpop.f32.mrf.mxu3 }
 0x703   : > { %v5757_v13 = vmul.f32 %v12949_v34, %v5680_v36 }
 0x705   : > { %v5425_v26 = vpop.f32.mrf.mxu2  ;;  %v5793_v9 = vadd.f32 %v12959_v44, %v5757_v13 }
 0x706   : > { %v5479_v15 = vmul.f32 %v12996_v32, %v5425_v26 }
 0x707   : > { %v5825_v47 = vmax.f32 %v5793_v9, 0.0 }
 0x708   : > { %v5515_v40 = vadd.f32 %v13003_v33, %v5479_v15 }
 0x709   : > { %v5861_v21 = vsel %vm1770_vm7, %v5825_v47, 0.0 }
 0x70a   : > { %v5547_v35 = vadd.f32 %v5515_v40, %v13791_v59  ;;  %v5862_v20 = vadd.f32 %v5861_v21, %v5860_v37 }
 0x70b   : > { %v5683_v5 = vpop.f32.mrf.mxu3 }
 0x70c   : > { %v5758_v1 = vmul.f32 %v12949_v34, %v5683_v5  ;;  %v5579_v2 = vmax.f32 %v5547_v35, 0.0 }
 0x70d   : > { %v5427_v62 = vpop.f32.mrf.mxu2 }
 0x70e   : > { %v5794_v7 = vadd.f32 %v12959_v44, %v5758_v1  ;;  %v5480_v53 = vmul.f32 %v12996_v32, %v5427_v62  ;;  %v13798_v62 = vld [vmem:[#allocation64_spill] sm:$0xff] }
 0x70f   : > { %v13799_v21 = vmax.f32 %v13798_v62, 0.0 }
 0x710   : > { %v5826_v4 = vmax.f32 %v5794_v7, 0.0  ;;  %v5516_v16 = vadd.f32 %v13003_v33, %v5480_v53 }
 0x712   : > { %v5863_v58 = vsel %vm1770_vm7, %v5826_v4, 0.0  ;;  %v5548_v23 = vadd.f32 %v5516_v16, %v13793_v11  ;;  %v13800_v4 = vld [vmem:[#allocation29_spill] sm:$0xff] }
 0x713   : > { %v5864_v18 = vadd.f32 %v5863_v58, %v5862_v20  ;;  %v5685_v10 = vpop.f32.mrf.mxu3  ;;  %v13801_v16 = vmax.f32 %v13800_v4, 0.0 }
 0x714   : > { %v5580_v45 = vmax.f32 %v5548_v23, 0.0  ;;  %v5759_v50 = vmul.f32 %v12949_v34, %v5685_v10 }
 0x716   : > { %v5601_v3 = vpack.c.bf16 %v5580_v45, %v5579_v2  ;;  %v5795_v54 = vadd.f32 %v12959_v44, %v5759_v50 }
 0x718   : > { %6129 = vmatmul.msk.bf16.gmra.mxu3 %vm1704_vm4, %v5601_v3  ;;  %v5827_v29 = vmax.f32 %v5795_v54, 0.0 }
 0x71a   : > { %v5865_v46 = vsel %vm1770_vm7, %v5827_v29, 0.0 }
 0x71b   : > { %v5866_v61 = vadd.f32 %v5865_v46, %v5864_v18 }
 0x71c   : > { %v5430_v31 = vpop.f32.mrf.mxu2  ;;  %v5688_v30 = vpop.f32.mrf.mxu3 }
 0x71d   : > { %v5760_v41 = vmul.f32 %v12949_v34, %v5688_v30  ;;  %v5481_v0 = vmul.f32 %v12996_v32, %v5430_v31 }
 0x71f   : > { %v5796_v49 = vadd.f32 %v12959_v44, %v5760_v41  ;;  %v5517_v12 = vadd.f32 %v13003_v33, %v5481_v0 }
 0x721   : > { %v5828_v48 = vmax.f32 %v5796_v49, 0.0  ;;  %v5549_v39 = vadd.f32 %v5517_v12, %v13795_v8 }
 0x723   : > { %v5867_v27 = vsel %vm1770_vm7, %v5828_v48, 0.0  ;;  %v5581_v56 = vmax.f32 %v5549_v39, 0.0 }
 0x724   : > { %v5432_v63 = vpop.f32.mrf.mxu2  ;;  %v5690_v55 = vpop.f32.mrf.mxu3  ;;  %v5868_v17 = vadd.f32 %v5867_v27, %v5866_v61  ;;  %v13804_v27 = vld [vmem:[#allocation65_spill] sm:$0xff] }
 0x725   : > { %v5482_v28 = vmul.f32 %v12996_v32, %v5432_v63  ;;  %v5761_v42 = vmul.f32 %v12949_v34, %v5690_v55 }
 0x727   : > { %v5518_v52 = vadd.f32 %v13003_v33, %v5482_v28  ;;  %v5797_v51 = vadd.f32 %v12959_v44, %v5761_v42  ;;  %v13802_v28 = vld [vmem:[#allocation51_spill] sm:$0xff] }
 0x728   : > { %v13803_v42 = vmax.f32 %v13802_v28, 0.0 }
 0x729   : > { %v5550_v6 = vadd.f32 %v5518_v52, %v13797_v25  ;;  %v5829_v14 = vmax.f32 %v5797_v51, 0.0  ;;  %v13805_v52 = vmax.f32 %v13804_v27, 0.0 }
 0x72b   : > { %v5582_v43 = vmax.f32 %v5550_v6, 0.0  ;;  %v5869_v60 = vsel %vm1770_vm7, %v5829_v14, 0.0 }
 0x72c   : > { %v5870_v37 = vadd.f32 %v5869_v60, %v5868_v17 }
 0x72d   : > { %v5602_v36 = vpack.c.bf16 %v5582_v43, %v5581_v56 }
 0x72e   : > { %v5435_v13 = vpop.f32.mrf.mxu2 }
 0x72f   : > { %6130 = vmatmul.msk.bf16.gmra.mxu3 %vm1704_vm4, %v5602_v36  ;;  %v5483_v26 = vmul.f32 %v12996_v32, %v5435_v13 }
 0x731   : > { %v5519_v47 = vadd.f32 %v13003_v33, %v5483_v26 }
 0x732   : > { %v5693_v9 = vpop.f32.mrf.mxu3 }
 0x733   : > { %v5762_v15 = vmul.f32 %v12949_v34, %v5693_v9  ;;  %v5551_v7 = vadd.f32 %v5519_v47, %v13799_v21 }
 0x735   : > { %v5798_v5 = vadd.f32 %v12959_v44, %v5762_v15  ;;  %v5583_v38 = vmax.f32 %v5551_v7, 0.0 }
 0x736   : > { %v5437_v40 = vpop.f32.mrf.mxu2 }
 0x737   : > { %v5830_v1 = vmax.f32 %v5798_v5, 0.0  ;;  %v5484_v19 = vmul.f32 %v12996_v32, %v5437_v40 }
 0x739   : > { %v5871_v53 = vsel %vm1770_vm7, %v5830_v1, 0.0  ;;  %v5520_v24 = vadd.f32 %v13003_v33, %v5484_v19  ;;  %v13806_v19 = vld [vmem:[#allocation35_spill] sm:$0xff] }
 0x73a   : > { %v5872_v59 = vadd.f32 %v5871_v53, %v5870_v37  ;;  %v5695_v35 = vpop.f32.mrf.mxu3  ;;  %v13807_v62 = vmax.f32 %v13806_v19, 0.0 }
 0x73b   : > { %v5552_v20 = vadd.f32 %v5520_v24, %v13801_v16  ;;  %v5763_v58 = vmul.f32 %v12949_v34, %v5695_v35  ;;  %v13808_v24 = vld [vmem:[#allocation16_spill] sm:$0xff] }
 0x73d   : > { %v5584_v11 = vmax.f32 %v5552_v20, 0.0  ;;  %v5799_v23 = vadd.f32 %v12959_v44, %v5763_v58 }
 0x73f   : > { %v5603_v18 = vpack.c.bf16 %v5584_v11, %v5583_v38  ;;  %v5831_v10 = vmax.f32 %v5799_v23, 0.0 }
 0x741   : > { %v5873_v2 = vsel %vm1770_vm7, %v5831_v10, 0.0  ;;  %6131 = vmatmul.msk.bf16.gmra.mxu3 %vm1704_vm4, %v5603_v18 }
 0x742   : > { %v5874_v45 = vadd.f32 %v5873_v2, %v5872_v59  ;;  %v13809_v59 = vmax.f32 %v13808_v24, 0.0 }
 0x744   : > { %v5698_v3 = vpop.f32.mrf.mxu3 }
 0x745   : > { %v5764_v50 = vmul.f32 %v12949_v34, %v5698_v3  ;;  %v5440_v31 = vpop.f32.mrf.mxu2 }
 0x746   : > { %v5485_v54 = vmul.f32 %v12996_v32, %v5440_v31 }
 0x747   : > { %v5800_v30 = vadd.f32 %v12959_v44, %v5764_v50 }
 0x748   : > { %v5521_v29 = vadd.f32 %v13003_v33, %v5485_v54 }
 0x749   : > { %v5832_v41 = vmax.f32 %v5800_v30, 0.0  ;;  %v13810_v30 = vld [vmem:[#allocation46_spill] sm:$0xff] }
 0x74a   : > { %v5553_v22 = vadd.f32 %v5521_v29, %v13803_v42  ;;  %v13811_v54 = vmax.f32 %v13810_v30, 0.0 }
 0x74b   : > { %v5875_v0 = vsel %vm1770_vm7, %v5832_v41, 0.0 }
 0x74c   : > { %v5876_v49 = vadd.f32 %v5875_v0, %v5874_v45  ;;  %v5700_v12 = vpop.f32.mrf.mxu3  ;;  %v5585_v57 = vmax.f32 %v5553_v22, 0.0 }
 0x74d   : > { %v5765_v48 = vmul.f32 %v12949_v34, %v5700_v12  ;;  %v5442_v63 = vpop.f32.mrf.mxu2 }
 0x74e   : > { %v5486_v55 = vmul.f32 %v12996_v32, %v5442_v63 }
 0x74f   : > { %v5801_v46 = vadd.f32 %v12959_v44, %v5765_v48  ;;  %v13812_v48 = vld [vmem:[#allocation62_spill] sm:$0xff] }
 0x750   : > { %v5522_v8 = vadd.f32 %v13003_v33, %v5486_v55  ;;  %v13813_v63 = vmax.f32 %v13812_v48, 0.0 }
 0x751   : > { %v5833_v39 = vmax.f32 %v5801_v46, 0.0 }
 0x752   : > { %v5554_v51 = vadd.f32 %v5522_v8, %v13805_v52 }
 0x753   : > { %v5877_v61 = vsel %vm1770_vm7, %v5833_v39, 0.0 }
 0x754   : > { %v5878_v25 = vadd.f32 %v5877_v61, %v5876_v49  ;;  %v5586_v6 = vmax.f32 %v5554_v51, 0.0 }
 0x756   : > { %v5604_v14 = vpack.c.bf16 %v5586_v6, %v5585_v57 }
 0x758   : > { %6132 = vmatmul.msk.bf16.gmra.mxu3 %vm1704_vm4, %v5604_v14 }
 0x75b   : > { %v5703_v17 = vpop.f32.mrf.mxu3 }
 0x75c   : > { %v5766_v56 = vmul.f32 %v12949_v34, %v5703_v17  ;;  %v5445_v43 = vpop.f32.mrf.mxu2 }
 0x75d   : > { %v5487_v37 = vmul.f32 %v12996_v32, %v5445_v43 }
 0x75e   : > { %v5802_v60 = vadd.f32 %v12959_v44, %v5766_v56 }
 0x75f   : > { %v5523_v9 = vadd.f32 %v13003_v33, %v5487_v37 }
 0x760   : > { %v5834_v36 = vmax.f32 %v5802_v60, 0.0 }
 0x761   : > { %v5555_v21 = vadd.f32 %v5523_v9, %v13807_v62 }
 0x762   : > { %v5879_v13 = vsel %vm1770_vm7, %v5834_v36, 0.0 }
 0x763   : > { %v5880_v26 = vadd.f32 %v5879_v13, %v5878_v25  ;;  %v5705_v15 = vpop.f32.mrf.mxu3  ;;  %v5587_v16 = vmax.f32 %v5555_v21, 0.0  ;;  %v5929_v25 = vld [vmem:[%s13208_s13] sm:$0xff] }
 0x764   : > { %v5767_v47 = vmul.f32 %v12949_v34, %v5705_v15  ;;  %v5447_v5 = vpop.f32.mrf.mxu2  ;;  %5950 = vmatpush.msrb.mxu3 %v5929_v25 }
 0x765   : > { %v5488_v40 = vmul.f32 %v12996_v32, %v5447_v5 }
 0x766   : > { %v5803_v1 = vadd.f32 %v12959_v44, %v5767_v47 }
 0x767   : > { %v5524_v7 = vadd.f32 %v13003_v33, %v5488_v40 }
 0x768   : > { %v5835_v53 = vmax.f32 %v5803_v1, 0.0 }
 0x769   : > { %v5556_v35 = vadd.f32 %v5524_v7, %v13809_v59 }
 0x76a   : > { %v5881_v4 = vsel %vm1770_vm7, %v5835_v53, 0.0 }
 0x76b   : > { %v5882_v20 = vadd.f32 %v5881_v4, %v5880_v26  ;;  %v5588_v58 = vmax.f32 %v5556_v35, 0.0 }
 0x76d   : > { %v5605_v38 = vpack.c.bf16 %v5588_v58, %v5587_v16 }
 0x76e   : > { %v5450_v11 = vpop.f32.mrf.mxu2 }
 0x76f   : > { %6133 = vmatmul.msk.bf16.gmra.mxu3 %vm1704_vm4, %v5605_v38  ;;  %v5489_v23 = vmul.f32 %v12996_v32, %v5450_v11 }
 0x771   : > { %v5525_v2 = vadd.f32 %v13003_v33, %v5489_v23 }
 0x772   : > { %v5708_v18 = vpop.f32.mrf.mxu3 }
 0x773   : > { %v5768_v10 = vmul.f32 %v12949_v34, %v5708_v18  ;;  %v5557_v41 = vadd.f32 %v5525_v2, %v13811_v54 }
 0x775   : > { %v5804_v45 = vadd.f32 %v12959_v44, %v5768_v10  ;;  %v5589_v28 = vmax.f32 %v5557_v41, 0.0 }
 0x776   : > { %v5452_v3 = vpop.f32.mrf.mxu2 }
 0x777   : > { %v5836_v50 = vmax.f32 %v5804_v45, 0.0  ;;  %v5490_v31 = vmul.f32 %v12996_v32, %v5452_v3 }
 0x779   : > { %v5883_v0 = vsel %vm1770_vm7, %v5836_v50, 0.0  ;;  %v5526_v49 = vadd.f32 %v13003_v33, %v5490_v31 }
 0x77a   : > { %v5884_v29 = vadd.f32 %v5883_v0, %v5882_v20  ;;  %v5710_v12 = vpop.f32.mrf.mxu3 }
 0x77b   : > { %v5558_v55 = vadd.f32 %v5526_v49, %v13813_v63  ;;  %v5769_v46 = vmul.f32 %v12949_v34, %v5710_v12 }
 0x77d   : > { %v5590_v42 = vmax.f32 %v5558_v55, 0.0  ;;  %v5805_v22 = vadd.f32 %v12959_v44, %v5769_v46 }
 0x77f   : > { %v5606_v8 = vpack.c.bf16 %v5590_v42, %v5589_v28  ;;  %v5837_v32 = vmax.f32 %v5805_v22, 0.0 }
 0x781   : > { %v5885_v39 = vsel %vm1770_vm7, %v5837_v32, 0.0  ;;  %6134 = vmatmul.msk.bf16.gmra.mxu3 %vm1704_vm4, %v5606_v8 }
 0x782   : > { %v5886_v27 = vadd.f32 %v5885_v39, %v5884_v29 }
 0x784   : > { %v5713_v52 = vpop.f32.mrf.mxu3 }
 0x785   : > { %v5770_v33 = vmul.f32 %v12949_v34, %v5713_v52 }
 0x787   : > { %v5806_v51 = vadd.f32 %v12959_v44, %v5770_v33 }
 0x789   : > { %v5838_v61 = vmax.f32 %v5806_v51, 0.0  ;;  %v8311_v51 = vmov 256.0  }
 0x78a   : > { %8130 = vrcp.f32 %v8311_v51 }
 0x78b   : > { %v5887_v57 = vsel %vm1770_vm7, %v5838_v61, 0.0 }
 0x78c   : > { %v5888_v6 = vadd.f32 %v5887_v57, %v5886_v27  ;;  %v5715_v14 = vpop.f32.mrf.mxu3 }
 0x78d   : > { %v5771_v17 = vmul.f32 %v12949_v34, %v5715_v14 }
 0x78f   : > { %v5807_v56 = vadd.f32 %v12959_v44, %v5771_v17 }
 0x791   : > { %v5839_v43 = vmax.f32 %v5807_v56, 0.0 }
 0x793   : > { %v5889_v60 = vsel %vm1770_vm7, %v5839_v43, 0.0 }
 0x794   : > { %v5890_v37 = vadd.f32 %v5889_v60, %v5888_v6 }
 0x79b   : > { %v5718_v36 = vpop.f32.mrf.mxu3 }
 0x79c   : > { %v5772_v13 = vmul.f32 %v12949_v34, %v5718_v36 }
 0x79e   : > { %v5808_v26 = vadd.f32 %v12959_v44, %v5772_v13 }
 0x7a0   : > { %v5840_v9 = vmax.f32 %v5808_v26, 0.0 }
 0x7a2   : > { %v5891_v15 = vsel %vm1770_vm7, %v5840_v9, 0.0 }
 0x7a3   : > { %v5892_v47 = vadd.f32 %v5891_v15, %v5890_v37  ;;  %v5720_v5 = vpop.f32.mrf.mxu3  ;;  %v8131_v37 = vpop.eup %8130 }
 0x7a4   : > { %v5773_v53 = vmul.f32 %v12949_v34, %v5720_v5  ;;  %vm5926_vm2 = vweird.f32 %v8131_v37 }
 0x7a6   : > { %v5809_v35 = vadd.f32 %v12959_v44, %v5773_v53 }
 0x7a8   : > { %v5841_v58 = vmax.f32 %v5809_v35, 0.0 }
 0x7aa   : > { %v5893_v45 = vsel %vm1770_vm7, %v5841_v58, 0.0 }
 0x7ab   : > { %v5894_v49 = vadd.f32 %v5893_v45, %v5892_v47 }
 0x7b2   : > { %v5723_v40 = vpop.f32.mrf.mxu3 }
 0x7b3   : > { %v5774_v59 = vmul.f32 %v12949_v34, %v5723_v40  ;;  %v5922_v40 = vmul.f32 256.0, %v8131_v37 }
 0x7b5   : > { %v5810_v16 = vadd.f32 %v12959_v44, %v5774_v59 }
 0x7b7   : > { %v5842_v23 = vmax.f32 %v5810_v16, 0.0 }
 0x7b9   : > { %v5895_v30 = vsel %vm1770_vm7, %v5842_v23, 0.0 }
 0x7ba   : > { %v5725_v1 = vpop.f32.mrf.mxu3  ;;  %v5896_v55 = vadd.f32 %v5895_v30, %v5894_v49 }
 0x7bb   : > { %v5775_v4 = vmul.f32 %v12949_v34, %v5725_v1 }
 0x7bd   : > { %v5811_v38 = vadd.f32 %v12959_v44, %v5775_v4 }
 0x7bf   : > { %v5843_v3 = vmax.f32 %v5811_v38, 0.0 }
 0x7c1   : > { %v5897_v29 = vsel %vm1770_vm7, %v5843_v3, 0.0 }
 0x7c2   : > { %v5898_v22 = vadd.f32 %v5897_v29, %v5896_v55 }
 0x7c4   : > { %v5728_v19 = vpop.f32.mrf.mxu3 }
 0x7c5   : > { %v5776_v20 = vmul.f32 %v12949_v34, %v5728_v19 }
 0x7c7   : > { %v5812_v18 = vadd.f32 %v12959_v44, %v5776_v20 }
 0x7c9   : > { %v5844_v54 = vmax.f32 %v5812_v18, 0.0 }
 0x7cb   : > { %v5899_v46 = vsel %vm1770_vm7, %v5844_v54, 0.0 }
 0x7cc   : > { %v5730_v62 = vpop.f32.mrf.mxu3  ;;  %v5900_v33 = vadd.f32 %v5899_v46, %v5898_v22 }
 0x7cd   : > { %v5777_v11 = vmul.f32 %v12949_v34, %v5730_v62 }
 0x7cf   : > { %v5813_v50 = vadd.f32 %v12959_v44, %v5777_v11  ;;  %v5931_v11 = vld [vmem:[%s13209_s14] sm:$0x1] }
 0x7d1   : > { %v5845_v12 = vmax.f32 %v5813_v50, 0.0 }
 0x7d3   : > { %v5901_v32 = vsel %vm1770_vm7, %v5845_v12, 0.0 }
 0x7d4   : > { %v5902_v6 = vadd.f32 %v5901_v32, %v5900_v33 }
 0x7db   : > { %v5733_v21 = vpop.f32.mrf.mxu3 }
 0x7dc   : > { %v5778_v10 = vmul.f32 %v12949_v34, %v5733_v21 }
 0x7de   : > { %v5814_v41 = vadd.f32 %v12959_v44, %v5778_v10 }
 0x7e0   : > { %v5846_v28 = vmax.f32 %v5814_v41, 0.0 }
 0x7e2   : > { %v5903_v61 = vsel %vm1770_vm7, %v5846_v28, 0.0 }
 0x7e3   : > { %v5735_v7 = vpop.f32.mrf.mxu3  ;;  %v5904_v56 = vadd.f32 %v5903_v61, %v5902_v6 }
 0x7e4   : > { %v5779_v31 = vmul.f32 %v12949_v34, %v5735_v7  ;;  %v5923_v7 = vsub.f32 1.0, %v5922_v40 }
 0x7e6   : > { %v5815_v48 = vadd.f32 %v12959_v44, %v5779_v31  ;;  %v5924_v59 = vmul.f32 %v8131_v37, %v5923_v7 }
 0x7e8   : > { %v5847_v39 = vmax.f32 %v5815_v48, 0.0 }
 0x7ea   : > { %v5905_v14 = vsel %vm1770_vm7, %v5847_v39, 0.0 }
 0x7eb   : > { %v5906_v36 = vadd.f32 %v5905_v14, %v5904_v56 }
 0x7f2   : > { %v5738_v24 = vpop.f32.mrf.mxu3 }
 0x7f3   : > { %v5780_v0 = vmul.f32 %v12949_v34, %v5738_v24 }
 0x7f5   : > { %v5816_v42 = vadd.f32 %v12959_v44, %v5780_v0 }
 0x7f7   : > { %v5848_v57 = vmax.f32 %v5816_v42, 0.0 }
 0x7f9   : > { %v5907_v43 = vsel %vm1770_vm7, %v5848_v57, 0.0 }
 0x7fa   : > { %v5740_v2 = vpop.f32.mrf.mxu3  ;;  %v5908_v15 = vadd.f32 %v5907_v43, %v5906_v36 }
 0x7fb   : > { %v5781_v63 = vmul.f32 %v12949_v34, %v5740_v2 }
 0x7fd   : > { %v5817_v27 = vadd.f32 %v12959_v44, %v5781_v63 }
 0x7ff   : > { %v5849_v17 = vmax.f32 %v5817_v27, 0.0 }
 0x801   : > { %v5909_v26 = vsel %vm1770_vm7, %v5849_v17, 0.0 }
 0x802   : > { %v5910_v1 = vadd.f32 %v5909_v26, %v5908_v15 }
 0x804   : > { %v5743_v8 = vpop.f32.mrf.mxu3 }
 0x805   : > { %v5782_v52 = vmul.f32 %v12949_v34, %v5743_v8 }
 0x807   : > { %v5818_v25 = vadd.f32 %v12959_v44, %v5782_v52 }
 0x809   : > { %v5850_v60 = vmax.f32 %v5818_v25, 0.0 }
 0x80b   : > { %v5911_v47 = vsel %vm1770_vm7, %v5850_v60, 0.0 }
 0x80c   : > { %v5745_v13 = vpop.f32.mrf.mxu3  ;;  %v5912_v62 = vadd.f32 %v5911_v47, %v5910_v1 }
 0x80d   : > { %v5783_v9 = vmul.f32 %v12949_v34, %v5745_v13  ;;  %v5925_v34 = vadd.f32 %v8131_v37, %v5924_v59 }
 0x80f   : > { %v5819_v5 = vadd.f32 %v12959_v44, %v5783_v9  ;;  %v5927_v58 = vsel %vm5926_vm2, %v8131_v37, %v5925_v34 }
 0x811   : > { %v5851_v19 = vmax.f32 %v5819_v5, 0.0 }
 0x813   : > { %v5913_v21 = vsel %vm1770_vm7, %v5851_v19, 0.0 }
 0x814   : > { %v5914_v53 = vadd.f32 %v5913_v21, %v5912_v62 }
 0x816   : > { %v5915_v24 = vrot.slane %v5914_v53, 4 }
 0x818   : > { %v5916_v35 = vadd.f32 %v5915_v24, %v5914_v53 }
 0x81a   : > { %v5917_v4 = vrot.slane %v5916_v35, 2 }
 0x81c   : > { %v5918_v16 = vadd.f32 %v5917_v4, %v5916_v35 }
 0x81e   : > { %v5919_v20 = vrot.slane %v5918_v16, 1 }
 0x820   : > { %v5920_v44 = vadd.f32 %v5919_v20, %v5918_v16 }
 0x822   : > { %v5928_v38 = vmul.f32 %v5927_v58, %v5920_v44 }
 0x824   : > { %6135 = vmatmul.msk.f32.vlgmr.msrb.gmra.mxu3 %vm1770_vm7, %v5928_v38 }
 0x8a7   : > { %v5952_v23 = vpop.f32.mrf.mxu3 }
 0x8a8   : > { %v5953_v18 = vadd.f32 %v5952_v23, %v5931_v11 }
 0x8aa   : > { %5956 = vst.msk [vmem:[%s486_s3] sm:$0x1] %vm5955_vm3, %v5953_v18 }
 0x8ab   : > { %8261 = shalt.err (!%p8258_p3)
}
 0x8ac   : > { %6149 = dma.vmem_to_hbm [thread:$0]  (%p8430_p5), %s5969_s26, 16, %s5971_s4, %s5958_s27  }
 0x8ad PF: > { %p6155_p4 = scmp.ge.s32.totalorder %s8296_s21, 2  ;;  %s5982_s23 = sand.u32 1, %s8284_s18  }
 0x8ae   : > { %s5983_s2 = scalar_lea.sflag [#allocation5], %s5982_s23 }
 0x8af   : > { %p6152_p7 = pnand %p6155_p4, %p8434_p6 }
 0x8b1   : > { %p6153_p8 = pneg %p6152_p7 }
 0x8b3   : > { %8279 = dma.done.wait (%p6153_p8), %s5983_s2, 16  }
 0x8b4   : > { %8281 = vsyncadd (%p6153_p8), %s5983_s2, 4294967280  ;;  %s13814_s3 = sld [smem:[#allocation7_spill]]  ;;  %p25_p9 = scmp.ge.s32.totalorder %s8417_s24, 4  }
 0x8b5   : > { %s13815_s18 = smov %s8288_s19  ;;  %s13816_s19 = smov %s8292_s20 }
 0x8b6   : > { %s13818_s21 = smov %s8417_s24  ;;  %27 = sbr.rel (!%p25_p9) target bundleno = 9 (0x9), region = 117 }
 0x8ba   : > { %s13817_s20 = smov %s13814_s3 }
 0x8bb   :  { %5988 = vsyncpa [#allocation5], 1 }
 0x8bc   :  { %5990 = vsyncpa [#allocation5 + $0x1], 1 }

</bundles_post_ra>
